<compile_context>
chip_gen: v7x
topology: tpu7x:2x2x1
jax: 0.10.0
libtpu: 0.0.40
codegen_flags: <defaults>
</compile_context>

<pallas_src>
import functools
import math

import jax
import jax.numpy as jnp
from jax.experimental import pallas as pl
from jax.experimental.pallas import tpu as pltpu


def _layernorm_f32(h, w, b, eps=1e-5):
    h = h.astype(jnp.float32)
    mu = jnp.mean(h, axis=-1, keepdims=True)
    var = jnp.mean((h - mu) * (h - mu), axis=-1, keepdims=True)
    return (h - mu) * jax.lax.rsqrt(var + eps) * w + b


def tsa_kernel(x_ref, pos_ref,
               ln1w_ref, ln1b_ref,
               wq_ref, wk_ref, wv_ref,
               wo_ref, bo_ref,
               ln2w_ref, ln2b_ref,
               w1_ref, b1_ref, w2_ref, b2_ref,
               out_ref, *,
               heads, dim_head, seq_len, block_batch, pos_per_batch,
               compute_dtype):
    TB, N = block_batch, seq_len
    D = x_ref.shape[-1]
    rows = TB * N

    x = x_ref[...].astype(jnp.float32)                          # (rows, D)

    # ---- norm1 (f32); context == x so context_ == norm1(x) ----
    x_ = _layernorm_f32(x, ln1w_ref[...].astype(jnp.float32),
                        ln1b_ref[...].astype(jnp.float32))      # (rows, D)

    # ---- positional embedding added to q/k inputs only (not v) ----
    pos = pos_ref[...].astype(jnp.float32)
    if pos_per_batch:
        qin = x_ + pos                                          # pos is (rows, D)
    else:
        # pos is (N, D); broadcast over the TB batch elements in this block.
        qin = (x_.reshape(TB, N, D) + pos[None]).reshape(rows, D)

    # ---- fused QKV projections: one big MXU matmul each (bf16 in, f32 acc) ----
    qin_c = qin.astype(compute_dtype)
    ctx_c = x_.astype(compute_dtype)
    q = jnp.dot(qin_c, wq_ref[...], preferred_element_type=jnp.float32)  # (rows, inner)
    k = jnp.dot(qin_c, wk_ref[...], preferred_element_type=jnp.float32)
    v = jnp.dot(ctx_c, wv_ref[...], preferred_element_type=jnp.float32)

    # ---- head-batched attention: single batch dim of size heads * TB ----
    def to_heads(t):
        # (rows, heads*dh) -> (heads, rows, dh) -> (heads*TB, N, dh)
        t = jnp.stack([t[:, h * dim_head:(h + 1) * dim_head] for h in range(heads)],
                      axis=0)
        return t.reshape(heads * TB, N, dim_head)

    q_h = to_heads(q).astype(compute_dtype)
    k_h = to_heads(k).astype(compute_dtype)
    v_h = to_heads(v).astype(compute_dtype)

    scale = 1.0 / math.sqrt(dim_head)
    s = jnp.einsum("bnd,bmd->bnm", q_h, k_h,
                   preferred_element_type=jnp.float32) * scale           # (HB, N, N)
    m = jnp.max(s, axis=-1, keepdims=True)
    p = jnp.exp(s - m)
    denom = jnp.sum(p, axis=-1, keepdims=True)
    p = p * pl.reciprocal(denom, approx=True)                            # EUP, not VALU
    o_h = jnp.einsum("bnm,bmd->bnd", p.astype(compute_dtype), v_h,
                     preferred_element_type=jnp.float32)                 # (HB, N, dh)

    # ---- rebuild (rows, inner) and do ONE fused output projection matmul ----
    o_h = o_h.reshape(heads, rows, dim_head)
    o = jnp.concatenate([o_h[h] for h in range(heads)], axis=-1)         # (rows, inner)
    attn = (jnp.dot(o.astype(compute_dtype), wo_ref[...],
                    preferred_element_type=jnp.float32)
            + bo_ref[...].astype(jnp.float32))                           # (rows, D)

    # ---- residual 1 (f32 accumulator) ----
    x2 = x + attn

    # ---- norm2 + MLP (linear1 -> exact erf GELU -> linear2) + residual 2 ----
    x2_ = _layernorm_f32(x2, ln2w_ref[...].astype(jnp.float32),
                         ln2b_ref[...].astype(jnp.float32))
    h1 = (jnp.dot(x2_.astype(compute_dtype), w1_ref[...],
                  preferred_element_type=jnp.float32)
          + b1_ref[...].astype(jnp.float32))
    g = 0.5 * h1 * (1.0 + jax.lax.erf(h1 * (1.0 / math.sqrt(2.0))))      # exact GELU, f32
    h2 = (jnp.dot(g.astype(compute_dtype), w2_ref[...],
                  preferred_element_type=jnp.float32)
          + b2_ref[...].astype(jnp.float32))

    out_ref[...] = (x2 + h2).astype(out_ref.dtype)


def _pick_block_batch(batch, seq, target_rows=256):
    """Largest batch block that keeps >=2 grid steps (v7x dual-TC / megacore),
    preferring the smallest block that reaches ~target_rows MXU rows."""
    divisors = [d for d in range(1, batch + 1) if batch % d == 0]
    cands = [d for d in divisors if batch // d >= 2] or divisors
    for d in cands:
        if d * seq >= target_rows:
            return d
    return cands[-1]


def transformer_sa_layer(x, pos_emb, params, nhead, *,
                         compute_dtype=jnp.bfloat16,
                         block_batch=None,
                         vmem_limit_bytes=None):
    B, N, D = x.shape
    dim_mlp = params["w1"].shape[1]
    dim_head = D // nhead
    inner = dim_head * nhead
    assert inner == D, "dim_head defaults to query_dim // nhead, so inner_dim == query_dim"

    pos_emb = jnp.asarray(pos_emb)
    if pos_emb.ndim == 2:
        pos_emb = pos_emb[None]
    assert pos_emb.shape[0] in (1, B), "pos_emb must be (N, D), (1, N, D) or (B, N, D)"
    pos_per_batch = pos_emb.shape[0] != 1

    if block_batch is None:
        block_batch = _pick_block_batch(B, N)
    assert B % block_batch == 0
    TB = block_batch
    rows = TB * N
    grid = (B // TB,)

    cd = jnp.dtype(compute_dtype)
    # Cast the big weight matrices once in the wrapper (halves HBM->VMEM DMA bytes
    # for bf16).  Biases / LayerNorm params stay f32.
    wq = params["wq"].astype(cd)
    wk = params["wk"].astype(cd)
    wv = params["wv"].astype(cd)
    wo = params["wo"].astype(cd)
    w1 = params["w1"].astype(cd)
    w2 = params["w2"].astype(cd)

    # Present activations as contiguous 2-D (B*N, D) slabs (no in-kernel batch view).
    x2d = x.reshape(B * N, D)
    if pos_per_batch:
        pos_arr = pos_emb.reshape(B * N, D)
        pos_spec = pl.BlockSpec((rows, D), lambda b: (b, 0))
    else:
        pos_arr = pos_emb                                  # (1, N, D), broadcast
        pos_spec = pl.BlockSpec((None, N, D), lambda b: (0, 0, 0))  # squeezed leading dim

    def _full(shape):
        return pl.BlockSpec(shape, lambda b: (0,) * len(shape))

    in_specs = [
        pl.BlockSpec((rows, D), lambda b: (b, 0)),         # x: TB batch elements / step
        pos_spec,                                          # pos_emb
        _full((1, D)), _full((1, D)),                      # ln1 weight / bias
        _full((D, D)), _full((D, D)), _full((D, D)),       # Wq, Wk, Wv  (in, out)
        _full((D, D)), _full((1, D)),                      # Wo, bo
        _full((1, D)), _full((1, D)),                      # ln2 weight / bias
        _full((D, dim_mlp)), _full((1, dim_mlp)),          # linear1 W, b
        _full((dim_mlp, D)), _full((1, D)),                # linear2 W, b
    ]
    out_specs = pl.BlockSpec((rows, D), lambda b: (b, 0))

    kern = functools.partial(
        tsa_kernel, heads=nhead, dim_head=dim_head, seq_len=N,
        block_batch=TB, pos_per_batch=pos_per_batch, compute_dtype=cd)

    flops = int(2 * B * N * (3 * D * inner)                 # q/k/v projections
                + 2 * B * nhead * N * N * dim_head * 2      # scores + p@v
                + 2 * B * N * inner * D                     # output projection
                + 2 * B * N * (D * dim_mlp + dim_mlp * D))  # MLP
    transcendentals = int(B * nhead * N * N + B * N * dim_mlp)
    weight_bytes = sum(int(w.size) * w.dtype.itemsize for w in (wq, wk, wv, wo, w1, w2))
    bytes_accessed = int(2 * x2d.size * x2d.dtype.itemsize
                         + pos_arr.size * pos_arr.dtype.itemsize + weight_bytes)
    cost = pl.CostEstimate(flops=flops, transcendentals=transcendentals,
                           bytes_accessed=bytes_accessed)

    cp_kwargs = dict(dimension_semantics=("parallel",))
    if vmem_limit_bytes is not None:        # recommended at production sizes on v7x
        cp_kwargs["vmem_limit_bytes"] = int(vmem_limit_bytes)

    out2d = pl.pallas_call(
        kern,
        grid=grid,
        in_specs=in_specs,
        out_specs=out_specs,
        out_shape=jax.ShapeDtypeStruct((B * N, D), x.dtype),
        compiler_params=pltpu.CompilerParams(**cp_kwargs),
        cost_estimate=cost,
    )(x2d, pos_arr,
      params["ln1_w"], params["ln1_b"],
      wq, wk, wv, wo, params["bo"],
      params["ln2_w"], params["ln2_b"],
      w1, params["b1"], w2, params["b2"])

    return out2d.reshape(B, N, D)


def reference(x, pos, params, nhead):
    """Pure-JAX f32 reference mirroring the PyTorch forward."""
    B, N, D = x.shape
    dh = D // nhead
    if pos.ndim == 2:
        pos = pos[None]

    def ln(h, w, b):
        mu = h.mean(-1, keepdims=True)
        var = ((h - mu) ** 2).mean(-1, keepdims=True)
        return (h - mu) / jnp.sqrt(var + 1e-5) * w + b

    x_ = ln(x, params["ln1_w"][0], params["ln1_b"][0])
    q = (x_ + pos) @ params["wq"]
    k = (x_ + pos) @ params["wk"]
    v = x_ @ params["wv"]

    def split(t):
        return t.reshape(B, N, nhead, dh).transpose(0, 2, 1, 3)

    qh, kh, vh = split(q), split(k), split(v)
    s = jnp.einsum("bhnd,bhmd->bhnm", qh, kh) / math.sqrt(dh)
    p = jax.nn.softmax(s, axis=-1)
    o = jnp.einsum("bhnm,bhmd->bhnd", p, vh).transpose(0, 2, 1, 3).reshape(B, N, D)
    x2 = x + o @ params["wo"] + params["bo"][0]
    x2_ = ln(x2, params["ln2_w"][0], params["ln2_b"][0])
    h1 = x2_ @ params["w1"] + params["b1"][0]
    g = jax.nn.gelu(h1, approximate=False)
    return x2 + g @ params["w2"] + params["b2"][0]


if __name__ == "__main__":
    # query_dim=128, nhead=8 -> dim_head=16, inner_dim=128; dim_mlp=256; seq=16; batch=16.
    # Chosen so that blocked matmuls are 128 rows x 128 lanes (MXU/lane friendly).
    B, N, D, H, M = 16, 16, 128, 8, 256

    key = jax.random.PRNGKey(0)
    ks = jax.random.split(key, 16)
    s = 0.1
    params = dict(
        ln1_w=1.0 + 0.1 * jax.random.normal(ks[0], (1, D), jnp.float32),
        ln1_b=0.1 * jax.random.normal(ks[1], (1, D), jnp.float32),
        wq=s * jax.random.normal(ks[2], (D, D), jnp.float32),
        wk=s * jax.random.normal(ks[3], (D, D), jnp.float32),
        wv=s * jax.random.normal(ks[4], (D, D), jnp.float32),
        wo=s * jax.random.normal(ks[5], (D, D), jnp.float32),
        bo=s * jax.random.normal(ks[6], (1, D), jnp.float32),
        ln2_w=1.0 + 0.1 * jax.random.normal(ks[7], (1, D), jnp.float32),
        ln2_b=0.1 * jax.random.normal(ks[8], (1, D), jnp.float32),
        w1=s * jax.random.normal(ks[9], (D, M), jnp.float32),
        b1=s * jax.random.normal(ks[10], (1, M), jnp.float32),
        w2=s * jax.random.normal(ks[11], (M, D), jnp.float32),
        b2=s * jax.random.normal(ks[12], (1, D), jnp.float32),
    )
    x = jax.random.normal(ks[13], (B, N, D), jnp.float32)
    pos = 0.1 * jax.random.normal(ks[14], (1, N, D), jnp.float32)

    ref = reference(x, pos, params, H)

    # Structural check with f32 MXU inputs (tight-ish tolerance).
    out_f32 = jax.block_until_ready(
        transformer_sa_layer(x, pos, params, H, compute_dtype=jnp.float32))
    err_f32 = float(jnp.max(jnp.abs(out_f32 - ref)))
    assert jnp.allclose(out_f32, ref, atol=2e-2, rtol=2e-2), f"f32 max_err={err_f32}"

    # Fast path: bf16 MXU inputs, f32 accumulation / elementwise math.
    out_bf16 = jax.block_until_ready(
        transformer_sa_layer(x, pos, params, H, compute_dtype=jnp.bfloat16))
    err_bf16 = float(jnp.max(jnp.abs(out_bf16 - ref)))
    assert jnp.allclose(out_bf16, ref, atol=1.5e-1, rtol=1.5e-1), f"bf16 max_err={err_bf16}"

    print("KERNEL_OK")
</pallas_src>

<mosaic_0001>
module attributes {stable_mosaic.version = 11 : i64} {
  func.func @tsa_kernel(%arg0: i32, %arg1: memref<128x128xf32, #tpu.memory_space<vmem>>, %arg2: memref<1x16x128xf32, #tpu.memory_space<vmem>>, %arg3: memref<1x128xf32, #tpu.memory_space<vmem>>, %arg4: memref<1x128xf32, #tpu.memory_space<vmem>>, %arg5: memref<128x128xf32, #tpu.memory_space<vmem>>, %arg6: memref<128x128xf32, #tpu.memory_space<vmem>>, %arg7: memref<128x128xf32, #tpu.memory_space<vmem>>, %arg8: memref<128x128xf32, #tpu.memory_space<vmem>>, %arg9: memref<1x128xf32, #tpu.memory_space<vmem>>, %arg10: memref<1x128xf32, #tpu.memory_space<vmem>>, %arg11: memref<1x128xf32, #tpu.memory_space<vmem>>, %arg12: memref<128x256xf32, #tpu.memory_space<vmem>>, %arg13: memref<1x256xf32, #tpu.memory_space<vmem>>, %arg14: memref<256x128xf32, #tpu.memory_space<vmem>>, %arg15: memref<1x128xf32, #tpu.memory_space<vmem>>, %arg16: memref<128x128xf32, #tpu.memory_space<vmem>>) attributes {dimension_semantics = [#tpu.dimension_semantics<parallel>], iteration_bounds = array<i64: 2>, scalar_prefetch = 0 : i64, scratch_operands = 0 : i64, tpu.core_type = #tpu.core_type<tc>, window_params = [{transform_indices = @transform_0, window_bounds = array<i64: 128, 128>}, {pipeline_mode = #tpu.pipeline_mode<synchronous>, transform_indices = @transform_1, window_bounds = array<i64: 1, 16, 128>}, {pipeline_mode = #tpu.pipeline_mode<synchronous>, transform_indices = @transform_2, window_bounds = array<i64: 1, 128>}, {pipeline_mode = #tpu.pipeline_mode<synchronous>, transform_indices = @transform_3, window_bounds = array<i64: 1, 128>}, {pipeline_mode = #tpu.pipeline_mode<synchronous>, transform_indices = @transform_4, window_bounds = array<i64: 128, 128>}, {pipeline_mode = #tpu.pipeline_mode<synchronous>, transform_indices = @transform_5, window_bounds = array<i64: 128, 128>}, {pipeline_mode = #tpu.pipeline_mode<synchronous>, transform_indices = @transform_6, window_bounds = array<i64: 128, 128>}, {pipeline_mode = #tpu.pipeline_mode<synchronous>, transform_indices = @transform_7, window_bounds = array<i64: 128, 128>}, {pipeline_mode = #tpu.pipeline_mode<synchronous>, transform_indices = @transform_8, window_bounds = array<i64: 1, 128>}, {pipeline_mode = #tpu.pipeline_mode<synchronous>, transform_indices = @transform_9, window_bounds = array<i64: 1, 128>}, {pipeline_mode = #tpu.pipeline_mode<synchronous>, transform_indices = @transform_10, window_bounds = array<i64: 1, 128>}, {pipeline_mode = #tpu.pipeline_mode<synchronous>, transform_indices = @transform_11, window_bounds = array<i64: 128, 256>}, {pipeline_mode = #tpu.pipeline_mode<synchronous>, transform_indices = @transform_12, window_bounds = array<i64: 1, 256>}, {pipeline_mode = #tpu.pipeline_mode<synchronous>, transform_indices = @transform_13, window_bounds = array<i64: 256, 128>}, {pipeline_mode = #tpu.pipeline_mode<synchronous>, transform_indices = @transform_14, window_bounds = array<i64: 1, 128>}, {transform_indices = @transform_15, window_bounds = array<i64: 128, 128>}]} {
    %c0 = arith.constant 0 : index
    %c0_0 = arith.constant 0 : index
    %0 = vector.load %arg1[%c0, %c0_0] : memref<128x128xf32, #tpu.memory_space<vmem>>, vector<128x128xf32>
    %c0_1 = arith.constant 0 : index
    %c0_2 = arith.constant 0 : index
    %1 = vector.load %arg3[%c0_1, %c0_2] : memref<1x128xf32, #tpu.memory_space<vmem>>, vector<1x128xf32>
    %c0_3 = arith.constant 0 : index
    %c0_4 = arith.constant 0 : index
    %2 = vector.load %arg4[%c0_3, %c0_4] : memref<1x128xf32, #tpu.memory_space<vmem>>, vector<1x128xf32>
    %cst = arith.constant dense<0.000000e+00> : vector<128xf32>
    %3 = vector.multi_reduction <add>, %0, %cst [1] : vector<128x128xf32> to vector<128xf32>
    %4 = vector.shape_cast %3 : vector<128xf32> to vector<128x1xf32>
    %cst_5 = arith.constant 1.280000e+02 : f32
    %5 = vector.broadcast %cst_5 : f32 to vector<128x1xf32>
    %6 = arith.divf %4, %5 : vector<128x1xf32>
    %7 = vector.broadcast %6 : vector<128x1xf32> to vector<128x128xf32>
    %8 = arith.subf %0, %7 : vector<128x128xf32>
    %9 = vector.broadcast %6 : vector<128x1xf32> to vector<128x128xf32>
    %10 = arith.subf %0, %9 : vector<128x128xf32>
    %11 = arith.mulf %8, %10 : vector<128x128xf32>
    %cst_6 = arith.constant dense<0.000000e+00> : vector<128xf32>
    %12 = vector.multi_reduction <add>, %11, %cst_6 [1] : vector<128x128xf32> to vector<128xf32>
    %13 = vector.shape_cast %12 : vector<128xf32> to vector<128x1xf32>
    %cst_7 = arith.constant 1.280000e+02 : f32
    %14 = vector.broadcast %cst_7 : f32 to vector<128x1xf32>
    %15 = arith.divf %13, %14 : vector<128x1xf32>
    %16 = vector.broadcast %6 : vector<128x1xf32> to vector<128x128xf32>
    %17 = arith.subf %0, %16 : vector<128x128xf32>
    %cst_8 = arith.constant 9.99999974E-6 : f32
    %18 = vector.broadcast %cst_8 : f32 to vector<128x1xf32>
    %19 = arith.addf %15, %18 : vector<128x1xf32>
    %20 = math.rsqrt %19 : vector<128x1xf32>
    %21 = vector.broadcast %20 : vector<128x1xf32> to vector<128x128xf32>
    %22 = arith.mulf %17, %21 : vector<128x128xf32>
    %23 = vector.broadcast %1 : vector<1x128xf32> to vector<128x128xf32>
    %24 = arith.mulf %22, %23 : vector<128x128xf32>
    %25 = vector.broadcast %2 : vector<1x128xf32> to vector<128x128xf32>
    %26 = arith.addf %24, %25 : vector<128x128xf32>
    %c0_9 = arith.constant 0 : index
    %c0_10 = arith.constant 0 : index
    %c0_11 = arith.constant 0 : index
    %27 = vector.load %arg2[%c0_9, %c0_10, %c0_11] : memref<1x16x128xf32, #tpu.memory_space<vmem>>, vector<1x16x128xf32>
    %28 = vector.shape_cast %27 : vector<1x16x128xf32> to vector<16x128xf32>
    %29 = vector.shape_cast %26 : vector<128x128xf32> to vector<8x16x128xf32>
    %30 = vector.shape_cast %28 : vector<16x128xf32> to vector<1x16x128xf32>
    %31 = vector.broadcast %30 : vector<1x16x128xf32> to vector<8x16x128xf32>
    %32 = arith.addf %29, %31 : vector<8x16x128xf32>
    %33 = vector.shape_cast %32 : vector<8x16x128xf32> to vector<128x128xf32>
    %c0_12 = arith.constant 0 : index
    %c0_13 = arith.constant 0 : index
    %34 = vector.load %arg5[%c0_12, %c0_13] : memref<128x128xf32, #tpu.memory_space<vmem>>, vector<128x128xf32>
    %cst_14 = arith.constant dense<0.000000e+00> : vector<128x128xf32>
    %35 = tpu.matmul %33, %34, %cst_14 {dimension_numbers = #tpu.dot_dimension_numbers<[1], [0], [0], [1], [0, 0, 1, 1], [], []>} : vector<128x128xf32>, vector<128x128xf32>, vector<128x128xf32> -> vector<128x128xf32>
    %c0_15 = arith.constant 0 : index
    %c0_16 = arith.constant 0 : index
    %36 = vector.load %arg6[%c0_15, %c0_16] : memref<128x128xf32, #tpu.memory_space<vmem>>, vector<128x128xf32>
    %cst_17 = arith.constant dense<0.000000e+00> : vector<128x128xf32>
    %37 = tpu.matmul %33, %36, %cst_17 {dimension_numbers = #tpu.dot_dimension_numbers<[1], [0], [0], [1], [0, 0, 1, 1], [], []>} : vector<128x128xf32>, vector<128x128xf32>, vector<128x128xf32> -> vector<128x128xf32>
    %c0_18 = arith.constant 0 : index
    %c0_19 = arith.constant 0 : index
    %38 = vector.load %arg7[%c0_18, %c0_19] : memref<128x128xf32, #tpu.memory_space<vmem>>, vector<128x128xf32>
    %cst_20 = arith.constant dense<0.000000e+00> : vector<128x128xf32>
    %39 = tpu.matmul %26, %38, %cst_20 {dimension_numbers = #tpu.dot_dimension_numbers<[1], [0], [0], [1], [0, 0, 1, 1], [], []>} : vector<128x128xf32>, vector<128x128xf32>, vector<128x128xf32> -> vector<128x128xf32>
    %40 = vector.extract_strided_slice %35 {offsets = [0, 0], sizes = [128, 16], strides = [1, 1]} : vector<128x128xf32> to vector<128x16xf32>
    %41 = vector.extract_strided_slice %35 {offsets = [0, 16], sizes = [128, 16], strides = [1, 1]} : vector<128x128xf32> to vector<128x16xf32>
    %42 = vector.extract_strided_slice %35 {offsets = [0, 32], sizes = [128, 16], strides = [1, 1]} : vector<128x128xf32> to vector<128x16xf32>
    %43 = vector.extract_strided_slice %35 {offsets = [0, 48], sizes = [128, 16], strides = [1, 1]} : vector<128x128xf32> to vector<128x16xf32>
    %44 = vector.extract_strided_slice %35 {offsets = [0, 64], sizes = [128, 16], strides = [1, 1]} : vector<128x128xf32> to vector<128x16xf32>
    %45 = vector.extract_strided_slice %35 {offsets = [0, 80], sizes = [128, 16], strides = [1, 1]} : vector<128x128xf32> to vector<128x16xf32>
    %46 = vector.extract_strided_slice %35 {offsets = [0, 96], sizes = [128, 16], strides = [1, 1]} : vector<128x128xf32> to vector<128x16xf32>
    %47 = vector.extract_strided_slice %35 {offsets = [0, 112], sizes = [128, 16], strides = [1, 1]} : vector<128x128xf32> to vector<128x16xf32>
    %48 = vector.shape_cast %40 : vector<128x16xf32> to vector<1x128x16xf32>
    %49 = vector.shape_cast %41 : vector<128x16xf32> to vector<1x128x16xf32>
    %50 = vector.shape_cast %42 : vector<128x16xf32> to vector<1x128x16xf32>
    %51 = vector.shape_cast %43 : vector<128x16xf32> to vector<1x128x16xf32>
    %52 = vector.shape_cast %44 : vector<128x16xf32> to vector<1x128x16xf32>
    %53 = vector.shape_cast %45 : vector<128x16xf32> to vector<1x128x16xf32>
    %54 = vector.shape_cast %46 : vector<128x16xf32> to vector<1x128x16xf32>
    %55 = vector.shape_cast %47 : vector<128x16xf32> to vector<1x128x16xf32>
    %56 = tpu.concatenate %48, %49, %50, %51, %52, %53, %54, %55 in 0 : vector<1x128x16xf32>, vector<1x128x16xf32>, vector<1x128x16xf32>, vector<1x128x16xf32>, vector<1x128x16xf32>, vector<1x128x16xf32>, vector<1x128x16xf32>, vector<1x128x16xf32> -> vector<8x128x16xf32>
    %57 = vector.shape_cast %56 : vector<8x128x16xf32> to vector<64x16x16xf32>
    %58 = vector.extract_strided_slice %37 {offsets = [0, 0], sizes = [128, 16], strides = [1, 1]} : vector<128x128xf32> to vector<128x16xf32>
    %59 = vector.extract_strided_slice %37 {offsets = [0, 16], sizes = [128, 16], strides = [1, 1]} : vector<128x128xf32> to vector<128x16xf32>
    %60 = vector.extract_strided_slice %37 {offsets = [0, 32], sizes = [128, 16], strides = [1, 1]} : vector<128x128xf32> to vector<128x16xf32>
    %61 = vector.extract_strided_slice %37 {offsets = [0, 48], sizes = [128, 16], strides = [1, 1]} : vector<128x128xf32> to vector<128x16xf32>
    %62 = vector.extract_strided_slice %37 {offsets = [0, 64], sizes = [128, 16], strides = [1, 1]} : vector<128x128xf32> to vector<128x16xf32>
    %63 = vector.extract_strided_slice %37 {offsets = [0, 80], sizes = [128, 16], strides = [1, 1]} : vector<128x128xf32> to vector<128x16xf32>
    %64 = vector.extract_strided_slice %37 {offsets = [0, 96], sizes = [128, 16], strides = [1, 1]} : vector<128x128xf32> to vector<128x16xf32>
    %65 = vector.extract_strided_slice %37 {offsets = [0, 112], sizes = [128, 16], strides = [1, 1]} : vector<128x128xf32> to vector<128x16xf32>
    %66 = vector.shape_cast %58 : vector<128x16xf32> to vector<1x128x16xf32>
    %67 = vector.shape_cast %59 : vector<128x16xf32> to vector<1x128x16xf32>
    %68 = vector.shape_cast %60 : vector<128x16xf32> to vector<1x128x16xf32>
    %69 = vector.shape_cast %61 : vector<128x16xf32> to vector<1x128x16xf32>
    %70 = vector.shape_cast %62 : vector<128x16xf32> to vector<1x128x16xf32>
    %71 = vector.shape_cast %63 : vector<128x16xf32> to vector<1x128x16xf32>
    %72 = vector.shape_cast %64 : vector<128x16xf32> to vector<1x128x16xf32>
    %73 = vector.shape_cast %65 : vector<128x16xf32> to vector<1x128x16xf32>
    %74 = tpu.concatenate %66, %67, %68, %69, %70, %71, %72, %73 in 0 : vector<1x128x16xf32>, vector<1x128x16xf32>, vector<1x128x16xf32>, vector<1x128x16xf32>, vector<1x128x16xf32>, vector<1x128x16xf32>, vector<1x128x16xf32>, vector<1x128x16xf32> -> vector<8x128x16xf32>
    %75 = vector.shape_cast %74 : vector<8x128x16xf32> to vector<64x16x16xf32>
    %76 = vector.extract_strided_slice %39 {offsets = [0, 0], sizes = [128, 16], strides = [1, 1]} : vector<128x128xf32> to vector<128x16xf32>
    %77 = vector.extract_strided_slice %39 {offsets = [0, 16], sizes = [128, 16], strides = [1, 1]} : vector<128x128xf32> to vector<128x16xf32>
    %78 = vector.extract_strided_slice %39 {offsets = [0, 32], sizes = [128, 16], strides = [1, 1]} : vector<128x128xf32> to vector<128x16xf32>
    %79 = vector.extract_strided_slice %39 {offsets = [0, 48], sizes = [128, 16], strides = [1, 1]} : vector<128x128xf32> to vector<128x16xf32>
    %80 = vector.extract_strided_slice %39 {offsets = [0, 64], sizes = [128, 16], strides = [1, 1]} : vector<128x128xf32> to vector<128x16xf32>
    %81 = vector.extract_strided_slice %39 {offsets = [0, 80], sizes = [128, 16], strides = [1, 1]} : vector<128x128xf32> to vector<128x16xf32>
    %82 = vector.extract_strided_slice %39 {offsets = [0, 96], sizes = [128, 16], strides = [1, 1]} : vector<128x128xf32> to vector<128x16xf32>
    %83 = vector.extract_strided_slice %39 {offsets = [0, 112], sizes = [128, 16], strides = [1, 1]} : vector<128x128xf32> to vector<128x16xf32>
    %84 = vector.shape_cast %76 : vector<128x16xf32> to vector<1x128x16xf32>
    %85 = vector.shape_cast %77 : vector<128x16xf32> to vector<1x128x16xf32>
    %86 = vector.shape_cast %78 : vector<128x16xf32> to vector<1x128x16xf32>
    %87 = vector.shape_cast %79 : vector<128x16xf32> to vector<1x128x16xf32>
    %88 = vector.shape_cast %80 : vector<128x16xf32> to vector<1x128x16xf32>
    %89 = vector.shape_cast %81 : vector<128x16xf32> to vector<1x128x16xf32>
    %90 = vector.shape_cast %82 : vector<128x16xf32> to vector<1x128x16xf32>
    %91 = vector.shape_cast %83 : vector<128x16xf32> to vector<1x128x16xf32>
    %92 = tpu.concatenate %84, %85, %86, %87, %88, %89, %90, %91 in 0 : vector<1x128x16xf32>, vector<1x128x16xf32>, vector<1x128x16xf32>, vector<1x128x16xf32>, vector<1x128x16xf32>, vector<1x128x16xf32>, vector<1x128x16xf32>, vector<1x128x16xf32> -> vector<8x128x16xf32>
    %93 = vector.shape_cast %92 : vector<8x128x16xf32> to vector<64x16x16xf32>
    "tpu.trace_start"() <{level = 10 : i32, message = "bnd,bmd->bnm"}> : () -> ()
    %cst_21 = arith.constant dense<0.000000e+00> : vector<64x16x16xf32>
    %94 = tpu.matmul %57, %75, %cst_21 {dimension_numbers = #tpu.dot_dimension_numbers<[2], [2], [1], [1], [0, 0, 0, 1, 1, 1], [0], [0]>} : vector<64x16x16xf32>, vector<64x16x16xf32>, vector<64x16x16xf32> -> vector<64x16x16xf32>
    "tpu.trace_stop"() : () -> ()
    %cst_22 = arith.constant 2.500000e-01 : f32
    %95 = vector.broadcast %cst_22 : f32 to vector<64x16x16xf32>
    %96 = arith.mulf %94, %95 : vector<64x16x16xf32>
    %cst_23 = arith.constant dense<0xFF800000> : vector<64x16xf32>
    %97 = vector.multi_reduction <maximumf>, %96, %cst_23 [2] : vector<64x16x16xf32> to vector<64x16xf32>
    %98 = vector.shape_cast %97 : vector<64x16xf32> to vector<64x16x1xf32>
    %99 = vector.broadcast %98 : vector<64x16x1xf32> to vector<64x16x16xf32>
    %100 = arith.subf %96, %99 : vector<64x16x16xf32>
    %101 = math.exp %100 : vector<64x16x16xf32>
    %cst_24 = arith.constant dense<0.000000e+00> : vector<64x16xf32>
    %102 = vector.multi_reduction <add>, %101, %cst_24 [2] : vector<64x16x16xf32> to vector<64x16xf32>
    %103 = vector.shape_cast %102 : vector<64x16xf32> to vector<64x16x1xf32>
    %104 = tpu.reciprocal %103 {approx = true} : vector<64x16x1xf32> -> vector<64x16x1xf32>
    %105 = vector.broadcast %104 : vector<64x16x1xf32> to vector<64x16x16xf32>
    %106 = arith.mulf %101, %105 : vector<64x16x16xf32>
    "tpu.trace_start"() <{level = 10 : i32, message = "bnm,bmd->bnd"}> : () -> ()
    %cst_25 = arith.constant dense<0.000000e+00> : vector<64x16x16xf32>
    %107 = tpu.matmul %106, %93, %cst_25 {dimension_numbers = #tpu.dot_dimension_numbers<[2], [1], [1], [2], [0, 0, 0, 1, 1, 2], [0], [0]>} : vector<64x16x16xf32>, vector<64x16x16xf32>, vector<64x16x16xf32> -> vector<64x16x16xf32>
    "tpu.trace_stop"() : () -> ()
    %108 = vector.shape_cast %107 : vector<64x16x16xf32> to vector<8x128x16xf32>
    %109 = vector.extract_strided_slice %108 {offsets = [0, 0, 0], sizes = [1, 128, 16], strides = [1, 1, 1]} : vector<8x128x16xf32> to vector<1x128x16xf32>
    %110 = vector.shape_cast %109 : vector<1x128x16xf32> to vector<128x16xf32>
    %111 = vector.extract_strided_slice %108 {offsets = [1, 0, 0], sizes = [1, 128, 16], strides = [1, 1, 1]} : vector<8x128x16xf32> to vector<1x128x16xf32>
    %112 = vector.shape_cast %111 : vector<1x128x16xf32> to vector<128x16xf32>
    %113 = vector.extract_strided_slice %108 {offsets = [2, 0, 0], sizes = [1, 128, 16], strides = [1, 1, 1]} : vector<8x128x16xf32> to vector<1x128x16xf32>
    %114 = vector.shape_cast %113 : vector<1x128x16xf32> to vector<128x16xf32>
    %115 = vector.extract_strided_slice %108 {offsets = [3, 0, 0], sizes = [1, 128, 16], strides = [1, 1, 1]} : vector<8x128x16xf32> to vector<1x128x16xf32>
    %116 = vector.shape_cast %115 : vector<1x128x16xf32> to vector<128x16xf32>
    %117 = vector.extract_strided_slice %108 {offsets = [4, 0, 0], sizes = [1, 128, 16], strides = [1, 1, 1]} : vector<8x128x16xf32> to vector<1x128x16xf32>
    %118 = vector.shape_cast %117 : vector<1x128x16xf32> to vector<128x16xf32>
    %119 = vector.extract_strided_slice %108 {offsets = [5, 0, 0], sizes = [1, 128, 16], strides = [1, 1, 1]} : vector<8x128x16xf32> to vector<1x128x16xf32>
    %120 = vector.shape_cast %119 : vector<1x128x16xf32> to vector<128x16xf32>
    %121 = vector.extract_strided_slice %108 {offsets = [6, 0, 0], sizes = [1, 128, 16], strides = [1, 1, 1]} : vector<8x128x16xf32> to vector<1x128x16xf32>
    %122 = vector.shape_cast %121 : vector<1x128x16xf32> to vector<128x16xf32>
    %123 = vector.extract_strided_slice %108 {offsets = [7, 0, 0], sizes = [1, 128, 16], strides = [1, 1, 1]} : vector<8x128x16xf32> to vector<1x128x16xf32>
    %124 = vector.shape_cast %123 : vector<1x128x16xf32> to vector<128x16xf32>
    %125 = tpu.concatenate %110, %112, %114, %116, %118, %120, %122, %124 in 1 : vector<128x16xf32>, vector<128x16xf32>, vector<128x16xf32>, vector<128x16xf32>, vector<128x16xf32>, vector<128x16xf32>, vector<128x16xf32>, vector<128x16xf32> -> vector<128x128xf32>
    %c0_26 = arith.constant 0 : index
    %c0_27 = arith.constant 0 : index
    %126 = vector.load %arg8[%c0_26, %c0_27] : memref<128x128xf32, #tpu.memory_space<vmem>>, vector<128x128xf32>
    %cst_28 = arith.constant dense<0.000000e+00> : vector<128x128xf32>
    %127 = tpu.matmul %125, %126, %cst_28 {dimension_numbers = #tpu.dot_dimension_numbers<[1], [0], [0], [1], [0, 0, 1, 1], [], []>} : vector<128x128xf32>, vector<128x128xf32>, vector<128x128xf32> -> vector<128x128xf32>
    %c0_29 = arith.constant 0 : index
    %c0_30 = arith.constant 0 : index
    %128 = vector.load %arg9[%c0_29, %c0_30] : memref<1x128xf32, #tpu.memory_space<vmem>>, vector<1x128xf32>
    %129 = vector.broadcast %128 : vector<1x128xf32> to vector<128x128xf32>
    %130 = arith.addf %127, %129 : vector<128x128xf32>
    %131 = arith.addf %0, %130 : vector<128x128xf32>
    %c0_31 = arith.constant 0 : index
    %c0_32 = arith.constant 0 : index
    %132 = vector.load %arg10[%c0_31, %c0_32] : memref<1x128xf32, #tpu.memory_space<vmem>>, vector<1x128xf32>
    %c0_33 = arith.constant 0 : index
    %c0_34 = arith.constant 0 : index
    %133 = vector.load %arg11[%c0_33, %c0_34] : memref<1x128xf32, #tpu.memory_space<vmem>>, vector<1x128xf32>
    %cst_35 = arith.constant dense<0.000000e+00> : vector<128xf32>
    %134 = vector.multi_reduction <add>, %131, %cst_35 [1] : vector<128x128xf32> to vector<128xf32>
    %135 = vector.shape_cast %134 : vector<128xf32> to vector<128x1xf32>
    %cst_36 = arith.constant 1.280000e+02 : f32
    %136 = vector.broadcast %cst_36 : f32 to vector<128x1xf32>
    %137 = arith.divf %135, %136 : vector<128x1xf32>
    %138 = vector.broadcast %137 : vector<128x1xf32> to vector<128x128xf32>
    %139 = arith.subf %131, %138 : vector<128x128xf32>
    %140 = vector.broadcast %137 : vector<128x1xf32> to vector<128x128xf32>
    %141 = arith.subf %131, %140 : vector<128x128xf32>
    %142 = arith.mulf %139, %141 : vector<128x128xf32>
    %cst_37 = arith.constant dense<0.000000e+00> : vector<128xf32>
    %143 = vector.multi_reduction <add>, %142, %cst_37 [1] : vector<128x128xf32> to vector<128xf32>
    %144 = vector.shape_cast %143 : vector<128xf32> to vector<128x1xf32>
    %cst_38 = arith.constant 1.280000e+02 : f32
    %145 = vector.broadcast %cst_38 : f32 to vector<128x1xf32>
    %146 = arith.divf %144, %145 : vector<128x1xf32>
    %147 = vector.broadcast %137 : vector<128x1xf32> to vector<128x128xf32>
    %148 = arith.subf %131, %147 : vector<128x128xf32>
    %cst_39 = arith.constant 9.99999974E-6 : f32
    %149 = vector.broadcast %cst_39 : f32 to vector<128x1xf32>
    %150 = arith.addf %146, %149 : vector<128x1xf32>
    %151 = math.rsqrt %150 : vector<128x1xf32>
    %152 = vector.broadcast %151 : vector<128x1xf32> to vector<128x128xf32>
    %153 = arith.mulf %148, %152 : vector<128x128xf32>
    %154 = vector.broadcast %132 : vector<1x128xf32> to vector<128x128xf32>
    %155 = arith.mulf %153, %154 : vector<128x128xf32>
    %156 = vector.broadcast %133 : vector<1x128xf32> to vector<128x128xf32>
    %157 = arith.addf %155, %156 : vector<128x128xf32>
    %c0_40 = arith.constant 0 : index
    %c0_41 = arith.constant 0 : index
    %158 = vector.load %arg12[%c0_40, %c0_41] : memref<128x256xf32, #tpu.memory_space<vmem>>, vector<128x256xf32>
    %cst_42 = arith.constant dense<0.000000e+00> : vector<128x256xf32>
    %159 = tpu.matmul %157, %158, %cst_42 {dimension_numbers = #tpu.dot_dimension_numbers<[1], [0], [0], [1], [0, 0, 1, 1], [], []>} : vector<128x128xf32>, vector<128x256xf32>, vector<128x256xf32> -> vector<128x256xf32>
    %c0_43 = arith.constant 0 : index
    %c0_44 = arith.constant 0 : index
    %160 = vector.load %arg13[%c0_43, %c0_44] : memref<1x256xf32, #tpu.memory_space<vmem>>, vector<1x256xf32>
    %161 = vector.broadcast %160 : vector<1x256xf32> to vector<128x256xf32>
    %162 = arith.addf %159, %161 : vector<128x256xf32>
    %cst_45 = arith.constant 5.000000e-01 : f32
    %163 = vector.broadcast %cst_45 : f32 to vector<128x256xf32>
    %164 = arith.mulf %163, %162 : vector<128x256xf32>
    %cst_46 = arith.constant 0.707106769 : f32
    %165 = vector.broadcast %cst_46 : f32 to vector<128x256xf32>
    %166 = arith.mulf %162, %165 : vector<128x256xf32>
    %167 = math.erf %166 : vector<128x256xf32>
    %cst_47 = arith.constant 1.000000e+00 : f32
    %168 = vector.broadcast %cst_47 : f32 to vector<128x256xf32>
    %169 = arith.addf %168, %167 : vector<128x256xf32>
    %170 = arith.mulf %164, %169 : vector<128x256xf32>
    %c0_48 = arith.constant 0 : index
    %c0_49 = arith.constant 0 : index
    %171 = vector.load %arg14[%c0_48, %c0_49] : memref<256x128xf32, #tpu.memory_space<vmem>>, vector<256x128xf32>
    %cst_50 = arith.constant dense<0.000000e+00> : vector<128x128xf32>
    %172 = tpu.matmul %170, %171, %cst_50 {dimension_numbers = #tpu.dot_dimension_numbers<[1], [0], [0], [1], [0, 0, 1, 1], [], []>} : vector<128x256xf32>, vector<256x128xf32>, vector<128x128xf32> -> vector<128x128xf32>
    %c0_51 = arith.constant 0 : index
    %c0_52 = arith.constant 0 : index
    %173 = vector.load %arg15[%c0_51, %c0_52] : memref<1x128xf32, #tpu.memory_space<vmem>>, vector<1x128xf32>
    %174 = vector.broadcast %173 : vector<1x128xf32> to vector<128x128xf32>
    %175 = arith.addf %172, %174 : vector<128x128xf32>
    %176 = arith.addf %131, %175 : vector<128x128xf32>
    %c0_53 = arith.constant 0 : index
    %c0_54 = arith.constant 0 : index
    %177 = vector.load %arg16[%c0_53, %c0_54] : memref<128x128xf32, #tpu.memory_space<vmem>>, vector<128x128xf32>
    tpu.vector_store %arg16[%c0_53, %c0_54], %176 {strides = array<i32>} : memref<128x128xf32, #tpu.memory_space<vmem>>, vector<128x128xf32>,
    return
  }
  func.func @transform_0(%arg0: i32) -> (i32, i32) {
    %c0_i32 = arith.constant 0 : i32
    %c0_i32_0 = arith.constant 0 : i32
    return %arg0, %c0_i32 : i32, i32
  }
  func.func @transform_1(%arg0: i32) -> (i32, i32, i32) {
    %c0_i32 = arith.constant 0 : i32
    %c0_i32_0 = arith.constant 0 : i32
    %c0_i32_1 = arith.constant 0 : i32
    %c0_i32_2 = arith.constant 0 : i32
    return %c0_i32, %c0_i32_0, %c0_i32_1 : i32, i32, i32
  }
  func.func @transform_2(%arg0: i32) -> (i32, i32) {
    %c0_i32 = arith.constant 0 : i32
    %c0_i32_0 = arith.constant 0 : i32
    %c0_i32_1 = arith.constant 0 : i32
    return %c0_i32, %c0_i32_0 : i32, i32
  }
  func.func @transform_3(%arg0: i32) -> (i32, i32) {
    %c0_i32 = arith.constant 0 : i32
    %c0_i32_0 = arith.constant 0 : i32
    %c0_i32_1 = arith.constant 0 : i32
    return %c0_i32, %c0_i32_0 : i32, i32
  }
  func.func @transform_4(%arg0: i32) -> (i32, i32) {
    %c0_i32 = arith.constant 0 : i32
    %c0_i32_0 = arith.constant 0 : i32
    %c0_i32_1 = arith.constant 0 : i32
    return %c0_i32, %c0_i32_0 : i32, i32
  }
  func.func @transform_5(%arg0: i32) -> (i32, i32) {
    %c0_i32 = arith.constant 0 : i32
    %c0_i32_0 = arith.constant 0 : i32
    %c0_i32_1 = arith.constant 0 : i32
    return %c0_i32, %c0_i32_0 : i32, i32
  }
  func.func @transform_6(%arg0: i32) -> (i32, i32) {
    %c0_i32 = arith.constant 0 : i32
    %c0_i32_0 = arith.constant 0 : i32
    %c0_i32_1 = arith.constant 0 : i32
    return %c0_i32, %c0_i32_0 : i32, i32
  }
  func.func @transform_7(%arg0: i32) -> (i32, i32) {
    %c0_i32 = arith.constant 0 : i32
    %c0_i32_0 = arith.constant 0 : i32
    %c0_i32_1 = arith.constant 0 : i32
    return %c0_i32, %c0_i32_0 : i32, i32
  }
  func.func @transform_8(%arg0: i32) -> (i32, i32) {
    %c0_i32 = arith.constant 0 : i32
    %c0_i32_0 = arith.constant 0 : i32
    %c0_i32_1 = arith.constant 0 : i32
    return %c0_i32, %c0_i32_0 : i32, i32
  }
  func.func @transform_9(%arg0: i32) -> (i32, i32) {
    %c0_i32 = arith.constant 0 : i32
    %c0_i32_0 = arith.constant 0 : i32
    %c0_i32_1 = arith.constant 0 : i32
    return %c0_i32, %c0_i32_0 : i32, i32
  }
  func.func @transform_10(%arg0: i32) -> (i32, i32) {
    %c0_i32 = arith.constant 0 : i32
    %c0_i32_0 = arith.constant 0 : i32
    %c0_i32_1 = arith.constant 0 : i32
    return %c0_i32, %c0_i32_0 : i32, i32
  }
  func.func @transform_11(%arg0: i32) -> (i32, i32) {
    %c0_i32 = arith.constant 0 : i32
    %c0_i32_0 = arith.constant 0 : i32
    %c0_i32_1 = arith.constant 0 : i32
    return %c0_i32, %c0_i32_0 : i32, i32
  }
  func.func @transform_12(%arg0: i32) -> (i32, i32) {
    %c0_i32 = arith.constant 0 : i32
    %c0_i32_0 = arith.constant 0 : i32
    %c0_i32_1 = arith.constant 0 : i32
    return %c0_i32, %c0_i32_0 : i32, i32
  }
  func.func @transform_13(%arg0: i32) -> (i32, i32) {
    %c0_i32 = arith.constant 0 : i32
    %c0_i32_0 = arith.constant 0 : i32
    %c0_i32_1 = arith.constant 0 : i32
    return %c0_i32, %c0_i32_0 : i32, i32
  }
  func.func @transform_14(%arg0: i32) -> (i32, i32) {
    %c0_i32 = arith.constant 0 : i32
    %c0_i32_0 = arith.constant 0 : i32
    %c0_i32_1 = arith.constant 0 : i32
    return %c0_i32, %c0_i32_0 : i32, i32
  }
  func.func @transform_15(%arg0: i32) -> (i32, i32) {
    %c0_i32 = arith.constant 0 : i32
    %c0_i32_0 = arith.constant 0 : i32
    return %arg0, %c0_i32 : i32, i32
  }
}

</mosaic_0001>

<bundles_post_ra>
// kernel: tpu_custom_call.1
= control target key start
LH: loop header
LB: loop body
LE: loop exit
PB: predicated region body
PF: predicated region fallthrough
CT: control target
= control target key end

     0   :  { %s26304_s0 = inlined_call_operand.hbm [shape: f32[256,128], index: 0, kind: input, shape index: {}]   ;;  %s26305_s1 = inlined_call_operand.hbm [shape: f32[1,16,128], index: 1, kind: input, shape index: {}]   ;;  %s26306_s2 = inlined_call_operand.vmem [shape: f32[1,128], index: 2, kind: input, shape index: {}]   ;;  %s26307_s3 = inlined_call_operand.vmem [shape: f32[1,128], index: 3, kind: input, shape index: {}]   ;;  %s26308_s4 = inlined_call_operand.hbm [shape: f32[128,128], index: 4, kind: input, shape index: {}]   ;;  %s26309_s5 = inlined_call_operand.hbm [shape: f32[128,128], index: 5, kind: input, shape index: {}]   ;;  %s26310_s6 = inlined_call_operand.hbm [shape: f32[128,128], index: 6, kind: input, shape index: {}]   ;;  %s26311_s7 = inlined_call_operand.hbm [shape: f32[128,128], index: 7, kind: input, shape index: {}]   ;;  %s26312_s8 = inlined_call_operand.vmem [shape: f32[1,128], index: 8, kind: input, shape index: {}]   ;;  %s26313_s9 = inlined_call_operand.vmem [shape: f32[1,128], index: 9, kind: input, shape index: {}]   ;;  %s26314_s10 = inlined_call_operand.vmem [shape: f32[1,128], index: 10, kind: input, shape index: {}]   ;;  %s26315_s11 = inlined_call_operand.hbm [shape: f32[128,256], index: 11, kind: input, shape index: {}]   ;;  %s26316_s12 = inlined_call_operand.vmem [shape: f32[1,256], index: 12, kind: input, shape index: {}]   ;;  %s26317_s13 = inlined_call_operand.hbm [shape: f32[256,128], index: 13, kind: input, shape index: {}]   ;;  %s26318_s14 = inlined_call_operand.vmem [shape: f32[1,128], index: 14, kind: input, shape index: {}]   ;;  %s26319_s15 = inlined_call_operand.hbm [shape: f32[256,128], index: 15, kind: output, shape index: {}]  }
   0x1   :  { %26599 = sst [smem:[#allocation160_spill]] %s26305_s1 }
   0x2   :  { %26600 = sst [smem:[#allocation161_spill]] %s26307_s3 }
   0x3   :  { %26601 = sst [smem:[#allocation162_spill]] %s26312_s8 }
   0x4   :  { %26602 = sst [smem:[#allocation163_spill]] %s26313_s9 }
   0x5   :  { %26603 = sst [smem:[#allocation164_spill]] %s26314_s10 }
   0x6   :  { %26604 = sst [smem:[#allocation165_spill]] %s26316_s12 }
   0x7   :  { %26605 = sst [smem:[#allocation166_spill]] %s26318_s14 }
   0x8   :  { %26606 = sst [smem:[#allocation167_spill]] %s26319_s15 }
   0x9   :  { %20 = vsyncpa [#allocation3], 0 }
   0xa   :  { %22 = vsyncpa [#allocation3 + $0x1], 0 }
   0xb   :  { %23 = vsyncpa [#allocation6], 0 }
   0xc   :  { %24 = vsyncpa [#allocation9], 0 }
   0xd   :  { %25 = vsyncpa [#allocation12], 0 }
   0xe   :  { %26 = vsyncpa [#allocation15], 0 }
   0xf   :  { %27 = vsyncpa [#allocation4], 0 }
  0x10   :  { %29 = vsyncpa [#allocation4 + $0x1], 0  ;;  %s21077_s18 = smov 0   ;;  %s21079_s19 = smov 0  }
  0x11   :  { %s21081_s20 = smov 0   ;;  %s21083_s21 = smov 0  }
  0x12 LB: > { %s20974_s22 = smov [#allocation5]   ;;  %s21098_s24 = sadd.s32 4294967295, %s20972_s21   ;;  %s20972_s21 = sphi %s21083_s21, %s27470_s21   ;;  %s20968_s20 = sphi %s21081_s20, %s27469_s20   ;;  %s20964_s19 = sphi %s21079_s19, %s27468_s19   ;;  %s20960_s18 = sphi %s21077_s18, %s27467_s18  }
  0x13   : > { %s398_s23 = sshll.u32 %s20974_s22, 4  ;;  %p15930_p0 = scmp.ge.s32.totalorder %s20972_s21, 1  ;;  %s21103_s23 = int_to_ptr.vmem [resolvable:$true] %s398_s23 }
  0x14   : > { %p26321_p1 = scmp.eq.s32.totalorder %s21098_s24, 0  ;;  %p386_p2 = scmp.lt.s32.totalorder %s20972_s21, 3 }
  0x15   : > { %s20975_s26 = smov [#allocation8]   ;;  %s20976_s29 = smov [#allocation11]  }
  0x16   : > { %p21105_p3 = pnand %p15930_p0, %p386_p2  ;;  %s430_s27 = sshll.u32 %s20975_s26, 4  ;;  %s21118_s27 = int_to_ptr.vmem [resolvable:$true] %s430_s27 }
  0x17   : > { %s456_s30 = sshll.u32 %s20976_s29, 4  ;;  %s26609_s1 = sld [smem:[#allocation160_spill]]  ;;  %s21120_s30 = int_to_ptr.vmem [resolvable:$true] %s456_s30 }
  0x18   : > { %s26607_s25 = scalar_select %p21105_p3, 1, 0 }
  0x19   : > { %p19069_p5 = pneg %p21105_p3 }
  0x1b   : > { %p21114_p6 = pnand %p19069_p5, %p26321_p1 }
  0x1d   : > { %s20664_s22 = scalar_lea.hbm %s26609_s1, 256  ;;  %p21130_p8 = pneg %p21114_p6 }
  0x1e   : > { %p20665_p7 = scmp.ne.s32.totalorder %s26609_s1, %s20664_s22  ;;  %p20671_p11 = scmp.lt.u32.totalorder %s20664_s22, %s26609_s1 }
  0x20   : > { %p20667_p9 = pnand %p21130_p8, %p20665_p7 }
  0x22   : > { %p20668_p10 = pneg %p20667_p9 }
  0x24   : > { %p20673_p12 = pnand %p20671_p11, %p20668_p10 }
  0x26   : > { %20676 = shalt.err (!%p20673_p12)
}
  0x27   : > { %s20677_s14 = scalar_lea.vmem %s21103_s23, 256  ;;  %p20685_p5 = scmp.lt.s32.totalorder %s21103_s23, %s21103_s23 }
  0x28   : > { %p20678_p13 = scmp.ne.s32.totalorder %s21103_s23, %s20677_s14  ;;  %p20686_p4 = scmp.lt.s32.totalorder %s20677_s14, %s20677_s14 }
  0x2a   : > { %p20680_p0 = pnand %p20678_p13, %p21130_p8  ;;  %p20687_p7 = por %p20686_p4, %p20685_p5 }
  0x2c   : > { %p20681_p2 = pneg %p20680_p0 }
  0x2e   : > { %p20688_p9 = pnand %p20687_p7, %p20681_p2 }
  0x30   : > { %20691 = shalt.err (!%p20688_p9)
}
  0x31   : > { %s26323_s15 = smov 128   ;;  %s26325_s12 = smov 8  }
  0x32   : > { %19072 = dma.hbm_to_vmem [thread:$0]  (!%p21114_p6), %s26609_s1, 256, %s21103_s23, [#allocation6], %s26323_s15, %s26323_s15, %s26325_s12  }
  0x33   : > { %s20692_s14 = scalar_lea.hbm %s26309_s5, 2048 }
  0x34   : > { %p20693_p4 = scmp.ne.s32.totalorder %s26309_s5, %s20692_s14  ;;  %p20699_p12 = scmp.lt.u32.totalorder %s20692_s14, %s26309_s5 }
  0x36   : > { %p20695_p10 = pnand %p20693_p4, %p21130_p8 }
  0x38   : > { %p20696_p11 = pneg %p20695_p10 }
  0x3a   : > { %p20701_p13 = pnand %p20699_p12, %p20696_p11 }
  0x3c   : > { %20704 = shalt.err (!%p20701_p13)
}
  0x3d   : > { %s20705_s23 = scalar_lea.vmem %s21118_s27, 2048  ;;  %p20713_p7 = scmp.lt.s32.totalorder %s21118_s27, %s21118_s27 }
  0x3e   : > { %p20706_p0 = scmp.ne.s32.totalorder %s21118_s27, %s20705_s23  ;;  %p20714_p9 = scmp.lt.s32.totalorder %s20705_s23, %s20705_s23 }
  0x40   : > { %p20708_p2 = pnand %p20706_p0, %p21130_p8  ;;  %p20715_p4 = por %p20714_p9, %p20713_p7 }
  0x42   : > { %p20709_p5 = pneg %p20708_p2 }
  0x44   : > { %p20716_p10 = pnand %p20715_p4, %p20709_p5 }
  0x46   : > { %20719 = shalt.err (!%p20716_p10)
}
  0x47   : > { %19078 = dma.hbm_to_vmem [thread:$0]  (!%p21114_p6), %s26309_s5, 2048, %s21118_s27, [#allocation9], %s26323_s15, %s26323_s15, %s26325_s12  }
  0x48   : > { %s20720_s16 = scalar_lea.hbm %s26311_s7, 2048 }
  0x49   : > { %p20721_p11 = scmp.ne.s32.totalorder %s26311_s7, %s20720_s16  ;;  %p20727_p0 = scmp.lt.u32.totalorder %s20720_s16, %s26311_s7 }
  0x4b   : > { %p20723_p12 = pnand %p20721_p11, %p21130_p8 }
  0x4d   : > { %p20724_p13 = pneg %p20723_p12 }
  0x4f   : > { %p20729_p2 = pnand %p20727_p0, %p20724_p13 }
  0x51   : > { %20732 = shalt.err (!%p20729_p2)
}
  0x52   : > { %s20733_s27 = scalar_lea.vmem %s21120_s30, 2048  ;;  %p20741_p4 = scmp.lt.s32.totalorder %s21120_s30, %s21120_s30 }
  0x53   : > { %p20734_p5 = scmp.ne.s32.totalorder %s21120_s30, %s20733_s27  ;;  %p20742_p10 = scmp.lt.s32.totalorder %s20733_s27, %s20733_s27 }
  0x55   : > { %p20736_p7 = pnand %p20734_p5, %p21130_p8  ;;  %p20743_p11 = por %p20742_p10, %p20741_p4 }
  0x57   : > { %p20737_p9 = pneg %p20736_p7 }
  0x59   : > { %p20744_p12 = pnand %p20743_p11, %p20737_p9 }
  0x5b   : > { %20747 = shalt.err (!%p20744_p12)
}
  0x5c   : > { %19084 = dma.hbm_to_vmem [thread:$0]  (!%p21114_p6), %s26311_s7, 2048, %s21120_s30, [#allocation12], %s26323_s15, %s26323_s15, %s26325_s12  }
  0x5d   : > { %s20979_s8 = smov [#allocation7]   ;;  %s20980_s10 = smov [#allocation10]  }
  0x5e   : > { %s417_s9 = sshll.u32 %s20979_s8, 4  ;;  %s443_s16 = sshll.u32 %s20980_s10, 4  ;;  %s418_s9 = int_to_ptr.vmem [resolvable:$true] %s417_s9  ;;  %s444_s16 = int_to_ptr.vmem [resolvable:$true] %s443_s16 }
  0x5f   : > { %s20748_s29 = scalar_lea.hbm %s26308_s4, 2048 }
  0x60   : > { %p20749_p13 = scmp.ne.s32.totalorder %s26308_s4, %s20748_s29  ;;  %p20755_p5 = scmp.lt.u32.totalorder %s20748_s29, %s26308_s4 }
  0x62   : > { %p20751_p0 = pnand %p20749_p13, %p21130_p8 }
  0x64   : > { %p20752_p2 = pneg %p20751_p0 }
  0x66   : > { %p20757_p7 = pnand %p20755_p5, %p20752_p2 }
  0x68   : > { %20760 = shalt.err (!%p20757_p7)
}
  0x69   : > { %s20761_s30 = scalar_lea.vmem %s418_s9, 2048  ;;  %p20769_p11 = scmp.lt.s32.totalorder %s418_s9, %s418_s9 }
  0x6a   : > { %p20762_p9 = scmp.ne.s32.totalorder %s418_s9, %s20761_s30  ;;  %p20770_p12 = scmp.lt.s32.totalorder %s20761_s30, %s20761_s30 }
  0x6c   : > { %p20764_p4 = pnand %p20762_p9, %p21130_p8  ;;  %p20771_p1 = por %p20770_p12, %p20769_p11 }
  0x6e   : > { %p20765_p10 = pneg %p20764_p4 }
  0x70   : > { %p20772_p3 = pnand %p20771_p1, %p20765_p10 }
  0x72   : > { %20775 = shalt.err (!%p20772_p3)
}
  0x73   : > { %19075 = dma.hbm_to_vmem [thread:$0]  (!%p21114_p6), %s26308_s4, 2048, %s418_s9, [#allocation6], %s26323_s15, %s26323_s15, %s26325_s12  }
  0x74   : > { %s20776_s17 = scalar_lea.hbm %s26310_s6, 2048 }
  0x75   : > { %p20777_p1 = scmp.ne.s32.totalorder %s26310_s6, %s20776_s17  ;;  %p20783_p0 = scmp.lt.u32.totalorder %s20776_s17, %s26310_s6 }
  0x77   : > { %p20779_p3 = pnand %p20777_p1, %p21130_p8 }
  0x79   : > { %p20780_p13 = pneg %p20779_p3 }
  0x7b   : > { %p20785_p2 = pnand %p20783_p0, %p20780_p13 }
  0x7d   : > { %20788 = shalt.err (!%p20785_p2)
}
  0x7e   : > { %s20789_s23 = scalar_lea.vmem %s444_s16, 2048  ;;  %p20797_p4 = scmp.lt.s32.totalorder %s444_s16, %s444_s16 }
  0x7f   : > { %p20790_p5 = scmp.ne.s32.totalorder %s444_s16, %s20789_s23  ;;  %p20798_p10 = scmp.lt.s32.totalorder %s20789_s23, %s20789_s23 }
  0x81   : > { %p20792_p7 = pnand %p20790_p5, %p21130_p8  ;;  %p20799_p11 = por %p20798_p10, %p20797_p4 }
  0x83   : > { %p20793_p9 = pneg %p20792_p7 }
  0x85   : > { %p20800_p12 = pnand %p20799_p11, %p20793_p9 }
  0x87   : > { %20803 = shalt.err (!%p20800_p12)
}
  0x88   : > { %19081 = dma.hbm_to_vmem [thread:$0]  (!%p21114_p6), %s26310_s6, 2048, %s444_s16, [#allocation9], %s26323_s15, %s26323_s15, %s26325_s12  }
  0x89   : > { %s20981_s1 = smov [#allocation13]   ;;  %s20804_s17 = scalar_lea.hbm %s26315_s11, 4096 }
  0x8a   : > { %s478_s3 = sshll.u32 %s20981_s1, 4  ;;  %p20805_p1 = scmp.ne.s32.totalorder %s26315_s11, %s20804_s17  ;;  %s479_s3 = int_to_ptr.vmem [resolvable:$true] %s478_s3 }
  0x8b   : > { %p20811_p0 = scmp.lt.u32.totalorder %s20804_s17, %s26315_s11 }
  0x8c   : > { %p20807_p3 = pnand %p20805_p1, %p21130_p8 }
  0x8e   : > { %p20808_p13 = pneg %p20807_p3 }
  0x90   : > { %p20813_p2 = pnand %p20811_p0, %p20808_p13 }
  0x92   : > { %20816 = shalt.err (!%p20813_p2)
}
  0x93   : > { %s20817_s16 = scalar_lea.vmem %s479_s3, 4096  ;;  %p20825_p4 = scmp.lt.s32.totalorder %s479_s3, %s479_s3 }
  0x94   : > { %p20818_p5 = scmp.ne.s32.totalorder %s479_s3, %s20817_s16  ;;  %p20826_p10 = scmp.lt.s32.totalorder %s20817_s16, %s20817_s16 }
  0x96   : > { %p20820_p7 = pnand %p20818_p5, %p21130_p8  ;;  %p20827_p11 = por %p20826_p10, %p20825_p4 }
  0x98   : > { %p20821_p9 = pneg %p20820_p7 }
  0x9a   : > { %p20828_p12 = pnand %p20827_p11, %p20821_p9 }
  0x9c   : > { %20831 = shalt.err (!%p20828_p12)
}
  0x9d   : > { %s20982_s23 = smov 256   ;;  %s20983_s9 = smov 16  }
  0x9e   : > { %19087 = dma.hbm_to_vmem [thread:$0]  (!%p21114_p6), %s26315_s11, 4096, %s479_s3, [#allocation12], %s20982_s23, %s20982_s23, %s20983_s9  }
  0x9f   : > { %s20984_s8 = smov [#allocation14]   ;;  %s20832_s29 = scalar_lea.hbm %s26317_s13, 4096 }
  0xa0   : > { %s494_s10 = sshll.u32 %s20984_s8, 4  ;;  %p20833_p1 = scmp.ne.s32.totalorder %s26317_s13, %s20832_s29  ;;  %s495_s10 = int_to_ptr.vmem [resolvable:$true] %s494_s10 }
  0xa1   : > { %p20839_p0 = scmp.lt.u32.totalorder %s20832_s29, %s26317_s13 }
  0xa2   : > { %p20835_p3 = pnand %p20833_p1, %p21130_p8 }
  0xa4   : > { %p20836_p13 = pneg %p20835_p3 }
  0xa6   : > { %p20841_p2 = pnand %p20839_p0, %p20836_p13 }
  0xa8   : > { %20844 = shalt.err (!%p20841_p2)
}
  0xa9   : > { %s20845_s3 = scalar_lea.vmem %s495_s10, 4096  ;;  %p20853_p4 = scmp.lt.s32.totalorder %s495_s10, %s495_s10 }
  0xaa   : > { %p20846_p5 = scmp.ne.s32.totalorder %s495_s10, %s20845_s3  ;;  %p20854_p10 = scmp.lt.s32.totalorder %s20845_s3, %s20845_s3 }
  0xac   : > { %p20848_p7 = pnand %p20846_p5, %p21130_p8  ;;  %p20855_p11 = por %p20854_p10, %p20853_p4 }
  0xae   : > { %p20849_p9 = pneg %p20848_p7 }
  0xb0   : > { %p20856_p12 = pnand %p20855_p11, %p20849_p9 }
  0xb2   : > { %20859 = shalt.err (!%p20856_p12)
}
  0xb3   : > { %s26611_s23 = smov 128   ;;  %s15929_s28 = sadd.s32 4294967294, %s20972_s21  }
  0xb4   : > { %19090 = dma.hbm_to_vmem [thread:$0]  (!%p21114_p6), %s26317_s13, 4096, %s495_s10, [#allocation15], %s26611_s23, %s26611_s23, %s26325_s12  }
  0xb5   : > { %s21289_s26 = sadd.s32 1, %s20972_s21   ;;  %s42_s30 = sadd.s32 1, %s20968_s20 }
  0xb6   : > { %s39_s1 = ssub.s32 %s20972_s21, %s21289_s26  ;;  %p49_p8 = scmp.ne.s32.totalorder %s20968_s20, %s20964_s19 }
  0xb7   : > { %p40_p1 = scmp.eq.s32.totalorder %s39_s1, 0  ;;  %p50_p3 = scmp.eq.s32.totalorder %s20972_s21, 0 }
  0xb8   : > { %p55_p13 = scmp.ne.s32.totalorder %s20964_s19, %s20960_s18  ;;  %p373_p0 = scmp.eq.s32.totalorder %s21098_s24, 1 }
  0xb9   : > { %s21301_s8 = scalar_select %p40_p1, %s20968_s20, %s42_s30  }
  0xba   : > { %p51_p2 = por %p50_p3, %p49_p8  ;;  %p26612_p5 = scmp.eq.s32.totalorder %s21098_s24, 0 }
  0xbb   : > { %p21309_p6 = por %p373_p0, %p49_p8  ;;  %p379_p9 = scmp.eq.s32.totalorder %s15929_s28, 1 }
  0xbc   : > { %p21305_p7 = por %p26612_p5, %p55_p13  ;;  %p19106_p4 = scmp.lt.s32.totalorder %s20972_s21, 2 }
  0xbd   : > { %s26614_s10 = scalar_select %p21309_p6, 1, 0 }
  0xbe   : > { %s511_s22 = sand.u32 1, %s20968_s20   ;;  %p21315_p10 = por %p379_p9, %p55_p13 }
  0xbf   : > { %s15939_s14 = sshll.u32 %s511_s22, 7  ;;  %s16347_s27 = sshll.u32 %s20972_s21, 11 }
  0xc0   : > { %s26615_s29 = scalar_select %p21315_p10, 1, 0 }
  0xc1   : > { %s21323_s15 = scalar_lea.hbm %s26304_s0, %s16347_s27  ;;  %s515_s9 = scalar_lea.vmem [#allocation2], %s15939_s14 }
  0xc2   : > { %s522_s30 = sshll.u32 %s515_s9, 4  ;;  %p21325_p11 = pnand %p19106_p4, %p51_p2  ;;  %s21329_s30 = int_to_ptr.vmem [resolvable:$true] %s522_s30 }
  0xc3   : > { %s21331_s1 = scalar_lea.sflag [#allocation3], %s511_s22  ;;  %s20860_s12 = scalar_lea.hbm %s21323_s15, 2048 }
  0xc4   : > { %p20861_p12 = scmp.ne.s32.totalorder %s21323_s15, %s20860_s12  ;;  %p20862_p8 = pneg %p21325_p11 }
  0xc5   : > { %s20865_s16 = scalar_lea.hbm %s26304_s0, 4096  ;;  %p20866_p13 = scmp.lt.u32.totalorder %s21323_s15, %s26304_s0 }
  0xc6   : > { %p20863_p1 = pnand %p20862_p8, %p20861_p12  ;;  %p20867_p0 = scmp.lt.u32.totalorder %s20865_s16, %s20860_s12 }
  0xc7   : > { %p20869_p5 = scmp.lt.u32.totalorder %s20860_s12, %s21323_s15 }
  0xc8   : > { %p20864_p3 = pneg %p20863_p1  ;;  %p20868_p2 = por %p20867_p0, %p20866_p13 }
  0xca   : > { %p20870_p9 = por %p20869_p5, %p20868_p2 }
  0xcc   : > { %p20871_p4 = pnand %p20870_p9, %p20864_p3 }
  0xce   : > { %20874 = shalt.err (!%p20871_p4)
}
  0xcf   : > { %s20875_s22 = scalar_lea.vmem %s21329_s30, 2048  ;;  %s20985_s14 = smov [#allocation2]  }
  0xd0   : > { %p20876_p12 = scmp.ne.s32.totalorder %s21329_s30, %s20875_s22  ;;  %s20880_s27 = sshll.u32 %s20985_s14, 4  ;;  %s20881_s27 = int_to_ptr.vmem [resolvable:$false] %s20880_s27 }
  0xd1   : > { %s20882_s3 = scalar_lea.vmem %s20881_s27, 4096  ;;  %p20883_p6 = scmp.lt.s32.totalorder %s21329_s30, %s20881_s27 }
  0xd2   : > { %p20878_p1 = pnand %p20876_p12, %p20862_p8  ;;  %p20884_p13 = scmp.lt.s32.totalorder %s20882_s3, %s20875_s22 }
  0xd4   : > { %p20879_p10 = pneg %p20878_p1  ;;  %p20885_p0 = por %p20884_p13, %p20883_p6 }
  0xd6   : > { %p20886_p2 = pnand %p20885_p0, %p20879_p10 }
  0xd8   : > { %20889 = shalt.err (!%p20886_p2)
}
  0xd9   : > { %s26617_s12 = smov 8   ;;  %p26618_p8 = scmp.ne.s32.totalorder %s26607_s25, 0 }
  0xda   : > { %19094 = dma.hbm_to_vmem [thread:$0]  (!%p21325_p11), %s21323_s15, 2048, %s21329_s30, %s21331_s1, %s26611_s23, %s26611_s23, %s26617_s12  }
  0xdb   : > { %534 = sbr.rel (%p26618_p8) target bundleno = 4208 (0x1070), region = 80 }
  0xe2   : > { %s21365_s16 = sand.u32 1, %s20964_s19  }
  0xe3   : > { %s15943_s9 = sshll.u32 %s21365_s16, 7  ;;  %s537_s22 = scalar_lea.sflag [#allocation3], %s21365_s16 }
  0xe4   : > { %s21371_s28 = scalar_lea.vmem [#allocation2], %s15943_s9 }
  0xe5   : > { %20935 = dma.done.wait (%p21305_p7), %s537_s22, 2048  }
  0xe6   : > { %20937 = vsyncadd (%p21305_p7), %s537_s22, 4294965248  ;;  %p26619_p6 = scmp.eq.s32.totalorder %s21098_s24, 0 }
  0xe8   : > { %20939 = dma.done.wait (%p26619_p6), [#allocation6], 2304   ;;  %p26620_p10 = pmov %p26619_p6 }
  0xe9   : > { %p26621_p11 = pmov %p26619_p6 }
  0xea   : > { %20941 = vsyncadd (%p26620_p10), [#allocation6], 4294964992 }
  0xeb   : > { %20943 = dma.done.wait (%p26621_p11), [#allocation9], 4096   ;;  %p26622_p3 = pmov %p26619_p6 }
  0xed   : > { %20945 = vsyncadd (%p26622_p3), [#allocation9], 4294963200  ;;  %p26623_p5 = pmov %p26622_p3 }
  0xee   : > { %p26624_p9 = pmov %p26622_p3 }
  0xef   : > { %20947 = dma.done.wait (%p26623_p5), [#allocation12], 6144  }
  0xf0   : > { %20949 = vsyncadd (%p26624_p9), [#allocation12], 4294961152  ;;  %p26625_p7 = pmov %p26622_p3 }
  0xf1   : > { %p26626_p4 = pmov %p26622_p3 }
  0xf2   : > { %20951 = dma.done.wait (%p26625_p7), [#allocation15], 4096  }
  0xf3   : > { %20953 = vsyncadd (%p26626_p4), [#allocation15], 4294963200  ;;  %v617_v0 = vld [vmem:[%s21371_s28] sm:$0xff]  ;;  %v619_v1 = vld [vmem:[%s21371_s28 + $0x10] sm:$0xff]  ;;  %s26627_s30 = sld [smem:[#allocation161_spill]]  ;;  %vm2189_vm0 = vcmask 130048  }
  0xf4   : > { %635 = vadd.xlane.f32.xlu0 %v617_v0  ;;  %639 = vadd.xlane.f32.xlu1 %v619_v1  ;;  %v618_v2 = vld [vmem:[%s21371_s28 + $0x8] sm:$0xff]  ;;  %v620_v3 = vld [vmem:[%s21371_s28 + $0x18] sm:$0xff]  ;;  %v21398_v4 = vld [vmem:[%s21371_s28 + $0x20] sm:$0xff]  ;;  %s20986_s1 = smov 112   ;;  %s20987_s14 = smov 96   ;;  %vm14686_vm2 = vcmask 261120  }
  0xf5   : > { %v21401_v5 = vld [vmem:[%s21371_s28 + $0x28] sm:$0xff]  ;;  %v21406_v6 = vld [vmem:[%s21371_s28 + $0x30] sm:$0xff]  ;;  %v21409_v7 = vld [vmem:[%s21371_s28 + $0x38] sm:$0xff]  ;;  %s20988_s27 = smov 80   ;;  %s20989_s3 = smov 64   ;;  %vm14703_vm3 = vcmask 392192  }
  0xf6   : > { %v21414_v8 = vld [vmem:[%s21371_s28 + $0x40] sm:$0xff]  ;;  %v21417_v9 = vld [vmem:[%s21371_s28 + $0x48] sm:$0xff]  ;;  %v21422_v10 = vld [vmem:[%s21371_s28 + $0x50] sm:$0xff]  ;;  %s20990_s12 = smov 48   ;;  %s20991_s22 = smov 32   ;;  %vm14720_vm4 = vcmask 523264  }
  0xf7   : > { %v21425_v11 = vld [vmem:[%s21371_s28 + $0x58] sm:$0xff]  ;;  %v21430_v12 = vld [vmem:[%s21371_s28 + $0x60] sm:$0xff]  ;;  %v21433_v13 = vld [vmem:[%s21371_s28 + $0x68] sm:$0xff]  ;;  %s20992_s25 = smov 16   ;;  %vm14737_vm5 = vcmask 654336   ;;  %vm14754_vm6 = vcmask 785408  }
  0xf8   : > { %637 = vadd.xlane.f32.xlu0 %v618_v2  ;;  %641 = vadd.xlane.f32.xlu1 %v620_v3  ;;  %v21438_v14 = vld [vmem:[%s21371_s28 + $0x70] sm:$0xff]  ;;  %v21441_v15 = vld [vmem:[%s21371_s28 + $0x78] sm:$0xff]  ;;  %v876_v21 = vld [vmem:[#allocation7 + $0x10] sm:$0xff]  ;;  %vm14771_vm7 = vcmask 916480   ;;  %s27458_s15 = sld [smem:[#allocation162_spill]]  ;;  %p27464_p1 = scmp.ne.s32.totalorder %s26614_s10, 0 }
  0xf9   : > { %v874_v16 = vld [vmem:[#allocation7] sm:$0xff]  ;;  %v875_v17 = vld [vmem:[#allocation7 + $0x8] sm:$0xff]  ;;  %v877_v22 = vld [vmem:[#allocation7 + $0x18] sm:$0xff] }
  0xfa   : > { %v1035_v18 = vld [vmem:[#allocation8] sm:$0xff]  ;;  %v18189_v19 = vpack.c.bf16 %v875_v17, %v874_v16  ;;  %v1036_v20 = vld [vmem:[#allocation8 + $0x8] sm:$0xff]  ;;  %v18193_v24 = vpack.c.bf16 %v877_v22, %v876_v21  ;;  %v1037_v25 = vld [vmem:[#allocation8 + $0x10] sm:$0xff] }
  0xfb   : > { %v18221_v23 = vpack.c.bf16 %v1036_v20, %v1035_v18  ;;  %v1038_v26 = vld [vmem:[#allocation8 + $0x18] sm:$0xff]  ;;  %v879_v16 = vld [vmem:[#allocation7 + $0x28] sm:$0xff]  ;;  %v1039_v17 = vld [vmem:[#allocation8 + $0x20] sm:$0xff] }
  0xfc   : > { %643 = vadd.xlane.f32.xlu0 %v21398_v4  ;;  %645 = vadd.xlane.f32.xlu1 %v21401_v5  ;;  %v18225_v27 = vpack.c.bf16 %v1038_v26, %v1037_v25  ;;  %v1040_v20 = vld [vmem:[#allocation8 + $0x28] sm:$0xff]  ;;  %vm21657_vm1 = vmpackc.low %vm2189_vm0, %vm2189_vm0 }
  0xfd   : > { %18190 = vmatprep.subr.bf16.mxu0 %v18189_v19  ;;  %18222 = vmatprep.subr.bf16.mxu1 %v18221_v23  ;;  %v18229_v21 = vpack.c.bf16 %v1040_v20, %v1039_v17 }
  0xfe   : > { %18192 = vmatpush3.bf16.msra.mxu0 %v18189_v19  ;;  %18224 = vmatpush3.bf16.msra.mxu1 %v18221_v23 }
  0xff   : > { %18194 = vmatprep.subr.bf16.mxu0 %v18193_v24  ;;  %18226 = vmatprep.subr.bf16.mxu1 %v18225_v27 }
 0x100   : > { %647 = vadd.xlane.f32.xlu0 %v21406_v6  ;;  %649 = vadd.xlane.f32.xlu1 %v21409_v7 }
 0x102   : > { %18196 = vmatpush3.bf16.msra.mxu0 %v18193_v24  ;;  %18228 = vmatpush3.bf16.msra.mxu1 %v18225_v27 }
 0x103   : > { %18230 = vmatprep.subr.bf16.mxu1 %v18229_v21 }
 0x104   : > { %651 = vadd.xlane.f32.xlu0 %v21414_v8  ;;  %653 = vadd.xlane.f32.xlu1 %v21417_v9 }
 0x106   : > { %18232 = vmatpush3.bf16.msra.mxu1 %v18229_v21 }
 0x108   : > { %655 = vadd.xlane.f32.xlu0 %v21422_v10  ;;  %657 = vadd.xlane.f32.xlu1 %v21425_v11 }
 0x10c   : > { %659 = vadd.xlane.f32.xlu0 %v21430_v12  ;;  %661 = vadd.xlane.f32.xlu1 %v21433_v13 }
 0x110   : > { %663 = vadd.xlane.f32.xlu0 %v21438_v14  ;;  %665 = vadd.xlane.f32.xlu1 %v21441_v15 }
 0x181   : > { %v636_v28 = vpop.xlane.xlu0 %635  ;;  %v640_v29 = vpop.xlane.xlu1 %639 }
 0x182   : > { %v668_v30 = vmul.f32 0.0078125, %v636_v28  ;;  %v670_v31 = vmul.f32 0.0078125, %v640_v29  ;;  %v881_v28 = vld [vmem:[#allocation7 + $0x38] sm:$0xff]  ;;  %v1041_v29 = vld [vmem:[#allocation8 + $0x30] sm:$0xff] }
 0x184   : > { %v21445_v32 = vsub.f32 %v617_v0, %v668_v30  ;;  %v21447_v33 = vsub.f32 %v619_v1, %v670_v31 }
 0x185   : > { %v638_v34 = vpop.xlane.xlu0 %637  ;;  %v642_v35 = vpop.xlane.xlu1 %641 }
 0x186   : > { %v669_v36 = vmul.f32 0.0078125, %v638_v34  ;;  %v700_v37 = vmul.f32 %v21445_v32, %v21445_v32  ;;  %v671_v38 = vmul.f32 0.0078125, %v642_v35  ;;  %v702_v39 = vmul.f32 %v21447_v33, %v21447_v33  ;;  %v1042_v34 = vld [vmem:[#allocation8 + $0x38] sm:$0xff] }
 0x188   : > { %716 = vadd.xlane.f32.xlu0 %v700_v37  ;;  %v21453_v40 = vsub.f32 %v618_v2, %v669_v36  ;;  %v21455_v41 = vsub.f32 %v620_v3, %v671_v38  ;;  %v18233_v37 = vpack.c.bf16 %v1042_v34, %v1041_v29 }
 0x189   : > { %v644_v42 = vpop.xlane.xlu0 %643  ;;  %v646_v43 = vpop.xlane.xlu1 %645 }
 0x18a   : > { %v672_v44 = vmul.f32 0.0078125, %v644_v42  ;;  %v701_v45 = vmul.f32 %v21453_v40, %v21453_v40  ;;  %v673_v46 = vmul.f32 0.0078125, %v646_v43  ;;  %v703_v47 = vmul.f32 %v21455_v41, %v21455_v41  ;;  %18234 = vmatprep.subr.bf16.mxu1 %v18233_v37 }
 0x18b   : > { %18236 = vmatpush3.bf16.msra.mxu1 %v18233_v37 }
 0x18c   : > { %720 = vadd.xlane.f32.xlu0 %v702_v39  ;;  %718 = vadd.xlane.f32.xlu1 %v701_v45  ;;  %v21462_v48 = vsub.f32 %v21398_v4, %v672_v44  ;;  %v21465_v49 = vsub.f32 %v21401_v5, %v673_v46  ;;  %v883_v44 = vld [vmem:[#allocation7 + $0x48] sm:$0xff] }
 0x18d   : > { %v648_v50 = vpop.xlane.xlu0 %647  ;;  %v650_v51 = vpop.xlane.xlu1 %649 }
 0x18e   : > { %v674_v52 = vmul.f32 0.0078125, %v648_v50  ;;  %v704_v53 = vmul.f32 %v21462_v48, %v21462_v48  ;;  %v675_v54 = vmul.f32 0.0078125, %v650_v51  ;;  %v705_v55 = vmul.f32 %v21465_v49, %v21465_v49  ;;  %v1044_v50 = vld [vmem:[#allocation8 + $0x48] sm:$0xff] }
 0x190   : > { %722 = vadd.xlane.f32.xlu1 %v703_v47  ;;  %724 = vadd.xlane.f32.xlu0 %v704_v53  ;;  %v21472_v56 = vsub.f32 %v21406_v6, %v674_v52  ;;  %v21475_v57 = vsub.f32 %v21409_v7, %v675_v54  ;;  %v878_v7 = vld [vmem:[#allocation7 + $0x20] sm:$0xff]  ;;  %v884_v53 = vld [vmem:[#allocation7 + $0x50] sm:$0xff]  ;;  %v885_v54 = vld [vmem:[#allocation7 + $0x58] sm:$0xff] }
 0x191   : > { %v652_v58 = vpop.xlane.xlu0 %651  ;;  %v654_v59 = vpop.xlane.xlu1 %653  ;;  %v18197_v19 = vpack.c.bf16 %v879_v16, %v878_v7  ;;  %v1050_v16 = vld [vmem:[#allocation8 + $0x78] sm:$0xff] }
 0x192   : > { %v676_v60 = vmul.f32 0.0078125, %v652_v58  ;;  %v706_v61 = vmul.f32 %v21472_v56, %v21472_v56  ;;  %v677_v62 = vmul.f32 0.0078125, %v654_v59  ;;  %v707_v63 = vmul.f32 %v21475_v57, %v21475_v57  ;;  %v1046_v58 = vld [vmem:[#allocation8 + $0x58] sm:$0xff] }
 0x193   : > { %18198 = vmatprep.subr.bf16.mxu0 %v18197_v19 }
 0x194   : > { %726 = vadd.xlane.f32.xlu1 %v705_v55  ;;  %728 = vadd.xlane.f32.xlu0 %v706_v61  ;;  %v21482_v0 = vsub.f32 %v21414_v8, %v676_v60  ;;  %v21485_v1 = vsub.f32 %v21417_v9, %v677_v62  ;;  %v1045_v55 = vld [vmem:[#allocation8 + $0x50] sm:$0xff]  ;;  %v886_v60 = vld [vmem:[#allocation7 + $0x60] sm:$0xff]  ;;  %v887_v61 = vld [vmem:[#allocation7 + $0x68] sm:$0xff] }
 0x195   : > { %v656_v2 = vpop.xlane.xlu0 %655  ;;  %v658_v3 = vpop.xlane.xlu1 %657  ;;  %18200 = vmatpush3.bf16.msra.mxu0 %v18197_v19  ;;  %v18241_v59 = vpack.c.bf16 %v1046_v58, %v1045_v55  ;;  %v1047_v62 = vld [vmem:[#allocation8 + $0x60] sm:$0xff]  ;;  %v1197_v19 = vld [vmem:[#allocation10 + $0x8] sm:$0xff]  ;;  %v21534_v55 = vld [vmem:[%s26627_s30] ss:$0 sm:$0xff] }
 0x196   : > { %v678_v4 = vmul.f32 0.0078125, %v656_v2  ;;  %v708_v5 = vmul.f32 %v21482_v0, %v21482_v0  ;;  %v679_v6 = vmul.f32 0.0078125, %v658_v3  ;;  %v709_v18 = vmul.f32 %v21485_v1, %v21485_v1  ;;  %v1048_v2 = vld [vmem:[#allocation8 + $0x68] sm:$0xff] }
 0x197   : > { %v18245_v3 = vpack.c.bf16 %v1048_v2, %v1047_v62 }
 0x198   : > { %730 = vadd.xlane.f32.xlu1 %v707_v63  ;;  %732 = vadd.xlane.f32.xlu0 %v708_v5  ;;  %v21492_v8 = vsub.f32 %v21422_v10, %v678_v4  ;;  %v21495_v9 = vsub.f32 %v21425_v11, %v679_v6  ;;  %v880_v10 = vld [vmem:[#allocation7 + $0x30] sm:$0xff]  ;;  %v18213_v63 = vpack.c.bf16 %v887_v61, %v886_v60  ;;  %v889_v5 = vld [vmem:[#allocation7 + $0x78] sm:$0xff] }
 0x199   : > { %v660_v22 = vpop.xlane.xlu0 %659  ;;  %v662_v23 = vpop.xlane.xlu1 %661  ;;  %v18201_v31 = vpack.c.bf16 %v881_v28, %v880_v10  ;;  %v888_v4 = vld [vmem:[#allocation7 + $0x70] sm:$0xff] }
 0x19a   : > { %v680_v24 = vmul.f32 0.0078125, %v660_v22  ;;  %v710_v25 = vmul.f32 %v21492_v8, %v21492_v8  ;;  %v681_v26 = vmul.f32 0.0078125, %v662_v23  ;;  %v711_v27 = vmul.f32 %v21495_v9, %v21495_v9  ;;  %v1049_v6 = vld [vmem:[#allocation8 + $0x70] sm:$0xff] }
 0x19b   : > { %18202 = vmatprep.subr.bf16.mxu0 %v18201_v31  ;;  %v18217_v7 = vpack.c.bf16 %v889_v5, %v888_v4  ;;  %v18249_v17 = vpack.c.bf16 %v1050_v16, %v1049_v6  ;;  %v21537_v60 = vld [vmem:[#allocation5] sm:$0xff] }
 0x19c   : > { %734 = vadd.xlane.f32.xlu1 %v709_v18  ;;  %736 = vadd.xlane.f32.xlu0 %v710_v25  ;;  %v21502_v11 = vsub.f32 %v21430_v12, %v680_v24  ;;  %v21505_v30 = vsub.f32 %v21433_v13, %v681_v26  ;;  %v882_v12 = vld [vmem:[#allocation7 + $0x40] sm:$0xff] }
 0x19d   : > { %v664_v35 = vpop.xlane.xlu0 %663  ;;  %v666_v36 = vpop.xlane.xlu1 %665  ;;  %18204 = vmatpush3.bf16.msra.mxu0 %v18201_v31  ;;  %v1043_v13 = vld [vmem:[#allocation8 + $0x40] sm:$0xff]  ;;  %v18205_v47 = vpack.c.bf16 %v883_v44, %v882_v12 }
 0x19e   : > { %v682_v38 = vmul.f32 0.0078125, %v664_v35  ;;  %v712_v39 = vmul.f32 %v21502_v11, %v21502_v11  ;;  %v683_v42 = vmul.f32 0.0078125, %v666_v36  ;;  %v713_v43 = vmul.f32 %v21505_v30, %v21505_v30  ;;  %v1196_v18 = vld [vmem:[#allocation10] sm:$0xff] }
 0x19f   : > { %v18237_v51 = vpack.c.bf16 %v1044_v50, %v1043_v13  ;;  %18206 = vmatprep.subr.bf16.mxu0 %v18205_v47  ;;  %v21521_v20 = vpack.c.bf16 %v1197_v19, %v1196_v18  ;;  %v21547_v19 = vld [vmem:[#allocation5 + $0x8] sm:$0xff] }
 0x1a0   : > { %738 = vadd.xlane.f32.xlu1 %v711_v27  ;;  %740 = vadd.xlane.f32.xlu0 %v712_v39  ;;  %v21512_v45 = vsub.f32 %v21438_v14, %v682_v38  ;;  %v21515_v46 = vsub.f32 %v21441_v15, %v683_v42  ;;  %v18209_v15 = vpack.c.bf16 %v885_v54, %v884_v53 }
 0x1a1   : > { %18238 = vmatprep.subr.bf16.mxu1 %v18237_v51  ;;  %18208 = vmatpush3.bf16.msra.mxu0 %v18205_v47  ;;  %v21528_v47 = vld [vmem:[%s26306_s2] ss:$0 sm:$0xff] }
 0x1a2   : > { %v714_v52 = vmul.f32 %v21512_v45, %v21512_v45  ;;  %v715_v14 = vmul.f32 %v21515_v46, %v21515_v46  ;;  %18240 = vmatpush3.bf16.msra.mxu1 %v18237_v51  ;;  %18210 = vmatprep.subr.bf16.mxu0 %v18209_v15 }
 0x1a3   : > { %18242 = vmatprep.subr.bf16.mxu1 %v18241_v59 }
 0x1a4   : > { %742 = vadd.xlane.f32.xlu1 %v713_v43  ;;  %744 = vadd.xlane.f32.xlu0 %v714_v52 }
 0x1a5   : > { %18212 = vmatpush3.bf16.msra.mxu0 %v18209_v15 }
 0x1a6   : > { %18244 = vmatpush3.bf16.msra.mxu1 %v18241_v59  ;;  %18214 = vmatprep.subr.bf16.mxu0 %v18213_v63 }
 0x1a7   : > { %18246 = vmatprep.subr.bf16.mxu1 %v18245_v3 }
 0x1a8   : > { %746 = vadd.xlane.f32.xlu1 %v715_v14 }
 0x1a9   : > { %18216 = vmatpush3.bf16.msra.mxu0 %v18213_v63 }
 0x1aa   : > { %18248 = vmatpush3.bf16.msra.mxu1 %v18245_v3  ;;  %18218 = vmatprep.subr.bf16.mxu0 %v18217_v7 }
 0x1ab   : > { %18250 = vmatprep.subr.bf16.mxu1 %v18249_v17 }
 0x1ad   : > { %18220 = vmatpush3.bf16.msra.mxu0 %v18217_v7 }
 0x1ae   : > { %18252 = vmatpush3.bf16.msra.mxu1 %v18249_v17  ;;  %18254 = vmatprep.subr.bf16.mxu0 %v21521_v20 }
 0x1af   : > { %19021 = vmatprep.subr.bf16.mxu1 %v21521_v20 }
 0x215   : > { %v717_v21 = vpop.xlane.xlu0 %716 }
 0x216   : > { %v748_v22 = vmul.f32 0.0078125, %v717_v21 }
 0x218   : > { %v764_v23 = vadd.f32 1e-05, %v748_v22 }
 0x219   : > { %v719_v24 = vpop.xlane.xlu1 %718  ;;  %v721_v25 = vpop.xlane.xlu0 %720 }
 0x21a   : > { %20008 = vrsqrt.f32 %v764_v23  ;;  %v749_v26 = vmul.f32 0.0078125, %v719_v24  ;;  %v750_v27 = vmul.f32 0.0078125, %v721_v25  ;;  %v1198_v25 = vld [vmem:[#allocation10 + $0x10] sm:$0xff] }
 0x21c   : > { %v765_v10 = vadd.f32 1e-05, %v749_v26  ;;  %v766_v28 = vadd.f32 1e-05, %v750_v27  ;;  %v1199_v26 = vld [vmem:[#allocation10 + $0x18] sm:$0xff] }
 0x21d   : > { %v723_v29 = vpop.xlane.xlu1 %722  ;;  %v725_v31 = vpop.xlane.xlu0 %724 }
 0x21e   : > { %20010 = vrsqrt.f32 %v765_v10  ;;  %v751_v34 = vmul.f32 0.0078125, %v723_v29  ;;  %v752_v35 = vmul.f32 0.0078125, %v725_v31 }
 0x21f   : > { %20012 = vrsqrt.f32 %v766_v28 }
 0x220   : > { %v767_v36 = vadd.f32 1e-05, %v751_v34  ;;  %v768_v37 = vadd.f32 1e-05, %v752_v35 }
 0x221   : > { %v727_v38 = vpop.xlane.xlu1 %726  ;;  %v729_v39 = vpop.xlane.xlu0 %728 }
 0x222   : > { %20014 = vrsqrt.f32 %v767_v36  ;;  %v753_v42 = vmul.f32 0.0078125, %v727_v38  ;;  %v754_v43 = vmul.f32 0.0078125, %v729_v39  ;;  %v18257_v38 = vpack.c.bf16 %v1199_v26, %v1198_v25 }
 0x223   : > { %20016 = vrsqrt.f32 %v768_v37 }
 0x224   : > { %v20009_v12 = vpop.eup %20008  ;;  %v769_v44 = vadd.f32 1e-05, %v753_v42  ;;  %v770_v13 = vadd.f32 1e-05, %v754_v43 }
 0x225   : > { %v731_v50 = vpop.xlane.xlu1 %730  ;;  %v733_v51 = vpop.xlane.xlu0 %732  ;;  %v796_v52 = vmul.f32 %v20009_v12, %v21445_v32 }
 0x226   : > { %20018 = vrsqrt.f32 %v769_v44  ;;  %v755_v53 = vmul.f32 0.0078125, %v731_v50  ;;  %v756_v54 = vmul.f32 0.0078125, %v733_v51  ;;  %v1201_v50 = vld [vmem:[#allocation10 + $0x28] sm:$0xff] }
 0x227   : > { %20020 = vrsqrt.f32 %v770_v13  ;;  %v818_v14 = vmul.f32 %v21528_v47, %v796_v52 }
 0x228   : > { %v20011_v15 = vpop.eup %20010  ;;  %v771_v58 = vadd.f32 1e-05, %v755_v53  ;;  %v772_v59 = vadd.f32 1e-05, %v756_v54 }
 0x229   : > { %v20013_v61 = vpop.eup %20012  ;;  %v735_v62 = vpop.xlane.xlu1 %734  ;;  %v21540_v32 = vadd.f32 %v21534_v55, %v818_v14  ;;  %v797_v2 = vmul.f32 %v20011_v15, %v21453_v40 }
 0x22a   : > { %v737_v63 = vpop.xlane.xlu0 %736  ;;  %20022 = vrsqrt.f32 %v771_v58  ;;  %v757_v3 = vmul.f32 0.0078125, %v735_v62  ;;  %v798_v5 = vmul.f32 %v20013_v61, %v21447_v33 }
 0x22b   : > { %v758_v4 = vmul.f32 0.0078125, %v737_v63  ;;  %20024 = vrsqrt.f32 %v772_v59  ;;  %v858_v6 = vadd.f32 %v21537_v60, %v21540_v32  ;;  %v819_v7 = vmul.f32 %v21528_v47, %v797_v2 }
 0x22c   : > { %v20015_v16 = vpop.eup %20014  ;;  %v773_v17 = vadd.f32 1e-05, %v757_v3  ;;  %v820_v21 = vmul.f32 %v21528_v47, %v798_v5 }
 0x22d   : > { %v774_v18 = vadd.f32 1e-05, %v758_v4  ;;  %v20017_v22 = vpop.eup %20016  ;;  %v739_v40 = vpop.xlane.xlu1 %738  ;;  %17101 = vmatprep.mubr.f32.mxu0 %v858_v6  ;;  %17157 = vmatprep.mubr.f32.mxu1 %v858_v6  ;;  %v21551_v33 = vadd.f32 %v21534_v55, %v819_v7  ;;  %v799_v24 = vmul.f32 %v20015_v16, %v21455_v41 }
 0x22e   : > { %v741_v23 = vpop.xlane.xlu0 %740  ;;  %20026 = vrsqrt.f32 %v773_v17  ;;  %v759_v27 = vmul.f32 0.0078125, %v739_v40  ;;  %v21555_v28 = vadd.f32 %v21534_v55, %v820_v21  ;;  %v800_v34 = vmul.f32 %v20017_v22, %v21462_v48  ;;  %v1200_v48 = vld [vmem:[#allocation10 + $0x20] sm:$0xff]  ;;  %v1202_v17 = vld [vmem:[#allocation10 + $0x30] sm:$0xff] }
 0x22f   : > { %v760_v10 = vmul.f32 0.0078125, %v741_v23  ;;  %20028 = vrsqrt.f32 %v774_v18  ;;  %v859_v29 = vadd.f32 %v21547_v19, %v21551_v33  ;;  %v821_v31 = vmul.f32 %v21528_v47, %v799_v24  ;;  %v1203_v18 = vld [vmem:[#allocation10 + $0x38] sm:$0xff] }
 0x230   : > { %v20019_v35 = vpop.eup %20018  ;;  %v775_v36 = vadd.f32 1e-05, %v759_v27  ;;  %v860_v41 = vadd.f32 %v21537_v60, %v21555_v28  ;;  %v822_v44 = vmul.f32 %v21528_v47, %v800_v34  ;;  %v18261_v61 = vpack.c.bf16 %v1201_v50, %v1200_v48  ;;  %v1205_v34 = vld [vmem:[#allocation10 + $0x48] sm:$0xff]  ;;  %v1207_v48 = vld [vmem:[#allocation10 + $0x58] sm:$0xff] }
 0x231   : > { %v776_v37 = vadd.f32 1e-05, %v760_v10  ;;  %v20021_v39 = vpop.eup %20020  ;;  %v743_v42 = vpop.xlane.xlu1 %742  ;;  %17102 = vmatmul.mubr.f32.vlgmr.msra.gmra.mrb[0].mxu0 %v859_v29  ;;  %17158 = vmatmul.mubr.f32.vlgmr.msra.gmra.mrb[0].mxu1 %v859_v29  ;;  %v21564_v12 = vadd.f32 %v21534_v55, %v821_v31  ;;  %v801_v13 = vmul.f32 %v20019_v35, %v21465_v49  ;;  %v18265_v25 = vpack.c.bf16 %v1203_v18, %v1202_v17  ;;  %v1204_v31 = vld [vmem:[#allocation10 + $0x40] sm:$0xff]  ;;  %v1211_v17 = vld [vmem:[#allocation10 + $0x78] sm:$0xff] }
 0x232   : > { %v745_v43 = vpop.xlane.xlu0 %744  ;;  %20030 = vrsqrt.f32 %v775_v36  ;;  %v761_v51 = vmul.f32 0.0078125, %v743_v42  ;;  %17104 = vmatprep.mubr.f32.mxu0 %v860_v41  ;;  %17160 = vmatprep.mubr.f32.mxu1 %v860_v41  ;;  %v802_v53 = vmul.f32 %v20021_v39, %v21472_v56  ;;  %v21574_v14 = vadd.f32 %v21534_v55, %v822_v44 }
 0x233   : > { %v762_v52 = vmul.f32 0.0078125, %v745_v43  ;;  %20032 = vrsqrt.f32 %v776_v37  ;;  %18256 = vmatpush3.bf16.msra.mxu0 %v21521_v20  ;;  %19029 = vmatpush3.bf16.msra.mxu1 %v21521_v20  ;;  %v861_v54 = vadd.f32 %v21547_v19, %v21564_v12  ;;  %v823_v49 = vmul.f32 %v21528_v47, %v801_v13  ;;  %v1206_v13 = vld [vmem:[#allocation10 + $0x50] sm:$0xff] }
 0x234   : > { %v20023_v15 = vpop.eup %20022  ;;  %v777_v58 = vadd.f32 1e-05, %v761_v51  ;;  %18258 = vmatprep.subr.bf16.mxu0 %v18257_v38  ;;  %19022 = vmatprep.subr.bf16.mxu1 %v18257_v38  ;;  %v824_v56 = vmul.f32 %v21528_v47, %v802_v53  ;;  %v862_v20 = vadd.f32 %v21537_v60, %v21574_v14 }
 0x235   : > { %v778_v59 = vadd.f32 1e-05, %v762_v52  ;;  %v20025_v62 = vpop.eup %20024  ;;  %v747_v63 = vpop.xlane.xlu1 %746  ;;  %17105 = vmatmul.mubr.f32.gmra.mrb[2].mxu0 %v861_v54  ;;  %17161 = vmatmul.mubr.f32.gmra.mrb[2].mxu1 %v861_v54  ;;  %v21581_v2 = vadd.f32 %v21534_v55, %v823_v49  ;;  %v803_v3 = vmul.f32 %v20023_v15, %v21475_v57  ;;  %v18273_v54 = vpack.c.bf16 %v1207_v48, %v1206_v13 }
 0x236   : > { %20034 = vrsqrt.f32 %v777_v58  ;;  %v763_v4 = vmul.f32 0.0078125, %v747_v63  ;;  %v21585_v5 = vadd.f32 %v21534_v55, %v824_v56  ;;  %v804_v6 = vmul.f32 %v20025_v62, %v21482_v0  ;;  %17107 = vmatprep.mubr.f32.mxu0 %v862_v20  ;;  %17163 = vmatprep.mubr.f32.mxu1 %v862_v20  ;;  %v1209_v56 = vld [vmem:[#allocation10 + $0x68] sm:$0xff] }
 0x237   : > { %20036 = vrsqrt.f32 %v778_v59  ;;  %v863_v7 = vadd.f32 %v21547_v19, %v21581_v2  ;;  %v825_v16 = vmul.f32 %v21528_v47, %v803_v3  ;;  %18260 = vmatpush3.bf16.msra.mxu0 %v18257_v38  ;;  %19030 = vmatpush3.bf16.msra.mxu1 %v18257_v38  ;;  %v18269_v38 = vpack.c.bf16 %v1205_v34, %v1204_v31 }
 0x238   : > { %v20027_v21 = vpop.eup %20026  ;;  %v779_v22 = vadd.f32 1e-05, %v763_v4  ;;  %v864_v57 = vadd.f32 %v21537_v60, %v21585_v5  ;;  %v826_v40 = vmul.f32 %v21528_v47, %v804_v6  ;;  %18262 = vmatprep.subr.bf16.mxu0 %v18261_v61  ;;  %19023 = vmatprep.subr.bf16.mxu1 %v18261_v61 }
 0x239   : > { %v20029_v0 = vpop.eup %20028  ;;  %17108 = vmatmul.mubr.f32.gmra.mrb[4].mxu0 %v863_v7  ;;  %17164 = vmatmul.mubr.f32.gmra.mrb[4].mxu1 %v863_v7  ;;  %v21595_v23 = vadd.f32 %v21534_v55, %v825_v16  ;;  %v805_v24 = vmul.f32 %v20027_v21, %v21485_v1  ;;  %v1210_v16 = vld [vmem:[#allocation10 + $0x70] sm:$0xff] }
 0x23a   : > { %20038 = vrsqrt.f32 %v779_v22  ;;  %v21599_v26 = vadd.f32 %v21534_v55, %v826_v40  ;;  %v806_v27 = vmul.f32 %v20029_v0, %v21492_v8  ;;  %17110 = vmatprep.mubr.f32.mxu0 %v864_v57  ;;  %17166 = vmatprep.mubr.f32.mxu1 %v864_v57  ;;  %v18281_v21 = vpack.c.bf16 %v1211_v17, %v1210_v16 }
 0x23b   : > { %v865_v10 = vadd.f32 %v21547_v19, %v21595_v23  ;;  %v827_v29 = vmul.f32 %v21528_v47, %v805_v24  ;;  %18264 = vmatpush3.bf16.msra.mxu0 %v18261_v61  ;;  %19031 = vmatpush3.bf16.msra.mxu1 %v18261_v61  ;;  %v1208_v61 = vld [vmem:[#allocation10 + $0x60] sm:$0xff] }
 0x23c   : > { %v20031_v35 = vpop.eup %20030  ;;  %v866_v1 = vadd.f32 %v21537_v60, %v21599_v26  ;;  %v828_v36 = vmul.f32 %v21528_v47, %v806_v27  ;;  %18266 = vmatprep.subr.bf16.mxu0 %v18265_v25  ;;  %19024 = vmatprep.subr.bf16.mxu1 %v18265_v25  ;;  %v18277_v3 = vpack.c.bf16 %v1209_v56, %v1208_v61 }
 0x23d   : > { %v20033_v37 = vpop.eup %20032  ;;  %17111 = vmatmul.mubr.f32.gmra.mrb[6].mxu0 %v865_v10  ;;  %17167 = vmatmul.mubr.f32.gmra.mrb[6].mxu1 %v865_v10  ;;  %v21609_v8 = vadd.f32 %v21534_v55, %v827_v29  ;;  %v807_v41 = vmul.f32 %v20031_v35, %v21495_v9 }
 0x23e   : > { %v21613_v39 = vadd.f32 %v21534_v55, %v828_v36  ;;  %v808_v42 = vmul.f32 %v20033_v37, %v21502_v11  ;;  %17113 = vmatprep.mubr.f32.mxu0 %v866_v1  ;;  %17169 = vmatprep.mubr.f32.mxu1 %v866_v1 }
 0x23f   : > { %v867_v43 = vadd.f32 %v21547_v19, %v21609_v8  ;;  %v829_v44 = vmul.f32 %v21528_v47, %v807_v41  ;;  %18268 = vmatpush3.bf16.msra.mxu0 %v18265_v25  ;;  %19032 = vmatpush3.bf16.msra.mxu1 %v18265_v25 }
 0x240   : > { %v20035_v50 = vpop.eup %20034  ;;  %v868_v9 = vadd.f32 %v21537_v60, %v21613_v39  ;;  %v830_v51 = vmul.f32 %v21528_v47, %v808_v42  ;;  %18270 = vmatprep.subr.bf16.mxu0 %v18269_v38  ;;  %19025 = vmatprep.subr.bf16.mxu1 %v18269_v38 }
 0x241   : > { %v20037_v52 = vpop.eup %20036  ;;  %17114 = vmatmul.mubr.f32.gmra.mrb[8].mxu0 %v867_v43  ;;  %17170 = vmatmul.mubr.f32.gmra.mrb[8].mxu1 %v867_v43  ;;  %v851_v11 = vadd.f32 %v21534_v55, %v829_v44  ;;  %v809_v53 = vmul.f32 %v20035_v50, %v21505_v30 }
 0x242   : > { %v852_v49 = vadd.f32 %v21534_v55, %v830_v51  ;;  %v810_v15 = vmul.f32 %v20037_v52, %v21512_v45  ;;  %17116 = vmatprep.mubr.f32.mxu0 %v868_v9  ;;  %17172 = vmatprep.mubr.f32.mxu1 %v868_v9 }
 0x243   : > { %v869_v58 = vadd.f32 %v21547_v19, %v851_v11  ;;  %v831_v59 = vmul.f32 %v21528_v47, %v809_v53  ;;  %18272 = vmatpush3.bf16.msra.mxu0 %v18269_v38  ;;  %19033 = vmatpush3.bf16.msra.mxu1 %v18269_v38 }
 0x244   : > { %v20039_v62 = vpop.eup %20038  ;;  %v870_v30 = vadd.f32 %v21537_v60, %v852_v49  ;;  %v832_v63 = vmul.f32 %v21528_v47, %v810_v15  ;;  %18274 = vmatprep.subr.bf16.mxu0 %v18273_v54  ;;  %19026 = vmatprep.subr.bf16.mxu1 %v18273_v54 }
 0x245   : > { %17117 = vmatmul.mubr.f32.gmra.mrb[10].mxu0 %v869_v58  ;;  %17173 = vmatmul.mubr.f32.gmra.mrb[10].mxu1 %v869_v58  ;;  %v853_v20 = vadd.f32 %v21534_v55, %v831_v59  ;;  %v811_v45 = vmul.f32 %v20039_v62, %v21515_v46 }
 0x246   : > { %v854_v4 = vadd.f32 %v21534_v55, %v832_v63  ;;  %17119 = vmatprep.mubr.f32.mxu0 %v870_v30  ;;  %17175 = vmatprep.mubr.f32.mxu1 %v870_v30 }
 0x247   : > { %v871_v6 = vadd.f32 %v21547_v19, %v853_v20  ;;  %v833_v7 = vmul.f32 %v21528_v47, %v811_v45  ;;  %18276 = vmatpush3.bf16.msra.mxu0 %v18273_v54  ;;  %19034 = vmatpush3.bf16.msra.mxu1 %v18273_v54 }
 0x248   : > { %v872_v18 = vadd.f32 %v21537_v60, %v854_v4  ;;  %18278 = vmatprep.subr.bf16.mxu0 %v18277_v3  ;;  %19027 = vmatprep.subr.bf16.mxu1 %v18277_v3 }
 0x249   : > { %17120 = vmatmul.mubr.f32.gmra.mrb[12].mxu0 %v871_v6  ;;  %17176 = vmatmul.mubr.f32.gmra.mrb[12].mxu1 %v871_v6  ;;  %v855_v46 = vadd.f32 %v21534_v55, %v833_v7 }
 0x24a   : > { %17122 = vmatprep.mubr.f32.mxu0 %v872_v18  ;;  %17178 = vmatprep.mubr.f32.mxu1 %v872_v18 }
 0x24b   : > { %v873_v22 = vadd.f32 %v21547_v19, %v855_v46  ;;  %18280 = vmatpush3.bf16.msra.mxu0 %v18277_v3  ;;  %19035 = vmatpush3.bf16.msra.mxu1 %v18277_v3 }
 0x24c   : > { %18282 = vmatprep.subr.bf16.mxu0 %v18281_v21  ;;  %19028 = vmatprep.subr.bf16.mxu1 %v18281_v21 }
 0x24d   : > { %17123 = vmatmul.mubr.f32.gmra.mrb[14].mxu0 %v873_v22  ;;  %17179 = vmatmul.mubr.f32.gmra.mrb[14].mxu1 %v873_v22 }
 0x24e   : > { %17213 = vmatprep.mubr.f32.mxu0 %v21540_v32  ;;  %17225 = vmatprep.mubr.f32.mxu1 %v21599_v26 }
 0x24f   : > { %18284 = vmatpush3.bf16.msra.mxu0 %v18281_v21  ;;  %19036 = vmatpush3.bf16.msra.mxu1 %v18281_v21 }
 0x252   : > { %17214 = vmatmul.mubr.f32.vlgmr.msra.gmra.mrb[16].mxu0 %v21551_v33  ;;  %17226 = vmatmul.mubr.f32.vlgmr.msra.gmra.mrb[16].mxu1 %v21609_v8 }
 0x253   : > { %17216 = vmatprep.mubr.f32.mxu0 %v21555_v28  ;;  %17228 = vmatprep.mubr.f32.mxu1 %v21613_v39 }
 0x256   : > { %17217 = vmatmul.mubr.f32.gmra.mrb[18].mxu0 %v21564_v12  ;;  %17229 = vmatmul.mubr.f32.gmra.mrb[18].mxu1 %v851_v11 }
 0x257   : > { %17219 = vmatprep.mubr.f32.mxu0 %v21574_v14  ;;  %17231 = vmatprep.mubr.f32.mxu1 %v852_v49 }
 0x25a   : > { %17220 = vmatmul.mubr.f32.gmra.mrb[20].mxu0 %v21581_v2  ;;  %17232 = vmatmul.mubr.f32.gmra.mrb[20].mxu1 %v853_v20 }
 0x25b   : > { %17222 = vmatprep.mubr.f32.mxu0 %v21585_v5  ;;  %17234 = vmatprep.mubr.f32.mxu1 %v854_v4 }
 0x25e   : > { %17223 = vmatmul.mubr.f32.gmra.mrb[22].mxu0 %v21595_v23  ;;  %17235 = vmatmul.mubr.f32.gmra.mrb[22].mxu1 %v855_v46 }
 0x304   : > { %v21649_v47 = vpop.f32.mrb[0].mxu0  ;;  %v17159_v55 = vpop.f32.mrb[0].mxu1 }
 0x305   : > { %v1117_v60 = vpop.f32.mrb[1].mxu1  ;;  %1375 = vrot.lane.b32.xlu0 %v21649_v47, %s20986_s1  ;;  %v21653_v32 = vpop.f32.mrb[1].mxu0 }
 0x306   : > { %1373 = vrot.lane.b32.xlu1 %v21653_v32, %s20986_s1  ;;  %17241 = vmatprep.mubr.msk.f32.mxu1 %vm2189_vm0, %v21653_v32  ;;  %v18285_v33 = vpack.c.bf16 %v17159_v55, %v1117_v60  ;;  %v21665_v28 = vpack.i.bf16 %v17159_v55, %v1117_v60 }
 0x308   : > { %v21667_v12 = vpop.f32.mrb[2].mxu0  ;;  %v17162_v14 = vpop.f32.mrb[2].mxu1  ;;  %18287 = vmatprep.subr.msk.bf16.mxu1 %vm21657_vm1, %v18285_v33 }
 0x309   : > { %1407 = vrot.lane.b32.xlu0 %v21649_v47, %s20987_s14  ;;  %v21673_v2 = vpop.f32.mrb[3].mxu0  ;;  %v1127_v5 = vpop.f32.mrb[3].mxu1  ;;  %18290 = vmatpush3.bf16.xpose.msk.msra.mxu1 %vm21657_vm1, %v18285_v33 }
 0x30a   : > { %1379 = vrot.lane.b32.xlu1 %v21667_v12, %s20986_s1  ;;  %v18291_v57 = vpack.c.bf16 %v17162_v14, %v1127_v5  ;;  %v21679_v40 = vpack.i.bf16 %v17162_v14, %v1127_v5 }
 0x30c   : > { %v21681_v0 = vpop.f32.mrb[4].mxu0  ;;  %v17165_v23 = vpop.f32.mrb[4].mxu1  ;;  %18293 = vmatprep.subr.msk.bf16.mxu1 %vm21657_vm1, %v18291_v57 }
 0x30d   : > { %1439 = vrot.lane.b32.xlu0 %v21649_v47, %s20988_s27  ;;  %v21687_v24 = vpop.f32.mrb[5].mxu0  ;;  %v1137_v25 = vpop.f32.mrb[5].mxu1 }
 0x30e   : > { %1411 = vrot.lane.b32.xlu1 %v21667_v12, %s20987_s14  ;;  %v18297_v26 = vpack.c.bf16 %v17165_v23, %v1137_v25  ;;  %v21691_v27 = vpack.i.bf16 %v17165_v23, %v1137_v25 }
 0x310   : > { %v21693_v10 = vpop.f32.mrb[6].mxu0  ;;  %v17168_v29 = vpop.f32.mrb[6].mxu1  ;;  %17242 = vmatmul.mubr.msk.f32.vlgmr.msra.gmra.mrb[24].mxu1 %vm2189_vm0, %v21649_v47 }
 0x311   : > { %1471 = vrot.lane.b32.xlu0 %v21649_v47, %s20989_s3  ;;  %v21699_v31 = vpop.f32.mrb[7].mxu0  ;;  %v1147_v34 = vpop.f32.mrb[7].mxu1  ;;  %18296 = vmatpush3.bf16.xpose.msk.msra.mxu1 %vm21657_vm1, %v18291_v57 }
 0x312   : > { %17248 = vmatprep.mubr.msk.f32.mxu1 %vm2189_vm0, %v21673_v2  ;;  %1443 = vrot.lane.b32.xlu1 %v21667_v12, %s20988_s27  ;;  %v18303_v35 = vpack.c.bf16 %v17168_v29, %v1147_v34  ;;  %v21707_v1 = vpack.i.bf16 %v17168_v29, %v1147_v34 }
 0x313   : > { %18299 = vmatprep.subr.msk.bf16.mxu1 %vm21657_vm1, %v18297_v26 }
 0x314   : > { %v21711_v36 = vpop.f32.mrb[8].mxu0  ;;  %v17171_v37 = vpop.f32.mrb[8].mxu1 }
 0x315   : > { %1503 = vrot.lane.b32.xlu0 %v21649_v47, %s20990_s12  ;;  %v21715_v8 = vpop.f32.mrb[9].mxu0  ;;  %v1157_v41 = vpop.f32.mrb[9].mxu1 }
 0x316   : > { %1475 = vrot.lane.b32.xlu1 %v21667_v12, %s20989_s3  ;;  %17269 = vmatprep.mubr.msk.f32.mxu0 %vm2189_vm0, %v21715_v8  ;;  %v18309_v38 = vpack.c.bf16 %v17171_v37, %v1157_v41  ;;  %v21721_v39 = vpack.i.bf16 %v17171_v37, %v1157_v41 }
 0x318   : > { %v21723_v42 = vpop.f32.mrb[10].mxu0  ;;  %v17174_v43 = vpop.f32.mrb[10].mxu1  ;;  %17249 = vmatmul.mubr.msk.f32.vlgmr.msra.gmra.mrb[26].mxu1 %vm2189_vm0, %v21667_v12  ;;  %18311 = vmatprep.subr.msk.bf16.mxu0 %vm21657_vm1, %v18309_v38 }
 0x319   : > { %1535 = vrot.lane.b32.xlu0 %v21649_v47, %s20991_s22  ;;  %v21731_v44 = vpop.f32.mrb[11].mxu0  ;;  %v1167_v13 = vpop.f32.mrb[11].mxu1  ;;  %18302 = vmatpush3.bf16.xpose.msk.msra.mxu1 %vm21657_vm1, %v18297_v26 }
 0x31a   : > { %17255 = vmatprep.mubr.msk.f32.mxu1 %vm2189_vm0, %v21687_v24  ;;  %18314 = vmatpush3.bf16.xpose.msk.msra.mxu0 %vm21657_vm1, %v18309_v38  ;;  %v18315_v48 = vpack.c.bf16 %v17174_v43, %v1167_v13  ;;  %v21739_v50 = vpack.i.bf16 %v17174_v43, %v1167_v13 }
 0x31b   : > { %1507 = vrot.lane.b32.xlu1 %v21667_v12, %s20990_s12  ;;  %18305 = vmatprep.subr.msk.bf16.mxu1 %vm21657_vm1, %v18303_v35 }
 0x31c   : > { %v21745_v9 = vpop.f32.mrb[12].mxu0  ;;  %v17177_v51 = vpop.f32.mrb[12].mxu1 }
 0x31d   : > { %1567 = vrot.lane.b32.xlu0 %v21649_v47, %s20992_s25  ;;  %v21749_v52 = vpop.f32.mrb[13].mxu0  ;;  %v1177_v11 = vpop.f32.mrb[13].mxu1 }
 0x31e   : > { %v18321_v53 = vpack.c.bf16 %v17177_v51, %v1177_v11  ;;  %v21751_v54 = vpack.i.bf16 %v17177_v51, %v1177_v11 }
 0x31f   : > { %1539 = vrot.lane.b32.xlu1 %v21667_v12, %s20991_s22 }
 0x320   : > { %v21755_v49 = vpop.f32.mrb[14].mxu0  ;;  %v17180_v15 = vpop.f32.mrb[14].mxu1  ;;  %17256 = vmatmul.mubr.msk.f32.vlgmr.msra.gmra.mrb[28].mxu1 %vm2189_vm0, %v21681_v0  ;;  %18323 = vmatprep.subr.msk.bf16.mxu0 %vm21657_vm1, %v18321_v53 }
 0x321   : > { %17270 = vmatmul.mubr.msk.f32.vlgmr.msra.gmra.mrb[24].mxu0 %vm2189_vm0, %v21711_v36  ;;  %19169 = vrot.lane.b32.xlu0 %v21665_v28, %s20986_s1  ;;  %v21765_v58 = vpop.f32.mrb[15].mxu0  ;;  %v1187_v59 = vpop.f32.mrb[15].mxu1 }
 0x322   : > { %18308 = vmatpush3.bf16.xpose.msk.msra.mxu1 %vm21657_vm1, %v18303_v35  ;;  %17262 = vmatprep.mubr.msk.f32.mxu1 %vm2189_vm0, %v21699_v31  ;;  %v18327_v61 = vpack.c.bf16 %v17180_v15, %v1187_v59  ;;  %v21771_v56 = vpack.i.bf16 %v17180_v15, %v1187_v59 }
 0x323   : > { %18326 = vmatpush3.bf16.xpose.msk.msra.mxu0 %vm21657_vm1, %v18321_v53  ;;  %17283 = vmatprep.mubr.msk.f32.mxu0 %vm2189_vm0, %v21749_v52 }
 0x324   : > { %19204 = vrot.lane.b32.xlu1 %v21679_v40, %s20986_s1  ;;  %18317 = vmatprep.subr.msk.bf16.mxu1 %vm21657_vm1, %v18315_v48 }
 0x325   : > { %19174 = vrot.lane.b32.xlu0 %v21665_v28, %s20987_s14  ;;  %v17215_v62 = vpop.f32.mrb[16].mxu0  ;;  %v17227_v30 = vpop.f32.mrb[16].mxu1 }
 0x326   : > { %v1278_v63 = vpop.f32.mrb[17].mxu0  ;;  %v1318_v20 = vpop.f32.mrb[17].mxu1 }
 0x327   : > { %v21785_v45 = vpack.i.bf16 %v17215_v62, %v1278_v63  ;;  %v21787_v3 = vpack.i.bf16 %v17227_v30, %v1318_v20  ;;  %v21793_v4 = vpack.c.bf16 %v17215_v62, %v1278_v63  ;;  %v21795_v6 = vpack.c.bf16 %v17227_v30, %v1318_v20 }
 0x328   : > { %1377 = vrot.lane.b32.xlu1 %v21673_v2, %s20986_s1 }
 0x329   : > { %26630 = vst [vmem:[#allocation23_spill] sm:$0xff] %v21785_v45  ;;  %26631 = vst [vmem:[#allocation24_spill] sm:$0xff] %v21787_v3  ;;  %17263 = vmatmul.mubr.msk.f32.vlgmr.msra.gmra.mrb[30].mxu1 %vm2189_vm0, %v21693_v10  ;;  %1405 = vrot.lane.b32.xlu0 %v21653_v32, %s20987_s14  ;;  %v17218_v7 = vpop.f32.mrb[18].mxu0  ;;  %v17230_v16 = vpop.f32.mrb[18].mxu1 }
 0x32a   : > { %26632 = vst [vmem:[#allocation25_spill] sm:$0xff] %v21793_v4  ;;  %26633 = vst [vmem:[#allocation26_spill] sm:$0xff] %v21795_v6  ;;  %17284 = vmatmul.mubr.msk.f32.vlgmr.msra.gmra.mrb[26].mxu0 %vm2189_vm0, %v21745_v9  ;;  %18320 = vmatpush3.bf16.xpose.msk.msra.mxu1 %vm21657_vm1, %v18315_v48  ;;  %v1288_v17 = vpop.f32.mrb[19].mxu0  ;;  %v1328_v18 = vpop.f32.mrb[19].mxu1 }
 0x32b   : > { %17276 = vmatprep.mubr.msk.f32.mxu1 %vm2189_vm0, %v21731_v44  ;;  %18329 = vmatprep.subr.msk.bf16.mxu1 %vm21657_vm1, %v18327_v61  ;;  %v21807_v46 = vpack.i.bf16 %v17230_v16, %v1328_v18  ;;  %v21809_v21 = vpack.i.bf16 %v17218_v7, %v1288_v17  ;;  %v21811_v22 = vpack.c.bf16 %v17218_v7, %v1288_v17 }
 0x32c   : > { %19209 = vrot.lane.b32.xlu1 %v21679_v40, %s20987_s14  ;;  %v21815_v47 = vpack.c.bf16 %v17230_v16, %v1328_v18 }
 0x32d   : > { %26634 = vst [vmem:[#allocation27_spill] sm:$0xff] %v21807_v46  ;;  %26635 = vst [vmem:[#allocation28_spill] sm:$0xff] %v21809_v21  ;;  %19179 = vrot.lane.b32.xlu0 %v21665_v28, %s20988_s27  ;;  %v17221_v55 = vpop.f32.mrb[20].mxu0  ;;  %v17233_v60 = vpop.f32.mrb[20].mxu1 }
 0x32e   : > { %26636 = vst [vmem:[#allocation29_spill] sm:$0xff] %v21811_v22  ;;  %26637 = vst [vmem:[#allocation30_spill] sm:$0xff] %v21815_v47  ;;  %v1298_v33 = vpop.f32.mrb[21].mxu0  ;;  %v1338_v14 = vpop.f32.mrb[21].mxu1 }
 0x32f   : > { %v21819_v5 = vpack.i.bf16 %v17221_v55, %v1298_v33  ;;  %v21821_v57 = vpack.i.bf16 %v17233_v60, %v1338_v14  ;;  %v21827_v23 = vpack.c.bf16 %v17221_v55, %v1298_v33  ;;  %v21829_v25 = vpack.c.bf16 %v17233_v60, %v1338_v14 }
 0x330   : > { %1409 = vrot.lane.b32.xlu1 %v21673_v2, %s20987_s14 }
 0x331   : > { %26638 = vst [vmem:[#allocation31_spill] sm:$0xff] %v21819_v5  ;;  %26639 = vst [vmem:[#allocation32_spill] sm:$0xff] %v21821_v57  ;;  %17277 = vmatmul.mubr.msk.f32.vlgmr.msra.gmra.mrb[32].mxu1 %vm2189_vm0, %v21723_v42  ;;  %1437 = vrot.lane.b32.xlu0 %v21653_v32, %s20988_s27  ;;  %v17224_v26 = vpop.f32.mrb[22].mxu0  ;;  %v17236_v29 = vpop.f32.mrb[22].mxu1 }
 0x332   : > { %26640 = vst [vmem:[#allocation33_spill] sm:$0xff] %v21827_v23  ;;  %26641 = vst [vmem:[#allocation34_spill] sm:$0xff] %v21829_v25  ;;  %18332 = vmatpush3.bf16.xpose.msk.msra.mxu1 %vm21657_vm1, %v18327_v61  ;;  %17290 = vmatprep.mubr.msk.f32.mxu1 %vm2189_vm0, %v21765_v58  ;;  %v1308_v34 = vpop.f32.mrb[23].mxu0  ;;  %v1348_v35 = vpop.f32.mrb[23].mxu1 }
 0x333   : > { %v21837_v37 = vpack.i.bf16 %v17224_v26, %v1308_v34  ;;  %v21839_v41 = vpack.i.bf16 %v17236_v29, %v1348_v35  ;;  %v21841_v38 = vpack.c.bf16 %v17224_v26, %v1308_v34  ;;  %v21845_v43 = vpack.c.bf16 %v17236_v29, %v1348_v35 }
 0x334   : > { %19214 = vrot.lane.b32.xlu1 %v21679_v40, %s20988_s27 }
 0x335   : > { %26642 = vst [vmem:[#allocation35_spill] sm:$0xff] %v21837_v37  ;;  %26643 = vst [vmem:[#allocation36_spill] sm:$0xff] %v21839_v41  ;;  %19184 = vrot.lane.b32.xlu0 %v21665_v28, %s20989_s3 }
 0x336   : > { %26644 = vst [vmem:[#allocation37_spill] sm:$0xff] %v21841_v38  ;;  %26645 = vst [vmem:[#allocation38_spill] sm:$0xff] %v21845_v43 }
 0x338   : > { %1441 = vrot.lane.b32.xlu1 %v21673_v2, %s20988_s27 }
 0x339   : > { %17291 = vmatmul.mubr.msk.f32.vlgmr.msra.gmra.mrb[34].mxu1 %vm2189_vm0, %v21755_v49  ;;  %1469 = vrot.lane.b32.xlu0 %v21653_v32, %s20989_s3 }
 0x33c   : > { %19219 = vrot.lane.b32.xlu1 %v21679_v40, %s20989_s3 }
 0x33d   : > { %19189 = vrot.lane.b32.xlu0 %v21665_v28, %s20990_s12 }
 0x340   : > { %1473 = vrot.lane.b32.xlu1 %v21673_v2, %s20989_s3 }
 0x341   : > { %1501 = vrot.lane.b32.xlu0 %v21653_v32, %s20990_s12 }
 0x344   : > { %19224 = vrot.lane.b32.xlu1 %v21679_v40, %s20990_s12 }
 0x345   : > { %19194 = vrot.lane.b32.xlu0 %v21665_v28, %s20991_s22 }
 0x348   : > { %1505 = vrot.lane.b32.xlu1 %v21673_v2, %s20990_s12 }
 0x349   : > { %1533 = vrot.lane.b32.xlu0 %v21653_v32, %s20991_s22 }
 0x34c   : > { %19229 = vrot.lane.b32.xlu1 %v21679_v40, %s20991_s22 }
 0x34d   : > { %19199 = vrot.lane.b32.xlu0 %v21665_v28, %s20992_s25 }
 0x350   : > { %1537 = vrot.lane.b32.xlu1 %v21673_v2, %s20991_s22 }
 0x351   : > { %1565 = vrot.lane.b32.xlu0 %v21653_v32, %s20992_s25 }
 0x354   : > { %19234 = vrot.lane.b32.xlu1 %v21679_v40, %s20992_s25 }
 0x355   : > { %1571 = vrot.lane.b32.xlu0 %v21667_v12, %s20992_s25 }
 0x358   : > { %1569 = vrot.lane.b32.xlu1 %v21673_v2, %s20992_s25 }
 0x359   : > { %1383 = vrot.lane.b32.xlu0 %v21681_v0, %s20986_s1 }
 0x35c   : > { %1575 = vrot.lane.b32.xlu1 %v21681_v0, %s20992_s25 }
 0x35d   : > { %1415 = vrot.lane.b32.xlu0 %v21681_v0, %s20987_s14 }
 0x360   : > { %19239 = vrot.lane.b32.xlu1 %v21691_v27, %s20986_s1 }
 0x361   : > { %1447 = vrot.lane.b32.xlu0 %v21681_v0, %s20988_s27 }
 0x364   : > { %1387 = vrot.lane.b32.xlu1 %v21693_v10, %s20986_s1 }
 0x365   : > { %1479 = vrot.lane.b32.xlu0 %v21681_v0, %s20989_s3 }
 0x368   : > { %1419 = vrot.lane.b32.xlu1 %v21693_v10, %s20987_s14 }
 0x369   : > { %1511 = vrot.lane.b32.xlu0 %v21681_v0, %s20990_s12 }
 0x36c   : > { %1451 = vrot.lane.b32.xlu1 %v21693_v10, %s20988_s27 }
 0x36d   : > { %1543 = vrot.lane.b32.xlu0 %v21681_v0, %s20991_s22 }
 0x370   : > { %1483 = vrot.lane.b32.xlu1 %v21693_v10, %s20989_s3 }
 0x371   : > { %1381 = vrot.lane.b32.xlu0 %v21687_v24, %s20986_s1 }
 0x374   : > { %1515 = vrot.lane.b32.xlu1 %v21693_v10, %s20990_s12 }
 0x375   : > { %19244 = vrot.lane.b32.xlu0 %v21691_v27, %s20987_s14 }
 0x377   : > { %v1376_v32 = vpop.permute.xlu0 %1375 }
 0x378   : > { %1547 = vrot.lane.b32.xlu1 %v21693_v10, %s20991_s22  ;;  %v1374_v28 = vpop.permute.xlu1 %1373 }
 0x379   : > { %1413 = vrot.lane.b32.xlu0 %v21687_v24, %s20987_s14  ;;  %17297 = vmatprep.mubr.msk.f32.mxu0 %vm2189_vm0, %v1374_v28 }
 0x37b   : > { %v21918_v12 = vpop.permute.xlu0 %1407 }
 0x37c   : > { %19274 = vrot.lane.b32.xlu1 %v21707_v1, %s20986_s1  ;;  %v1380_v2 = vpop.permute.xlu1 %1379 }
 0x37d   : > { %19249 = vrot.lane.b32.xlu0 %v21691_v27, %s20988_s27 }
 0x37f   : > { %v21924_v40 = vpop.permute.xlu0 %1439 }
 0x380   : > { %1385 = vrot.lane.b32.xlu1 %v21699_v31, %s20986_s1  ;;  %v21928_v0 = vpop.permute.xlu1 %1411 }
 0x381   : > { %1445 = vrot.lane.b32.xlu0 %v21687_v24, %s20988_s27 }
 0x383   : > { %v21932_v13 = vpop.permute.xlu0 %1471 }
 0x384   : > { %26646 = vst [vmem:[#allocation39_spill] sm:$0xff] %v21932_v13  ;;  %19279 = vrot.lane.b32.xlu1 %v21707_v1, %s20987_s14  ;;  %v21936_v48 = vpop.permute.xlu1 %1443 }
 0x385   : > { %26647 = vst [vmem:[#allocation40_spill] sm:$0xff] %v21936_v48  ;;  %19254 = vrot.lane.b32.xlu0 %v21691_v27, %s20989_s3 }
 0x387   : > { %v21940_v51 = vpop.permute.xlu0 %1503 }
 0x388   : > { %26648 = vst [vmem:[#allocation41_spill] sm:$0xff] %v21940_v51  ;;  %1417 = vrot.lane.b32.xlu1 %v21699_v31, %s20987_s14  ;;  %v21944_v11 = vpop.permute.xlu1 %1475 }
 0x389   : > { %26649 = vst [vmem:[#allocation42_spill] sm:$0xff] %v21944_v11  ;;  %1477 = vrot.lane.b32.xlu0 %v21687_v24, %s20989_s3 }
 0x38b   : > { %v21948_v53 = vpop.permute.xlu0 %1535 }
 0x38c   : > { %26650 = vst [vmem:[#allocation43_spill] sm:$0xff] %v21948_v53  ;;  %19284 = vrot.lane.b32.xlu1 %v21707_v1, %s20988_s27 }
 0x38d   : > { %v21952_v15 = vpop.permute.xlu1 %1507  ;;  %19259 = vrot.lane.b32.xlu0 %v21691_v27, %s20990_s12 }
 0x38e   : > { %26651 = vst [vmem:[#allocation44_spill] sm:$0xff] %v21952_v15 }
 0x38f   : > { %v21956_v59 = vpop.permute.xlu0 %1567 }
 0x390   : > { %26652 = vst [vmem:[#allocation45_spill] sm:$0xff] %v21956_v59  ;;  %1449 = vrot.lane.b32.xlu1 %v21699_v31, %s20988_s27 }
 0x391   : > { %v21960_v61 = vpop.permute.xlu1 %1539  ;;  %1509 = vrot.lane.b32.xlu0 %v21687_v24, %s20990_s12 }
 0x392   : > { %26653 = vst [vmem:[#allocation46_spill] sm:$0xff] %v21960_v61 }
 0x393   : > { %v19170_v62 = vpop.permute.xlu0 %19169 }
 0x394   : > { %19289 = vrot.lane.b32.xlu1 %v21707_v1, %s20989_s3  ;;  %v19172_v30 = vunpack.i.h.bf16 %v19170_v62  ;;  %v19171_v63 = vunpack.i.l.bf16 %v19170_v62 }
 0x395   : > { %19264 = vrot.lane.b32.xlu0 %v21691_v27, %s20991_s22 }
 0x396   : > { %v18333_v20 = vpack.c.bf16 %v19172_v30, %v19171_v63  ;;  %v19205_v7 = vpop.permute.xlu1 %19204 }
 0x397   : > { %v19207_v16 = vunpack.i.h.bf16 %v19205_v7  ;;  %v19206_v17 = vunpack.i.l.bf16 %v19205_v7  ;;  %v21968_v18 = vpop.permute.xlu0 %19174 }
 0x398   : > { %1481 = vrot.lane.b32.xlu1 %v21699_v31, %s20989_s3  ;;  %18335 = vmatprep.subr.msk.bf16.mxu0 %vm21657_vm1, %v18333_v20 }
 0x399   : > { %v18339_v55 = vpack.c.bf16 %v19207_v16, %v19206_v17  ;;  %1541 = vrot.lane.b32.xlu0 %v21687_v24, %s20991_s22  ;;  %18338 = vmatpush3.bf16.xpose.msk.msra.mxu0 %vm21657_vm1, %v18333_v20 }
 0x39a   : > { %v1378_v60 = vpop.permute.xlu1 %1377 }
 0x39b   : > { %18341 = vmatprep.subr.msk.bf16.mxu1 %vm21657_vm1, %v18339_v55  ;;  %17304 = vmatprep.mubr.msk.f32.mxu1 %vm2189_vm0, %v1378_v60  ;;  %v21981_v33 = vpop.permute.xlu0 %1405 }
 0x39c   : > { %19294 = vrot.lane.b32.xlu1 %v21707_v1, %s20990_s12  ;;  %18344 = vmatpush3.bf16.xpose.msk.msra.mxu1 %vm21657_vm1, %v18339_v55 }
 0x39d   : > { %19269 = vrot.lane.b32.xlu0 %v21691_v27, %s20992_s25 }
 0x39e   : > { %v21989_v14 = vpop.permute.xlu1 %19209 }
 0x39f   : > { %v21991_v26 = vpop.permute.xlu0 %19179 }
 0x3a0   : > { %1513 = vrot.lane.b32.xlu1 %v21699_v31, %s20990_s12  ;;  %17298 = vmatmul.mubr.msk.f32.vlgmr.msra.gmra.mrb[28].mxu0 %vm2189_vm0, %v1376_v32 }
 0x3a1   : > { %1573 = vrot.lane.b32.xlu0 %v21687_v24, %s20992_s25 }
 0x3a2   : > { %v21998_v29 = vpop.permute.xlu1 %1409 }
 0x3a3   : > { %17305 = vmatmul.mubr.msk.f32.vlgmr.msra.gmra.mrb[36].mxu1 %vm2189_vm0, %v1380_v2  ;;  %v22001_v34 = vpop.permute.xlu0 %1437 }
 0x3a4   : > { %19299 = vrot.lane.b32.xlu1 %v21707_v1, %s20991_s22 }
 0x3a5   : > { %1579 = vrot.lane.b32.xlu0 %v21693_v10, %s20992_s25 }
 0x3a6   : > { %v22007_v27 = vpop.permute.xlu1 %19214 }
 0x3a7   : > { %v22009_v35 = vpop.permute.xlu0 %19184 }
 0x3a8   : > { %26654 = vst [vmem:[#allocation47_spill] sm:$0xff] %v22009_v35  ;;  %1545 = vrot.lane.b32.xlu1 %v21699_v31, %s20991_s22 }
 0x3a9   : > { %1391 = vrot.lane.b32.xlu0 %v21711_v36, %s20986_s1 }
 0x3aa   : > { %v22015_v24 = vpop.permute.xlu1 %1441 }
 0x3ab   : > { %26655 = vst [vmem:[#allocation48_spill] sm:$0xff] %v22015_v24  ;;  %v22017_v32 = vpop.permute.xlu0 %1469 }
 0x3ac   : > { %26656 = vst [vmem:[#allocation49_spill] sm:$0xff] %v22017_v32  ;;  %19304 = vrot.lane.b32.xlu1 %v21707_v1, %s20992_s25 }
 0x3ad   : > { %1423 = vrot.lane.b32.xlu0 %v21711_v36, %s20987_s14 }
 0x3ae   : > { %v22023_v10 = vpop.permute.xlu1 %19219 }
 0x3af   : > { %26657 = vst [vmem:[#allocation50_spill] sm:$0xff] %v22023_v10  ;;  %v22025_v28 = vpop.permute.xlu0 %19189 }
 0x3b0   : > { %26658 = vst [vmem:[#allocation51_spill] sm:$0xff] %v22025_v28  ;;  %1577 = vrot.lane.b32.xlu1 %v21699_v31, %s20992_s25 }
 0x3b1   : > { %1455 = vrot.lane.b32.xlu0 %v21711_v36, %s20988_s27 }
 0x3b2   : > { %v22031_v2 = vpop.permute.xlu1 %1473 }
 0x3b3   : > { %26659 = vst [vmem:[#allocation52_spill] sm:$0xff] %v22031_v2  ;;  %v22033_v62 = vpop.permute.xlu0 %1501 }
 0x3b4   : > { %26660 = vst [vmem:[#allocation53_spill] sm:$0xff] %v22033_v62  ;;  %1583 = vrot.lane.b32.xlu1 %v21711_v36, %s20992_s25 }
 0x3b5   : > { %1487 = vrot.lane.b32.xlu0 %v21711_v36, %s20989_s3 }
 0x3b6   : > { %v22039_v1 = vpop.permute.xlu1 %19224 }
 0x3b7   : > { %26661 = vst [vmem:[#allocation54_spill] sm:$0xff] %v22039_v1  ;;  %v22041_v30 = vpop.permute.xlu0 %19194 }
 0x3b8   : > { %26662 = vst [vmem:[#allocation55_spill] sm:$0xff] %v22041_v30  ;;  %1395 = vrot.lane.b32.xlu1 %v21723_v42, %s20986_s1 }
 0x3b9   : > { %1519 = vrot.lane.b32.xlu0 %v21711_v36, %s20990_s12 }
 0x3ba   : > { %v22047_v31 = vpop.permute.xlu1 %1505 }
 0x3bb   : > { %26663 = vst [vmem:[#allocation56_spill] sm:$0xff] %v22047_v31  ;;  %v22049_v63 = vpop.permute.xlu0 %1533 }
 0x3bc   : > { %26664 = vst [vmem:[#allocation57_spill] sm:$0xff] %v22049_v63  ;;  %1427 = vrot.lane.b32.xlu1 %v21723_v42, %s20987_s14 }
 0x3bd   : > { %1551 = vrot.lane.b32.xlu0 %v21711_v36, %s20991_s22 }
 0x3be   : > { %v22055_v20 = vpop.permute.xlu1 %19229 }
 0x3bf   : > { %26665 = vst [vmem:[#allocation58_spill] sm:$0xff] %v22055_v20  ;;  %v22057_v7 = vpop.permute.xlu0 %19199 }
 0x3c0   : > { %26666 = vst [vmem:[#allocation59_spill] sm:$0xff] %v22057_v7  ;;  %1459 = vrot.lane.b32.xlu1 %v21723_v42, %s20988_s27 }
 0x3c1   : > { %19309 = vrot.lane.b32.xlu0 %v21721_v39, %s20986_s1 }
 0x3c2   : > { %v22063_v16 = vpop.permute.xlu1 %1537 }
 0x3c3   : > { %26667 = vst [vmem:[#allocation60_spill] sm:$0xff] %v22063_v16  ;;  %v22065_v17 = vpop.permute.xlu0 %1565 }
 0x3c4   : > { %26668 = vst [vmem:[#allocation61_spill] sm:$0xff] %v22065_v17  ;;  %1491 = vrot.lane.b32.xlu1 %v21723_v42, %s20989_s3 }
 0x3c5   : > { %1389 = vrot.lane.b32.xlu0 %v21715_v8, %s20986_s1 }
 0x3c6   : > { %v22071_v36 = vpop.permute.xlu1 %19234 }
 0x3c7   : > { %26669 = vst [vmem:[#allocation62_spill] sm:$0xff] %v22071_v36  ;;  %v22073_v55 = vpop.permute.xlu0 %1571 }
 0x3c8   : > { %26670 = vst [vmem:[#allocation63_spill] sm:$0xff] %v22073_v55  ;;  %1523 = vrot.lane.b32.xlu1 %v21723_v42, %s20990_s12 }
 0x3c9   : > { %19314 = vrot.lane.b32.xlu0 %v21721_v39, %s20987_s14 }
 0x3ca   : > { %v22079_v60 = vpop.permute.xlu1 %1569 }
 0x3cb   : > { %26671 = vst [vmem:[#allocation64_spill] sm:$0xff] %v22079_v60  ;;  %v1384_v43 = vpop.permute.xlu0 %1383 }
 0x3cc   : > { %1555 = vrot.lane.b32.xlu1 %v21723_v42, %s20991_s22 }
 0x3cd   : > { %1421 = vrot.lane.b32.xlu0 %v21715_v8, %s20987_s14 }
 0x3ce   : > { %v22085_v25 = vpop.permute.xlu1 %1575 }
 0x3cf   : > { %26672 = vst [vmem:[#allocation65_spill] sm:$0xff] %v22085_v25  ;;  %v22087_v47 = vpop.permute.xlu0 %1415 }
 0x3d0   : > { %19344 = vrot.lane.b32.xlu1 %v21739_v50, %s20986_s1 }
 0x3d1   : > { %19319 = vrot.lane.b32.xlu0 %v21721_v39, %s20988_s27 }
 0x3d2   : > { %v19240_v6 = vpop.permute.xlu1 %19239 }
 0x3d3   : > { %v19242_v38 = vunpack.i.h.bf16 %v19240_v6  ;;  %v19241_v22 = vunpack.i.l.bf16 %v19240_v6  ;;  %v22093_v23 = vpop.permute.xlu0 %1447 }
 0x3d4   : > { %1393 = vrot.lane.b32.xlu1 %v21731_v44, %s20986_s1 }
 0x3d5   : > { %v18345_v4 = vpack.c.bf16 %v19242_v38, %v19241_v22  ;;  %1453 = vrot.lane.b32.xlu0 %v21715_v8, %s20988_s27 }
 0x3d6   : > { %v1388_v55 = vpop.permute.xlu1 %1387 }
 0x3d7   : > { %18347 = vmatprep.subr.msk.bf16.mxu0 %vm21657_vm1, %v18345_v4  ;;  %v22101_v60 = vpop.permute.xlu0 %1479 }
 0x3d8   : > { %26673 = vst [vmem:[#allocation66_spill] sm:$0xff] %v22101_v60  ;;  %19349 = vrot.lane.b32.xlu1 %v21739_v50, %s20987_s14  ;;  %18350 = vmatpush3.bf16.xpose.msk.msra.mxu0 %vm21657_vm1, %v18345_v4 }
 0x3d9   : > { %19324 = vrot.lane.b32.xlu0 %v21721_v39, %s20989_s3 }
 0x3da   : > { %v22109_v6 = vpop.permute.xlu1 %1419 }
 0x3db   : > { %v22111_v22 = vpop.permute.xlu0 %1511 }
 0x3dc   : > { %26674 = vst [vmem:[#allocation67_spill] sm:$0xff] %v22111_v22  ;;  %1425 = vrot.lane.b32.xlu1 %v21731_v44, %s20987_s14 }
 0x3dd   : > { %1485 = vrot.lane.b32.xlu0 %v21715_v8, %s20989_s3 }
 0x3de   : > { %v22117_v38 = vpop.permute.xlu1 %1451 }
 0x3df   : > { %26675 = vst [vmem:[#allocation68_spill] sm:$0xff] %v22117_v38  ;;  %v22119_v25 = vpop.permute.xlu0 %1543 }
 0x3e0   : > { %26676 = vst [vmem:[#allocation69_spill] sm:$0xff] %v22119_v25  ;;  %19354 = vrot.lane.b32.xlu1 %v21739_v50, %s20988_s27 }
 0x3e1   : > { %19329 = vrot.lane.b32.xlu0 %v21721_v39, %s20990_s12 }
 0x3e2   : > { %v22125_v4 = vpop.permute.xlu1 %1483 }
 0x3e3   : > { %26677 = vst [vmem:[#allocation70_spill] sm:$0xff] %v22125_v4  ;;  %v22127_v59 = vpop.f32.mrb[24].mxu1  ;;  %v1382_v36 = vpop.permute.xlu0 %1381 }
 0x3e4   : > { %1457 = vrot.lane.b32.xlu1 %v21731_v44, %s20988_s27  ;;  %v22131_v17 = vpop.f32.mrb[25].mxu1  ;;  %17311 = vmatprep.mubr.msk.f32.mxu0 %vm2189_vm0, %v1382_v36 }
 0x3e5   : > { %1517 = vrot.lane.b32.xlu0 %v21715_v8, %s20990_s12  ;;  %17312 = vmatmul.mubr.msk.f32.vlgmr.msra.gmra.mrb[30].mxu0 %vm2189_vm0, %v1384_v43 }
 0x3e6   : > { %v22137_v61 = vpop.permute.xlu1 %1515 }
 0x3e7   : > { %26678 = vst [vmem:[#allocation71_spill] sm:$0xff] %v22137_v61  ;;  %v22139_v7 = vpop.permute.xlu0 %19244 }
 0x3e8   : > { %19359 = vrot.lane.b32.xlu1 %v21739_v50, %s20989_s3 }
 0x3e9   : > { %19334 = vrot.lane.b32.xlu0 %v21721_v39, %s20991_s22 }
 0x3ea   : > { %v22145_v16 = vpop.permute.xlu1 %1547 }
 0x3eb   : > { %26679 = vst [vmem:[#allocation72_spill] sm:$0xff] %v22145_v16  ;;  %v22147_v25 = vpop.f32.mrb[26].mxu1  ;;  %v22149_v36 = vpop.permute.xlu0 %1413 }
 0x3ec   : > { %1489 = vrot.lane.b32.xlu1 %v21731_v44, %s20989_s3  ;;  %v22153_v43 = vpop.f32.mrb[27].mxu1 }
 0x3ed   : > { %1549 = vrot.lane.b32.xlu0 %v21715_v8, %s20991_s22 }
 0x3ee   : > { %v19275_v53 = vpop.permute.xlu1 %19274 }
 0x3ef   : > { %v19277_v20 = vunpack.i.h.bf16 %v19275_v53  ;;  %v19276_v61 = vunpack.i.l.bf16 %v19275_v53  ;;  %v22157_v63 = vpop.permute.xlu0 %19249 }
 0x3f0   : > { %19364 = vrot.lane.b32.xlu1 %v21739_v50, %s20990_s12 }
 0x3f1   : > { %v18351_v16 = vpack.c.bf16 %v19277_v20, %v19276_v61  ;;  %19339 = vrot.lane.b32.xlu0 %v21721_v39, %s20992_s25 }
 0x3f2   : > { %v1386_v15 = vpop.permute.xlu1 %1385 }
 0x3f3   : > { %18353 = vmatprep.subr.msk.bf16.mxu1 %vm21657_vm1, %v18351_v16  ;;  %17318 = vmatprep.mubr.msk.f32.mxu1 %vm2189_vm0, %v1386_v15  ;;  %v22166_v30 = vpop.f32.mrb[28].mxu1  ;;  %v22168_v31 = vpop.permute.xlu0 %1445 }
 0x3f4   : > { %1521 = vrot.lane.b32.xlu1 %v21731_v44, %s20990_s12  ;;  %18356 = vmatpush3.bf16.xpose.msk.msra.mxu1 %vm21657_vm1, %v18351_v16  ;;  %v22174_v53 = vpop.f32.mrb[24].mxu0  ;;  %v22176_v61 = vpop.f32.mrb[29].mxu1 }
 0x3f5   : > { %v22178_v39 = vpop.f32.mrb[25].mxu0  ;;  %1581 = vrot.lane.b32.xlu0 %v21715_v8, %s20992_s25 }
 0x3f6   : > { %v22182_v15 = vpop.permute.xlu1 %19279 }
 0x3f7   : > { %v22184_v20 = vpop.permute.xlu0 %19254 }
 0x3f8   : > { %26680 = vst [vmem:[#allocation73_spill] sm:$0xff] %v22184_v20  ;;  %19369 = vrot.lane.b32.xlu1 %v21739_v50, %s20991_s22 }
 0x3f9   : > { %1587 = vrot.lane.b32.xlu0 %v21723_v42, %s20992_s25 }
 0x3fa   : > { %v22190_v16 = vpop.permute.xlu1 %1417 }
 0x3fb   : > { %17319 = vmatmul.mubr.msk.f32.vlgmr.msra.gmra.mrb[38].mxu1 %vm2189_vm0, %v1388_v55  ;;  %v22193_v22 = vpop.permute.xlu0 %1477 }
 0x3fc   : > { %26681 = vst [vmem:[#allocation74_spill] sm:$0xff] %v22193_v22  ;;  %1553 = vrot.lane.b32.xlu1 %v21731_v44, %s20991_s22  ;;  %v22197_v8 = vpop.f32.mrb[30].mxu1 }
 0x3fd   : > { %v22199_v51 = vpop.f32.mrb[26].mxu0  ;;  %v22201_v1 = vpop.f32.mrb[31].mxu1  ;;  %1399 = vrot.lane.b32.xlu0 %v21745_v9, %s20986_s1 }
 0x3fe   : > { %v22205_v4 = vpop.permute.xlu1 %19284  ;;  %v22207_v42 = vpop.f32.mrb[27].mxu0 }
 0x3ff   : > { %v22209_v62 = vpop.permute.xlu0 %19259 }
 0x400   : > { %26682 = vst [vmem:[#allocation75_spill] sm:$0xff] %v22209_v62  ;;  %19374 = vrot.lane.b32.xlu1 %v21739_v50, %s20992_s25 }
 0x401   : > { %1431 = vrot.lane.b32.xlu0 %v21745_v9, %s20987_s14 }
 0x402   : > { %v22215_v55 = vpop.permute.xlu1 %1449 }
 0x403   : > { %26683 = vst [vmem:[#allocation76_spill] sm:$0xff] %v22215_v55  ;;  %v22217_v11 = vpop.permute.xlu0 %1509 }
 0x404   : > { %26684 = vst [vmem:[#allocation77_spill] sm:$0xff] %v22217_v11  ;;  %1585 = vrot.lane.b32.xlu1 %v21731_v44, %s20992_s25  ;;  %v22221_v28 = vpop.f32.mrb[32].mxu1 }
 0x405   : > { %v22223_v2 = vpop.f32.mrb[33].mxu1  ;;  %1463 = vrot.lane.b32.xlu0 %v21745_v9, %s20988_s27 }
 0x406   : > { %v22227_v62 = vpop.permute.xlu1 %19289 }
 0x407   : > { %26685 = vst [vmem:[#allocation78_spill] sm:$0xff] %v22227_v62  ;;  %v22229_v50 = vpop.permute.xlu0 %19264 }
 0x408   : > { %26686 = vst [vmem:[#allocation79_spill] sm:$0xff] %v22229_v50  ;;  %1591 = vrot.lane.b32.xlu1 %v21745_v9, %s20992_s25 }
 0x409   : > { %1495 = vrot.lane.b32.xlu0 %v21745_v9, %s20989_s3 }
 0x40a   : > { %v22235_v11 = vpop.permute.xlu1 %1481 }
 0x40b   : > { %26687 = vst [vmem:[#allocation80_spill] sm:$0xff] %v22235_v11  ;;  %v22237_v44 = vpop.permute.xlu0 %1541 }
 0x40c   : > { %26688 = vst [vmem:[#allocation81_spill] sm:$0xff] %v22237_v44  ;;  %1403 = vrot.lane.b32.xlu1 %v21755_v49, %s20986_s1  ;;  %v22241_v60 = vpop.f32.mrb[34].mxu1 }
 0x40d   : > { %v22243_v22 = vpop.f32.mrb[35].mxu1  ;;  %1527 = vrot.lane.b32.xlu0 %v21745_v9, %s20990_s12 }
 0x40e   : > { %v22247_v50 = vpop.permute.xlu1 %19294 }
 0x40f   : > { %26689 = vst [vmem:[#allocation82_spill] sm:$0xff] %v22247_v50  ;;  %v22249_v62 = vpop.permute.xlu0 %19269 }
 0x410   : > { %26690 = vst [vmem:[#allocation83_spill] sm:$0xff] %v22249_v62  ;;  %1435 = vrot.lane.b32.xlu1 %v21755_v49, %s20987_s14 }
 0x411   : > { %1559 = vrot.lane.b32.xlu0 %v21745_v9, %s20991_s22 }
 0x412   : > { %v22255_v44 = vpop.permute.xlu1 %1513 }
 0x413   : > { %26691 = vst [vmem:[#allocation84_spill] sm:$0xff] %v22255_v44  ;;  %v22257_v11 = vpop.permute.xlu0 %1573 }
 0x414   : > { %26692 = vst [vmem:[#allocation85_spill] sm:$0xff] %v22257_v11  ;;  %1467 = vrot.lane.b32.xlu1 %v21755_v49, %s20988_s27 }
 0x415   : > { %19379 = vrot.lane.b32.xlu0 %v21751_v54, %s20986_s1 }
 0x416   : > { %v22263_v13 = vpop.permute.xlu1 %19299 }
 0x417   : > { %26693 = vst [vmem:[#allocation86_spill] sm:$0xff] %v22263_v13  ;;  %v22265_v50 = vpop.permute.xlu0 %1579 }
 0x418   : > { %26694 = vst [vmem:[#allocation87_spill] sm:$0xff] %v22265_v50  ;;  %1499 = vrot.lane.b32.xlu1 %v21755_v49, %s20989_s3 }
 0x419   : > { %1397 = vrot.lane.b32.xlu0 %v21749_v52, %s20986_s1 }
 0x41a   : > { %v22271_v9 = vpop.permute.xlu1 %1545 }
 0x41b   : > { %26695 = vst [vmem:[#allocation88_spill] sm:$0xff] %v22271_v9  ;;  %v1392_v62 = vpop.permute.xlu0 %1391 }
 0x41c   : > { %1531 = vrot.lane.b32.xlu1 %v21755_v49, %s20990_s12 }
 0x41d   : > { %19384 = vrot.lane.b32.xlu0 %v21751_v54, %s20987_s14 }
 0x41e   : > { %v22277_v11 = vpop.permute.xlu1 %19304 }
 0x41f   : > { %26696 = vst [vmem:[#allocation89_spill] sm:$0xff] %v22277_v11  ;;  %v22279_v13 = vpop.permute.xlu0 %1423 }
 0x420   : > { %1563 = vrot.lane.b32.xlu1 %v21755_v49, %s20991_s22 }
 0x421   : > { %1429 = vrot.lane.b32.xlu0 %v21749_v52, %s20987_s14 }
 0x422   : > { %v22285_v50 = vpop.permute.xlu1 %1577 }
 0x423   : > { %26697 = vst [vmem:[#allocation90_spill] sm:$0xff] %v22285_v50  ;;  %v22287_v9 = vpop.permute.xlu0 %1455 }
 0x424   : > { %26698 = vst [vmem:[#allocation91_spill] sm:$0xff] %v22287_v9  ;;  %1595 = vrot.lane.b32.xlu1 %v21755_v49, %s20992_s25  ;;  %v22477_v9 = vmul.f32 0.25, %v22147_v25 }
 0x425   : > { %19389 = vrot.lane.b32.xlu0 %v21751_v54, %s20988_s27 }
 0x426   : > { %v22293_v44 = vpop.permute.xlu1 %1583  ;;  %v7639_v25 = vsel %vm2189_vm0, %v22477_v9, -inf }
 0x427   : > { %26699 = vst [vmem:[#allocation92_spill] sm:$0xff] %v22293_v44  ;;  %v22295_v11 = vpop.permute.xlu0 %1487 }
 0x428   : > { %26700 = vst [vmem:[#allocation93_spill] sm:$0xff] %v22295_v11  ;;  %19414 = vrot.lane.b32.xlu1 %v21771_v56, %s20986_s1 }
 0x429   : > { %1461 = vrot.lane.b32.xlu0 %v21749_v52, %s20988_s27 }
 0x42a   : > { %v1396_v10 = vpop.permute.xlu1 %1395 }
 0x42b   : > { %v22301_v50 = vpop.permute.xlu0 %1519 }
 0x42c   : > { %26701 = vst [vmem:[#allocation94_spill] sm:$0xff] %v22301_v50  ;;  %1401 = vrot.lane.b32.xlu1 %v21765_v58, %s20986_s1 }
 0x42d   : > { %19394 = vrot.lane.b32.xlu0 %v21751_v54, %s20989_s3 }
 0x42e   : > { %v22307_v49 = vpop.permute.xlu1 %1427 }
 0x42f   : > { %v22309_v44 = vpop.permute.xlu0 %1551 }
 0x430   : > { %26702 = vst [vmem:[#allocation95_spill] sm:$0xff] %v22309_v44  ;;  %19419 = vrot.lane.b32.xlu1 %v21771_v56, %s20987_s14 }
 0x431   : > { %1493 = vrot.lane.b32.xlu0 %v21749_v52, %s20989_s3 }
 0x432   : > { %v22315_v11 = vpop.permute.xlu1 %1459 }
 0x433   : > { %26703 = vst [vmem:[#allocation96_spill] sm:$0xff] %v22315_v11  ;;  %v19310_v32 = vpop.permute.xlu0 %19309 }
 0x434   : > { %1433 = vrot.lane.b32.xlu1 %v21765_v58, %s20987_s14  ;;  %v19312_v50 = vunpack.i.h.bf16 %v19310_v32  ;;  %v19311_v38 = vunpack.i.l.bf16 %v19310_v32 }
 0x435   : > { %19399 = vrot.lane.b32.xlu0 %v21751_v54, %s20990_s12 }
 0x436   : > { %v18357_v20 = vpack.c.bf16 %v19312_v50, %v19311_v38  ;;  %v22321_v55 = vpop.permute.xlu1 %1491 }
 0x437   : > { %26704 = vst [vmem:[#allocation97_spill] sm:$0xff] %v22321_v55  ;;  %v1390_v44 = vpop.permute.xlu0 %1389 }
 0x438   : > { %19424 = vrot.lane.b32.xlu1 %v21771_v56, %s20988_s27  ;;  %18359 = vmatprep.subr.msk.bf16.mxu0 %vm21657_vm1, %v18357_v20 }
 0x439   : > { %17325 = vmatprep.mubr.msk.f32.mxu0 %vm2189_vm0, %v1390_v44  ;;  %1525 = vrot.lane.b32.xlu0 %v21749_v52, %s20990_s12 }
 0x43a   : > { %v22330_v11 = vpop.permute.xlu1 %1523  ;;  %18362 = vmatpush3.bf16.xpose.msk.msra.mxu0 %vm21657_vm1, %v18357_v20 }
 0x43b   : > { %26705 = vst [vmem:[#allocation98_spill] sm:$0xff] %v22330_v11  ;;  %v22334_v32 = vpop.permute.xlu0 %19314 }
 0x43c   : > { %1465 = vrot.lane.b32.xlu1 %v21765_v58, %s20988_s27 }
 0x43d   : > { %19404 = vrot.lane.b32.xlu0 %v21751_v54, %s20991_s22 }
 0x43e   : > { %v22340_v38 = vpop.permute.xlu1 %1555 }
 0x43f   : > { %26706 = vst [vmem:[#allocation99_spill] sm:$0xff] %v22340_v38  ;;  %v22342_v50 = vpop.permute.xlu0 %1421 }
 0x440   : > { %19429 = vrot.lane.b32.xlu1 %v21771_v56, %s20989_s3 }
 0x441   : > { %17326 = vmatmul.mubr.msk.f32.vlgmr.msra.gmra.mrb[32].mxu0 %vm2189_vm0, %v1392_v62  ;;  %1557 = vrot.lane.b32.xlu0 %v21749_v52, %s20991_s22 }
 0x442   : > { %v19345_v20 = vpop.permute.xlu1 %19344 }
 0x443   : > { %v19347_v44 = vunpack.i.h.bf16 %v19345_v20  ;;  %v19346_v11 = vunpack.i.l.bf16 %v19345_v20  ;;  %v22349_v55 = vpop.permute.xlu0 %19319 }
 0x444   : > { %1497 = vrot.lane.b32.xlu1 %v21765_v58, %s20989_s3 }
 0x445   : > { %v18363_v48 = vpack.c.bf16 %v19347_v44, %v19346_v11  ;;  %19409 = vrot.lane.b32.xlu0 %v21751_v54, %s20992_s25 }
 0x446   : > { %v1394_v38 = vpop.permute.xlu1 %1393 }
 0x447   : > { %18365 = vmatprep.subr.msk.bf16.mxu1 %vm21657_vm1, %v18363_v48  ;;  %17332 = vmatprep.mubr.msk.f32.mxu1 %vm2189_vm0, %v1394_v38  ;;  %v22358_v62 = vpop.permute.xlu0 %1453 }
 0x448   : > { %19434 = vrot.lane.b32.xlu1 %v21771_v56, %s20990_s12  ;;  %18368 = vmatpush3.bf16.xpose.msk.msra.mxu1 %vm21657_vm1, %v18363_v48 }
 0x449   : > { %1589 = vrot.lane.b32.xlu0 %v21749_v52, %s20992_s25 }
 0x44a   : > { %v22366_v11 = vpop.permute.xlu1 %19349 }
 0x44b   : > { %v22368_v54 = vpop.permute.xlu0 %19324 }
 0x44c   : > { %26707 = vst [vmem:[#allocation100_spill] sm:$0xff] %v22368_v54  ;;  %1529 = vrot.lane.b32.xlu1 %v21765_v58, %s20990_s12 }
 0x44d   : > { %1593 = vrot.lane.b32.xlu0 %v21765_v58, %s20992_s25 }
 0x44e   : > { %v22374_v38 = vpop.permute.xlu1 %1425 }
 0x44f   : > { %17333 = vmatmul.mubr.msk.f32.vlgmr.msra.gmra.mrb[40].mxu1 %vm2189_vm0, %v1396_v10  ;;  %v22377_v20 = vpop.permute.xlu0 %1485 }
 0x450   : > { %26708 = vst [vmem:[#allocation101_spill] sm:$0xff] %v22377_v20  ;;  %19439 = vrot.lane.b32.xlu1 %v21771_v56, %s20991_s22 }
 0x451   : > { %19449 = vrot.lane.b32.xlu0 %v21785_v45, %s20986_s1 }
 0x452   : > { %v22383_v52 = vpop.permute.xlu1 %19354 }
 0x453   : > { %26709 = vst [vmem:[#allocation102_spill] sm:$0xff] %v22383_v52  ;;  %v22385_v48 = vpop.permute.xlu0 %19329 }
 0x454   : > { %26710 = vst [vmem:[#allocation103_spill] sm:$0xff] %v22385_v48  ;;  %1561 = vrot.lane.b32.xlu1 %v21765_v58, %s20991_s22 }
 0x455   : > { %19474 = vrot.lane.b32.xlu0 %v21807_v46, %s20986_s1 }
 0x456   : > { %v22391_v44 = vpop.permute.xlu1 %1457 }
 0x457   : > { %26711 = vst [vmem:[#allocation104_spill] sm:$0xff] %v22391_v44  ;;  %v22393_v10 = vpop.permute.xlu0 %1517 }
 0x458   : > { %26712 = vst [vmem:[#allocation105_spill] sm:$0xff] %v22393_v10  ;;  %19444 = vrot.lane.b32.xlu1 %v21771_v56, %s20992_s25 }
 0x459   : > { %19479 = vrot.lane.b32.xlu0 %v21809_v21, %s20987_s14 }
 0x45a   : > { %v22399_v20 = vpop.permute.xlu1 %19359 }
 0x45b   : > { %26713 = vst [vmem:[#allocation106_spill] sm:$0xff] %v22399_v20  ;;  %v22401_v54 = vpop.permute.xlu0 %19334 }
 0x45c   : > { %26714 = vst [vmem:[#allocation107_spill] sm:$0xff] %v22401_v54  ;;  %19454 = vrot.lane.b32.xlu1 %v21787_v3, %s20986_s1 }
 0x45d   : > { %19484 = vrot.lane.b32.xlu0 %v21819_v5, %s20986_s1 }
 0x45e   : > { %v22407_v58 = vpop.permute.xlu1 %1489 }
 0x45f   : > { %26715 = vst [vmem:[#allocation108_spill] sm:$0xff] %v22407_v58  ;;  %v22409_v46 = vpop.permute.xlu0 %1549 }
 0x460   : > { %26716 = vst [vmem:[#allocation109_spill] sm:$0xff] %v22409_v46  ;;  %19459 = vrot.lane.b32.xlu1 %v21785_v45, %s20987_s14 }
 0x461   : > { %19504 = vrot.lane.b32.xlu0 %v21837_v37, %s20986_s1 }
 0x462   : > { %v22415_v56 = vpop.permute.xlu1 %19364 }
 0x463   : > { %26717 = vst [vmem:[#allocation110_spill] sm:$0xff] %v22415_v56  ;;  %v22417_v10 = vpop.permute.xlu0 %19339 }
 0x464   : > { %26718 = vst [vmem:[#allocation111_spill] sm:$0xff] %v22417_v10  ;;  %19464 = vrot.lane.b32.xlu1 %v21787_v3, %s20987_s14 }
 0x465   : > { %19509 = vrot.lane.b32.xlu0 %v21839_v41, %s20986_s1 }
 0x466   : > { %v22423_v54 = vpop.permute.xlu1 %1521 }
 0x467   : > { %26719 = vst [vmem:[#allocation112_spill] sm:$0xff] %v22423_v54  ;;  %v22425_v48 = vpop.permute.xlu0 %1581 }
 0x468   : > { %26720 = vst [vmem:[#allocation113_spill] sm:$0xff] %v22425_v48  ;;  %19469 = vrot.lane.b32.xlu1 %v21809_v21, %s20986_s1 }
 0x469   : > { %19514 = vrot.lane.b32.xlu0 %v21837_v37, %s20987_s14 }
 0x46a   : > { %v22431_v45 = vpop.permute.xlu1 %19369 }
 0x46b   : > { %26721 = vst [vmem:[#allocation114_spill] sm:$0xff] %v22431_v45  ;;  %v22433_v46 = vpop.permute.xlu0 %1587 }
 0x46c   : > { %26722 = vst [vmem:[#allocation115_spill] sm:$0xff] %v22433_v46  ;;  %19489 = vrot.lane.b32.xlu1 %v21821_v57, %s20986_s1 }
 0x46e   : > { %v22437_v3 = vpop.permute.xlu1 %1553 }
 0x46f   : > { %26723 = vst [vmem:[#allocation116_spill] sm:$0xff] %v22437_v3  ;;  %v1400_v41 = vpop.permute.xlu0 %1399 }
 0x470   : > { %19494 = vrot.lane.b32.xlu1 %v21819_v5, %s20987_s14 }
 0x472   : > { %v22441_v48 = vpop.permute.xlu1 %19374 }
 0x473   : > { %26724 = vst [vmem:[#allocation117_spill] sm:$0xff] %v22441_v48  ;;  %v22443_v10 = vpop.permute.xlu0 %1431  ;;  %v22445_v21 = vpop.f32.mrb[28].mxu0 }
 0x474   : > { %19499 = vrot.lane.b32.xlu1 %v21821_v57, %s20987_s14  ;;  %v22449_v37 = vpop.f32.mrb[29].mxu0  ;;  %v22470_v57 = vmul.f32 0.25, %v22131_v17 }
 0x476   : > { %v22451_v46 = vpop.permute.xlu1 %1585  ;;  %v22453_v45 = vpop.f32.mrb[36].mxu1 }
 0x477   : > { %26725 = vst [vmem:[#allocation118_spill] sm:$0xff] %v22451_v46  ;;  %v22455_v3 = vpop.f32.mrb[37].mxu1  ;;  %v22457_v54 = vpop.permute.xlu0 %1463 }
 0x478   : > { %26726 = vst [vmem:[#allocation119_spill] sm:$0xff] %v22457_v54 }
 0x47a   : > { %v22459_v5 = vpop.permute.xlu1 %1591 }
 0x47b   : > { %26727 = vst [vmem:[#allocation120_spill] sm:$0xff] %v22459_v5  ;;  %v22461_v48 = vpop.permute.xlu0 %1495  ;;  %v7630_v5 = vsel %vm2189_vm0, %v22470_v57, -inf }
 0x47c   : > { %26728 = vst [vmem:[#allocation121_spill] sm:$0xff] %v22461_v48  ;;  %v19177_v48 = vunpack.i.h.bf16 %v21968_v18 }
 0x47e   : > { %v22463_v56 = vpop.permute.xlu1 %1403 }
 0x47f   : > { %v22465_v58 = vpop.permute.xlu0 %1527 }
 0x480   : > { %26729 = vst [vmem:[#allocation122_spill] sm:$0xff] %v22465_v58  ;;  %v19176_v58 = vunpack.i.l.bf16 %v21968_v18  ;;  %v22500_v18 = vmul.f32 0.25, %v22166_v30 }
 0x482   : > { %v22467_v20 = vpop.permute.xlu1 %1435  ;;  %v7645_v30 = vsel %vm2189_vm0, %v22500_v18, -inf }
 0x483   : > { %26730 = vst [vmem:[#allocation123_spill] sm:$0xff] %v22467_v20  ;;  %v22472_v46 = vpop.permute.xlu0 %1559  ;;  %v18381_v20 = vpack.c.bf16 %v19177_v48, %v19176_v58  ;;  %v22509_v48 = vmul.f32 0.25, %v22127_v59  ;;  %v22525_v59 = vmul.f32 0.25, %v22197_v8  ;;  %v22538_v8 = vmul.f32 0.25, %v22178_v39 }
 0x484   : > { %26731 = vst [vmem:[#allocation124_spill] sm:$0xff] %v22472_v46  ;;  %v22486_v46 = vmul.f32 0.25, %v22153_v43  ;;  %v19247_v43 = vunpack.i.h.bf16 %v22139_v7 }
 0x485   : > { %26733 = vst [vmem:[#allocation126_spill] sm:$0xff] %v22525_v59 }
 0x486   : > { %v22474_v44 = vpop.permute.xlu1 %1467 }
 0x487   : > { %26732 = vst [vmem:[#allocation125_spill] sm:$0xff] %v22474_v44  ;;  %v19380_v54 = vpop.permute.xlu0 %19379 }
 0x488   : > { %v19382_v52 = vunpack.i.h.bf16 %v19380_v54  ;;  %v19381_v35 = vunpack.i.l.bf16 %v19380_v54  ;;  %7631 = vmax.xlane.f32.xlu0 %v7630_v5  ;;  %v19246_v54 = vunpack.i.l.bf16 %v22139_v7  ;;  %v22522_v7 = vmul.f32 0.25, %v22174_v53 }
 0x489   : > { %v19211_v53 = vunpack.i.l.bf16 %v21989_v14 }
 0x48a   : > { %v18369_v17 = vpack.c.bf16 %v19382_v52, %v19381_v35  ;;  %v22483_v24 = vpop.permute.xlu1 %1499  ;;  %v7636_v35 = vsel %vm2189_vm0, %v22486_v46, -inf  ;;  %v18393_v58 = vpack.c.bf16 %v19247_v43, %v19246_v54  ;;  %v19317_v43 = vunpack.i.h.bf16 %v22334_v32 }
 0x48b   : > { %v1398_v44 = vpop.permute.xlu0 %1397  ;;  %v19316_v54 = vunpack.i.l.bf16 %v22334_v32  ;;  %v22556_v32 = vmul.f32 0.25, %v22199_v51 }
 0x48c   : > { %7640 = vmax.xlane.f32.xlu0 %v7639_v25  ;;  %18371 = vmatprep.subr.msk.bf16.mxu0 %vm21657_vm1, %v18369_v17  ;;  %v7657_v25 = vsel %vm2189_vm0, %v22522_v7, -inf }
 0x48d   : > { %17339 = vmatprep.mubr.msk.f32.mxu0 %vm2189_vm0, %v1398_v44  ;;  %18374 = vmatpush3.bf16.xpose.msk.msra.mxu0 %vm21657_vm1, %v18369_v17  ;;  %v22512_v44 = vmul.f32 0.25, %v22176_v61 }
 0x48e   : > { %v22495_v5 = vpop.permute.xlu1 %1531  ;;  %18383 = vmatprep.subr.msk.bf16.mxu0 %vm21657_vm1, %v18381_v20 }
 0x490   : > { %7637 = vmax.xlane.f32.xlu0 %v7636_v35  ;;  %v7651_v35 = vsel %vm2189_vm0, %v22525_v59, -inf }
 0x492   : > { %v22506_v52 = vpop.permute.xlu1 %1563 }
 0x494   : > { %7646 = vmax.xlane.f32.xlu0 %v7645_v30  ;;  %17340 = vmatmul.mubr.msk.f32.vlgmr.msra.gmra.mrb[34].mxu0 %vm2189_vm0, %v1400_v41  ;;  %v7633_v41 = vsel %vm2189_vm0, %v22509_v48, -inf }
 0x495   : > { %18386 = vmatpush3.bf16.xpose.msk.msra.mxu0 %vm21657_vm1, %v18381_v20  ;;  %17353 = vmatprep.mubr.msk.f32.mxu0 %vm2189_vm0, %v21981_v33  ;;  %v7642_v20 = vsel %vm2189_vm0, %v22512_v44, -inf  ;;  %v19212_v33 = vunpack.i.h.bf16 %v21989_v14  ;;  %v22547_v14 = vmul.f32 0.25, %v22201_v1  ;;  %v19385_v1 = vpop.permute.xlu0 %19384 }
 0x496   : > { %v22527_v61 = vpop.permute.xlu1 %1595  ;;  %18395 = vmatprep.subr.msk.bf16.mxu0 %vm21657_vm1, %v18393_v58 }
 0x497   : > { %v18387_v59 = vpack.c.bf16 %v19212_v33, %v19211_v53  ;;  %v7648_v51 = vsel %vm2189_vm0, %v22547_v14, -inf  ;;  %v19386_v33 = vunpack.i.l.bf16 %v19385_v1  ;;  %v7669_v53 = vsel %vm2189_vm0, %v22556_v32, -inf }
 0x498   : > { %7634 = vmax.xlane.f32.xlu1 %v7633_v41  ;;  %7643 = vmax.xlane.f32.xlu0 %v7642_v20 }
 0x49a   : > { %v19415_v17 = vpop.permute.xlu1 %19414 }
 0x49b   : > { %v19417_v30 = vunpack.i.h.bf16 %v19415_v17  ;;  %v19416_v41 = vunpack.i.l.bf16 %v19415_v17  ;;  %v18405_v17 = vpack.c.bf16 %v19317_v43, %v19316_v54  ;;  %v22582_v43 = vmul.f32 0.25, %v22223_v2 }
 0x49c   : > { %7658 = vmax.xlane.f32.xlu1 %v7657_v25  ;;  %7652 = vmax.xlane.f32.xlu0 %v7651_v35  ;;  %v19282_v25 = vunpack.i.h.bf16 %v22182_v15  ;;  %v22579_v35 = vmul.f32 0.25, %v22207_v42  ;;  %v22595_v2 = vmul.f32 0.25, %v22445_v21  ;;  %v22604_v42 = vmul.f32 0.25, %v22241_v60 }
 0x49d   : > { %v18375_v39 = vpack.c.bf16 %v19417_v30, %v19416_v41  ;;  %17354 = vmatmul.mubr.msk.f32.vlgmr.msra.gmra.mrb[36].mxu0 %vm2189_vm0, %v21918_v12  ;;  %v7654_v12 = vsel %vm2189_vm0, %v22538_v8, -inf  ;;  %v7660_v21 = vsel %vm2189_vm0, %v22582_v43, -inf  ;;  %v19351_v60 = vunpack.i.l.bf16 %v22366_v11 }
 0x49e   : > { %v1402_v20 = vpop.permute.xlu1 %1401  ;;  %18398 = vmatpush3.bf16.xpose.msk.msra.mxu0 %vm21657_vm1, %v18393_v58  ;;  %17367 = vmatprep.mubr.msk.f32.mxu0 %vm2189_vm0, %v22149_v36  ;;  %v22566_v36 = vmul.f32 0.25, %v22221_v28  ;;  %v19387_v58 = vunpack.i.h.bf16 %v19385_v1  ;;  %v19281_v28 = vunpack.i.l.bf16 %v22182_v15  ;;  %v7681_v41 = vsel %vm2189_vm0, %v22595_v2, -inf }
 0x49f   : > { %18377 = vmatprep.subr.msk.bf16.mxu1 %vm21657_vm1, %v18375_v39  ;;  %17346 = vmatprep.mubr.msk.f32.mxu1 %vm2189_vm0, %v1402_v20  ;;  %v7675_v20 = vsel %vm2189_vm0, %v22604_v42, -inf }
 0x4a0   : > { %18380 = vmatpush3.bf16.xpose.msk.msra.mxu1 %vm21657_vm1, %v18375_v39  ;;  %7655 = vmax.xlane.f32.xlu1 %v7654_v12  ;;  %v7663_v54 = vsel %vm2189_vm0, %v22566_v36, -inf  ;;  %v18417_v30 = vpack.c.bf16 %v19387_v58, %v19386_v33  ;;  %v18399_v15 = vpack.c.bf16 %v19282_v25, %v19281_v28  ;;  %v22622_v39 = vmul.f32 0.25, %v22243_v22 }
 0x4a1   : > { %18407 = vmatprep.subr.msk.bf16.mxu0 %vm21657_vm1, %v18405_v17  ;;  %18389 = vmatprep.subr.msk.bf16.mxu1 %vm21657_vm1, %v18387_v59  ;;  %v19252_v12 = vunpack.i.h.bf16 %v22157_v63  ;;  %v19216_v28 = vunpack.i.l.bf16 %v22007_v27 }
 0x4a2   : > { %7649 = vmax.xlane.f32.xlu0 %v7648_v51 }
 0x4a4   : > { %7670 = vmax.xlane.f32.xlu1 %v7669_v53 }
 0x4a5   : > { %17368 = vmatmul.mubr.msk.f32.vlgmr.msra.gmra.mrb[38].mxu0 %vm2189_vm0, %v22087_v47  ;;  %v7666_v47 = vsel %vm2189_vm0, %v22579_v35, -inf }
 0x4a6   : > { %7664 = vmax.xlane.f32.xlu0 %v7663_v54  ;;  %18410 = vmatpush3.bf16.xpose.msk.msra.mxu0 %vm21657_vm1, %v18405_v17  ;;  %v22640_v17 = vmul.f32 0.25, %v22453_v45  ;;  %v22651_v45 = vmul.f32 0.25, %v22455_v3 }
 0x4a7   : > { %17347 = vmatmul.mubr.msk.f32.vlgmr.msra.gmra.mrb[42].mxu1 %vm2189_vm0, %v22463_v56  ;;  %17381 = vmatprep.mubr.msk.f32.mxu0 %vm2189_vm0, %v22342_v50  ;;  %v19182_v50 = vunpack.i.h.bf16 %v21991_v26  ;;  %v19352_v56 = vunpack.i.h.bf16 %v22366_v11  ;;  %v19420_v11 = vpop.permute.xlu1 %19419 }
 0x4a8   : > { %18392 = vmatpush3.bf16.xpose.msk.msra.mxu1 %vm21657_vm1, %v18387_v59  ;;  %17360 = vmatprep.mubr.msk.f32.mxu1 %vm2189_vm0, %v21998_v29  ;;  %v19181_v29 = vunpack.i.l.bf16 %v21991_v26  ;;  %v22617_v59 = vmul.f32 0.25, %v22449_v37  ;;  %v1430_v26 = vpop.permute.xlu0 %1429  ;;  %v19422_v1 = vunpack.i.h.bf16 %v19420_v11  ;;  %v19421_v51 = vunpack.i.l.bf16 %v19420_v11 }
 0x4a9   : > { %7667 = vmax.xlane.f32.xlu1 %v7666_v47  ;;  %18419 = vmatprep.subr.msk.bf16.mxu0 %vm21657_vm1, %v18417_v30  ;;  %v18411_v22 = vpack.c.bf16 %v19352_v56, %v19351_v60  ;;  %v7687_v58 = vsel %vm2189_vm0, %v22640_v17, -inf  ;;  %v26734_v60 = vld [vmem:[#allocation123_spill] sm:$0xff] }
 0x4aa   : > { %18401 = vmatprep.subr.msk.bf16.mxu1 %vm21657_vm1, %v18399_v15  ;;  %7661 = vmax.xlane.f32.xlu0 %v7660_v21  ;;  %v18429_v37 = vpack.c.bf16 %v19182_v50, %v19181_v29  ;;  %v18423_v53 = vpack.c.bf16 %v19422_v1, %v19421_v51  ;;  %v26739_v51 = vld [vmem:[#allocation40_spill] sm:$0xff] }
 0x4ab   : > { %v1434_v21 = vpop.permute.xlu1 %1433 }
 0x4ad   : > { %7682 = vmax.xlane.f32.xlu1 %v7681_v41  ;;  %17382 = vmatmul.mubr.msk.f32.vlgmr.msra.gmra.mrb[40].mxu0 %vm2189_vm0, %v22279_v13  ;;  %v7678_v13 = vsel %vm2189_vm0, %v22617_v59, -inf }
 0x4ae   : > { %7676 = vmax.xlane.f32.xlu0 %v7675_v20  ;;  %18422 = vmatpush3.bf16.xpose.msk.msra.mxu0 %vm21657_vm1, %v18417_v30 }
 0x4af   : > { %17361 = vmatmul.mubr.msk.f32.vlgmr.msra.gmra.mrb[44].mxu1 %vm2189_vm0, %v21928_v0  ;;  %17395 = vmatprep.mubr.msk.f32.mxu0 %vm2189_vm0, %v1430_v26  ;;  %v7672_v0 = vsel %vm2189_vm0, %v22622_v39, -inf }
 0x4b0   : > { %18404 = vmatpush3.bf16.xpose.msk.msra.mxu1 %vm21657_vm1, %v18399_v15  ;;  %17374 = vmatprep.mubr.msk.f32.mxu1 %vm2189_vm0, %v22190_v16  ;;  %v19251_v16 = vunpack.i.l.bf16 %v22157_v63  ;;  %v19322_v63 = vunpack.i.h.bf16 %v22349_v55  ;;  %v19390_v15 = vpop.permute.xlu0 %19389 }
 0x4b1   : > { %18431 = vmatprep.subr.msk.bf16.mxu0 %vm21657_vm1, %v18429_v37  ;;  %7679 = vmax.xlane.f32.xlu1 %v7678_v13  ;;  %v19391_v50 = vunpack.i.l.bf16 %v19390_v15  ;;  %v26738_v13 = vld [vmem:[#allocation91_spill] sm:$0xff] }
 0x4b2   : > { %18413 = vmatprep.subr.msk.bf16.mxu1 %vm21657_vm1, %v18411_v22  ;;  %7673 = vmax.xlane.f32.xlu0 %v7672_v0  ;;  %v18441_v33 = vpack.c.bf16 %v19252_v12, %v19251_v16 }
 0x4b4   : > { %v1462_v11 = vpop.permute.xlu0 %1461 }
 0x4b5   : > { %17396 = vmatmul.mubr.msk.f32.vlgmr.msra.gmra.mrb[42].mxu0 %vm2189_vm0, %v22443_v10  ;;  %v19321_v10 = vunpack.i.l.bf16 %v22349_v55 }
 0x4b6   : > { %7688 = vmax.xlane.f32.xlu0 %v7687_v58  ;;  %18434 = vmatpush3.bf16.xpose.msk.msra.mxu0 %vm21657_vm1, %v18429_v37  ;;  %v19425_v58 = vpop.permute.xlu1 %19424 }
 0x4b7   : > { %17375 = vmatmul.mubr.msk.f32.vlgmr.msra.gmra.mrb[46].mxu1 %vm2189_vm0, %v22109_v6  ;;  %17409 = vmatprep.mubr.msk.f32.mxu0 %vm2189_vm0, %v22001_v34  ;;  %v7684_v34 = vsel %vm2189_vm0, %v22651_v45, -inf  ;;  %v18453_v30 = vpack.c.bf16 %v19322_v63, %v19321_v10  ;;  %v26741_v63 = vld [vmem:[#allocation73_spill] sm:$0xff] }
 0x4b8   : > { %18416 = vmatpush3.bf16.xpose.msk.msra.mxu1 %vm21657_vm1, %v18411_v22  ;;  %17388 = vmatprep.mubr.msk.f32.mxu1 %vm2189_vm0, %v22374_v38  ;;  %v17313_v3 = vpop.f32.mrb[30].mxu0  ;;  %v19217_v38 = vunpack.i.h.bf16 %v22007_v27  ;;  %v19392_v27 = vunpack.i.h.bf16 %v19390_v15  ;;  %v19257_v10 = vunpack.i.h.bf16 %v26741_v63 }
 0x4b9   : > { %18443 = vmatprep.subr.msk.bf16.mxu0 %vm21657_vm1, %v18441_v33  ;;  %18425 = vmatprep.subr.msk.bf16.mxu1 %vm21657_vm1, %v18423_v53  ;;  %v22675_v6 = vmul.f32 0.25, %v17313_v3  ;;  %v3094_v25 = vpop.f32.mrb[31].mxu0 }
 0x4ba   : > { %7685 = vmax.xlane.f32.xlu0 %v7684_v34  ;;  %v22681_v54 = vmul.f32 0.25, %v3094_v25  ;;  %v18435_v47 = vpack.c.bf16 %v19217_v38, %v19216_v28  ;;  %v18465_v29 = vpack.c.bf16 %v19392_v27, %v19391_v50  ;;  %v19256_v34 = vunpack.i.l.bf16 %v26741_v63  ;;  %v26746_v27 = vld [vmem:[#allocation100_spill] sm:$0xff]  ;;  %v26756_v63 = vld [vmem:[#allocation51_spill] sm:$0xff] }
 0x4bb   : > { %v7693_v55 = vsel %vm2189_vm0, %v22675_v6, -inf  ;;  %v19427_v25 = vunpack.i.h.bf16 %v19425_v58  ;;  %v19426_v38 = vunpack.i.l.bf16 %v19425_v58  ;;  %v19327_v50 = vunpack.i.h.bf16 %v26746_v27 }
 0x4bc   : > { %7694 = vmax.xlane.f32.xlu1 %v7693_v55  ;;  %v26742_v55 = vld [vmem:[#allocation119_spill] sm:$0xff] }
 0x4bd   : > { %17410 = vmatmul.mubr.msk.f32.vlgmr.msra.gmra.mrb[44].mxu0 %vm2189_vm0, %v21924_v40  ;;  %v7690_v40 = vsel %vm2189_vm0, %v22681_v54, -inf  ;;  %v18471_v15 = vpack.c.bf16 %v19427_v25, %v19426_v38  ;;  %v26757_v25 = vld [vmem:[#allocation106_spill] sm:$0xff] }
 0x4be   : > { %18446 = vmatpush3.bf16.xpose.msk.msra.mxu0 %vm21657_vm1, %v18441_v33  ;;  %17423 = vmatprep.mubr.msk.f32.mxu0 %vm2189_vm0, %v22168_v31  ;;  %v19287_v31 = vunpack.i.h.bf16 %v22205_v4  ;;  %v26740_v33 = vld [vmem:[#allocation76_spill] sm:$0xff]  ;;  %v19362_v38 = vunpack.i.h.bf16 %v26757_v25 }
 0x4bf   : > { %17389 = vmatmul.mubr.msk.f32.vlgmr.msra.gmra.mrb[48].mxu1 %vm2189_vm0, %v22307_v49  ;;  %18455 = vmatprep.subr.msk.bf16.mxu0 %vm21657_vm1, %v18453_v30  ;;  %v19286_v49 = vunpack.i.l.bf16 %v22205_v4  ;;  %v26735_v4 = vld [vmem:[#allocation48_spill] sm:$0xff] }
 0x4c0   : > { %18428 = vmatpush3.bf16.xpose.msk.msra.mxu1 %vm21657_vm1, %v18423_v53  ;;  %17402 = vmatprep.mubr.msk.f32.mxu1 %vm2189_vm0, %v1434_v21  ;;  %v26744_v21 = vld [vmem:[#allocation49_spill] sm:$0xff] }
 0x4c1   : > { %18437 = vmatprep.subr.msk.bf16.mxu1 %vm21657_vm1, %v18435_v47  ;;  %7691 = vmax.xlane.f32.xlu1 %v7690_v40  ;;  %v18447_v56 = vpack.c.bf16 %v19287_v31, %v19286_v49  ;;  %v26745_v40 = vld [vmem:[#allocation104_spill] sm:$0xff]  ;;  %v19326_v31 = vunpack.i.l.bf16 %v26746_v27  ;;  %v26747_v49 = vld [vmem:[#allocation50_spill] sm:$0xff] }
 0x4c2   : > { %v26760_v27 = vld [vmem:[#allocation80_spill] sm:$0xff] }
 0x4c5   : > { %17424 = vmatmul.mubr.msk.f32.vlgmr.msra.gmra.mrb[46].mxu0 %vm2189_vm0, %v22093_v23  ;;  %v26736_v23 = vld [vmem:[#allocation47_spill] sm:$0xff] }
 0x4c6   : > { %18458 = vmatpush3.bf16.xpose.msk.msra.mxu0 %vm21657_vm1, %v18453_v30  ;;  %17437 = vmatprep.mubr.msk.f32.mxu0 %vm2189_vm0, %v22358_v62  ;;  %v19187_v41 = vunpack.i.h.bf16 %v26736_v23  ;;  %v19186_v20 = vunpack.i.l.bf16 %v26736_v23  ;;  %v26737_v62 = vld [vmem:[#allocation102_spill] sm:$0xff]  ;;  %v18489_v30 = vpack.c.bf16 %v19257_v10, %v19256_v34  ;;  %v19395_v23 = vpop.permute.xlu0 %19394  ;;  %v19192_v10 = vunpack.i.h.bf16 %v26756_v63 }
 0x4c7   : > { %17403 = vmatmul.mubr.msk.f32.vlgmr.msra.gmra.mrb[50].mxu1 %vm2189_vm0, %v26734_v60  ;;  %18467 = vmatprep.subr.msk.bf16.mxu0 %vm21657_vm1, %v18465_v29  ;;  %v19357_v26 = vunpack.i.h.bf16 %v26737_v62  ;;  %v19356_v37 = vunpack.i.l.bf16 %v26737_v62  ;;  %v18501_v60 = vpack.c.bf16 %v19327_v50, %v19326_v31  ;;  %v1466_v62 = vpop.permute.xlu1 %1465  ;;  %v19191_v34 = vunpack.i.l.bf16 %v26756_v63  ;;  %v26761_v50 = vld [vmem:[#allocation75_spill] sm:$0xff]  ;;  %v26770_v63 = vld [vmem:[#allocation97_spill] sm:$0xff] }
 0x4c8   : > { %18440 = vmatpush3.bf16.xpose.msk.msra.mxu1 %vm21657_vm1, %v18435_v47  ;;  %17416 = vmatprep.mubr.msk.f32.mxu1 %vm2189_vm0, %v26735_v4  ;;  %v18477_v22 = vpack.c.bf16 %v19187_v41, %v19186_v20  ;;  %v26743_v47 = vld [vmem:[#allocation68_spill] sm:$0xff]  ;;  %v26748_v4 = vld [vmem:[#allocation39_spill] sm:$0xff]  ;;  %v26749_v41 = vld [vmem:[#allocation74_spill] sm:$0xff]  ;;  %v19262_v31 = vunpack.i.h.bf16 %v26761_v50 }
 0x4c9   : > { %18449 = vmatprep.subr.msk.bf16.mxu1 %vm21657_vm1, %v18447_v56  ;;  %v18459_v12 = vpack.c.bf16 %v19357_v26, %v19356_v37  ;;  %v26750_v26 = vld [vmem:[#allocation96_spill] sm:$0xff]  ;;  %v19397_v37 = vunpack.i.h.bf16 %v19395_v23 }
 0x4cd   : > { %17438 = vmatmul.mubr.msk.f32.vlgmr.msra.gmra.mrb[48].mxu0 %vm2189_vm0, %v26738_v13 }
 0x4ce   : > { %v17320_v0 = vpop.f32.mrb[38].mxu1  ;;  %18470 = vmatpush3.bf16.xpose.msk.msra.mxu0 %vm21657_vm1, %v18465_v29  ;;  %17451 = vmatprep.mubr.msk.f32.mxu0 %vm2189_vm0, %v1462_v11  ;;  %v19222_v29 = vunpack.i.h.bf16 %v26747_v49  ;;  %v26751_v11 = vld [vmem:[#allocation78_spill] sm:$0xff] }
 0x4cf   : > { %v22727_v16 = vmul.f32 0.25, %v17320_v0  ;;  %v3177_v1 = vpop.f32.mrb[39].mxu1  ;;  %17417 = vmatmul.mubr.msk.f32.vlgmr.msra.gmra.mrb[52].mxu1 %vm2189_vm0, %v26739_v51  ;;  %18479 = vmatprep.subr.msk.bf16.mxu0 %vm21657_vm1, %v18477_v22  ;;  %v19292_v13 = vunpack.i.h.bf16 %v26751_v11  ;;  %v19291_v0 = vunpack.i.l.bf16 %v26751_v11  ;;  %v26753_v51 = vld [vmem:[#allocation101_spill] sm:$0xff]  ;;  %v26767_v11 = vld [vmem:[#allocation54_spill] sm:$0xff] }
 0x4d0   : > { %18452 = vmatpush3.bf16.xpose.msk.msra.mxu1 %vm21657_vm1, %v18447_v56  ;;  %17430 = vmatprep.mubr.msk.f32.mxu1 %vm2189_vm0, %v26740_v33  ;;  %v22737_v53 = vmul.f32 0.25, %v3177_v1  ;;  %v19221_v56 = vunpack.i.l.bf16 %v26747_v49  ;;  %v26752_v1 = vld [vmem:[#allocation66_spill] sm:$0xff]  ;;  %v26754_v33 = vld [vmem:[#allocation125_spill] sm:$0xff]  ;;  %v19261_v49 = vunpack.i.l.bf16 %v26761_v50 }
 0x4d1   : > { %18461 = vmatprep.subr.msk.bf16.mxu1 %vm21657_vm1, %v18459_v12  ;;  %v7699_v3 = vsel %vm2189_vm0, %v22727_v16, -inf  ;;  %v18495_v58 = vpack.c.bf16 %v19292_v13, %v19291_v0  ;;  %v19227_v13 = vunpack.i.h.bf16 %v26767_v11  ;;  %v19226_v0 = vunpack.i.l.bf16 %v26767_v11 }
 0x4d2   : > { %7700 = vmax.xlane.f32.xlu0 %v7699_v3  ;;  %v7696_v28 = vsel %vm2189_vm0, %v22737_v53, -inf  ;;  %v18483_v20 = vpack.c.bf16 %v19222_v29, %v19221_v56  ;;  %v26755_v3 = vld [vmem:[#allocation52_spill] sm:$0xff] }
 0x4d5   : > { %17452 = vmatmul.mubr.msk.f32.vlgmr.msra.gmra.mrb[50].mxu0 %vm2189_vm0, %v26742_v55  ;;  %v18525_v55 = vpack.c.bf16 %v19192_v10, %v19191_v34 }
 0x4d6   : > { %7697 = vmax.xlane.f32.xlu0 %v7696_v28  ;;  %18482 = vmatpush3.bf16.xpose.msk.msra.mxu0 %vm21657_vm1, %v18477_v22  ;;  %v19396_v22 = vunpack.i.l.bf16 %v19395_v23  ;;  %v19361_v28 = vunpack.i.l.bf16 %v26757_v25  ;;  %v26763_v23 = vld [vmem:[#allocation53_spill] sm:$0xff]  ;;  %v26771_v25 = vld [vmem:[#allocation82_spill] sm:$0xff] }
 0x4d7   : > { %17431 = vmatmul.mubr.msk.f32.vlgmr.msra.gmra.mrb[54].mxu1 %vm2189_vm0, %v26743_v47  ;;  %17465 = vmatprep.mubr.msk.f32.mxu0 %vm2189_vm0, %v26744_v21  ;;  %v26759_v21 = vld [vmem:[#allocation42_spill] sm:$0xff] }
 0x4d8   : > { %18464 = vmatpush3.bf16.xpose.msk.msra.mxu1 %vm21657_vm1, %v18459_v12  ;;  %17444 = vmatprep.mubr.msk.f32.mxu1 %vm2189_vm0, %v26745_v40  ;;  %v18513_v12 = vpack.c.bf16 %v19397_v37, %v19396_v22  ;;  %v18507_v47 = vpack.c.bf16 %v19362_v38, %v19361_v28  ;;  %v19430_v40 = vpop.permute.xlu1 %19429  ;;  %v19297_v38 = vunpack.i.h.bf16 %v26771_v25  ;;  %v19296_v28 = vunpack.i.l.bf16 %v26771_v25  ;;  %v26785_v25 = vld [vmem:[#allocation107_spill] sm:$0xff] }
 0x4d9   : > { %18491 = vmatprep.subr.msk.bf16.mxu0 %vm21657_vm1, %v18489_v30  ;;  %18473 = vmatprep.subr.msk.bf16.mxu1 %vm21657_vm1, %v18471_v15  ;;  %v19432_v29 = vunpack.i.h.bf16 %v19430_v40  ;;  %v19431_v56 = vunpack.i.l.bf16 %v19430_v40  ;;  %v26775_v40 = vld [vmem:[#allocation55_spill] sm:$0xff] }
 0x4da   : > { %v19196_v50 = vunpack.i.l.bf16 %v26775_v40 }
 0x4dd   : > { %17466 = vmatmul.mubr.msk.f32.vlgmr.msra.gmra.mrb[52].mxu0 %vm2189_vm0, %v26748_v4  ;;  %v26762_v4 = vld [vmem:[#allocation121_spill] sm:$0xff] }
 0x4de   : > { %18494 = vmatpush3.bf16.xpose.msk.msra.mxu0 %vm21657_vm1, %v18489_v30  ;;  %17479 = vmatprep.mubr.msk.f32.mxu0 %vm2189_vm0, %v26749_v41  ;;  %v1494_v30 = vpop.permute.xlu0 %1493  ;;  %v18519_v41 = vpack.c.bf16 %v19432_v29, %v19431_v56 }
 0x4df   : > { %17445 = vmatmul.mubr.msk.f32.vlgmr.msra.gmra.mrb[56].mxu1 %vm2189_vm0, %v26750_v26  ;;  %18503 = vmatprep.subr.msk.bf16.mxu0 %vm21657_vm1, %v18501_v60  ;;  %v26766_v26 = vld [vmem:[#allocation103_spill] sm:$0xff] }
 0x4e0   : > { %18476 = vmatpush3.bf16.xpose.msk.msra.mxu1 %vm21657_vm1, %v18471_v15  ;;  %17458 = vmatprep.mubr.msk.f32.mxu1 %vm2189_vm0, %v1466_v62  ;;  %v26758_v15 = vld [vmem:[#allocation93_spill] sm:$0xff]  ;;  %v26765_v62 = vld [vmem:[#allocation108_spill] sm:$0xff]  ;;  %v19332_v37 = vunpack.i.h.bf16 %v26766_v26  ;;  %v19331_v22 = vunpack.i.l.bf16 %v26766_v26 }
 0x4e1   : > { %18485 = vmatprep.subr.msk.bf16.mxu1 %vm21657_vm1, %v18483_v20 }
 0x4e5   : > { %17480 = vmatmul.mubr.msk.f32.vlgmr.msra.gmra.mrb[54].mxu0 %vm2189_vm0, %v26752_v1  ;;  %v26768_v1 = vld [vmem:[#allocation41_spill] sm:$0xff] }
 0x4e6   : > { %18506 = vmatpush3.bf16.xpose.msk.msra.mxu0 %vm21657_vm1, %v18501_v60  ;;  %17493 = vmatprep.mubr.msk.f32.mxu0 %vm2189_vm0, %v26753_v51  ;;  %v18537_v60 = vpack.c.bf16 %v19262_v31, %v19261_v49  ;;  %v19400_v51 = vpop.permute.xlu0 %19399  ;;  %v26776_v31 = vld [vmem:[#allocation110_spill] sm:$0xff] }
 0x4e7   : > { %17459 = vmatmul.mubr.msk.f32.vlgmr.msra.gmra.mrb[58].mxu1 %vm2189_vm0, %v26754_v33  ;;  %18515 = vmatprep.subr.msk.bf16.mxu0 %vm21657_vm1, %v18513_v12  ;;  %v18531_v33 = vpack.c.bf16 %v19227_v13, %v19226_v0  ;;  %v19402_v10 = vunpack.i.h.bf16 %v19400_v51  ;;  %v19401_v34 = vunpack.i.l.bf16 %v19400_v51  ;;  %v19367_v49 = vunpack.i.h.bf16 %v26776_v31  ;;  %v26781_v51 = vld [vmem:[#allocation122_spill] sm:$0xff] }
 0x4e8   : > { %18488 = vmatpush3.bf16.xpose.msk.msra.mxu1 %vm21657_vm1, %v18483_v20  ;;  %17472 = vmatprep.mubr.msk.f32.mxu1 %vm2189_vm0, %v26755_v3  ;;  %v26764_v20 = vld [vmem:[#allocation70_spill] sm:$0xff]  ;;  %v1498_v3 = vpop.permute.xlu1 %1497 }
 0x4e9   : > { %18497 = vmatprep.subr.msk.bf16.mxu1 %vm21657_vm1, %v18495_v58 }
 0x4ea   : > { %v1526_v56 = vpop.permute.xlu0 %1525 }
 0x4ed   : > { %17494 = vmatmul.mubr.msk.f32.vlgmr.msra.gmra.mrb[56].mxu0 %vm2189_vm0, %v26758_v15  ;;  %v26773_v15 = vld [vmem:[#allocation105_spill] sm:$0xff] }
 0x4ee   : > { %18518 = vmatpush3.bf16.xpose.msk.msra.mxu0 %vm21657_vm1, %v18513_v12  ;;  %17507 = vmatprep.mubr.msk.f32.mxu0 %vm2189_vm0, %v1494_v30  ;;  %v18549_v12 = vpack.c.bf16 %v19332_v37, %v19331_v22  ;;  %v26772_v30 = vld [vmem:[#allocation67_spill] sm:$0xff] }
 0x4ef   : > { %17473 = vmatmul.mubr.msk.f32.vlgmr.msra.gmra.mrb[60].mxu1 %vm2189_vm0, %v26759_v21  ;;  %18527 = vmatprep.subr.msk.bf16.mxu0 %vm21657_vm1, %v18525_v55  ;;  %v26774_v21 = vld [vmem:[#allocation56_spill] sm:$0xff] }
 0x4f0   : > { %18500 = vmatpush3.bf16.xpose.msk.msra.mxu1 %vm21657_vm1, %v18495_v58  ;;  %17486 = vmatprep.mubr.msk.f32.mxu1 %vm2189_vm0, %v26760_v27  ;;  %v26769_v58 = vld [vmem:[#allocation77_spill] sm:$0xff]  ;;  %v19197_v27 = vunpack.i.h.bf16 %v26775_v40  ;;  %v26787_v40 = vld [vmem:[#allocation43_spill] sm:$0xff] }
 0x4f1   : > { %18509 = vmatprep.subr.msk.bf16.mxu1 %vm21657_vm1, %v18507_v47 }
 0x4f2   : > { %v18573_v29 = vpack.c.bf16 %v19197_v27, %v19196_v50  ;;  %v26788_v27 = vld [vmem:[#allocation81_spill] sm:$0xff] }
 0x4f5   : > { %17508 = vmatmul.mubr.msk.f32.vlgmr.msra.gmra.mrb[58].mxu0 %vm2189_vm0, %v26762_v4 }
 0x4f6   : > { %18530 = vmatpush3.bf16.xpose.msk.msra.mxu0 %vm21657_vm1, %v18525_v55  ;;  %17521 = vmatprep.mubr.msk.f32.mxu0 %vm2189_vm0, %v26763_v23  ;;  %v18561_v55 = vpack.c.bf16 %v19402_v10, %v19401_v34  ;;  %v26778_v23 = vld [vmem:[#allocation44_spill] sm:$0xff] }
 0x4f7   : > { %17487 = vmatmul.mubr.msk.f32.vlgmr.msra.gmra.mrb[62].mxu1 %vm2189_vm0, %v26764_v20  ;;  %18539 = vmatprep.subr.msk.bf16.mxu0 %vm21657_vm1, %v18537_v60  ;;  %v26779_v20 = vld [vmem:[#allocation84_spill] sm:$0xff] }
 0x4f8   : > { %18512 = vmatpush3.bf16.xpose.msk.msra.mxu1 %vm21657_vm1, %v18507_v47  ;;  %17500 = vmatprep.mubr.msk.f32.mxu1 %vm2189_vm0, %v26765_v62  ;;  %v18543_v47 = vpack.c.bf16 %v19297_v38, %v19296_v28  ;;  %v26780_v62 = vld [vmem:[#allocation79_spill] sm:$0xff]  ;;  %v26784_v34 = vld [vmem:[#allocation112_spill] sm:$0xff]  ;;  %v19337_v38 = vunpack.i.h.bf16 %v26785_v25  ;;  %v19336_v28 = vunpack.i.l.bf16 %v26785_v25 }
 0x4f9   : > { %18521 = vmatprep.subr.msk.bf16.mxu1 %vm21657_vm1, %v18519_v41  ;;  %v19267_v26 = vunpack.i.h.bf16 %v26780_v62  ;;  %v19266_v37 = vunpack.i.l.bf16 %v26780_v62 }
 0x4fb   : > { %v18585_v0 = vpack.c.bf16 %v19267_v26, %v19266_v37 }
 0x4fd   : > { %17522 = vmatmul.mubr.msk.f32.vlgmr.msra.gmra.mrb[60].mxu0 %vm2189_vm0, %v26768_v1 }
 0x4fe   : > { %18542 = vmatpush3.bf16.xpose.msk.msra.mxu0 %vm21657_vm1, %v18537_v60  ;;  %17535 = vmatprep.mubr.msk.f32.mxu0 %vm2189_vm0, %v26769_v58  ;;  %v26777_v60 = vld [vmem:[#allocation94_spill] sm:$0xff]  ;;  %v26782_v58 = vld [vmem:[#allocation57_spill] sm:$0xff] }
 0x4ff   : > { %17501 = vmatmul.mubr.msk.f32.vlgmr.msra.gmra.mrb[64].mxu1 %vm2189_vm0, %v26770_v63  ;;  %18551 = vmatprep.subr.msk.bf16.mxu0 %vm21657_vm1, %v18549_v12 }
 0x500   : > { %18524 = vmatpush3.bf16.xpose.msk.msra.mxu1 %vm21657_vm1, %v18519_v41  ;;  %17514 = vmatprep.mubr.msk.f32.mxu1 %vm2189_vm0, %v1498_v3  ;;  %v19435_v41 = vpop.permute.xlu1 %19434  ;;  %v26783_v3 = vld [vmem:[#allocation71_spill] sm:$0xff] }
 0x501   : > { %18533 = vmatprep.subr.msk.bf16.mxu1 %vm21657_vm1, %v18531_v33  ;;  %v19437_v22 = vunpack.i.h.bf16 %v19435_v41  ;;  %v19436_v11 = vunpack.i.l.bf16 %v19435_v41 }
 0x505   : > { %17536 = vmatmul.mubr.msk.f32.vlgmr.msra.gmra.mrb[62].mxu0 %vm2189_vm0, %v26772_v30 }
 0x506   : > { %18554 = vmatpush3.bf16.xpose.msk.msra.mxu0 %vm21657_vm1, %v18549_v12  ;;  %17549 = vmatprep.mubr.msk.f32.mxu0 %vm2189_vm0, %v26773_v15 }
 0x507   : > { %17515 = vmatmul.mubr.msk.f32.vlgmr.msra.gmra.mrb[66].mxu1 %vm2189_vm0, %v22483_v24  ;;  %18563 = vmatprep.subr.msk.bf16.mxu0 %vm21657_vm1, %v18561_v55  ;;  %v19366_v24 = vunpack.i.l.bf16 %v26776_v31  ;;  %v1530_v31 = vpop.permute.xlu1 %1529 }
 0x508   : > { %18536 = vmatpush3.bf16.xpose.msk.msra.mxu1 %vm21657_vm1, %v18531_v33  ;;  %17528 = vmatprep.mubr.msk.f32.mxu1 %vm2189_vm0, %v26774_v21  ;;  %v18567_v33 = vpack.c.bf16 %v19437_v22, %v19436_v11  ;;  %v18597_v21 = vpack.c.bf16 %v19337_v38, %v19336_v28  ;;  %v26791_v22 = vld [vmem:[#allocation69_spill] sm:$0xff]  ;;  %v26796_v28 = vld [vmem:[#allocation95_spill] sm:$0xff] }
 0x509   : > { %18545 = vmatprep.subr.msk.bf16.mxu1 %vm21657_vm1, %v18543_v47  ;;  %v18555_v4 = vpack.c.bf16 %v19367_v49, %v19366_v24  ;;  %v26789_v49 = vld [vmem:[#allocation98_spill] sm:$0xff]  ;;  %v19405_v24 = vpop.permute.xlu0 %19404 }
 0x50a   : > { %v19406_v41 = vunpack.i.l.bf16 %v19405_v24 }
 0x50d   : > { %17550 = vmatmul.mubr.msk.f32.vlgmr.msra.gmra.mrb[64].mxu0 %vm2189_vm0, %v26777_v60  ;;  %v1558_v38 = vpop.permute.xlu0 %1557 }
 0x50e   : > { %18566 = vmatpush3.bf16.xpose.msk.msra.mxu0 %vm21657_vm1, %v18561_v55  ;;  %17563 = vmatprep.mubr.msk.f32.mxu0 %vm2189_vm0, %v1526_v56  ;;  %v26786_v55 = vld [vmem:[#allocation58_spill] sm:$0xff] }
 0x50f   : > { %17529 = vmatmul.mubr.msk.f32.vlgmr.msra.gmra.mrb[68].mxu1 %vm2189_vm0, %v26778_v23  ;;  %18575 = vmatprep.subr.msk.bf16.mxu0 %vm21657_vm1, %v18573_v29  ;;  %v19232_v30 = vunpack.i.h.bf16 %v26786_v55  ;;  %v19231_v15 = vunpack.i.l.bf16 %v26786_v55  ;;  %v19407_v23 = vunpack.i.h.bf16 %v19405_v24 }
 0x510   : > { %18548 = vmatpush3.bf16.xpose.msk.msra.mxu1 %vm21657_vm1, %v18543_v47  ;;  %17542 = vmatprep.mubr.msk.f32.mxu1 %vm2189_vm0, %v26779_v20 }
 0x511   : > { %18557 = vmatprep.subr.msk.bf16.mxu1 %vm21657_vm1, %v18555_v4  ;;  %v18579_v50 = vpack.c.bf16 %v19232_v30, %v19231_v15  ;;  %v26797_v30 = vld [vmem:[#allocation46_spill] sm:$0xff]  ;;  %v19440_v15 = vpop.permute.xlu1 %19439 }
 0x514   : > { %v17327_v13 = vpop.f32.mrb[32].mxu0 }
 0x515   : > { %v22895_v12 = vmul.f32 0.25, %v17327_v13  ;;  %v3260_v1 = vpop.f32.mrb[33].mxu0  ;;  %17564 = vmatmul.mubr.msk.f32.vlgmr.msra.gmra.mrb[66].mxu0 %vm2189_vm0, %v26781_v51  ;;  %v18609_v13 = vpack.c.bf16 %v19407_v23, %v19406_v41  ;;  %v26794_v51 = vld [vmem:[#allocation59_spill] sm:$0xff]  ;;  %v26802_v23 = vld [vmem:[#allocation72_spill] sm:$0xff] }
 0x516   : > { %18578 = vmatpush3.bf16.xpose.msk.msra.mxu0 %vm21657_vm1, %v18573_v29  ;;  %17577 = vmatprep.mubr.msk.f32.mxu0 %vm2189_vm0, %v26782_v58  ;;  %v22909_v10 = vmul.f32 0.25, %v3260_v1  ;;  %v26790_v29 = vld [vmem:[#allocation86_spill] sm:$0xff]  ;;  %v26793_v1 = vld [vmem:[#allocation60_spill] sm:$0xff]  ;;  %v19202_v58 = vunpack.i.h.bf16 %v26794_v51 }
 0x517   : > { %17543 = vmatmul.mubr.msk.f32.vlgmr.msra.gmra.mrb[70].mxu1 %vm2189_vm0, %v26783_v3  ;;  %18587 = vmatprep.subr.msk.bf16.mxu0 %vm21657_vm1, %v18585_v0  ;;  %v7705_v63 = vsel %vm2189_vm0, %v22895_v12, -inf  ;;  %v19302_v56 = vunpack.i.h.bf16 %v26790_v29  ;;  %v26795_v3 = vld [vmem:[#allocation114_spill] sm:$0xff]  ;;  %v26803_v41 = vld [vmem:[#allocation116_spill] sm:$0xff] }
 0x518   : > { %18560 = vmatpush3.bf16.xpose.msk.msra.mxu1 %vm21657_vm1, %v18555_v4  ;;  %17556 = vmatprep.mubr.msk.f32.mxu1 %vm2189_vm0, %v26784_v34  ;;  %v7702_v47 = vsel %vm2189_vm0, %v22909_v10, -inf  ;;  %v19301_v4 = vunpack.i.l.bf16 %v26790_v29  ;;  %v19371_v34 = vunpack.i.l.bf16 %v26795_v3  ;;  %v26800_v29 = vld [vmem:[#allocation124_spill] sm:$0xff] }
 0x519   : > { %18569 = vmatprep.subr.msk.bf16.mxu1 %vm21657_vm1, %v18567_v33  ;;  %7706 = vmax.xlane.f32.xlu1 %v7705_v63  ;;  %v19372_v63 = vunpack.i.h.bf16 %v26795_v3 }
 0x51a   : > { %v18591_v11 = vpack.c.bf16 %v19302_v56, %v19301_v4  ;;  %v26801_v56 = vld [vmem:[#allocation61_spill] sm:$0xff]  ;;  %v1562_v4 = vpop.permute.xlu1 %1561 }
 0x51b   : > { %v18603_v55 = vpack.c.bf16 %v19372_v63, %v19371_v34  ;;  %v26808_v34 = vld [vmem:[#allocation99_spill] sm:$0xff] }
 0x51d   : > { %7703 = vmax.xlane.f32.xlu1 %v7702_v47  ;;  %17578 = vmatmul.mubr.msk.f32.vlgmr.msra.gmra.mrb[68].mxu0 %vm2189_vm0, %v26787_v40  ;;  %v26798_v47 = vld [vmem:[#allocation88_spill] sm:$0xff] }
 0x51e   : > { %18590 = vmatpush3.bf16.xpose.msk.msra.mxu0 %vm21657_vm1, %v18585_v0  ;;  %17591 = vmatprep.mubr.msk.f32.mxu0 %vm2189_vm0, %v26788_v27  ;;  %v26792_v0 = vld [vmem:[#allocation109_spill] sm:$0xff] }
 0x51f   : > { %17557 = vmatmul.mubr.msk.f32.vlgmr.msra.gmra.mrb[72].mxu1 %vm2189_vm0, %v26789_v49  ;;  %18599 = vmatprep.subr.msk.bf16.mxu0 %vm21657_vm1, %v18597_v21  ;;  %v19441_v49 = vunpack.i.l.bf16 %v19440_v15 }
 0x520   : > { %18572 = vmatpush3.bf16.xpose.msk.msra.mxu1 %vm21657_vm1, %v18567_v33  ;;  %17570 = vmatprep.mubr.msk.f32.mxu1 %vm2189_vm0, %v1530_v31  ;;  %v19201_v33 = vunpack.i.l.bf16 %v26794_v51  ;;  %v19442_v31 = vunpack.i.h.bf16 %v19440_v15 }
 0x521   : > { %18581 = vmatprep.subr.msk.bf16.mxu1 %vm21657_vm1, %v18579_v50 }
 0x522   : > { %v17334_v60 = vpop.f32.mrb[40].mxu1  ;;  %v18621_v25 = vpack.c.bf16 %v19202_v58, %v19201_v33  ;;  %v19445_v58 = vpop.permute.xlu1 %19444  ;;  %v26806_v33 = vld [vmem:[#allocation45_spill] sm:$0xff] }
 0x523   : > { %v22940_v20 = vmul.f32 0.25, %v17334_v60  ;;  %v3343_v62 = vpop.f32.mrb[41].mxu1  ;;  %v18615_v60 = vpack.c.bf16 %v19442_v31, %v19441_v49  ;;  %v26814_v31 = vld [vmem:[#allocation64_spill] sm:$0xff] }
 0x524   : > { %v22942_v26 = vmul.f32 0.25, %v3343_v62  ;;  %v26804_v62 = vld [vmem:[#allocation111_spill] sm:$0xff] }
 0x525   : > { %v7711_v37 = vsel %vm2189_vm0, %v22940_v20, -inf  ;;  %17592 = vmatmul.mubr.msk.f32.vlgmr.msra.gmra.mrb[70].mxu0 %vm2189_vm0, %v26791_v22  ;;  %v19341_v22 = vunpack.i.l.bf16 %v26804_v62 }
 0x526   : > { %7712 = vmax.xlane.f32.xlu0 %v7711_v37  ;;  %18602 = vmatpush3.bf16.xpose.msk.msra.mxu0 %vm21657_vm1, %v18597_v21  ;;  %v26799_v21 = vld [vmem:[#allocation83_spill] sm:$0xff]  ;;  %v19342_v37 = vunpack.i.h.bf16 %v26804_v62  ;;  %v23022_v15 = vpop.permute.xlu1 %19454  ;;  %v26821_v62 = vld [vmem:[#allocation25_spill] sm:$0xff] }
 0x527   : > { %17571 = vmatmul.mubr.msk.f32.vlgmr.msra.gmra.mrb[74].mxu1 %vm2189_vm0, %v22495_v5  ;;  %17605 = vmatprep.mubr.msk.f32.mxu0 %vm2189_vm0, %v26792_v0  ;;  %v7708_v5 = vsel %vm2189_vm0, %v22942_v26, -inf  ;;  %v19272_v40 = vunpack.i.h.bf16 %v26799_v21  ;;  %v19271_v27 = vunpack.i.l.bf16 %v26799_v21  ;;  %26810 = vst [vmem:[#allocation123_spill] sm:$0xff] %v23022_v15 }
 0x528   : > { %18584 = vmatpush3.bf16.xpose.msk.msra.mxu1 %vm21657_vm1, %v18579_v50  ;;  %17584 = vmatprep.mubr.msk.f32.mxu1 %vm2189_vm0, %v26793_v1  ;;  %v19410_v50 = vpop.permute.xlu0 %19409  ;;  %v18645_v51 = vpack.c.bf16 %v19342_v37, %v19341_v22  ;;  %v26822_v37 = vld [vmem:[#allocation90_spill] sm:$0xff] }
 0x529   : > { %18611 = vmatprep.subr.msk.bf16.mxu0 %vm21657_vm1, %v18609_v13  ;;  %18593 = vmatprep.subr.msk.bf16.mxu1 %vm21657_vm1, %v18591_v11  ;;  %v18633_v24 = vpack.c.bf16 %v19272_v40, %v19271_v27  ;;  %v26812_v40 = vld [vmem:[#allocation65_spill] sm:$0xff] }
 0x52a   : > { %7709 = vmax.xlane.f32.xlu0 %v7708_v5  ;;  %v26807_v5 = vld [vmem:[#allocation85_spill] sm:$0xff]  ;;  %v23040_v49 = vpop.permute.xlu1 %19459 }
 0x52b   : > { %v26813_v27 = vld [vmem:[#allocation113_spill] sm:$0xff]  ;;  %26815 = vst [vmem:[#allocation47_spill] sm:$0xff] %v23040_v49 }
 0x52d   : > { %17606 = vmatmul.mubr.msk.f32.vlgmr.msra.gmra.mrb[72].mxu0 %vm2189_vm0, %v26796_v28  ;;  %v26809_v28 = vld [vmem:[#allocation89_spill] sm:$0xff] }
 0x52e   : > { %18614 = vmatpush3.bf16.xpose.msk.msra.mxu0 %vm21657_vm1, %v18609_v13  ;;  %17619 = vmatprep.mubr.msk.f32.mxu0 %vm2189_vm0, %v1558_v38  ;;  %v26805_v13 = vld [vmem:[#allocation62_spill] sm:$0xff]  ;;  %v19411_v38 = vunpack.i.l.bf16 %v19410_v50 }
 0x52f   : > { %17585 = vmatmul.mubr.msk.f32.vlgmr.msra.gmra.mrb[76].mxu1 %vm2189_vm0, %v26797_v30  ;;  %18623 = vmatprep.subr.msk.bf16.mxu0 %vm21657_vm1, %v18621_v25  ;;  %v19237_v0 = vunpack.i.h.bf16 %v26805_v13  ;;  %v19236_v1 = vunpack.i.l.bf16 %v26805_v13  ;;  %v19306_v30 = vunpack.i.l.bf16 %v26809_v28  ;;  %v19446_v13 = vunpack.i.l.bf16 %v19445_v58 }
 0x530   : > { %18596 = vmatpush3.bf16.xpose.msk.msra.mxu1 %vm21657_vm1, %v18591_v11  ;;  %17598 = vmatprep.mubr.msk.f32.mxu1 %vm2189_vm0, %v26798_v47  ;;  %v1590_v11 = vpop.permute.xlu0 %1589 }
 0x531   : > { %18605 = vmatprep.subr.msk.bf16.mxu1 %vm21657_vm1, %v18603_v55  ;;  %v18627_v3 = vpack.c.bf16 %v19237_v0, %v19236_v1  ;;  %v26825_v1 = vld [vmem:[#allocation120_spill] sm:$0xff] }
 0x534   : > { %v1594_v63 = vpop.permute.xlu0 %1593 }
 0x535   : > { %17620 = vmatmul.mubr.msk.f32.vlgmr.msra.gmra.mrb[74].mxu0 %vm2189_vm0, %v26800_v29 }
 0x536   : > { %18626 = vmatpush3.bf16.xpose.msk.msra.mxu0 %vm21657_vm1, %v18621_v25  ;;  %17633 = vmatprep.mubr.msk.f32.mxu0 %vm2189_vm0, %v26801_v56  ;;  %v19412_v25 = vunpack.i.h.bf16 %v19410_v50 }
 0x537   : > { %17599 = vmatmul.mubr.msk.f32.vlgmr.msra.gmra.mrb[78].mxu1 %vm2189_vm0, %v26802_v23  ;;  %18635 = vmatprep.subr.msk.bf16.mxu0 %vm21657_vm1, %v18633_v24  ;;  %v23053_v23 = vpop.permute.xlu1 %19464 }
 0x538   : > { %18608 = vmatpush3.bf16.xpose.msk.msra.mxu1 %vm21657_vm1, %v18603_v55  ;;  %17612 = vmatprep.mubr.msk.f32.mxu1 %vm2189_vm0, %v26803_v41  ;;  %v19307_v55 = vunpack.i.h.bf16 %v26809_v28  ;;  %v18657_v47 = vpack.c.bf16 %v19412_v25, %v19411_v38  ;;  %v23024_v21 = vpop.permute.xlu0 %19449  ;;  %26819 = vst [vmem:[#allocation91_spill] sm:$0xff] %v23053_v23  ;;  %v26820_v41 = vld [vmem:[#allocation63_spill] sm:$0xff] }
 0x539   : > { %18617 = vmatprep.subr.msk.bf16.mxu1 %vm21657_vm1, %v18615_v60  ;;  %26811 = vst [vmem:[#allocation48_spill] sm:$0xff] %v23024_v21  ;;  %v26832_v38 = vld [vmem:[#allocation115_spill] sm:$0xff] }
 0x53a   : > { %v18639_v50 = vpack.c.bf16 %v19307_v55, %v19306_v30  ;;  %v26834_v55 = vld [vmem:[#allocation29_spill] sm:$0xff] }
 0x53b   : > { %v23066_v0 = vpop.permute.xlu1 %19469 }
 0x53c   : > { %26824 = vst [vmem:[#allocation76_spill] sm:$0xff] %v23066_v0 }
 0x53d   : > { %17634 = vmatmul.mubr.msk.f32.vlgmr.msra.gmra.mrb[76].mxu0 %vm2189_vm0, %v26806_v33 }
 0x53e   : > { %18638 = vmatpush3.bf16.xpose.msk.msra.mxu0 %vm21657_vm1, %v18633_v24  ;;  %17647 = vmatprep.mubr.msk.f32.mxu0 %vm2189_vm0, %v26807_v5  ;;  %v26816_v24 = vld [vmem:[#allocation117_spill] sm:$0xff]  ;;  %v26827_v5 = vld [vmem:[#allocation87_spill] sm:$0xff] }
 0x53f   : > { %17613 = vmatmul.mubr.msk.f32.vlgmr.msra.gmra.mrb[80].mxu1 %vm2189_vm0, %v26808_v34  ;;  %18647 = vmatprep.subr.msk.bf16.mxu0 %vm21657_vm1, %v18645_v51  ;;  %v19377_v29 = vunpack.i.h.bf16 %v26816_v24  ;;  %v19376_v56 = vunpack.i.l.bf16 %v26816_v24  ;;  %v26829_v34 = vld [vmem:[#allocation118_spill] sm:$0xff] }
 0x540   : > { %18620 = vmatpush3.bf16.xpose.msk.msra.mxu1 %vm21657_vm1, %v18615_v60  ;;  %17626 = vmatprep.mubr.msk.f32.mxu1 %vm2189_vm0, %v1562_v4  ;;  %v23046_v60 = vpop.permute.xlu0 %19474 }
 0x541   : > { %18629 = vmatprep.subr.msk.bf16.mxu1 %vm21657_vm1, %v18627_v3  ;;  %26817 = vst [vmem:[#allocation102_spill] sm:$0xff] %v23046_v60  ;;  %v18651_v4 = vpack.c.bf16 %v19377_v29, %v19376_v56 }
 0x544   : > { %v23062_v22 = vpop.permute.xlu0 %19479 }
 0x545   : > { %17648 = vmatmul.mubr.msk.f32.vlgmr.msra.gmra.mrb[78].mxu0 %vm2189_vm0, %v26812_v40  ;;  %26823 = vst [vmem:[#allocation40_spill] sm:$0xff] %v23062_v22 }
 0x546   : > { %18650 = vmatpush3.bf16.xpose.msk.msra.mxu0 %vm21657_vm1, %v18645_v51  ;;  %17661 = vmatprep.mubr.msk.f32.mxu0 %vm2189_vm0, %v26813_v27 }
 0x547   : > { %17627 = vmatmul.mubr.msk.f32.vlgmr.msra.gmra.mrb[82].mxu1 %vm2189_vm0, %v22506_v52  ;;  %18659 = vmatprep.subr.msk.bf16.mxu0 %vm21657_vm1, %v18657_v47  ;;  %v26818_v52 = vld [vmem:[#allocation92_spill] sm:$0xff] }
 0x548   : > { %18632 = vmatpush3.bf16.xpose.msk.msra.mxu1 %vm21657_vm1, %v18627_v3  ;;  %17640 = vmatprep.mubr.msk.f32.mxu1 %vm2189_vm0, %v26814_v31  ;;  %v23071_v33 = vpop.permute.xlu0 %19484  ;;  %v26828_v3 = vld [vmem:[#allocation33_spill] sm:$0xff] }
 0x549   : > { %18641 = vmatprep.subr.msk.bf16.mxu1 %vm21657_vm1, %v18639_v50  ;;  %26826 = vst [vmem:[#allocation73_spill] sm:$0xff] %v23071_v33 }
 0x54c   : > { %v23084_v25 = vpop.permute.xlu0 %19504 }
 0x54d   : > { %17662 = vmatmul.mubr.msk.f32.vlgmr.msra.gmra.mrb[80].mxu0 %vm2189_vm0, %v26818_v52  ;;  %26831 = vst [vmem:[#allocation68_spill] sm:$0xff] %v23084_v25 }
 0x54e   : > { %18662 = vmatpush3.bf16.xpose.msk.msra.mxu0 %vm21657_vm1, %v18657_v47  ;;  %17675 = vmatprep.mubr.msk.f32.mxu0 %vm2189_vm0, %v1590_v11  ;;  %v19447_v11 = vunpack.i.h.bf16 %v19445_v58  ;;  %v23082_v58 = vpop.permute.xlu1 %19489 }
 0x54f   : > { %17641 = vmatmul.mubr.msk.f32.vlgmr.msra.gmra.mrb[84].mxu1 %vm2189_vm0, %v26820_v41  ;;  %18670 = vmatprep.subr.bf16.mxu0 %v26821_v62  ;;  %26830 = vst [vmem:[#allocation119_spill] sm:$0xff] %v23082_v58 }
 0x550   : > { %18644 = vmatpush3.bf16.xpose.msk.msra.mxu1 %vm21657_vm1, %v18639_v50  ;;  %17654 = vmatprep.mubr.msk.f32.mxu1 %vm2189_vm0, %v26822_v37  ;;  %v18663_v51 = vpack.c.bf16 %v19447_v11, %v19446_v13  ;;  %v23094_v30 = vpop.permute.xlu0 %19509 }
 0x551   : > { %18653 = vmatprep.subr.msk.bf16.mxu1 %vm21657_vm1, %v18651_v4  ;;  %26835 = vst [vmem:[#allocation104_spill] sm:$0xff] %v23094_v30 }
 0x552   : > { %v23091_v28 = vpop.permute.xlu1 %19494 }
 0x553   : > { %26833 = vst [vmem:[#allocation49_spill] sm:$0xff] %v23091_v28 }
 0x554   : > { %v23103_v50 = vpop.permute.xlu0 %19514 }
 0x555   : > { %17676 = vmatmul.mubr.msk.f32.vlgmr.msra.gmra.mrb[82].mxu0 %vm2189_vm0, %v26825_v1  ;;  %26837 = vst [vmem:[#allocation50_spill] sm:$0xff] %v23103_v50 }
 0x556   : > { %18672 = vmatpush3.bf16.msra.mxu0 %v26821_v62  ;;  %v23096_v47 = vpop.permute.xlu1 %19499 }
 0x557   : > { %17655 = vmatmul.mubr.msk.f32.vlgmr.msra.gmra.mrb[86].mxu1 %vm2189_vm0, %v26827_v5  ;;  %18678 = vmatprep.subr.bf16.mxu0 %v26828_v3  ;;  %26836 = vst [vmem:[#allocation100_spill] sm:$0xff] %v23096_v47 }
 0x558   : > { %18656 = vmatpush3.bf16.xpose.msk.msra.mxu1 %vm21657_vm1, %v18651_v4  ;;  %17668 = vmatprep.mubr.msk.f32.mxu1 %vm2189_vm0, %v26829_v34  ;;  %v7632_v56 = vpop.xlane.xlu0 %7631 }
 0x559   : > { %18665 = vmatprep.subr.msk.bf16.mxu1 %vm21657_vm1, %v18663_v51 }
 0x55a   : > { %v7635_v29 = vpop.xlane.xlu1 %7634 }
 0x55c   : > { %v7641_v11 = vpop.xlane.xlu0 %7640 }
 0x55f   : > { %17669 = vmatmul.mubr.msk.f32.vlgmr.msra.gmra.mrb[88].mxu1 %vm2189_vm0, %v26832_v38 }
 0x560   : > { %18668 = vmatpush3.bf16.xpose.msk.msra.mxu1 %vm21657_vm1, %v18663_v51  ;;  %17682 = vmatprep.mubr.msk.f32.mxu1 %vm2189_vm0, %v1594_v63  ;;  %v26838_v63 = vld [vmem:[#allocation37_spill] sm:$0xff]  ;;  %v23121_v5 = vpop.xlane.xlu0 %7637 }
 0x561   : > { %18674 = vmatprep.subr.bf16.mxu1 %v26834_v55 }
 0x567   : > { %17683 = vmatmul.mubr.msk.f32.vlgmr.msra.gmra.mrb[90].mxu1 %vm2189_vm0, %v22527_v61  ;;  %v17341_v40 = vpop.f32.mrb[34].mxu0  ;;  %v8015_v61 = vsub.f32 %v22509_v48, %v7635_v29 }
 0x568   : > { %18676 = vmatpush3.bf16.msra.mxu1 %v26834_v55  ;;  %v23101_v27 = vmul.f32 0.25, %v17341_v40  ;;  %v3426_v19 = vpop.f32.mrb[35].mxu0 }
 0x569   : > { %18682 = vmatprep.subr.bf16.mxu1 %v26838_v63  ;;  %v23106_v31 = vmul.f32 0.25, %v3426_v19  ;;  %v8144_v37 = vmul.f32 1.442695, %v8015_v61  ;;  %v8014_v61 = vsub.f32 %v22470_v57, %v7632_v56 }
 0x56a   : > { %v7717_v24 = vsel %vm2189_vm0, %v23101_v27, -inf }
 0x56b   : > { %7718 = vmax.xlane.f32.xlu1 %v7717_v24  ;;  %v7714_v52 = vsel %vm2189_vm0, %v23106_v31, -inf  ;;  %20040 = vpow2.f32 %v8144_v37 }
 0x56f   : > { %7715 = vmax.xlane.f32.xlu1 %v7714_v52 }
 0x570   : > { %v17355_v4 = vpop.f32.mrb[36].mxu0 }
 0x571   : > { %v23113_v41 = vmul.f32 0.25, %v17355_v4  ;;  %v3592_v62 = vpop.f32.mrb[37].mxu0 }
 0x572   : > { %v23115_v13 = vmul.f32 0.25, %v3592_v62  ;;  %v7647_v62 = vpop.xlane.xlu0 %7646 }
 0x573   : > { %v7729_v1 = vsel %vm2189_vm0, %v23113_v41, -inf }
 0x574   : > { %26839 = vst [vmem:[#allocation39_spill] sm:$0xff] %v23115_v13  ;;  %7730 = vmax.xlane.f32.xlu1 %v7729_v1  ;;  %v7726_v48 = vsel %vm2189_vm0, %v23115_v13, -inf }
 0x575   : > { %v23138_v1 = vpop.eup %20040 }
 0x576   : > { %v8401_v23 = vsel %vm2189_vm0, %v23138_v1, 0.0 }
 0x578   : > { %7727 = vmax.xlane.f32.xlu1 %v7726_v48  ;;  %v17369_v51 = vpop.f32.mrb[38].mxu0  ;;  %v8142_v48 = vmul.f32 1.442695, %v8014_v61  ;;  %v8017_v61 = vsub.f32 %v22477_v9, %v7641_v11 }
 0x579   : > { %v23123_v34 = vmul.f32 0.25, %v17369_v51  ;;  %v3758_v38 = vpop.f32.mrb[39].mxu0 }
 0x57a   : > { %v17348_v55 = vpop.f32.mrb[42].mxu1  ;;  %v23127_v19 = vmul.f32 0.25, %v3758_v38  ;;  %v7659_v38 = vpop.xlane.xlu1 %7658  ;;  %20042 = vpow2.f32 %v8142_v48  ;;  %v8148_v28 = vmul.f32 1.442695, %v8017_v61  ;;  %v8016_v61 = vsub.f32 %v22486_v46, %v23121_v5 }
 0x57b   : > { %26840 = vst [vmem:[#allocation74_spill] sm:$0xff] %v23123_v34  ;;  %v23125_v40 = vmul.f32 0.25, %v17348_v55  ;;  %v3509_v24 = vpop.f32.mrb[43].mxu1  ;;  %v7741_v29 = vsel %vm2189_vm0, %v23123_v34, -inf  ;;  %v8019_v55 = vsub.f32 %v22500_v18, %v7647_v62  ;;  %v8023_v62 = vsub.f32 %v22522_v7, %v7659_v38 }
 0x57c   : > { %26841 = vst [vmem:[#allocation96_spill] sm:$0xff] %v23127_v19  ;;  %7742 = vmax.xlane.f32.xlu1 %v7741_v29  ;;  %v23132_v52 = vmul.f32 0.25, %v3509_v24  ;;  %v7738_v37 = vsel %vm2189_vm0, %v23127_v19, -inf }
 0x57d   : > { %v7723_v4 = vsel %vm2189_vm0, %v23125_v40, -inf  ;;  %v8152_v18 = vmul.f32 1.442695, %v8019_v55 }
 0x57e   : > { %7724 = vmax.xlane.f32.xlu0 %v7723_v4  ;;  %v7720_v57 = vsel %vm2189_vm0, %v23132_v52, -inf }
 0x57f   : > { %20044 = vpow2.f32 %v8152_v18 }
 0x580   : > { %7739 = vmax.xlane.f32.xlu1 %v7738_v37  ;;  %v17383_v51 = vpop.f32.mrb[40].mxu0  ;;  %20046 = vpow2.f32 %v8148_v28 }
 0x581   : > { %v3924_v56 = vpop.f32.mrb[41].mxu0  ;;  %v23143_v29 = vmul.f32 0.25, %v17383_v51  ;;  %v7656_v51 = vpop.xlane.xlu1 %7655 }
 0x582   : > { %v17362_v24 = vpop.f32.mrb[44].mxu1  ;;  %7721 = vmax.xlane.f32.xlu0 %v7720_v57  ;;  %v23155_v57 = vmul.f32 0.25, %v3924_v56  ;;  %v8022_v11 = vsub.f32 %v22538_v8, %v7656_v51 }
 0x583   : > { %26842 = vst [vmem:[#allocation78_spill] sm:$0xff] %v23143_v29  ;;  %v23145_v4 = vmul.f32 0.25, %v17362_v24  ;;  %v3675_v47 = vpop.f32.mrb[45].mxu1  ;;  %v7753_v24 = vsel %vm2189_vm0, %v23143_v29, -inf }
 0x584   : > { %8402 = vadd.xlane.f32.xlu1 %v8401_v23  ;;  %v23150_v37 = vmul.f32 0.25, %v3675_v47  ;;  %26845 = vst [vmem:[#allocation125_spill] sm:$0xff] %v23155_v57  ;;  %v8160_v47 = vmul.f32 1.442695, %v8023_v62  ;;  %v7750_v56 = vsel %vm2189_vm0, %v23155_v57, -inf  ;;  %v23172_v62 = vpop.eup %20042 }
 0x585   : > { %26843 = vst [vmem:[#allocation66_spill] sm:$0xff] %v23145_v4  ;;  %v7735_v50 = vsel %vm2189_vm0, %v23145_v4, -inf  ;;  %v8158_v8 = vmul.f32 1.442695, %v8022_v11  ;;  %v8398_v46 = vsel %vm2189_vm0, %v23172_v62, 0.0 }
 0x586   : > { %26844 = vst [vmem:[#allocation101_spill] sm:$0xff] %v23150_v37  ;;  %7736 = vmax.xlane.f32.xlu0 %v7735_v50  ;;  %v7732_v9 = vsel %vm2189_vm0, %v23150_v37, -inf  ;;  %20048 = vpow2.f32 %v8160_v47 }
 0x587   : > { %20050 = vpow2.f32 %v8158_v8 }
 0x588   : > { %7754 = vmax.xlane.f32.xlu1 %v7753_v24  ;;  %v17397_v48 = vpop.f32.mrb[42].mxu0 }
 0x589   : > { %v4090_v23 = vpop.f32.mrb[43].mxu0  ;;  %v23162_v7 = vmul.f32 0.25, %v17397_v48  ;;  %v8146_v48 = vmul.f32 1.442695, %v8016_v61  ;;  %v23184_v11 = vpop.eup %20044 }
 0x58a   : > { %v17376_v55 = vpop.f32.mrb[46].mxu1  ;;  %7733 = vmax.xlane.f32.xlu0 %v7732_v9  ;;  %v23174_v51 = vmul.f32 0.25, %v4090_v23  ;;  %v7671_v9 = vpop.xlane.xlu1 %7670 }
 0x58b   : > { %26846 = vst [vmem:[#allocation52_spill] sm:$0xff] %v23162_v7  ;;  %v23164_v50 = vmul.f32 0.25, %v17376_v55  ;;  %v3841_v38 = vpop.f32.mrb[47].mxu1  ;;  %v7765_v24 = vsel %vm2189_vm0, %v23162_v7, -inf  ;;  %20052 = vpow2.f32 %v8146_v48  ;;  %v7644_v61 = vpop.xlane.xlu0 %7643 }
 0x58c   : > { %7751 = vmax.xlane.f32.xlu1 %v7750_v56  ;;  %26848 = vst [vmem:[#allocation106_spill] sm:$0xff] %v23174_v51  ;;  %v23178_v55 = vmul.f32 0.25, %v3841_v38  ;;  %v7762_v23 = vsel %vm2189_vm0, %v23174_v51, -inf  ;;  %v8018_v30 = vsub.f32 %v22512_v44, %v7644_v61 }
 0x58d   : > { %26847 = vst [vmem:[#allocation51_spill] sm:$0xff] %v23164_v50  ;;  %v7747_v18 = vsel %vm2189_vm0, %v23164_v50, -inf }
 0x58e   : > { %7748 = vmax.xlane.f32.xlu0 %v7747_v18  ;;  %26849 = vst [vmem:[#allocation93_spill] sm:$0xff] %v23178_v55  ;;  %v7744_v38 = vsel %vm2189_vm0, %v23178_v55, -inf  ;;  %v23188_v18 = vpop.eup %20046  ;;  %v7668_v8 = vpop.xlane.xlu1 %7667  ;;  %v8150_v44 = vmul.f32 1.442695, %v8018_v30 }
 0x58f   : > { %v8407_v49 = vsel %vm2189_vm0, %v23188_v18, 0.0 }
 0x590   : > { %7766 = vmax.xlane.f32.xlu1 %v7765_v24  ;;  %v17411_v28 = vpop.f32.mrb[44].mxu0  ;;  %v8027_v24 = vsub.f32 %v22556_v32, %v7671_v9  ;;  %v23193_v22 = vpop.eup %20048  ;;  %v8026_v32 = vsub.f32 %v22579_v35, %v7668_v8  ;;  %v26854_v8 = vld [vmem:[#allocation126_spill] sm:$0xff] }
 0x591   : > { %v4256_v5 = vpop.f32.mrb[45].mxu0  ;;  %26850 = vst [vmem:[#allocation42_spill] sm:$0xff] %v23193_v22  ;;  %v8425_v15 = vsel %vm2189_vm0, %v23193_v22, 0.0  ;;  %v23205_v7 = vpop.eup %20050  ;;  %v23211_v35 = vmul.f32 0.25, %v17411_v28 }
 0x592   : > { %v17390_v56 = vpop.f32.mrb[48].mxu1  ;;  %8399 = vadd.xlane.f32.xlu0 %v8398_v46  ;;  %v8413_v46 = vsel %vm2189_vm0, %v23184_v11, 0.0  ;;  %v8168_v58 = vmul.f32 1.442695, %v8027_v24  ;;  %26852 = vst [vmem:[#allocation75_spill] sm:$0xff] %v23205_v7  ;;  %v23222_v28 = vmul.f32 0.25, %v4256_v5 }
 0x593   : > { %v4007_v47 = vpop.f32.mrb[49].mxu1  ;;  %v8166_v24 = vmul.f32 1.442695, %v8026_v32  ;;  %26853 = vst [vmem:[#allocation121_spill] sm:$0xff] %v23211_v35 }
 0x594   : > { %7763 = vmax.xlane.f32.xlu1 %v7762_v23  ;;  %v23196_v23 = vmul.f32 0.25, %v17390_v56  ;;  %v7653_v56 = vpop.xlane.xlu0 %7652  ;;  %20054 = vpow2.f32 %v8168_v58  ;;  %26856 = vst [vmem:[#allocation70_spill] sm:$0xff] %v23222_v28 }
 0x595   : > { %20056 = vpow2.f32 %v8150_v44  ;;  %v8021_v25 = vsub.f32 %v26854_v8, %v7653_v56  ;;  %v7777_v44 = vsel %vm2189_vm0, %v23211_v35, -inf }
 0x596   : > { %7745 = vmax.xlane.f32.xlu0 %v7744_v38  ;;  %26851 = vst [vmem:[#allocation80_spill] sm:$0xff] %v23196_v23  ;;  %v7759_v61 = vsel %vm2189_vm0, %v23196_v23, -inf  ;;  %20058 = vpow2.f32 %v8166_v24  ;;  %v7774_v24 = vsel %vm2189_vm0, %v23222_v28, -inf }
 0x597   : > { %v8156_v56 = vmul.f32 1.442695, %v8021_v25 }
 0x598   : > { %8414 = vadd.xlane.f32.xlu1 %v8413_v46  ;;  %v17425_v48 = vpop.f32.mrb[46].mxu0  ;;  %v23209_v46 = vpop.eup %20052 }
 0x599   : > { %v23200_v60 = vpop.f32.mrb[47].mxu0  ;;  %v8404_v57 = vsel %vm2189_vm0, %v23209_v46, 0.0  ;;  %20060 = vpow2.f32 %v8156_v56 }
 0x59a   : > { %v17404_v9 = vpop.f32.mrb[50].mxu1  ;;  %8408 = vadd.xlane.f32.xlu0 %v8407_v49  ;;  %v8422_v49 = vsel %vm2189_vm0, %v23205_v7, 0.0 }
 0x59b   : > { %v4173_v38 = vpop.f32.mrb[51].mxu1 }
 0x59c   : > { %8426 = vadd.xlane.f32.xlu1 %v8425_v15  ;;  %v23216_v15 = vmul.f32 0.25, %v4007_v47  ;;  %v23228_v47 = vmul.f32 0.25, %v17404_v9 }
 0x59e   : > { %7760 = vmax.xlane.f32.xlu0 %v7759_v61  ;;  %26855 = vst [vmem:[#allocation53_spill] sm:$0xff] %v23216_v15  ;;  %v7650_v61 = vpop.xlane.xlu0 %7649  ;;  %26857 = vst [vmem:[#allocation108_spill] sm:$0xff] %v23228_v47  ;;  %v7771_v25 = vsel %vm2189_vm0, %v23228_v47, -inf  ;;  %v23255_v47 = vmul.f32 0.25, %v17425_v48  ;;  %v23269_v48 = vmul.f32 0.25, %v23200_v60 }
 0x59f   : > { %v8020_v5 = vsub.f32 %v22547_v14, %v7650_v61 }
 0x5a0   : > { %8423 = vadd.xlane.f32.xlu1 %v8422_v49  ;;  %v17439_v30 = vpop.f32.mrb[48].mxu0  ;;  %v7756_v49 = vsel %vm2189_vm0, %v23216_v15, -inf  ;;  %26861 = vst [vmem:[#allocation77_spill] sm:$0xff] %v23255_v47  ;;  %26863 = vst [vmem:[#allocation82_spill] sm:$0xff] %v23269_v48  ;;  %v7786_v60 = vsel %vm2189_vm0, %v23269_v48, -inf }
 0x5a1   : > { %v23220_v29 = vpop.f32.mrb[49].mxu0  ;;  %v8154_v14 = vmul.f32 1.442695, %v8020_v5  ;;  %v23279_v50 = vmul.f32 0.25, %v17439_v30 }
 0x5a2   : > { %v17418_v58 = vpop.f32.mrb[52].mxu1  ;;  %8405 = vadd.xlane.f32.xlu0 %v8404_v57  ;;  %v23234_v57 = vpop.eup %20054  ;;  %v23291_v30 = vmul.f32 0.25, %v23220_v29 }
 0x5a3   : > { %v23224_v32 = vpop.f32.mrb[53].mxu1  ;;  %26858 = vst [vmem:[#allocation103_spill] sm:$0xff] %v23234_v57  ;;  %v23241_v9 = vpop.eup %20056  ;;  %v8437_v28 = vsel %vm2189_vm0, %v23234_v57, 0.0  ;;  %20062 = vpow2.f32 %v8154_v14  ;;  %26865 = vst [vmem:[#allocation105_spill] sm:$0xff] %v23279_v50 }
 0x5a4   : > { %7778 = vmax.xlane.f32.xlu1 %v7777_v44  ;;  %v23249_v56 = vpop.eup %20058  ;;  %v7665_v61 = vpop.xlane.xlu0 %7664  ;;  %v8410_v15 = vsel %vm2189_vm0, %v23241_v9, 0.0  ;;  %26867 = vst [vmem:[#allocation55_spill] sm:$0xff] %v23291_v30  ;;  %v7798_v29 = vsel %vm2189_vm0, %v23291_v30, -inf }
 0x5a5   : > { %26859 = vst [vmem:[#allocation54_spill] sm:$0xff] %v23249_v56  ;;  %v8025_v51 = vsub.f32 %v22566_v36, %v7665_v61  ;;  %v7789_v36 = vsel %vm2189_vm0, %v23255_v47, -inf }
 0x5a6   : > { %7757 = vmax.xlane.f32.xlu0 %v7756_v49 }
 0x5a7   : > { %v8164_v14 = vmul.f32 1.442695, %v8025_v51 }
 0x5a8   : > { %7775 = vmax.xlane.f32.xlu1 %v7774_v24  ;;  %v17453_v8 = vpop.f32.mrb[50].mxu0  ;;  %v23251_v24 = vmul.f32 0.25, %v4173_v38  ;;  %v23264_v38 = vpop.eup %20060 }
 0x5a9   : > { %v23239_v44 = vpop.f32.mrb[51].mxu0  ;;  %26862 = vst [vmem:[#allocation97_spill] sm:$0xff] %v23264_v38  ;;  %v7662_v61 = vpop.xlane.xlu0 %7661  ;;  %20064 = vpow2.f32 %v8164_v14  ;;  %v7801_v14 = vsel %vm2189_vm0, %v23279_v50, -inf }
 0x5aa   : > { %v23243_v35 = vpop.f32.mrb[54].mxu1  ;;  %7772 = vmax.xlane.f32.xlu0 %v7771_v25  ;;  %26860 = vst [vmem:[#allocation41_spill] sm:$0xff] %v23251_v24  ;;  %v8434_v25 = vsel %vm2189_vm0, %v23249_v56, 0.0 }
 0x5ab   : > { %v23245_v49 = vpop.f32.mrb[55].mxu1 }
 0x5ac   : > { %8438 = vadd.xlane.f32.xlu1 %v8437_v28  ;;  %v7768_v28 = vsel %vm2189_vm0, %v23251_v24, -inf  ;;  %v8419_v24 = vsel %vm2189_vm0, %v23264_v38, 0.0 }
 0x5ae   : > { %8411 = vadd.xlane.f32.xlu0 %v8410_v15 }
 0x5b0   : > { %8435 = vadd.xlane.f32.xlu1 %v8434_v25  ;;  %v17467_v55 = vpop.f32.mrb[52].mxu0  ;;  %v23275_v25 = vmul.f32 0.25, %v17418_v58  ;;  %v23286_v58 = vpop.eup %20062 }
 0x5b1   : > { %v23262_v5 = vpop.f32.mrb[53].mxu0  ;;  %26866 = vst [vmem:[#allocation56_spill] sm:$0xff] %v23286_v58  ;;  %v8416_v48 = vsel %vm2189_vm0, %v23286_v58, 0.0 }
 0x5b2   : > { %v23266_v23 = vpop.f32.mrb[56].mxu1  ;;  %7769 = vmax.xlane.f32.xlu0 %v7768_v28  ;;  %26864 = vst [vmem:[#allocation67_spill] sm:$0xff] %v23275_v25  ;;  %v8024_v28 = vsub.f32 %v22582_v43, %v7662_v61  ;;  %v7783_v51 = vsel %vm2189_vm0, %v23275_v25, -inf  ;;  %v7677_v61 = vpop.xlane.xlu0 %7676  ;;  %v23302_v25 = vmul.f32 0.25, %v17453_v8  ;;  %v23314_v8 = vmul.f32 0.25, %v23239_v44 }
 0x5b3   : > { %v23271_v15 = vpop.f32.mrb[57].mxu1 }
 0x5b4   : > { %7790 = vmax.xlane.f32.xlu1 %v7789_v36  ;;  %v8162_v43 = vmul.f32 1.442695, %v8024_v28  ;;  %26869 = vst [vmem:[#allocation94_spill] sm:$0xff] %v23302_v25  ;;  %26871 = vst [vmem:[#allocation84_spill] sm:$0xff] %v23314_v8  ;;  %v7810_v44 = vsel %vm2189_vm0, %v23314_v8, -inf }
 0x5b6   : > { %8420 = vadd.xlane.f32.xlu0 %v8419_v24  ;;  %20066 = vpow2.f32 %v8162_v43  ;;  %v7813_v43 = vsel %vm2189_vm0, %v23302_v25, -inf }
 0x5b8   : > { %7787 = vmax.xlane.f32.xlu1 %v7786_v60  ;;  %v17481_v0 = vpop.f32.mrb[54].mxu0  ;;  %v23298_v60 = vmul.f32 0.25, %v23224_v32  ;;  %v23309_v32 = vpop.eup %20064 }
 0x5b9   : > { %v5086_v36 = vpop.f32.mrb[55].mxu0  ;;  %26870 = vst [vmem:[#allocation44_spill] sm:$0xff] %v23309_v32  ;;  %v8431_v30 = vsel %vm2189_vm0, %v23309_v32, 0.0  ;;  %v23348_v8 = vmul.f32 0.25, %v17481_v0 }
 0x5ba   : > { %v23288_v47 = vpop.f32.mrb[58].mxu1  ;;  %7784 = vmax.xlane.f32.xlu0 %v7783_v51  ;;  %26868 = vst [vmem:[#allocation110_spill] sm:$0xff] %v23298_v60  ;;  %v8029_v51 = vsub.f32 %v22604_v42, %v7677_v61  ;;  %v7780_v28 = vsel %vm2189_vm0, %v23298_v60, -inf  ;;  %v7674_v61 = vpop.xlane.xlu0 %7673  ;;  %v23325_v60 = vmul.f32 0.25, %v17467_v55  ;;  %v23337_v55 = vmul.f32 0.25, %v23262_v5 }
 0x5bb   : > { %v23293_v24 = vpop.f32.mrb[59].mxu1  ;;  %26877 = vst [vmem:[#allocation107_spill] sm:$0xff] %v23348_v8  ;;  %v7837_v0 = vsel %vm2189_vm0, %v23348_v8, -inf }
 0x5bc   : > { %7802 = vmax.xlane.f32.xlu1 %v7801_v14  ;;  %v8172_v42 = vmul.f32 1.442695, %v8029_v51  ;;  %26873 = vst [vmem:[#allocation122_spill] sm:$0xff] %v23325_v60  ;;  %26875 = vst [vmem:[#allocation71_spill] sm:$0xff] %v23337_v55  ;;  %v7822_v5 = vsel %vm2189_vm0, %v23337_v55, -inf }
 0x5be   : > { %8417 = vadd.xlane.f32.xlu0 %v8416_v48  ;;  %20068 = vpow2.f32 %v8172_v42  ;;  %v7825_v42 = vsel %vm2189_vm0, %v23325_v60, -inf }
 0x5c0   : > { %7799 = vmax.xlane.f32.xlu1 %v7798_v29  ;;  %v17495_v50 = vpop.f32.mrb[56].mxu0  ;;  %v23321_v29 = vmul.f32 0.25, %v23243_v35  ;;  %v23332_v35 = vpop.eup %20066 }
 0x5c1   : > { %v5252_v14 = vpop.f32.mrb[57].mxu0  ;;  %26874 = vst [vmem:[#allocation57_spill] sm:$0xff] %v23332_v35  ;;  %v23369_v55 = vmul.f32 0.25, %v17495_v50 }
 0x5c2   : > { %v23311_v19 = vpop.f32.mrb[60].mxu1  ;;  %7781 = vmax.xlane.f32.xlu0 %v7780_v28  ;;  %26872 = vst [vmem:[#allocation79_spill] sm:$0xff] %v23321_v29  ;;  %v8028_v28 = vsub.f32 %v22622_v39, %v7674_v61  ;;  %v7795_v51 = vsel %vm2189_vm0, %v23321_v29, -inf  ;;  %v23344_v61 = vmul.f32 0.25, %v23245_v49  ;;  %v23358_v29 = vmul.f32 0.25, %v5086_v36 }
 0x5c3   : > { %v23316_v48 = vpop.f32.mrb[61].mxu1  ;;  %26881 = vst [vmem:[#allocation98_spill] sm:$0xff] %v23369_v55 }
 0x5c4   : > { %7814 = vmax.xlane.f32.xlu1 %v7813_v43  ;;  %v8170_v39 = vmul.f32 1.442695, %v8028_v28  ;;  %26876 = vst [vmem:[#allocation112_spill] sm:$0xff] %v23344_v61  ;;  %v7792_v60 = vsel %vm2189_vm0, %v23344_v61, -inf  ;;  %26879 = vst [vmem:[#allocation43_spill] sm:$0xff] %v23358_v29 }
 0x5c6   : > { %8432 = vadd.xlane.f32.xlu0 %v8431_v30  ;;  %20070 = vpow2.f32 %v8170_v39  ;;  %v23365_v39 = vmul.f32 0.25, %v23266_v23  ;;  %v23379_v23 = vpop.xlane.xlu1 %7682 }
 0x5c7   : > { %v8031_v33 = vsub.f32 %v22595_v2, %v23379_v23 }
 0x5c8   : > { %7811 = vmax.xlane.f32.xlu1 %v7810_v44  ;;  %v17509_v25 = vpop.f32.mrb[58].mxu0  ;;  %v8428_v44 = vsel %vm2189_vm0, %v23332_v35, 0.0  ;;  %26880 = vst [vmem:[#allocation81_spill] sm:$0xff] %v23365_v39  ;;  %v7807_v61 = vsel %vm2189_vm0, %v23365_v39, -inf }
 0x5c9   : > { %v5418_v43 = vpop.f32.mrb[59].mxu0 }
 0x5ca   : > { %v23334_v38 = vpop.f32.mrb[62].mxu1  ;;  %7796 = vmax.xlane.f32.xlu0 %v7795_v51 }
 0x5cb   : > { %v23339_v30 = vpop.f32.mrb[63].mxu1 }
 0x5cc   : > { %7826 = vmax.xlane.f32.xlu1 %v7825_v42  ;;  %v23354_v42 = vpop.eup %20068 }
 0x5cd   : > { %26878 = vst [vmem:[#allocation58_spill] sm:$0xff] %v23354_v42 }
 0x5ce   : > { %8429 = vadd.xlane.f32.xlu0 %v8428_v44 }
 0x5d0   : > { %7823 = vmax.xlane.f32.xlu1 %v7822_v5  ;;  %v17523_v51 = vpop.f32.mrb[60].mxu0  ;;  %v8443_v5 = vsel %vm2189_vm0, %v23354_v42, 0.0  ;;  %v23394_v42 = vmul.f32 0.25, %v17509_v25  ;;  %v23409_v25 = vmul.f32 0.25, %v5418_v43 }
 0x5d1   : > { %v5584_v28 = vpop.f32.mrb[61].mxu0  ;;  %v23422_v58 = vmul.f32 0.25, %v17523_v51 }
 0x5d2   : > { %v23356_v49 = vpop.f32.mrb[64].mxu1  ;;  %7793 = vmax.xlane.f32.xlu0 %v7792_v60  ;;  %v7834_v60 = vsel %vm2189_vm0, %v23358_v29, -inf  ;;  %v23390_v29 = vmul.f32 0.25, %v23271_v15  ;;  %26885 = vst [vmem:[#allocation60_spill] sm:$0xff] %v23394_v42  ;;  %26887 = vst [vmem:[#allocation114_spill] sm:$0xff] %v23409_v25  ;;  %v7858_v43 = vsel %vm2189_vm0, %v23409_v25, -inf  ;;  %v23443_v25 = vpop.xlane.xlu0 %7688 }
 0x5d3   : > { %v23360_v44 = vpop.f32.mrb[65].mxu1  ;;  %26889 = vst [vmem:[#allocation46_spill] sm:$0xff] %v23422_v58  ;;  %v23496_v56 = vmul.f32 0.25, %v23356_v49 }
 0x5d4   : > { %7838 = vmax.xlane.f32.xlu1 %v7837_v0  ;;  %v23377_v0 = vpop.eup %20070  ;;  %26884 = vst [vmem:[#allocation109_spill] sm:$0xff] %v23390_v29  ;;  %v7804_v15 = vsel %vm2189_vm0, %v23390_v29, -inf }
 0x5d5   : > { %26882 = vst [vmem:[#allocation86_spill] sm:$0xff] %v23377_v0  ;;  %v8440_v39 = vsel %vm2189_vm0, %v23377_v0, 0.0  ;;  %26898 = vst [vmem:[#allocation45_spill] sm:$0xff] %v23496_v56 }
 0x5d6   : > { %8444 = vadd.xlane.f32.xlu0 %v8443_v5  ;;  %v23383_v5 = vmul.f32 0.25, %v5252_v14  ;;  %v23398_v14 = vpop.xlane.xlu1 %7679 }
 0x5d8   : > { %7835 = vmax.xlane.f32.xlu1 %v7834_v60  ;;  %v17537_v36 = vpop.f32.mrb[62].mxu0  ;;  %26883 = vst [vmem:[#allocation69_spill] sm:$0xff] %v23383_v5  ;;  %v7849_v60 = vsel %vm2189_vm0, %v23369_v55, -inf  ;;  %v23403_v55 = vmul.f32 0.25, %v23288_v47  ;;  %v23418_v47 = vmul.f32 0.25, %v23293_v24 }
 0x5d9   : > { %v23375_v32 = vpop.f32.mrb[63].mxu0 }
 0x5da   : > { %v23381_v8 = vpop.f32.mrb[66].mxu1  ;;  %7808 = vmax.xlane.f32.xlu0 %v7807_v61  ;;  %v7846_v61 = vsel %vm2189_vm0, %v23383_v5, -inf  ;;  %26886 = vst [vmem:[#allocation59_spill] sm:$0xff] %v23403_v55  ;;  %v7861_v5 = vsel %vm2189_vm0, %v23394_v42, -inf  ;;  %26888 = vst [vmem:[#allocation95_spill] sm:$0xff] %v23418_v47  ;;  %v7819_v29 = vsel %vm2189_vm0, %v23403_v55, -inf }
 0x5db   : > { %v23385_v50 = vpop.f32.mrb[67].mxu1  ;;  %v23429_v42 = vmul.f32 0.25, %v23311_v19  ;;  %v23446_v19 = vmul.f32 0.25, %v23316_v48 }
 0x5dc   : > { %7850 = vmax.xlane.f32.xlu1 %v7849_v60 }
 0x5dd   : > { %26890 = vst [vmem:[#allocation88_spill] sm:$0xff] %v23429_v42  ;;  %26892 = vst [vmem:[#allocation124_spill] sm:$0xff] %v23446_v19  ;;  %v7828_v48 = vsel %vm2189_vm0, %v23446_v19, -inf }
 0x5de   : > { %8441 = vadd.xlane.f32.xlu0 %v8440_v39 }
 0x5e0   : > { %7847 = vmax.xlane.f32.xlu1 %v7846_v61  ;;  %v23400_v35 = vpop.f32.mrb[64].mxu0  ;;  %v23415_v61 = vpop.xlane.xlu1 %7694 }
 0x5e1   : > { %v23407_v60 = vpop.f32.mrb[65].mxu0 }
 0x5e2   : > { %v17530_v0 = vpop.f32.mrb[68].mxu1  ;;  %7805 = vmax.xlane.f32.xlu0 %v7804_v15 }
 0x5e3   : > { %v23411_v39 = vpop.f32.mrb[69].mxu1 }
 0x5e4   : > { %7862 = vmax.xlane.f32.xlu1 %v7861_v5  ;;  %v7816_v5 = vsel %vm2189_vm0, %v23418_v47, -inf  ;;  %v23435_v34 = vpop.xlane.xlu1 %7691  ;;  %v7831_v47 = vsel %vm2189_vm0, %v23429_v42, -inf  ;;  %v23465_v42 = vpop.xlane.xlu0 %7685 }
 0x5e6   : > { %7820 = vmax.xlane.f32.xlu0 %v7819_v29  ;;  %v23437_v29 = vmul.f32 0.25, %v5584_v28 }
 0x5e8   : > { %7859 = vmax.xlane.f32.xlu1 %v7858_v43  ;;  %v23426_v15 = vpop.f32.mrb[66].mxu0  ;;  %26891 = vst [vmem:[#allocation83_spill] sm:$0xff] %v23437_v29  ;;  %v7873_v43 = vsel %vm2189_vm0, %v23422_v58, -inf  ;;  %v23450_v57 = vpop.xlane.xlu1 %7706  ;;  %v7870_v28 = vsel %vm2189_vm0, %v23437_v29, -inf  ;;  %v23459_v58 = vmul.f32 0.25, %v23334_v38  ;;  %v23478_v38 = vmul.f32 0.25, %v23339_v30 }
 0x5e9   : > { %v23433_v24 = vpop.f32.mrb[67].mxu0 }
 0x5ea   : > { %v17544_v55 = vpop.f32.mrb[70].mxu1  ;;  %7817 = vmax.xlane.f32.xlu0 %v7816_v5  ;;  %v23452_v5 = vmul.f32 0.25, %v17530_v0  ;;  %26894 = vst [vmem:[#allocation72_spill] sm:$0xff] %v23459_v58  ;;  %v23469_v0 = vmul.f32 0.25, %v17537_v36  ;;  %26896 = vst [vmem:[#allocation111_spill] sm:$0xff] %v23478_v38  ;;  %v7843_v19 = vsel %vm2189_vm0, %v23459_v58, -inf }
 0x5eb   : > { %v23439_v51 = vpop.f32.mrb[71].mxu1  ;;  %v23487_v36 = vmul.f32 0.25, %v23375_v32  ;;  %v7840_v2 = vsel %vm2189_vm0, %v23478_v38, -inf  ;;  %v8030_v32 = vsub.f32 %v22617_v59, %v23398_v14  ;;  %v7855_v59 = vsel %vm2189_vm0, %v23496_v56, -inf }
 0x5ec   : > { %7874 = vmax.xlane.f32.xlu1 %v7873_v43  ;;  %26893 = vst [vmem:[#allocation61_spill] sm:$0xff] %v23452_v5  ;;  %26895 = vst [vmem:[#allocation116_spill] sm:$0xff] %v23469_v0  ;;  %v23475_v29 = vpop.xlane.xlu1 %7703 }
 0x5ed   : > { %26897 = vst [vmem:[#allocation62_spill] sm:$0xff] %v23487_v36  ;;  %v7882_v49 = vsel %vm2189_vm0, %v23487_v36, -inf  ;;  %v8174_v14 = vmul.f32 1.442695, %v8030_v32 }
 0x5ee   : > { %7832 = vmax.xlane.f32.xlu0 %v7831_v47 }
 0x5f0   : > { %7871 = vmax.xlane.f32.xlu1 %v7870_v28  ;;  %v23456_v13 = vpop.f32.mrb[68].mxu0  ;;  %v7879_v28 = vsel %vm2189_vm0, %v23452_v5, -inf  ;;  %v7885_v5 = vsel %vm2189_vm0, %v23469_v0, -inf }
 0x5f1   : > { %v23463_v43 = vpop.f32.mrb[69].mxu0 }
 0x5f2   : > { %v23467_v37 = vpop.f32.mrb[72].mxu1  ;;  %7829 = vmax.xlane.f32.xlu0 %v7828_v48  ;;  %v23484_v48 = vpop.xlane.xlu0 %7700 }
 0x5f3   : > { %v23471_v47 = vpop.f32.mrb[73].mxu1 }
 0x5f4   : > { %7880 = vmax.xlane.f32.xlu1 %v7879_v28 }
 0x5f6   : > { %7844 = vmax.xlane.f32.xlu0 %v7843_v19  ;;  %v8176_v19 = vmul.f32 1.442695, %v8031_v33  ;;  %v23512_v22 = vpop.xlane.xlu0 %7697  ;;  %v23517_v33 = vmul.f32 0.25, %v23360_v44  ;;  %v23531_v44 = vmul.f32 0.25, %v23381_v8 }
 0x5f8   : > { %7886 = vmax.xlane.f32.xlu1 %v7885_v5  ;;  %v23491_v28 = vpop.f32.mrb[70].mxu0  ;;  %v23493_v30 = vpop.xlane.xlu1 %7718  ;;  %v23506_v5 = vmul.f32 0.25, %v17544_v55  ;;  %26900 = vst [vmem:[#allocation99_spill] sm:$0xff] %v23517_v33  ;;  %20072 = vpow2.f32 %v8176_v19  ;;  %v23522_v55 = vmul.f32 0.25, %v23407_v60  ;;  %26902 = vst [vmem:[#allocation65_spill] sm:$0xff] %v23531_v44  ;;  %v7852_v56 = vsel %vm2189_vm0, %v23517_v33, -inf }
 0x5f9   : > { %v23500_v23 = vpop.f32.mrb[71].mxu0  ;;  %20074 = vpow2.f32 %v8174_v14  ;;  %v7867_v33 = vsel %vm2189_vm0, %v23531_v44, -inf }
 0x5fa   : > { %v23504_v58 = vpop.f32.mrb[74].mxu1  ;;  %7841 = vmax.xlane.f32.xlu0 %v7840_v2  ;;  %26899 = vst [vmem:[#allocation85_spill] sm:$0xff] %v23506_v5  ;;  %26901 = vst [vmem:[#allocation89_spill] sm:$0xff] %v23522_v55  ;;  %v7891_v2 = vsel %vm2189_vm0, %v23506_v5, -inf  ;;  %v23526_v36 = vpop.xlane.xlu0 %7712  ;;  %v7894_v8 = vsel %vm2189_vm0, %v23522_v55, -inf  ;;  %v23549_v5 = vmul.f32 0.25, %v23385_v50 }
 0x5fb   : > { %v23508_v0 = vpop.f32.mrb[75].mxu1  ;;  %v23566_v50 = vmul.f32 0.25, %v23411_v39 }
 0x5fc   : > { %7883 = vmax.xlane.f32.xlu1 %v7882_v49  ;;  %v23514_v38 = vpop.xlane.xlu1 %7715  ;;  %26904 = vst [vmem:[#allocation64_spill] sm:$0xff] %v23549_v5  ;;  %v7864_v55 = vsel %vm2189_vm0, %v23549_v5, -inf  ;;  %v23587_v5 = vmul.f32 0.25, %v23439_v51  ;;  %v23603_v51 = vmul.f32 0.25, %v23400_v35 }
 0x5fd   : > { %26907 = vst [vmem:[#allocation63_spill] sm:$0xff] %v23566_v50 }
 0x5fe   : > { %7856 = vmax.xlane.f32.xlu0 %v7855_v59  ;;  %v23542_v59 = vmul.f32 0.25, %v23433_v24  ;;  %v23557_v24 = vpop.xlane.xlu0 %7709  ;;  %26910 = vst [vmem:[#allocation120_spill] sm:$0xff] %v23587_v5  ;;  %26913 = vst [vmem:[#allocation118_spill] sm:$0xff] %v23603_v51 }
 0x600   : > { %7892 = vmax.xlane.f32.xlu1 %v7891_v2  ;;  %v23528_v49 = vpop.f32.mrb[72].mxu0  ;;  %26903 = vst [vmem:[#allocation113_spill] sm:$0xff] %v23542_v59  ;;  %v7906_v14 = vsel %vm2189_vm0, %v23542_v59, -inf }
 0x601   : > { %v23535_v19 = vpop.xlane.xlu1 %7730  ;;  %v23537_v32 = vpop.f32.mrb[73].mxu0 }
 0x602   : > { %v23539_v60 = vpop.f32.mrb[76].mxu1  ;;  %7853 = vmax.xlane.f32.xlu0 %v7852_v56  ;;  %v8035_v56 = vsub.f32 %v22675_v6, %v23415_v61  ;;  %v23561_v7 = vpop.eup %20072 }
 0x603   : > { %v23544_v2 = vpop.f32.mrb[77].mxu1  ;;  %26906 = vst [vmem:[#allocation92_spill] sm:$0xff] %v23561_v7  ;;  %v8449_v39 = vsel %vm2189_vm0, %v23561_v7, 0.0  ;;  %v23584_v21 = vpop.eup %20074 }
 0x604   : > { %7895 = vmax.xlane.f32.xlu1 %v7894_v8  ;;  %v8184_v61 = vmul.f32 1.442695, %v8035_v56  ;;  %26909 = vst [vmem:[#allocation90_spill] sm:$0xff] %v23584_v21  ;;  %v7876_v56 = vsel %vm2189_vm0, %v23566_v50, -inf  ;;  %v8446_v7 = vsel %vm2189_vm0, %v23584_v21, 0.0  ;;  %v7888_v50 = vsel %vm2189_vm0, %v23587_v5, -inf }
 0x605   : > { %v23553_v4 = vpop.xlane.xlu1 %7727  ;;  %v23621_v5 = vmul.f32 0.25, %v23467_v37 }
 0x606   : > { %26905 = vst [vmem:[#allocation117_spill] sm:$0xff] %v23553_v4  ;;  %7868 = vmax.xlane.f32.xlu0 %v7867_v33  ;;  %v8034_v33 = vsub.f32 %v22681_v54, %v23435_v34  ;;  %20076 = vpow2.f32 %v8184_v61 }
 0x607   : > { %26916 = vst [vmem:[#allocation37_spill] sm:$0xff] %v23621_v5 }
 0x608   : > { %7907 = vmax.xlane.f32.xlu1 %v7906_v14  ;;  %v23563_v8 = vpop.f32.mrb[74].mxu0  ;;  %v8182_v34 = vmul.f32 1.442695, %v8034_v33 }
 0x609   : > { %v23570_v44 = vpop.xlane.xlu1 %7742  ;;  %v23572_v6 = vpop.f32.mrb[75].mxu0 }
 0x60a   : > { %26908 = vst [vmem:[#allocation25_spill] sm:$0xff] %v23570_v44  ;;  %v23576_v59 = vpop.f32.mrb[78].mxu1  ;;  %7865 = vmax.xlane.f32.xlu0 %v7864_v55  ;;  %v23594_v55 = vmul.f32 0.25, %v23456_v13  ;;  %20078 = vpow2.f32 %v8182_v34  ;;  %v7897_v34 = vsel %vm2189_vm0, %v23603_v51, -inf }
 0x60b   : > { %v23578_v14 = vpop.f32.mrb[79].mxu1  ;;  %v23580_v4 = vpop.xlane.xlu0 %7724 }
 0x60c   : > { %8450 = vadd.xlane.f32.xlu1 %v8449_v39  ;;  %26912 = vst [vmem:[#allocation33_spill] sm:$0xff] %v23594_v55  ;;  %v7921_v35 = vsel %vm2189_vm0, %v23594_v55, -inf }
 0x60d   : > { %v23591_v54 = vpop.xlane.xlu1 %7739 }
 0x60e   : > { %26911 = vst [vmem:[#allocation87_spill] sm:$0xff] %v23591_v54  ;;  %7877 = vmax.xlane.f32.xlu0 %v7876_v56  ;;  %v23612_v56 = vmul.f32 0.25, %v23463_v43  ;;  %v8036_v43 = vsub.f32 %v22737_v53, %v23512_v22  ;;  %v7903_v53 = vsel %vm2189_vm0, %v23621_v5, -inf  ;;  %v8032_v5 = vsub.f32 %v22651_v45, %v23465_v42 }
 0x60f   : > { %v23596_v44 = vpop.xlane.xlu0 %7721 }
 0x610   : > { %8447 = vadd.xlane.f32.xlu1 %v8446_v7  ;;  %v23600_v39 = vpop.f32.mrb[76].mxu0  ;;  %26915 = vst [vmem:[#allocation29_spill] sm:$0xff] %v23612_v56  ;;  %v23635_v55 = vpop.eup %20076 }
 0x611   : > { %v8403_v61 = vpop.xlane.xlu1 %8402  ;;  %v23607_v33 = vpop.f32.mrb[77].mxu0  ;;  %26918 = vst [vmem:[#allocation127_spill] sm:$0xff] %v23635_v55 }
 0x612   : > { %26914 = vst [vmem:[#allocation115_spill] sm:$0xff] %v23607_v33  ;;  %v23609_v13 = vpop.f32.mrb[80].mxu1  ;;  %7889 = vmax.xlane.f32.xlu0 %v7888_v50  ;;  %v8033_v50 = vsub.f32 %v22640_v17, %v23443_v25  ;;  %v8186_v17 = vmul.f32 1.442695, %v8036_v43  ;;  %v8039_v25 = vsub.f32 %v22895_v12, %v23450_v57  ;;  %v23663_v43 = vmul.f32 0.25, %v23426_v15 }
 0x613   : > { %v23614_v21 = vpop.f32.mrb[81].mxu1  ;;  %v23616_v7 = vpop.xlane.xlu0 %7736  ;;  %v8178_v15 = vmul.f32 1.442695, %v8032_v5  ;;  %v23690_v5 = vmul.f32 0.25, %v23500_v23  ;;  %v8037_v23 = vsub.f32 %v22727_v16, %v23484_v48  ;;  %v8040_v16 = vsub.f32 %v22942_v26, %v23557_v24 }
 0x614   : > { %7922 = vmax.xlane.f32.xlu1 %v7921_v35  ;;  %v7918_v35 = vsel %vm2189_vm0, %v23612_v56, -inf  ;;  %26923 = vst [vmem:[#allocation132_spill] sm:$0xff] %v23663_v43  ;;  %20080 = vpow2.f32 %v8186_v17  ;;  %v23679_v17 = vmul.f32 0.25, %v23504_v58 }
 0x615   : > { %v23623_v54 = vpop.xlane.xlu1 %7754  ;;  %26927 = vst [vmem:[#allocation136_spill] sm:$0xff] %v23690_v5 }
 0x616   : > { %26917 = vst [vmem:[#allocation126_spill] sm:$0xff] %v23623_v54  ;;  %7898 = vmax.xlane.f32.xlu0 %v7897_v34  ;;  %v23640_v54 = vmul.f32 0.25, %v23471_v47  ;;  %v8461_v47 = vsel %vm2189_vm0, %v23635_v55, 0.0  ;;  %v23672_v55 = vmul.f32 0.25, %v23491_v28  ;;  %26926 = vst [vmem:[#allocation135_spill] sm:$0xff] %v23679_v17 }
 0x617   : > { %v23631_v33 = vpop.xlane.xlu0 %7733 }
 0x618   : > { %7919 = vmax.xlane.f32.xlu1 %v7918_v35  ;;  %v23637_v37 = vpop.f32.mrb[78].mxu0  ;;  %26920 = vst [vmem:[#allocation129_spill] sm:$0xff] %v23640_v54  ;;  %v8180_v35 = vmul.f32 1.442695, %v8033_v50  ;;  %v7900_v57 = vsel %vm2189_vm0, %v23640_v54, -inf  ;;  %26925 = vst [vmem:[#allocation134_spill] sm:$0xff] %v23672_v55 }
 0x619   : > { %26919 = vst [vmem:[#allocation128_spill] sm:$0xff] %v23637_v37  ;;  %v23642_v51 = vpop.xlane.xlu1 %7751  ;;  %v23646_v22 = vpop.f32.mrb[79].mxu0  ;;  %v8192_v50 = vmul.f32 1.442695, %v8039_v25 }
 0x61a   : > { %26921 = vst [vmem:[#allocation130_spill] sm:$0xff] %v23642_v51  ;;  %v23650_v34 = vpop.f32.mrb[82].mxu1  ;;  %7904 = vmax.xlane.f32.xlu0 %v7903_v53  ;;  %v23658_v51 = vpop.eup %20078  ;;  %v8038_v53 = vsub.f32 %v22909_v10, %v23475_v29  ;;  %20082 = vpow2.f32 %v8180_v35  ;;  %v7909_v10 = vsel %vm2189_vm0, %v23663_v43, -inf }
 0x61b   : > { %v23652_v56 = vpop.f32.mrb[83].mxu1  ;;  %v23654_v37 = vpop.xlane.xlu0 %7748  ;;  %26922 = vst [vmem:[#allocation131_spill] sm:$0xff] %v23658_v51  ;;  %v8458_v42 = vsel %vm2189_vm0, %v23658_v51, 0.0  ;;  %20084 = vrcp.f32 %v8403_v61 }
 0x61c   : > { %8462 = vadd.xlane.f32.xlu1 %v8461_v47  ;;  %v8190_v28 = vmul.f32 1.442695, %v8038_v53  ;;  %v7915_v53 = vsel %vm2189_vm0, %v23679_v17, -inf }
 0x61d   : > { %v23665_v12 = vpop.xlane.xlu1 %7766 }
 0x61e   : > { %26924 = vst [vmem:[#allocation133_spill] sm:$0xff] %v23665_v12  ;;  %7901 = vmax.xlane.f32.xlu0 %v7900_v57  ;;  %v7933_v57 = vsel %vm2189_vm0, %v23672_v55, -inf  ;;  %v23709_v55 = vpop.eup %20080  ;;  %v8043_v12 = vsub.f32 %v23101_v27, %v23493_v30  ;;  %v26932_v27 = vld [vmem:[#allocation26_spill] sm:$0xff] }
 0x61f   : > { %v8400_v45 = vpop.xlane.xlu0 %8399 }
 0x620   : > { %8459 = vadd.xlane.f32.xlu1 %v8458_v42  ;;  %v23676_v47 = vpop.f32.mrb[80].mxu0  ;;  %20086 = vrcp.f32 %v8400_v45  ;;  %v23699_v45 = vmul.f32 0.25, %v23508_v0 }
 0x621   : > { %v23681_v25 = vpop.xlane.xlu1 %7763  ;;  %v23685_v29 = vpop.f32.mrb[81].mxu0  ;;  %20088 = vpow2.f32 %v8192_v50 }
 0x622   : > { %v23687_v35 = vpop.f32.mrb[84].mxu1  ;;  %7910 = vmax.xlane.f32.xlu0 %v7909_v10  ;;  %20090 = vpow2.f32 %v8178_v15  ;;  %26928 = vst [vmem:[#allocation137_spill] sm:$0xff] %v23699_v45  ;;  %v7930_v10 = vsel %vm2189_vm0, %v23690_v5, -inf }
 0x623   : > { %v23692_v61 = vpop.f32.mrb[85].mxu1  ;;  %v23694_v58 = vpop.xlane.xlu0 %7745  ;;  %20092 = vpow2.f32 %v8190_v28  ;;  %v7912_v28 = vsel %vm2189_vm0, %v23699_v45, -inf }
 0x624   : > { %7934 = vmax.xlane.f32.xlu1 %v7933_v57  ;;  %v23713_v0 = vpop.eup %20082 }
 0x625   : > { %v23701_v50 = vpop.xlane.xlu1 %8414  ;;  %v20085_v17 = vpop.eup %20084  ;;  %v8455_v24 = vsel %vm2189_vm0, %v23713_v0, 0.0 }
 0x626   : > { %7916 = vmax.xlane.f32.xlu0 %v7915_v53 }
 0x627   : > { %v8409_v42 = vpop.xlane.xlu0 %8408 }
 0x628   : > { %7931 = vmax.xlane.f32.xlu1 %v7930_v10  ;;  %v23711_v15 = vpop.f32.mrb[82].mxu0  ;;  %v8188_v10 = vmul.f32 1.442695, %v8037_v23  ;;  %v8194_v23 = vmul.f32 1.442695, %v8040_v16 }
 0x629   : > { %26929 = vst [vmem:[#allocation138_spill] sm:$0xff] %v23711_v15  ;;  %v23715_v57 = vpop.xlane.xlu1 %8426  ;;  %v23719_v53 = vpop.f32.mrb[83].mxu0  ;;  %v8464_v15 = vsel %vm2189_vm0, %v23709_v55, 0.0 }
 0x62a   : > { %26930 = vst [vmem:[#allocation139_spill] sm:$0xff] %v23719_v53  ;;  %v23723_v48 = vpop.f32.mrb[86].mxu1  ;;  %7913 = vmax.xlane.f32.xlu0 %v7912_v28  ;;  %v20087_v5 = vpop.eup %20086  ;;  %v8911_v53 = vmul.f32 %v20085_v17, %v23138_v1  ;;  %20094 = vpow2.f32 %v8188_v10 }
 0x62b   : > { %v23725_v54 = vpop.f32.mrb[87].mxu1  ;;  %v23727_v43 = vpop.xlane.xlu0 %7760  ;;  %v8910_v45 = vmul.f32 %v20087_v5, %v23172_v62  ;;  %20096 = vrcp.f32 %v8409_v42  ;;  %v23749_v5 = vmul.f32 0.25, %v23539_v60 }
 0x62c   : > { %v23731_v51 = vpop.eup %20088  ;;  %8465 = vadd.xlane.f32.xlu1 %v8464_v15  ;;  %v8041_v15 = vsub.f32 %v22940_v20, %v23526_v36 }
 0x62d   : > { %v8424_v26 = vpop.xlane.xlu1 %8423  ;;  %v23737_v28 = vpop.eup %20090  ;;  %17689 = vmatprep.mubr.msk.f32.mxu0 %vm2189_vm0, %v8910_v45  ;;  %v8473_v1 = vsel %vm2189_vm0, %v23731_v51, 0.0  ;;  %26931 = vst [vmem:[#allocation140_spill] sm:$0xff] %v23749_v5  ;;  %v7927_v36 = vsel %vm2189_vm0, %v23749_v5, -inf }
 0x62e   : > { %8456 = vadd.xlane.f32.xlu0 %v8455_v24  ;;  %17690 = vmatmul.mubr.msk.f32.vlgmr.msra.gmra.mrb[84].mxu0 %vm2189_vm0, %v8911_v53  ;;  %v23745_v17 = vpop.eup %20092  ;;  %v8452_v45 = vsel %vm2189_vm0, %v23737_v28, 0.0  ;;  %v8200_v53 = vmul.f32 1.442695, %v8043_v12  ;;  %v23770_v24 = vmul.f32 0.25, %v23544_v2  ;;  %v8196_v12 = vmul.f32 1.442695, %v8041_v15 }
 0x62f   : > { %v8406_v62 = vpop.xlane.xlu0 %8405  ;;  %18680 = vmatpush3.bf16.msra.mxu0 %v26828_v3  ;;  %v23761_v3 = vmul.f32 0.25, %v23528_v49  ;;  %v8470_v10 = vsel %vm2189_vm0, %v23745_v17, 0.0  ;;  %v23777_v49 = vmul.f32 0.25, %v23537_v32 }
 0x630   : > { %8474 = vadd.xlane.f32.xlu1 %v8473_v1  ;;  %20098 = vrcp.f32 %v8406_v62  ;;  %18686 = vmatprep.subr.bf16.mxu0 %v26932_v27  ;;  %26934 = vst [vmem:[#allocation141_spill] sm:$0xff] %v23770_v24 }
 0x631   : > { %v23752_v30 = vpop.xlane.xlu1 %7778  ;;  %20100 = vpow2.f32 %v8194_v23  ;;  %26933 = vst [vmem:[#allocation26_spill] sm:$0xff] %v23761_v3  ;;  %26935 = vst [vmem:[#allocation142_spill] sm:$0xff] %v23777_v49  ;;  %v7945_v62 = vsel %vm2189_vm0, %v23761_v3, -inf }
 0x632   : > { %v23758_v42 = vpop.f32.mrb[88].mxu1  ;;  %8453 = vadd.xlane.f32.xlu0 %v8452_v45  ;;  %20102 = vpow2.f32 %v8200_v53  ;;  %v7924_v45 = vsel %vm2189_vm0, %v23770_v24, -inf }
 0x633   : > { %v23763_v60 = vpop.f32.mrb[89].mxu1  ;;  %v23765_v16 = vpop.xlane.xlu0 %7757  ;;  %20104 = vpow2.f32 %v8196_v12  ;;  %v23798_v12 = vmul.f32 0.25, %v23576_v59 }
 0x634   : > { %8471 = vadd.xlane.f32.xlu1 %v8470_v10  ;;  %v23783_v1 = vpop.eup %20094  ;;  %20106 = vrcp.f32 %v23701_v50 }
 0x635   : > { %v23772_v20 = vpop.xlane.xlu1 %7775  ;;  %v20097_v10 = vpop.eup %20096  ;;  %20108 = vrcp.f32 %v8424_v26  ;;  %26938 = vst [vmem:[#allocation145_spill] sm:$0xff] %v23798_v12  ;;  %v8467_v50 = vsel %vm2189_vm0, %v23783_v1, 0.0 }
 0x636   : > { %7928 = vmax.xlane.f32.xlu0 %v7927_v36 }
 0x637   : > { %v23779_v23 = vpop.xlane.xlu0 %7772 }
 0x638   : > { %7946 = vmax.xlane.f32.xlu1 %v7945_v62  ;;  %v7942_v62 = vsel %vm2189_vm0, %v23777_v49, -inf  ;;  %v8047_v49 = vsub.f32 %v23113_v41, %v23535_v19  ;;  %v26940_v41 = vld [vmem:[#allocation30_spill] sm:$0xff] }
 0x639   : > { %v8439_v2 = vpop.xlane.xlu1 %8438 }
 0x63a   : > { %v23787_v15 = vpop.f32.mrb[90].mxu1  ;;  %7925 = vmax.xlane.f32.xlu0 %v7924_v45  ;;  %v20099_v53 = vpop.eup %20098  ;;  %v8913_v45 = vmul.f32 %v20097_v10, %v23188_v18  ;;  %v8042_v18 = vsub.f32 %v23106_v31, %v23514_v38  ;;  %v7939_v10 = vsel %vm2189_vm0, %v23798_v12, -inf  ;;  %v23826_v31 = vmul.f32 0.25, %v23563_v8 }
 0x63b   : > { %26936 = vst [vmem:[#allocation143_spill] sm:$0xff] %v23787_v15  ;;  %v23790_v32 = vpop.f32.mrb[91].mxu1  ;;  %v8412_v36 = vpop.xlane.xlu0 %8411  ;;  %v8912_v3 = vmul.f32 %v20099_v53, %v23209_v46  ;;  %v8208_v53 = vmul.f32 1.442695, %v8047_v49  ;;  %v26977_v15 = vld [vmem:[#allocation57_spill] sm:$0xff] }
 0x63c   : > { %26937 = vst [vmem:[#allocation144_spill] sm:$0xff] %v23790_v32  ;;  %v23794_v5 = vpop.eup %20100  ;;  %7943 = vmax.xlane.f32.xlu1 %v7942_v62  ;;  %20110 = vrcp.f32 %v8412_v36  ;;  %26941 = vst [vmem:[#allocation30_spill] sm:$0xff] %v23826_v31 }
 0x63d   : > { %v8436_v24 = vpop.xlane.xlu1 %8435  ;;  %17696 = vmatprep.mubr.msk.f32.mxu1 %vm2189_vm0, %v8912_v3  ;;  %v8476_v59 = vsel %vm2189_vm0, %v23794_v5, 0.0  ;;  %v23811_v26 = vpop.eup %20102  ;;  %20112 = vrcp.f32 %v23715_v57  ;;  %v23818_v3 = vmul.f32 0.25, %v23578_v14 }
 0x63e   : > { %8468 = vadd.xlane.f32.xlu0 %v8467_v50  ;;  %17697 = vmatmul.mubr.msk.f32.vlgmr.msra.gmra.mrb[92].mxu1 %vm2189_vm0, %v8913_v45  ;;  %20114 = vrcp.f32 %v8436_v24  ;;  %v8485_v14 = vsel %vm2189_vm0, %v23811_v26, 0.0  ;;  %v23832_v57 = vpop.eup %20104  ;;  %v8198_v24 = vmul.f32 1.442695, %v8042_v18  ;;  %v7957_v50 = vsel %vm2189_vm0, %v23826_v31, -inf  ;;  %v26955_v31 = vld [vmem:[#allocation39_spill] sm:$0xff] }
 0x63f   : > { %v23807_v46 = vpop.xlane.xlu0 %7769  ;;  %18684 = vmatpush3.bf16.msra.mxu1 %v26838_v63  ;;  %26939 = vst [vmem:[#allocation146_spill] sm:$0xff] %v23818_v3  ;;  %v8045_v63 = vsub.f32 %v23125_v40, %v23580_v4  ;;  %20116 = vrcp.f32 %v8439_v2  ;;  %v20107_v36 = vpop.eup %20106  ;;  %v7936_v49 = vsel %vm2189_vm0, %v23818_v3, -inf  ;;  %v23843_v2 = vmul.f32 0.25, %v23572_v6 }
 0x640   : > { %8477 = vadd.xlane.f32.xlu1 %v8476_v59  ;;  %18690 = vmatprep.subr.bf16.mxu1 %v26940_v41  ;;  %v20109_v8 = vpop.eup %20108  ;;  %20118 = vpow2.f32 %v8208_v53  ;;  %v8044_v59 = vsub.f32 %v23132_v52, %v23596_v44  ;;  %v8915_v53 = vmul.f32 %v20107_v36, %v23184_v11  ;;  %v26945_v52 = vld [vmem:[#allocation75_spill] sm:$0xff] }
 0x641   : > { %v23821_v19 = vpop.xlane.xlu1 %7790  ;;  %v8204_v40 = vmul.f32 1.442695, %v8045_v63  ;;  %20120 = vpow2.f32 %v8198_v24  ;;  %26942 = vst [vmem:[#allocation147_spill] sm:$0xff] %v23843_v2 }
 0x642   : > { %7940 = vmax.xlane.f32.xlu0 %v7939_v10  ;;  %v23849_v10 = vmul.f32 0.25, %v23609_v13  ;;  %v26946_v13 = vld [vmem:[#allocation66_spill] sm:$0xff] }
 0x643   : > { %v8421_v38 = vpop.xlane.xlu0 %8420  ;;  %20122 = vpow2.f32 %v8204_v40  ;;  %v8049_v11 = vsub.f32 %v26946_v13, %v23616_v7  ;;  %v23871_v40 = vmul.f32 0.25, %v23614_v21  ;;  %v26949_v7 = vld [vmem:[#allocation34_spill] sm:$0xff] }
 0x644   : > { %8486 = vadd.xlane.f32.xlu1 %v8485_v14  ;;  %26943 = vst [vmem:[#allocation148_spill] sm:$0xff] %v23849_v10  ;;  %v8479_v14 = vsel %vm2189_vm0, %v23832_v57, 0.0  ;;  %20124 = vrcp.f32 %v8421_v38  ;;  %v26951_v38 = vld [vmem:[#allocation54_spill] sm:$0xff] }
 0x645   : > { %v23834_v62 = vpop.xlane.xlu1 %7787  ;;  %26948 = vst [vmem:[#allocation75_spill] sm:$0xff] %v23871_v40  ;;  %v8212_v13 = vmul.f32 1.442695, %v8049_v11 }
 0x646   : > { %7937 = vmax.xlane.f32.xlu0 %v7936_v49  ;;  %v20111_v45 = vpop.eup %20110  ;;  %v26944_v49 = vld [vmem:[#allocation48_spill] sm:$0xff] }
 0x647   : > { %v23838_v4 = vpop.xlane.xlu0 %7784  ;;  %v8914_v18 = vmul.f32 %v20111_v45, %v23241_v9  ;;  %v20113_v24 = vpop.eup %20112  ;;  %v19452_v6 = vunpack.i.h.bf16 %v26944_v49  ;;  %v19451_v12 = vunpack.i.l.bf16 %v26944_v49  ;;  %v8918_v9 = vmul.f32 %v20109_v8, %v26945_v52  ;;  %v26952_v52 = vld [vmem:[#allocation73_spill] sm:$0xff] }
 0x648   : > { %7958 = vmax.xlane.f32.xlu1 %v7957_v50  ;;  %v20115_v44 = vpop.eup %20114  ;;  %v8202_v45 = vmul.f32 1.442695, %v8044_v59  ;;  %v23864_v50 = vmul.f32 0.25, %v23650_v34  ;;  %v7954_v8 = vsel %vm2189_vm0, %v23843_v2, -inf  ;;  %v7951_v34 = vsel %vm2189_vm0, %v23849_v10, -inf }
 0x649   : > { %v23852_v63 = vpop.xlane.xlu1 %7802  ;;  %17703 = vmatprep.mubr.msk.f32.mxu0 %vm2189_vm0, %v8914_v18  ;;  %v26950_v18 = vld [vmem:[#allocation42_spill] sm:$0xff]  ;;  %v18701_v49 = vpack.c.bf16 %v19452_v6, %v19451_v12  ;;  %v19486_v21 = vunpack.i.l.bf16 %v26952_v52 }
 0x64a   : > { %8480 = vadd.xlane.f32.xlu0 %v8479_v14  ;;  %17704 = vmatmul.mubr.msk.f32.vlgmr.msra.gmra.mrb[86].mxu0 %vm2189_vm0, %v8915_v53  ;;  %26947 = vst [vmem:[#allocation48_spill] sm:$0xff] %v23864_v50  ;;  %v8919_v59 = vmul.f32 %v20113_v24, %v26950_v18  ;;  %v8922_v14 = vmul.f32 %v20115_v44, %v26951_v38  ;;  %v26954_v18 = vld [vmem:[#allocation117_spill] sm:$0xff]  ;;  %v7963_v12 = vsel %vm2189_vm0, %v23864_v50, -inf }
 0x64b   : > { %v8418_v36 = vpop.xlane.xlu0 %8417  ;;  %18688 = vmatpush3.bf16.msra.mxu0 %v26932_v27  ;;  %17717 = vmatprep.mubr.msk.f32.mxu0 %vm2189_vm0, %v8918_v9  ;;  %v20117_v27 = vpop.eup %20116  ;;  %v19487_v9 = vunpack.i.h.bf16 %v26952_v52  ;;  %v8046_v10 = vsub.f32 %v26955_v31, %v26954_v18  ;;  %v26961_v18 = vld [vmem:[#allocation115_spill] sm:$0xff] }
 0x64c   : > { %20126 = vrcp.f32 %v8418_v36  ;;  %18694 = vmatprep.subr.bf16.mxu0 %v26949_v7  ;;  %7955 = vmax.xlane.f32.xlu1 %v7954_v8  ;;  %v26953_v36 = vld [vmem:[#allocation101_spill] sm:$0xff]  ;;  %v23893_v6 = vpop.eup %20118 }
 0x64d   : > { %v23875_v53 = vpop.xlane.xlu1 %7799  ;;  %v8048_v8 = vsub.f32 %v26953_v36, %v23631_v33  ;;  %20128 = vpow2.f32 %v8202_v45  ;;  %26956 = vst [vmem:[#allocation66_spill] sm:$0xff] %v23893_v6  ;;  %v26957_v33 = vld [vmem:[#allocation103_spill] sm:$0xff]  ;;  %v23900_v31 = vpop.eup %20120  ;;  %v8206_v38 = vmul.f32 1.442695, %v8046_v10 }
 0x64e   : > { %7952 = vmax.xlane.f32.xlu0 %v7951_v34  ;;  %17718 = vmatmul.mubr.msk.f32.vlgmr.msra.gmra.mrb[88].mxu0 %vm2189_vm0, %v8919_v59  ;;  %v8923_v44 = vmul.f32 %v20117_v27, %v26957_v33  ;;  %v7948_v59 = vsel %vm2189_vm0, %v23871_v40, -inf  ;;  %20130 = vpow2.f32 %v8212_v13  ;;  %v23903_v34 = vpack.c.bf16 %v19487_v9, %v19486_v21  ;;  %v23910_v52 = vpop.eup %20122  ;;  %v26959_v21 = vld [vmem:[#allocation25_spill] sm:$0xff]  ;;  %v26963_v33 = vld [vmem:[#allocation56_spill] sm:$0xff]  ;;  %v26975_v40 = vld [vmem:[#allocation51_spill] sm:$0xff] }
 0x64f   : > { %v23885_v24 = vpop.xlane.xlu0 %7781  ;;  %18696 = vmatpush3.bf16.msra.mxu0 %v26949_v7  ;;  %17731 = vmatprep.mubr.msk.f32.mxu0 %vm2189_vm0, %v8922_v14  ;;  %v8210_v45 = vmul.f32 1.442695, %v8048_v8  ;;  %v23906_v14 = vmul.f32 0.25, %v23600_v39  ;;  %v8497_v27 = vsel %vm2189_vm0, %v23893_v6, 0.0  ;;  %v8482_v36 = vsel %vm2189_vm0, %v23900_v31, 0.0  ;;  %v20125_v9 = vpop.eup %20124  ;;  %v26960_v39 = vld [vmem:[#allocation74_spill] sm:$0xff] }
 0x650   : > { %18702 = vmatprep.subr.bf16.mxu0 %v18701_v49  ;;  %7964 = vmax.xlane.f32.xlu1 %v7963_v12  ;;  %v8051_v8 = vsub.f32 %v26960_v39, %v26959_v21  ;;  %v23922_v12 = vmul.f32 0.25, %v26961_v18  ;;  %v8491_v21 = vsel %vm2189_vm0, %v23910_v52, 0.0  ;;  %v26965_v39 = vld [vmem:[#allocation87_spill] sm:$0xff]  ;;  %v26966_v18 = vld [vmem:[#allocation96_spill] sm:$0xff]  ;;  %v8053_v2 = vsub.f32 %v26975_v40, %v23654_v37 }
 0x651   : > { %v23896_v11 = vpop.xlane.xlu1 %7814  ;;  %26958 = vst [vmem:[#allocation34_spill] sm:$0xff] %v23906_v14  ;;  %20132 = vpow2.f32 %v8210_v45 }
 0x652   : > { %7949 = vmax.xlane.f32.xlu0 %v7948_v59  ;;  %17732 = vmatmul.mubr.msk.f32.vlgmr.msra.gmra.mrb[90].mxu0 %vm2189_vm0, %v8923_v44  ;;  %20134 = vpow2.f32 %v8206_v38  ;;  %26962 = vst [vmem:[#allocation42_spill] sm:$0xff] %v23922_v12  ;;  %v7969_v59 = vsel %vm2189_vm0, %v23906_v14, -inf  ;;  %v8216_v38 = vmul.f32 1.442695, %v8051_v8 }
 0x653   : > { %v8433_v7 = vpop.xlane.xlu0 %8432  ;;  %18704 = vmatpush3.bf16.msra.mxu0 %v18701_v49 }
 0x654   : > { %18710 = vmatprep.subr.bf16.mxu0 %v23903_v34  ;;  %8498 = vadd.xlane.f32.xlu1 %v8497_v27  ;;  %v26964_v27 = vld [vmem:[#allocation97_spill] sm:$0xff]  ;;  %20136 = vrcp.f32 %v8433_v7 }
 0x655   : > { %v23913_v13 = vpop.xlane.xlu1 %7811  ;;  %v8917_v50 = vmul.f32 %v20125_v9, %v26964_v27  ;;  %v7966_v9 = vsel %vm2189_vm0, %v23922_v12, -inf  ;;  %v23944_v27 = vmul.f32 0.25, %v23652_v56 }
 0x656   : > { %8483 = vadd.xlane.f32.xlu0 %v8482_v36  ;;  %v20127_v10 = vpop.eup %20126 }
 0x657   : > { %v23919_v49 = vpop.xlane.xlu0 %7796  ;;  %v8916_v44 = vmul.f32 %v20127_v10, %v26963_v33  ;;  %v23932_v45 = vpop.eup %20128  ;;  %v8050_v10 = vsub.f32 %v26966_v18, %v26965_v39  ;;  %26968 = vst [vmem:[#allocation73_spill] sm:$0xff] %v23944_v27  ;;  %v7960_v18 = vsel %vm2189_vm0, %v23944_v27, -inf }
 0x658   : > { %7970 = vmax.xlane.f32.xlu1 %v7969_v59  ;;  %v23941_v59 = vpop.eup %20130 }
 0x659   : > { %v23928_v36 = vpop.xlane.xlu1 %7826  ;;  %17710 = vmatprep.mubr.msk.f32.mxu1 %vm2189_vm0, %v8916_v44  ;;  %26967 = vst [vmem:[#allocation54_spill] sm:$0xff] %v23941_v59  ;;  %v26969_v44 = vld [vmem:[#allocation38_spill] sm:$0xff] }
 0x65a   : > { %8492 = vadd.xlane.f32.xlu0 %v8491_v21  ;;  %17711 = vmatmul.mubr.msk.f32.vlgmr.msra.gmra.mrb[94].mxu1 %vm2189_vm0, %v8917_v50  ;;  %v8488_v50 = vsel %vm2189_vm0, %v23932_v45, 0.0  ;;  %v8503_v21 = vsel %vm2189_vm0, %v23941_v59, 0.0 }
 0x65b   : > { %v8430_v33 = vpop.xlane.xlu0 %8429  ;;  %18692 = vmatpush3.bf16.msra.mxu1 %v26940_v41  ;;  %v8214_v41 = vmul.f32 1.442695, %v8050_v10  ;;  %v23955_v39 = vpop.eup %20132 }
 0x65c   : > { %18698 = vmatprep.subr.bf16.mxu1 %v26969_v44  ;;  %20138 = vrcp.f32 %v8430_v33  ;;  %7967 = vmax.xlane.f32.xlu1 %v7966_v9  ;;  %26970 = vst [vmem:[#allocation101_spill] sm:$0xff] %v23955_v39  ;;  %v23961_v33 = vpop.eup %20134  ;;  %v8500_v10 = vsel %vm2189_vm0, %v23955_v39, 0.0 }
 0x65d   : > { %v23947_v8 = vpop.xlane.xlu1 %7823  ;;  %20140 = vpow2.f32 %v8216_v38  ;;  %26971 = vst [vmem:[#allocation117_spill] sm:$0xff] %v23961_v33  ;;  %v23964_v38 = vmul.f32 0.25, %v23687_v35  ;;  %v8494_v27 = vsel %vm2189_vm0, %v23961_v33, 0.0 }
 0x65e   : > { %8489 = vadd.xlane.f32.xlu0 %v8488_v50  ;;  %20142 = vpow2.f32 %v8214_v41  ;;  %v23969_v50 = vmul.f32 0.25, %v23692_v61  ;;  %v20137_v14 = vpop.eup %20136  ;;  %v26974_v41 = vld [vmem:[#allocation76_spill] sm:$0xff] }
 0x65f   : > { %v23951_v7 = vpop.xlane.xlu0 %7793  ;;  %26972 = vst [vmem:[#allocation39_spill] sm:$0xff] %v23964_v38  ;;  %v19472_v12 = vunpack.i.h.bf16 %v26974_v41  ;;  %v19471_v35 = vunpack.i.l.bf16 %v26974_v41  ;;  %v26976_v61 = vld [vmem:[#allocation80_spill] sm:$0xff]  ;;  %v7975_v6 = vsel %vm2189_vm0, %v23964_v38, -inf  ;;  %v26997_v38 = vld [vmem:[#allocation86_spill] sm:$0xff] }
 0x660   : > { %8504 = vadd.xlane.f32.xlu1 %v8503_v21  ;;  %26973 = vst [vmem:[#allocation103_spill] sm:$0xff] %v23969_v50  ;;  %v26979_v41 = vld [vmem:[#allocation44_spill] sm:$0xff]  ;;  %v7972_v37 = vsel %vm2189_vm0, %v23969_v50, -inf }
 0x661   : > { %v23957_v56 = vpop.xlane.xlu1 %7838  ;;  %v8921_v59 = vmul.f32 %v20137_v14, %v26979_v41 }
 0x662   : > { %7961 = vmax.xlane.f32.xlu0 %v7960_v18 }
 0x663   : > { %v8445_v9 = vpop.xlane.xlu0 %8444 }
 0x664   : > { %8501 = vadd.xlane.f32.xlu1 %v8500_v10  ;;  %v8057_v10 = vsub.f32 %v26976_v61, %v23727_v43  ;;  %v8220_v43 = vmul.f32 1.442695, %v8053_v2  ;;  %20144 = vrcp.f32 %v8445_v9  ;;  %v24010_v2 = vmul.f32 0.25, %v23725_v54  ;;  %v26985_v9 = vld [vmem:[#allocation128_spill] sm:$0xff] }
 0x665   : > { %v23971_v21 = vpop.xlane.xlu1 %7835 }
 0x666   : > { %8495 = vadd.xlane.f32.xlu0 %v8494_v27  ;;  %v20139_v18 = vpop.eup %20138  ;;  %v23989_v27 = vmul.f32 0.25, %v23723_v48  ;;  %v8228_v61 = vmul.f32 1.442695, %v8057_v10  ;;  %26982 = vst [vmem:[#allocation74_spill] sm:$0xff] %v24010_v2 }
 0x667   : > { %v23979_v3 = vpop.xlane.xlu0 %7808  ;;  %v8920_v32 = vmul.f32 %v20139_v18, %v26977_v15  ;;  %v23986_v33 = vpop.eup %20140  ;;  %v26980_v15 = vld [vmem:[#allocation93_spill] sm:$0xff]  ;;  %v24000_v18 = vpack.c.bf16 %v19472_v12, %v19471_v35  ;;  %v26983_v12 = vld [vmem:[#allocation126_spill] sm:$0xff]  ;;  %v24020_v35 = vmul.f32 0.25, %v26985_v9 }
 0x668   : > { %26978 = vst [vmem:[#allocation25_spill] sm:$0xff] %v23989_v27  ;;  %7976 = vmax.xlane.f32.xlu1 %v7975_v6  ;;  %v8052_v40 = vsub.f32 %v26980_v15, %v23694_v58  ;;  %v26981_v6 = vld [vmem:[#allocation106_spill] sm:$0xff]  ;;  %v24007_v41 = vpop.eup %20142  ;;  %v26987_v15 = vld [vmem:[#allocation108_spill] sm:$0xff]  ;;  %v26992_v9 = vld [vmem:[#allocation41_spill] sm:$0xff] }
 0x669   : > { %v23992_v39 = vpop.xlane.xlu1 %7850  ;;  %17724 = vmatprep.mubr.msk.f32.mxu1 %vm2189_vm0, %v8920_v32  ;;  %v8058_v14 = vsub.f32 %v26981_v6, %v23681_v25  ;;  %v8509_v32 = vsel %vm2189_vm0, %v23986_v33, 0.0  ;;  %v7987_v25 = vsel %vm2189_vm0, %v23989_v27, -inf  ;;  %26986 = vst [vmem:[#allocation115_spill] sm:$0xff] %v24020_v35  ;;  %v8506_v6 = vsel %vm2189_vm0, %v24007_v41, 0.0 }
 0x66a   : > { %7973 = vmax.xlane.f32.xlu0 %v7972_v37  ;;  %17725 = vmatmul.mubr.msk.f32.vlgmr.msra.gmra.mrb[96].mxu1 %vm2189_vm0, %v8921_v59  ;;  %v26984_v59 = vld [vmem:[#allocation78_spill] sm:$0xff]  ;;  %v8218_v10 = vmul.f32 1.442695, %v8052_v40 }
 0x66b   : > { %v8442_v48 = vpop.xlane.xlu0 %8441  ;;  %18700 = vmatpush3.bf16.msra.mxu1 %v26969_v44  ;;  %v8055_v44 = vsub.f32 %v26984_v59, %v26983_v12  ;;  %v8230_v37 = vmul.f32 1.442695, %v8058_v14  ;;  %v26989_v12 = vld [vmem:[#allocation130_spill] sm:$0xff]  ;;  %v26990_v14 = vld [vmem:[#allocation125_spill] sm:$0xff]  ;;  %v24038_v59 = vmul.f32 0.25, %v23646_v22 }
 0x66c   : > { %18706 = vmatprep.subr.bf16.mxu1 %v24000_v18  ;;  %20146 = vrcp.f32 %v8442_v48  ;;  %8510 = vadd.xlane.f32.xlu1 %v8509_v32  ;;  %v8061_v48 = vsub.f32 %v26987_v15, %v23779_v23  ;;  %v24029_v32 = vmul.f32 0.25, %v23676_v47  ;;  %v8060_v15 = vsub.f32 %v26992_v9, %v23807_v46  ;;  %v26995_v9 = vld [vmem:[#allocation53_spill] sm:$0xff] }
 0x66d   : > { %v24013_v58 = vpop.xlane.xlu1 %7847  ;;  %20148 = vpow2.f32 %v8220_v43  ;;  %v7984_v43 = vsel %vm2189_vm0, %v24010_v2, -inf  ;;  %v8224_v40 = vmul.f32 1.442695, %v8055_v44  ;;  %26991 = vst [vmem:[#allocation97_spill] sm:$0xff] %v24038_v59  ;;  %v8056_v27 = vsub.f32 %v26995_v9, %v23765_v16  ;;  %v26996_v2 = vld [vmem:[#allocation121_spill] sm:$0xff] }
 0x66e   : > { %7988 = vmax.xlane.f32.xlu0 %v7987_v25  ;;  %20150 = vpow2.f32 %v8228_v61  ;;  %26988 = vst [vmem:[#allocation56_spill] sm:$0xff] %v24029_v32  ;;  %v8054_v61 = vsub.f32 %v26990_v14, %v26989_v12  ;;  %v8236_v47 = vmul.f32 1.442695, %v8061_v48  ;;  %v7993_v22 = vsel %vm2189_vm0, %v24029_v32, -inf  ;;  %v26994_v12 = vld [vmem:[#allocation68_spill] sm:$0xff] }
 0x66f   : > { %v24022_v54 = vpop.xlane.xlu0 %7805  ;;  %20152 = vpow2.f32 %v8218_v10  ;;  %v20145_v10 = vpop.eup %20144  ;;  %v19507_v14 = vunpack.i.h.bf16 %v26994_v12  ;;  %v8063_v32 = vsub.f32 %v26996_v2, %v23752_v30  ;;  %v8226_v30 = vmul.f32 1.442695, %v8056_v27 }
 0x670   : > { %8507 = vadd.xlane.f32.xlu1 %v8506_v6  ;;  %20154 = vpow2.f32 %v8230_v37  ;;  %v7981_v6 = vsel %vm2189_vm0, %v24020_v35, -inf  ;;  %v19506_v37 = vunpack.i.l.bf16 %v26994_v12  ;;  %v8222_v46 = vmul.f32 1.442695, %v8054_v61 }
 0x671   : > { %v24031_v25 = vpop.xlane.xlu1 %7862  ;;  %20156 = vpow2.f32 %v8224_v40  ;;  %v8234_v35 = vmul.f32 1.442695, %v8060_v15  ;;  %v26998_v40 = vld [vmem:[#allocation58_spill] sm:$0xff] }
 0x672   : > { %7985 = vmax.xlane.f32.xlu0 %v7984_v43  ;;  %v24047_v43 = vmul.f32 0.25, %v23685_v29  ;;  %20158 = vpow2.f32 %v8236_v47  ;;  %v8925_v61 = vmul.f32 %v20145_v10, %v26998_v40  ;;  %v24077_v2 = vpack.c.bf16 %v19507_v14, %v19506_v37  ;;  %v27000_v15 = vld [vmem:[#allocation70_spill] sm:$0xff] }
 0x673   : > { %v24040_v23 = vpop.xlane.xlu0 %7820  ;;  %20160 = vpow2.f32 %v8222_v46  ;;  %v8240_v47 = vmul.f32 1.442695, %v8063_v32  ;;  %v8062_v10 = vsub.f32 %v27000_v15, %v23772_v20 }
 0x674   : > { %26993 = vst [vmem:[#allocation87_spill] sm:$0xff] %v24047_v43  ;;  %7982 = vmax.xlane.f32.xlu1 %v7981_v6  ;;  %v7978_v6 = vsel %vm2189_vm0, %v24038_v59, -inf  ;;  %v7990_v16 = vsel %vm2189_vm0, %v24047_v43, -inf  ;;  %20162 = vpow2.f32 %v8234_v35  ;;  %v27001_v35 = vld [vmem:[#allocation67_spill] sm:$0xff] }
 0x675   : > { %v24049_v44 = vpop.xlane.xlu1 %7859  ;;  %20164 = vpow2.f32 %v8226_v30  ;;  %v8065_v37 = vsub.f32 %v27001_v35, %v23838_v4  ;;  %v27004_v30 = vld [vmem:[#allocation133_spill] sm:$0xff] }
 0x676   : > { %7994 = vmax.xlane.f32.xlu0 %v7993_v22  ;;  %v20147_v48 = vpop.eup %20146  ;;  %20166 = vpow2.f32 %v8240_v47  ;;  %v27005_v47 = vld [vmem:[#allocation52_spill] sm:$0xff]  ;;  %v27006_v4 = vld [vmem:[#allocation77_spill] sm:$0xff] }
 0x677   : > { %v24057_v29 = vpop.xlane.xlu0 %7817  ;;  %v8924_v50 = vmul.f32 %v20147_v48, %v26997_v38  ;;  %v24064_v12 = vpop.eup %20148  ;;  %v8059_v15 = vsub.f32 %v27005_v47, %v27004_v30 }
 0x678   : > { %7979 = vmax.xlane.f32.xlu1 %v7978_v6  ;;  %v24071_v9 = vpop.eup %20150  ;;  %v8515_v48 = vsel %vm2189_vm0, %v24064_v12, 0.0 }
 0x679   : > { %v24067_v22 = vpop.xlane.xlu1 %7874  ;;  %17738 = vmatprep.mubr.msk.f32.mxu1 %vm2189_vm0, %v8924_v50  ;;  %v24084_v50 = vpop.eup %20152  ;;  %v8527_v14 = vsel %vm2189_vm0, %v24071_v9, 0.0  ;;  %v8232_v30 = vmul.f32 1.442695, %v8059_v15 }
 0x67a   : > { %26999 = vst [vmem:[#allocation96_spill] sm:$0xff] %v24067_v22  ;;  %7991 = vmax.xlane.f32.xlu0 %v7990_v16  ;;  %17739 = vmatmul.mubr.msk.f32.vlgmr.msra.gmra.mrb[98].mxu1 %vm2189_vm0, %v8925_v61  ;;  %v24091_v32 = vpop.eup %20154  ;;  %v8512_v46 = vsel %vm2189_vm0, %v24084_v50, 0.0 }
 0x67b   : > { %v24075_v38 = vpop.xlane.xlu0 %7832  ;;  %18708 = vmatpush3.bf16.msra.mxu1 %v24000_v18  ;;  %v8238_v18 = vmul.f32 1.442695, %v8062_v10  ;;  %v24099_v6 = vpop.eup %20156  ;;  %v8530_v61 = vsel %vm2189_vm0, %v24091_v32, 0.0 }
 0x67c   : > { %18714 = vmatprep.subr.bf16.mxu1 %v24077_v2  ;;  %8516 = vadd.xlane.f32.xlu1 %v8515_v48  ;;  %v24105_v16 = vpop.eup %20158  ;;  %v8067_v48 = vsub.f32 %v27006_v4, %v23821_v19  ;;  %v8521_v35 = vsel %vm2189_vm0, %v24099_v6, 0.0  ;;  %v27009_v4 = vld [vmem:[#allocation79_spill] sm:$0xff] }
 0x67d   : > { %v24087_v27 = vpop.xlane.xlu1 %7871  ;;  %27003 = vst [vmem:[#allocation76_spill] sm:$0xff] %v24105_v16  ;;  %20168 = vpow2.f32 %v8238_v18  ;;  %v27008_v18 = vld [vmem:[#allocation110_spill] sm:$0xff] }
 0x67e   : > { %8528 = vadd.xlane.f32.xlu0 %v8527_v14  ;;  %v8244_v14 = vmul.f32 1.442695, %v8065_v37  ;;  %v8064_v47 = vsub.f32 %v27008_v18, %v23885_v24  ;;  %v8248_v37 = vmul.f32 1.442695, %v8067_v48  ;;  %v24140_v24 = vmul.f32 0.25, %v23758_v42 }
 0x67f   : > { %v24093_v20 = vpop.xlane.xlu0 %7829 }
 0x680   : > { %8513 = vadd.xlane.f32.xlu1 %v8512_v46  ;;  %v24115_v46 = vpop.eup %20160  ;;  %20170 = vpow2.f32 %v8244_v14  ;;  %27011 = vst [vmem:[#allocation57_spill] sm:$0xff] %v24140_v24  ;;  %v8242_v14 = vmul.f32 1.442695, %v8064_v47 }
 0x681   : > { %v24101_v40 = vpop.xlane.xlu1 %7880  ;;  %v24121_v59 = vpop.eup %20162  ;;  %20172 = vpow2.f32 %v8232_v30 }
 0x682   : > { %27002 = vst [vmem:[#allocation38_spill] sm:$0xff] %v24101_v40  ;;  %8531 = vadd.xlane.f32.xlu0 %v8530_v61  ;;  %v8539_v61 = vsel %vm2189_vm0, %v24105_v16, 0.0  ;;  %v8069_v40 = vsub.f32 %v27009_v4, %v23919_v49  ;;  %v8536_v15 = vsel %vm2189_vm0, %v24121_v59, 0.0  ;;  %v27012_v49 = vld [vmem:[#allocation82_spill] sm:$0xff]  ;;  %20174 = vpow2.f32 %v8248_v37  ;;  %v27013_v4 = vld [vmem:[#allocation55_spill] sm:$0xff] }
 0x683   : > { %v24109_v10 = vpop.xlane.xlu0 %7844  ;;  %v8066_v48 = vsub.f32 %v27012_v49, %v23834_v62  ;;  %v24157_v62 = vmul.f32 0.25, %v23763_v60  ;;  %20176 = vpow2.f32 %v8242_v14 }
 0x684   : > { %8522 = vadd.xlane.f32.xlu1 %v8521_v35  ;;  %v8518_v35 = vsel %vm2189_vm0, %v24115_v46, 0.0 }
 0x685   : > { %v24117_v43 = vpop.xlane.xlu1 %7886  ;;  %27015 = vst [vmem:[#allocation93_spill] sm:$0xff] %v24157_v62  ;;  %v8246_v47 = vmul.f32 1.442695, %v8066_v48 }
 0x686   : > { %27007 = vst [vmem:[#allocation51_spill] sm:$0xff] %v24117_v43  ;;  %8540 = vadd.xlane.f32.xlu0 %v8539_v61  ;;  %v24131_v43 = vpop.eup %20164 }
 0x687   : > { %v24125_v19 = vpop.xlane.xlu0 %7841  ;;  %v24137_v61 = vpop.eup %20166  ;;  %v8524_v22 = vsel %vm2189_vm0, %v24131_v43, 0.0 }
 0x688   : > { %8519 = vadd.xlane.f32.xlu1 %v8518_v35  ;;  %v8070_v35 = vsub.f32 %v27013_v4, %v23875_v53  ;;  %v8545_v42 = vsel %vm2189_vm0, %v24137_v61, 0.0  ;;  %v24154_v30 = vpop.eup %20168  ;;  %v27016_v53 = vld [vmem:[#allocation112_spill] sm:$0xff] }
 0x689   : > { %v24133_v16 = vpop.xlane.xlu1 %7883  ;;  %v8542_v60 = vsel %vm2189_vm0, %v24154_v30, 0.0 }
 0x68a   : > { %27010 = vst [vmem:[#allocation80_spill] sm:$0xff] %v24133_v16  ;;  %8537 = vadd.xlane.f32.xlu0 %v8536_v15  ;;  %v8252_v16 = vmul.f32 1.442695, %v8069_v40  ;;  %v8068_v40 = vsub.f32 %v27016_v53, %v23951_v7  ;;  %v8254_v49 = vmul.f32 1.442695, %v8070_v35  ;;  %v24171_v48 = vpop.eup %20170  ;;  %v27020_v7 = vld [vmem:[#allocation105_spill] sm:$0xff] }
 0x68b   : > { %v24144_v18 = vpop.xlane.xlu0 %7856  ;;  %27019 = vst [vmem:[#allocation126_spill] sm:$0xff] %v24171_v48  ;;  %v8071_v14 = vsub.f32 %v27020_v7, %v23852_v63  ;;  %v27021_v53 = vld [vmem:[#allocation109_spill] sm:$0xff] }
 0x68c   : > { %8525 = vadd.xlane.f32.xlu1 %v8524_v22  ;;  %20178 = vpow2.f32 %v8252_v16  ;;  %v27017_v22 = vld [vmem:[#allocation81_spill] sm:$0xff]  ;;  %v8250_v16 = vmul.f32 1.442695, %v8068_v40 }
 0x68d   : > { %v24150_v15 = vpop.xlane.xlu1 %7892  ;;  %v8073_v4 = vsub.f32 %v27017_v22, %v23979_v3  ;;  %20180 = vpow2.f32 %v8246_v47  ;;  %v7996_v22 = vsel %vm2189_vm0, %v24157_v62, -inf  ;;  %v8551_v47 = vsel %vm2189_vm0, %v24171_v48, 0.0 }
 0x68e   : > { %27014 = vst [vmem:[#allocation44_spill] sm:$0xff] %v24150_v15  ;;  %8546 = vadd.xlane.f32.xlu0 %v8545_v42  ;;  %v7999_v15 = vsel %vm2189_vm0, %v24140_v24, -inf  ;;  %20182 = vpow2.f32 %v8254_v49  ;;  %v24181_v24 = vpop.eup %20172  ;;  %v8256_v40 = vmul.f32 1.442695, %v8071_v14  ;;  %v27023_v49 = vld [vmem:[#allocation94_spill] sm:$0xff] }
 0x68f   : > { %v24161_v37 = vpop.xlane.xlu0 %7853  ;;  %v8260_v3 = vmul.f32 1.442695, %v8073_v4  ;;  %v24187_v63 = vpop.eup %20174  ;;  %v8075_v4 = vsub.f32 %v27023_v49, %v23896_v11  ;;  %20184 = vpow2.f32 %v8250_v16  ;;  %v27026_v16 = vld [vmem:[#allocation95_spill] sm:$0xff] }
 0x690   : > { %8000 = vmax.xlane.f32.xlu1 %v7999_v15  ;;  %v8072_v15 = vsub.f32 %v27021_v53, %v24022_v54  ;;  %v24197_v62 = vpop.eup %20176  ;;  %v8557_v14 = vsel %vm2189_vm0, %v24187_v63, 0.0  ;;  %v27028_v49 = vld [vmem:[#allocation59_spill] sm:$0xff] }
 0x691   : > { %v24167_v42 = vpop.xlane.xlu1 %7895  ;;  %20186 = vpow2.f32 %v8260_v3  ;;  %v8264_v11 = vmul.f32 1.442695, %v8075_v4 }
 0x692   : > { %27018 = vst [vmem:[#allocation106_spill] sm:$0xff] %v24167_v42  ;;  %8543 = vadd.xlane.f32.xlu0 %v8542_v60  ;;  %v27024_v60 = vld [vmem:[#allocation84_spill] sm:$0xff]  ;;  %v8258_v53 = vmul.f32 1.442695, %v8072_v15  ;;  %20188 = vpow2.f32 %v8256_v40 }
 0x693   : > { %v24175_v35 = vpop.xlane.xlu0 %7868  ;;  %v8074_v7 = vsub.f32 %v27024_v60, %v23913_v13  ;;  %v8076_v13 = vsub.f32 %v27026_v16, %v24057_v29  ;;  %v8077_v60 = vsub.f32 %v27028_v49, %v24040_v23  ;;  %v27029_v29 = vld [vmem:[#allocation122_spill] sm:$0xff]  ;;  %v27031_v16 = vld [vmem:[#allocation71_spill] sm:$0xff] }
 0x694   : > { %7997 = vmax.xlane.f32.xlu1 %v7996_v22  ;;  %v8533_v22 = vsel %vm2189_vm0, %v24181_v24, 0.0  ;;  %20190 = vpow2.f32 %v8258_v53 }
 0x695   : > { %v24183_v42 = vpop.xlane.xlu1 %7907  ;;  %v8262_v15 = vmul.f32 1.442695, %v8074_v7  ;;  %v8079_v7 = vsub.f32 %v27029_v29, %v23928_v36  ;;  %v8266_v23 = vmul.f32 1.442695, %v8076_v13  ;;  %v8268_v49 = vmul.f32 1.442695, %v8077_v60 }
 0x696   : > { %27022 = vst [vmem:[#allocation78_spill] sm:$0xff] %v24183_v42  ;;  %8552 = vadd.xlane.f32.xlu0 %v8551_v47  ;;  %v24201_v47 = vpop.eup %20178  ;;  %v27037_v29 = vld [vmem:[#allocation43_spill] sm:$0xff] }
 0x697   : > { %v24191_v54 = vpop.xlane.xlu0 %7865  ;;  %27025 = vst [vmem:[#allocation128_spill] sm:$0xff] %v24201_v47  ;;  %v24211_v48 = vpop.eup %20180  ;;  %v8563_v40 = vsel %vm2189_vm0, %v24201_v47, 0.0  ;;  %v8272_v13 = vmul.f32 1.442695, %v8079_v7 }
 0x698   : > { %8534 = vadd.xlane.f32.xlu1 %v8533_v22  ;;  %v8548_v22 = vsel %vm2189_vm0, %v24197_v62, 0.0  ;;  %v24215_v4 = vpop.eup %20182 }
 0x699   : > { %v8451_v42 = vpop.xlane.xlu1 %8450  ;;  %v24225_v47 = vpop.eup %20184 }
 0x69a   : > { %8558 = vadd.xlane.f32.xlu0 %v8557_v14  ;;  %20192 = vrcp.f32 %v8451_v42  ;;  %v8078_v42 = vsub.f32 %v27031_v16, %v23947_v8  ;;  %27032 = vst [vmem:[#allocation125_spill] sm:$0xff] %v24225_v47  ;;  %v8082_v16 = vsub.f32 %v27037_v29, %v23971_v21 }
 0x69b   : > { %v24205_v3 = vpop.xlane.xlu0 %7877  ;;  %v24231_v36 = vpop.eup %20186 }
 0x69c   : > { %27027 = vst [vmem:[#allocation108_spill] sm:$0xff] %v24205_v3  ;;  %8549 = vadd.xlane.f32.xlu1 %v8548_v22  ;;  %v8554_v22 = vsel %vm2189_vm0, %v24211_v48, 0.0  ;;  %27034 = vst [vmem:[#allocation68_spill] sm:$0xff] %v24231_v36  ;;  %v8270_v60 = vmul.f32 1.442695, %v8078_v42  ;;  %v8575_v7 = vsel %vm2189_vm0, %v24231_v36, 0.0 }
 0x69d   : > { %v8448_v14 = vpop.xlane.xlu1 %8447  ;;  %v27040_v42 = vld [vmem:[#allocation123_spill] sm:$0xff] }
 0x69e   : > { %20194 = vrcp.f32 %v8448_v14  ;;  %8564 = vadd.xlane.f32.xlu0 %v8563_v40  ;;  %v19456_v29 = vunpack.i.l.bf16 %v27040_v42 }
 0x69f   : > { %20196 = vpow2.f32 %v8264_v11  ;;  %v24219_v53 = vpop.xlane.xlu0 %7889  ;;  %v8566_v11 = vsel %vm2189_vm0, %v24215_v4, 0.0 }
 0x6a0   : > { %27030 = vst [vmem:[#allocation130_spill] sm:$0xff] %v24219_v53  ;;  %20198 = vpow2.f32 %v8262_v15  ;;  %8555 = vadd.xlane.f32.xlu1 %v8554_v22  ;;  %v27035_v15 = vld [vmem:[#allocation107_spill] sm:$0xff]  ;;  %v8560_v22 = vsel %vm2189_vm0, %v24225_v47, 0.0 }
 0x6a1   : > { %v24227_v14 = vpop.xlane.xlu1 %7922  ;;  %v8083_v40 = vsub.f32 %v27035_v15, %v23957_v56  ;;  %20200 = vpow2.f32 %v8266_v23 }
 0x6a2   : > { %27033 = vst [vmem:[#allocation41_spill] sm:$0xff] %v24227_v14  ;;  %8567 = vadd.xlane.f32.xlu0 %v8566_v11  ;;  %20202 = vpow2.f32 %v8268_v49  ;;  %v24241_v14 = vpop.eup %20188  ;;  %v19457_v11 = vunpack.i.h.bf16 %v27040_v42 }
 0x6a3   : > { %v24235_v8 = vpop.xlane.xlu0 %7898  ;;  %v24247_v56 = vpop.eup %20190  ;;  %20204 = vpow2.f32 %v8272_v13  ;;  %v8280_v21 = vmul.f32 1.442695, %v8083_v40 }
 0x6a4   : > { %27036 = vst [vmem:[#allocation53_spill] sm:$0xff] %v24235_v8  ;;  %8561 = vadd.xlane.f32.xlu1 %v8560_v22  ;;  %27039 = vst [vmem:[#allocation86_spill] sm:$0xff] %v24247_v56  ;;  %v20193_v23 = vpop.eup %20192  ;;  %20206 = vpow2.f32 %v8270_v60  ;;  %v8278_v22 = vmul.f32 1.442695, %v8082_v16  ;;  %v27043_v8 = vld [vmem:[#allocation90_spill] sm:$0xff]  ;;  %v18717_v16 = vpack.c.bf16 %v19457_v11, %v19456_v29 }
 0x6a5   : > { %v24243_v53 = vpop.xlane.xlu1 %7919  ;;  %20208 = vpow2.f32 %v8280_v21 }
 0x6a6   : > { %27038 = vst [vmem:[#allocation121_spill] sm:$0xff] %v24243_v53  ;;  %8576 = vadd.xlane.f32.xlu0 %v8575_v7  ;;  %v8569_v53 = vsel %vm2189_vm0, %v24241_v14, 0.0  ;;  %v8572_v7 = vsel %vm2189_vm0, %v24247_v56, 0.0  ;;  %20210 = vpow2.f32 %v8278_v22 }
 0x6a7   : > { %v24250_v49 = vpop.xlane.xlu0 %7904 }
 0x6a8   : > { %27041 = vst [vmem:[#allocation58_spill] sm:$0xff] %v24250_v49  ;;  %v20195_v15 = vpop.eup %20194  ;;  %8570 = vadd.xlane.f32.xlu1 %v8569_v53  ;;  %v27044_v49 = vld [vmem:[#allocation92_spill] sm:$0xff] }
 0x6a9   : > { %v24255_v47 = vpop.eup %20196  ;;  %v8463_v36 = vpop.xlane.xlu1 %8462  ;;  %v8926_v13 = vmul.f32 %v20195_v15, %v27043_v8  ;;  %v8927_v3 = vmul.f32 %v20193_v23, %v27044_v49 }
 0x6aa   : > { %27042 = vst [vmem:[#allocation70_spill] sm:$0xff] %v24255_v47  ;;  %v24260_v40 = vpop.eup %20198  ;;  %8573 = vadd.xlane.f32.xlu0 %v8572_v7  ;;  %v8581_v53 = vsel %vm2189_vm0, %v24255_v47, 0.0  ;;  %20212 = vrcp.f32 %v8463_v36 }
 0x6ab   : > { %v24263_v60 = vpop.xlane.xlu0 %7901  ;;  %17745 = vmatprep.mubr.msk.f32.mxu0 %vm2189_vm0, %v8926_v13  ;;  %v24269_v42 = vpop.eup %20200  ;;  %v8578_v23 = vsel %vm2189_vm0, %v24260_v40, 0.0 }
 0x6ac   : > { %27045 = vst [vmem:[#allocation67_spill] sm:$0xff] %v24263_v60  ;;  %17746 = vmatmul.mubr.msk.f32.vlgmr.msra.gmra.mrb[92].mxu0 %vm2189_vm0, %v8927_v3  ;;  %27046 = vst [vmem:[#allocation133_spill] sm:$0xff] %v24269_v42  ;;  %8582 = vadd.xlane.f32.xlu1 %v8581_v53  ;;  %v24274_v21 = vpop.eup %20202  ;;  %v8584_v11 = vsel %vm2189_vm0, %v24269_v42, 0.0 }
 0x6ad   : > { %18712 = vmatpush3.bf16.msra.mxu0 %v23903_v34  ;;  %v8460_v8 = vpop.xlane.xlu1 %8459  ;;  %27047 = vst [vmem:[#allocation52_spill] sm:$0xff] %v24274_v21  ;;  %v24280_v49 = vpop.eup %20204  ;;  %v8587_v34 = vsel %vm2189_vm0, %v24274_v21, 0.0  ;;  %v27057_v21 = vld [vmem:[#allocation119_spill] sm:$0xff] }
 0x6ae   : > { %18718 = vmatprep.subr.bf16.mxu0 %v18717_v16  ;;  %20214 = vrcp.f32 %v8460_v8  ;;  %8579 = vadd.xlane.f32.xlu0 %v8578_v23  ;;  %27049 = vst [vmem:[#allocation110_spill] sm:$0xff] %v24280_v49  ;;  %v24286_v15 = vpop.eup %20206  ;;  %v8593_v22 = vsel %vm2189_vm0, %v24280_v49, 0.0  ;;  %v27058_v49 = vld [vmem:[#allocation131_spill] sm:$0xff] }
 0x6af   : > { %v24276_v3 = vpop.xlane.xlu0 %7910  ;;  %27051 = vst [vmem:[#allocation82_spill] sm:$0xff] %v24286_v15  ;;  %v24292_v7 = vpop.eup %20208  ;;  %v8590_v53 = vsel %vm2189_vm0, %v24286_v15, 0.0 }
 0x6b0   : > { %27048 = vst [vmem:[#allocation77_spill] sm:$0xff] %v24276_v3  ;;  %8585 = vadd.xlane.f32.xlu1 %v8584_v11  ;;  %27053 = vst [vmem:[#allocation112_spill] sm:$0xff] %v24292_v7  ;;  %v24298_v8 = vpop.eup %20210  ;;  %v8605_v42 = vsel %vm2189_vm0, %v24292_v7, 0.0 }
 0x6b1   : > { %v24282_v36 = vpop.xlane.xlu1 %7934  ;;  %27055 = vst [vmem:[#allocation105_spill] sm:$0xff] %v24298_v8 }
 0x6b2   : > { %27050 = vst [vmem:[#allocation79_spill] sm:$0xff] %v24282_v36  ;;  %8588 = vadd.xlane.f32.xlu0 %v8587_v34  ;;  %v19491_v36 = vunpack.i.l.bf16 %v27057_v21 }
 0x6b3   : > { %v24288_v29 = vpop.xlane.xlu0 %7916 }
 0x6b4   : > { %27052 = vst [vmem:[#allocation55_spill] sm:$0xff] %v24288_v29  ;;  %8594 = vadd.xlane.f32.xlu1 %v8593_v22  ;;  %v20213_v23 = vpop.eup %20212  ;;  %v19492_v29 = vunpack.i.h.bf16 %v27057_v21 }
 0x6b5   : > { %v24294_v13 = vpop.xlane.xlu1 %7931 }
 0x6b6   : > { %27054 = vst [vmem:[#allocation81_spill] sm:$0xff] %v24294_v13  ;;  %8591 = vadd.xlane.f32.xlu0 %v8590_v53  ;;  %v8602_v13 = vsel %vm2189_vm0, %v24298_v8, 0.0  ;;  %v27059_v53 = vld [vmem:[#allocation127_spill] sm:$0xff] }
 0x6b7   : > { %v24300_v11 = vpop.xlane.xlu0 %7913  ;;  %v8931_v56 = vmul.f32 %v20213_v23, %v27059_v53 }
 0x6b8   : > { %27056 = vst [vmem:[#allocation109_spill] sm:$0xff] %v24300_v11  ;;  %v20215_v34 = vpop.eup %20214  ;;  %8606 = vadd.xlane.f32.xlu1 %v8605_v42  ;;  %v18725_v11 = vpack.c.bf16 %v19492_v29, %v19491_v36  ;;  %v27064_v36 = vld [vmem:[#allocation102_spill] sm:$0xff] }
 0x6b9   : > { %v8466_v22 = vpop.xlane.xlu1 %8465  ;;  %v8930_v60 = vmul.f32 %v20215_v34, %v27058_v49  ;;  %v19477_v29 = vunpack.i.h.bf16 %v27064_v36 }
 0x6ba   : > { %8603 = vadd.xlane.f32.xlu0 %v8602_v13  ;;  %20216 = vrcp.f32 %v8466_v22  ;;  %v27065_v22 = vld [vmem:[#allocation23_spill] sm:$0xff] }
 0x6bb   : > { %v8457_v15 = vpop.xlane.xlu0 %8456  ;;  %17759 = vmatprep.mubr.msk.f32.mxu0 %vm2189_vm0, %v8930_v60 }
 0x6bc   : > { %17760 = vmatmul.mubr.msk.f32.vlgmr.msra.gmra.mrb[94].mxu0 %vm2189_vm0, %v8931_v56  ;;  %20218 = vrcp.f32 %v8457_v15  ;;  %v19476_v15 = vunpack.i.l.bf16 %v27064_v36 }
 0x6bd   : > { %18720 = vmatpush3.bf16.msra.mxu0 %v18717_v16  ;;  %v8475_v21 = vpop.xlane.xlu1 %8474 }
 0x6be   : > { %18726 = vmatprep.subr.bf16.mxu0 %v18725_v11  ;;  %v18721_v3 = vpack.c.bf16 %v19477_v29, %v19476_v15 }
 0x6bf   : > { %v8454_v42 = vpop.xlane.xlu0 %8453 }
 0x6c0   : > { %20220 = vrcp.f32 %v8454_v42 }
 0x6c1   : > { %20222 = vrcp.f32 %v8475_v21  ;;  %v8472_v7 = vpop.xlane.xlu1 %8471 }
 0x6c2   : > { %20224 = vrcp.f32 %v8472_v7 }
 0x6c3   : > { %v24312_v49 = vpop.xlane.xlu0 %7928 }
 0x6c4   : > { %27060 = vst [vmem:[#allocation94_spill] sm:$0xff] %v24312_v49  ;;  %v20217_v60 = vpop.eup %20216  ;;  %v27066_v49 = vld [vmem:[#allocation47_spill] sm:$0xff] }
 0x6c5   : > { %v24314_v13 = vpop.xlane.xlu1 %7946  ;;  %v19461_v8 = vunpack.i.l.bf16 %v27066_v49  ;;  %v8932_v36 = vmul.f32 %v20217_v60, %v23709_v55  ;;  %v27068_v60 = vld [vmem:[#allocation104_spill] sm:$0xff] }
 0x6c6   : > { %27061 = vst [vmem:[#allocation84_spill] sm:$0xff] %v24314_v13  ;;  %v20219_v34 = vpop.eup %20218  ;;  %v19462_v13 = vunpack.i.h.bf16 %v27066_v49  ;;  %v27067_v49 = vld [vmem:[#allocation27_spill] sm:$0xff] }
 0x6c7   : > { %v24316_v23 = vpop.xlane.xlu0 %7925 }
 0x6c8   : > { %27062 = vst [vmem:[#allocation95_spill] sm:$0xff] %v24316_v23  ;;  %v8929_v23 = vmul.f32 %v20219_v34, %v23713_v0  ;;  %v24341_v55 = vpack.c.bf16 %v19462_v13, %v19461_v8  ;;  %v19511_v34 = vunpack.i.l.bf16 %v27068_v60  ;;  %v27069_v8 = vld [vmem:[#allocation124_spill] sm:$0xff] }
 0x6c9   : > { %v24318_v56 = vpop.xlane.xlu1 %7943  ;;  %19524 = vrot.lane.b32.xlu1 %v27065_v22, %s20988_s27  ;;  %v8080_v13 = vsub.f32 %v27069_v8, %v24093_v20 }
 0x6ca   : > { %27063 = vst [vmem:[#allocation59_spill] sm:$0xff] %v24318_v56  ;;  %v20221_v16 = vpop.eup %20220 }
 0x6cb   : > { %v20223_v53 = vpop.eup %20222  ;;  %v8469_v7 = vpop.xlane.xlu0 %8468  ;;  %v8928_v21 = vmul.f32 %v20221_v16, %v23737_v28 }
 0x6cc   : > { %v20225_v42 = vpop.eup %20224  ;;  %20226 = vrcp.f32 %v8469_v7  ;;  %v8935_v0 = vmul.f32 %v20223_v53, %v23731_v51  ;;  %v19512_v51 = vunpack.i.h.bf16 %v27068_v60 }
 0x6cd   : > { %17752 = vmatprep.mubr.msk.f32.mxu1 %vm2189_vm0, %v8928_v21  ;;  %v8478_v56 = vpop.xlane.xlu1 %8477  ;;  %v8934_v47 = vmul.f32 %v20225_v42, %v23745_v17  ;;  %v27071_v21 = vld [vmem:[#allocation69_spill] sm:$0xff] }
 0x6ce   : > { %17753 = vmatmul.mubr.msk.f32.vlgmr.msra.gmra.mrb[100].mxu1 %vm2189_vm0, %v8929_v23  ;;  %20228 = vrcp.f32 %v8478_v56  ;;  %v8086_v42 = vsub.f32 %v27071_v21, %v24013_v58 }
 0x6cf   : > { %18716 = vmatpush3.bf16.msra.mxu1 %v24077_v2  ;;  %v24333_v28 = vpop.xlane.xlu0 %7940  ;;  %17766 = vmatprep.mubr.msk.f32.mxu1 %vm2189_vm0, %v8932_v36 }
 0x6d0   : > { %18722 = vmatprep.subr.bf16.mxu1 %v18721_v3  ;;  %17773 = vmatprep.mubr.msk.f32.mxu0 %vm2189_vm0, %v8934_v47 }
 0x6d1   : > { %19519 = vrot.lane.b32.xlu0 %v27067_v49, %s20987_s14  ;;  %17774 = vmatmul.mubr.msk.f32.vlgmr.msra.gmra.mrb[96].mxu0 %vm2189_vm0, %v8935_v0  ;;  %v8487_v17 = vpop.xlane.xlu1 %8486  ;;  %v27074_v0 = vld [vmem:[#allocation98_spill] sm:$0xff] }
 0x6d2   : > { %18728 = vmatpush3.bf16.msra.mxu0 %v18725_v11  ;;  %v18729_v11 = vpack.c.bf16 %v19512_v51, %v19511_v34  ;;  %v8087_v60 = vsub.f32 %v27074_v0, %v23992_v39  ;;  %v8286_v51 = vmul.f32 1.442695, %v8086_v42  ;;  %v27075_v34 = vld [vmem:[#allocation40_spill] sm:$0xff] }
 0x6d3   : > { %18734 = vmatprep.subr.bf16.mxu0 %v24341_v55  ;;  %v24344_v2 = vpop.xlane.xlu0 %7937 }
 0x6d4   : > { %v8288_v8 = vmul.f32 1.442695, %v8087_v60  ;;  %v27081_v60 = vld [vmem:[#allocation138_spill] sm:$0xff] }
 0x6d5   : > { %v24346_v23 = vpop.xlane.xlu1 %7958 }
 0x6d6   : > { %v20227_v47 = vpop.eup %20226 }
 0x6d7   : > { %v8481_v56 = vpop.xlane.xlu0 %8480  ;;  %v8933_v16 = vmul.f32 %v20227_v47, %v23783_v1  ;;  %v8274_v1 = vmul.f32 1.442695, %v8080_v13  ;;  %v27076_v47 = vld [vmem:[#allocation88_spill] sm:$0xff] }
 0x6d8   : > { %v20229_v29 = vpop.eup %20228  ;;  %20230 = vrcp.f32 %v8481_v56  ;;  %v8081_v56 = vsub.f32 %v27076_v47, %v24075_v38  ;;  %v27078_v38 = vld [vmem:[#allocation139_spill] sm:$0xff] }
 0x6d9   : > { %17767 = vmatmul.mubr.msk.f32.vlgmr.msra.gmra.mrb[102].mxu1 %vm2189_vm0, %v8933_v16  ;;  %v24354_v15 = vpop.xlane.xlu1 %7955  ;;  %v8936_v53 = vmul.f32 %v20229_v29, %v23794_v5  ;;  %v19482_v5 = vunpack.i.h.bf16 %v27075_v34  ;;  %20232 = vpow2.f32 %v8274_v1  ;;  %v24377_v1 = vmul.f32 0.25, %v27078_v38 }
 0x6da   : > { %18724 = vmatpush3.bf16.msra.mxu1 %v18721_v3  ;;  %v19481_v3 = vunpack.i.l.bf16 %v27075_v34  ;;  %20234 = vpow2.f32 %v8286_v51  ;;  %v24384_v51 = vmul.f32 0.25, %v27081_v60 }
 0x6db   : > { %v24357_v7 = vpop.xlane.xlu0 %7952  ;;  %18730 = vmatprep.subr.bf16.mxu1 %v18729_v11  ;;  %17780 = vmatprep.mubr.msk.f32.mxu1 %vm2189_vm0, %v8936_v53  ;;  %20236 = vrcp.f32 %v8487_v17  ;;  %v8276_v53 = vmul.f32 1.442695, %v8081_v56  ;;  %27079 = vst [vmem:[#allocation123_spill] sm:$0xff] %v24377_v1 }
 0x6dc   : > { %27070 = vst [vmem:[#allocation122_spill] sm:$0xff] %v24357_v7  ;;  %v18737_v39 = vpack.c.bf16 %v19482_v5, %v19481_v3  ;;  %27082 = vst [vmem:[#allocation92_spill] sm:$0xff] %v24384_v51 }
 0x6dd   : > { %v24362_v36 = vpop.xlane.xlu1 %7964 }
 0x6de   : > { %27072 = vst [vmem:[#allocation71_spill] sm:$0xff] %v24362_v36 }
 0x6df   : > { %v24364_v20 = vpop.xlane.xlu0 %7949 }
 0x6e0   : > { %27073 = vst [vmem:[#allocation107_spill] sm:$0xff] %v24364_v20 }
 0x6e1   : > { %v8499_v58 = vpop.xlane.xlu1 %8498 }
 0x6e2   : > { %v20231_v16 = vpop.eup %20230 }
 0x6e3   : > { %v8484_v29 = vpop.xlane.xlu0 %8483  ;;  %v8937_v13 = vmul.f32 %v20231_v16, %v23832_v57  ;;  %v24381_v17 = vpop.eup %20232 }
 0x6e4   : > { %20238 = vrcp.f32 %v8484_v29  ;;  %v24388_v34 = vpop.eup %20234  ;;  %v8596_v56 = vsel %vm2189_vm0, %v24381_v17, 0.0  ;;  %v27084_v29 = vld [vmem:[#allocation49_spill] sm:$0xff] }
 0x6e5   : > { %17781 = vmatmul.mubr.msk.f32.vlgmr.msra.gmra.mrb[104].mxu1 %vm2189_vm0, %v8937_v13  ;;  %v24374_v21 = vpop.xlane.xlu1 %7970  ;;  %20240 = vpow2.f32 %v8288_v8  ;;  %v20237_v3 = vpop.eup %20236  ;;  %v19497_v8 = vunpack.i.h.bf16 %v27084_v29  ;;  %v19496_v13 = vunpack.i.l.bf16 %v27084_v29  ;;  %v8614_v29 = vsel %vm2189_vm0, %v24388_v34, 0.0 }
 0x6e6   : > { %27077 = vst [vmem:[#allocation43_spill] sm:$0xff] %v24374_v21  ;;  %18732 = vmatpush3.bf16.msra.mxu1 %v18729_v11  ;;  %20242 = vpow2.f32 %v8276_v53  ;;  %v8002_v11 = vsel %vm2189_vm0, %v24377_v1, -inf }
 0x6e7   : > { %v8493_v42 = vpop.xlane.xlu0 %8492  ;;  %18738 = vmatprep.subr.bf16.mxu1 %v18737_v39 }
 0x6e8   : > { %20244 = vrcp.f32 %v8493_v42  ;;  %v8005_v42 = vsel %vm2189_vm0, %v24384_v51, -inf }
 0x6e9   : > { %v24379_v0 = vpop.xlane.xlu1 %7967 }
 0x6ea   : > { %27080 = vst [vmem:[#allocation90_spill] sm:$0xff] %v24379_v0 }
 0x6eb   : > { %v8490_v57 = vpop.xlane.xlu0 %8489 }
 0x6ec   : > { %20246 = vrcp.f32 %v8490_v57  ;;  %v8939_v57 = vmul.f32 %v20237_v3, %v23811_v26  ;;  %v27085_v3 = vld [vmem:[#allocation50_spill] sm:$0xff] }
 0x6ed   : > { %v8505_v5 = vpop.xlane.xlu1 %8504  ;;  %8003 = vmax.xlane.f32.xlu1 %v8002_v11 }
 0x6ee   : > { %v20239_v16 = vpop.eup %20238  ;;  %20248 = vrcp.f32 %v8505_v5 }
 0x6ef   : > { %v24390_v47 = vpop.xlane.xlu0 %7961  ;;  %v8938_v53 = vmul.f32 %v20239_v16, %v23900_v31  ;;  %v24399_v38 = vpop.eup %20240  ;;  %v18741_v31 = vpack.c.bf16 %v19497_v8, %v19496_v13 }
 0x6f0   : > { %27083 = vst [vmem:[#allocation119_spill] sm:$0xff] %v24390_v47  ;;  %8597 = vadd.xlane.f32.xlu0 %v8596_v56  ;;  %v24405_v56 = vpop.eup %20242  ;;  %v8617_v26 = vsel %vm2189_vm0, %v24399_v38, 0.0 }
 0x6f1   : > { %v8502_v60 = vpop.xlane.xlu1 %8501  ;;  %8006 = vmax.xlane.f32.xlu1 %v8005_v42  ;;  %17787 = vmatprep.mubr.msk.f32.mxu0 %vm2189_vm0, %v8938_v53  ;;  %v19517_v53 = vunpack.i.h.bf16 %v27085_v3  ;;  %v19516_v42 = vunpack.i.l.bf16 %v27085_v3  ;;  %v8599_v8 = vsel %vm2189_vm0, %v24405_v56, 0.0 }
 0x6f2   : > { %20250 = vrcp.f32 %v8502_v60  ;;  %17788 = vmatmul.mubr.msk.f32.vlgmr.msra.gmra.mrb[98].mxu0 %vm2189_vm0, %v8939_v57  ;;  %v20245_v16 = vpop.eup %20244 }
 0x6f3   : > { %v8496_v11 = vpop.xlane.xlu0 %8495  ;;  %20252 = vrcp.f32 %v8499_v58  ;;  %18736 = vmatpush3.bf16.msra.mxu0 %v24341_v55  ;;  %v8941_v13 = vmul.f32 %v20245_v16, %v23910_v52 }
 0x6f4   : > { %8615 = vadd.xlane.f32.xlu0 %v8614_v29  ;;  %20254 = vrcp.f32 %v8496_v11  ;;  %18742 = vmatprep.subr.bf16.mxu0 %v18741_v31  ;;  %v18745_v11 = vpack.c.bf16 %v19517_v53, %v19516_v42  ;;  %v27092_v53 = vld [vmem:[#allocation54_spill] sm:$0xff]  ;;  %v27093_v42 = vld [vmem:[#allocation117_spill] sm:$0xff] }
 0x6f5   : > { %v24413_v60 = vpop.xlane.xlu1 %7976  ;;  %8618 = vadd.xlane.f32.xlu1 %v8617_v26 }
 0x6f6   : > { %v20247_v5 = vpop.eup %20246  ;;  %27086 = vst [vmem:[#allocation131_spill] sm:$0xff] %v24413_v60  ;;  %v27089_v60 = vld [vmem:[#allocation101_spill] sm:$0xff] }
 0x6f7   : > { %v24415_v58 = vpop.xlane.xlu0 %7973  ;;  %v8940_v55 = vmul.f32 %v20247_v5, %v23932_v45 }
 0x6f8   : > { %27087 = vst [vmem:[#allocation127_spill] sm:$0xff] %v24415_v58  ;;  %8600 = vadd.xlane.f32.xlu0 %v8599_v8  ;;  %v20249_v26 = vpop.eup %20248  ;;  %v27090_v8 = vld [vmem:[#allocation91_spill] sm:$0xff] }
 0x6f9   : > { %17794 = vmatprep.mubr.msk.f32.mxu1 %vm2189_vm0, %v8940_v55  ;;  %v8511_v57 = vpop.xlane.xlu1 %8510  ;;  %v19467_v52 = vunpack.i.h.bf16 %v27090_v8  ;;  %v19466_v16 = vunpack.i.l.bf16 %v27090_v8 }
 0x6fa   : > { %17795 = vmatmul.mubr.msk.f32.vlgmr.msra.gmra.mrb[106].mxu1 %vm2189_vm0, %v8941_v13  ;;  %20256 = vrcp.f32 %v8511_v57  ;;  %v27094_v57 = vld [vmem:[#allocation66_spill] sm:$0xff] }
 0x6fb   : > { %18740 = vmatpush3.bf16.msra.mxu1 %v18737_v39  ;;  %v24423_v29 = vpop.xlane.xlu0 %7988  ;;  %v8945_v39 = vmul.f32 %v20249_v26, %v27092_v53  ;;  %v18749_v26 = vpack.c.bf16 %v19467_v52, %v19466_v16  ;;  %v27102_v53 = vld [vmem:[#allocation100_spill] sm:$0xff] }
 0x6fc   : > { %27088 = vst [vmem:[#allocation102_spill] sm:$0xff] %v24423_v29  ;;  %18746 = vmatprep.subr.bf16.mxu1 %v18745_v11  ;;  %v20251_v3 = vpop.eup %20250 }
 0x6fd   : > { %v20253_v51 = vpop.eup %20252  ;;  %v8508_v1 = vpop.xlane.xlu1 %8507  ;;  %v8944_v45 = vmul.f32 %v20251_v3, %v27089_v60 }
 0x6fe   : > { %v20255_v5 = vpop.eup %20254  ;;  %20258 = vrcp.f32 %v8508_v1  ;;  %v8943_v29 = vmul.f32 %v20253_v51, %v27094_v57  ;;  %v27101_v51 = vld [vmem:[#allocation31_spill] sm:$0xff]  ;;  %v27103_v57 = vld [vmem:[#allocation36_spill] sm:$0xff] }
 0x6ff   : > { %v24428_v55 = vpop.xlane.xlu0 %7985  ;;  %17808 = vmatprep.mubr.msk.f32.mxu1 %vm2189_vm0, %v8944_v45  ;;  %v8942_v13 = vmul.f32 %v20255_v5, %v27093_v42 }
 0x700   : > { %27091 = vst [vmem:[#allocation23_spill] sm:$0xff] %v24428_v55  ;;  %17809 = vmatmul.mubr.msk.f32.vlgmr.msra.gmra.mrb[108].mxu1 %vm2189_vm0, %v8945_v39  ;;  %v19502_v39 = vunpack.i.h.bf16 %v27102_v53 }
 0x701   : > { %v24435_v58 = vpop.f32.mrb[84].mxu0  ;;  %17801 = vmatprep.mubr.msk.f32.mxu0 %vm2189_vm0, %v8942_v13  ;;  %18748 = vmatpush3.bf16.msra.mxu1 %v18745_v11  ;;  %v24438_v60 = vpop.xlane.xlu1 %7982 }
 0x702   : > { %27095 = vst [vmem:[#allocation47_spill] sm:$0xff] %v24435_v58  ;;  %27096 = vst [vmem:[#allocation27_spill] sm:$0xff] %v24438_v60  ;;  %17802 = vmatmul.mubr.msk.f32.vlgmr.msra.gmra.mrb[100].mxu0 %vm2189_vm0, %v8943_v29  ;;  %v24441_v1 = vpop.f32.mrb[85].mxu0  ;;  %v19501_v29 = vunpack.i.l.bf16 %v27102_v53 }
 0x703   : > { %27097 = vst [vmem:[#allocation104_spill] sm:$0xff] %v24441_v1  ;;  %v24443_v3 = vpop.xlane.xlu0 %7994  ;;  %18744 = vmatpush3.bf16.msra.mxu0 %v18741_v31 }
 0x704   : > { %27098 = vst [vmem:[#allocation124_spill] sm:$0xff] %v24443_v3  ;;  %18750 = vmatprep.subr.bf16.mxu0 %v18749_v26  ;;  %v20257_v8 = vpop.eup %20256  ;;  %v18757_v13 = vpack.c.bf16 %v19502_v39, %v19501_v29  ;;  %v27107_v39 = vld [vmem:[#allocation114_spill] sm:$0xff] }
 0x705   : > { %v24445_v45 = vpop.xlane.xlu1 %7979  ;;  %v8947_v31 = vmul.f32 %v20257_v8, %v23986_v33  ;;  %v27106_v8 = vld [vmem:[#allocation111_spill] sm:$0xff]  ;;  %v8090_v29 = vsub.f32 %v27107_v39, %v24049_v44 }
 0x706   : > { %27099 = vst [vmem:[#allocation69_spill] sm:$0xff] %v24445_v45  ;;  %19534 = vrot.lane.b32.xlu1 %v27101_v51, %s20988_s27 }
 0x707   : > { %v24447_v5 = vpop.xlane.xlu0 %7991  ;;  %v8294_v60 = vmul.f32 1.442695, %v8090_v29 }
 0x708   : > { %27100 = vst [vmem:[#allocation98_spill] sm:$0xff] %v24447_v5  ;;  %v20259_v11 = vpop.eup %20258 }
 0x709   : > { %v8517_v42 = vpop.xlane.xlu1 %8516  ;;  %v8946_v52 = vmul.f32 %v20259_v11, %v24007_v41 }
 0x70a   : > { %20260 = vrcp.f32 %v8517_v42 }
 0x70b   : > { %v24454_v16 = vpop.xlane.xlu0 %8528  ;;  %17815 = vmatprep.mubr.msk.f32.mxu0 %vm2189_vm0, %v8946_v52  ;;  %v8084_v52 = vsub.f32 %v27106_v8, %v24125_v19  ;;  %v27109_v19 = vld [vmem:[#allocation72_spill] sm:$0xff] }
 0x70c   : > { %17816 = vmatmul.mubr.msk.f32.vlgmr.msra.gmra.mrb[102].mxu0 %vm2189_vm0, %v8947_v31 }
 0x70d   : > { %18752 = vmatpush3.bf16.msra.mxu0 %v18749_v26  ;;  %v8514_v1 = vpop.xlane.xlu1 %8513 }
 0x70e   : > { %19529 = vrot.lane.b32.xlu0 %v27103_v57, %s20987_s14  ;;  %18758 = vmatprep.subr.bf16.mxu0 %v18757_v13  ;;  %20262 = vrcp.f32 %v8514_v1 }
 0x70f   : > { %v8532_v53 = vpop.xlane.xlu0 %8531 }
 0x710   : > { %20264 = vrcp.f32 %v8532_v53  ;;  %v8085_v53 = vsub.f32 %v27109_v19, %v24109_v10 }
 0x711   : > { %v24461_v58 = vpop.f32.mrb[92].mxu1  ;;  %v8523_v41 = vpop.xlane.xlu1 %8522 }
 0x712   : > { %27104 = vst [vmem:[#allocation40_spill] sm:$0xff] %v24461_v58  ;;  %v24463_v11 = vpop.f32.mrb[93].mxu1  ;;  %20266 = vrcp.f32 %v8523_v41  ;;  %v27108_v58 = vld [vmem:[#allocation60_spill] sm:$0xff] }
 0x713   : > { %27105 = vst [vmem:[#allocation88_spill] sm:$0xff] %v24463_v11  ;;  %v24465_v33 = vpop.xlane.xlu0 %8540  ;;  %v8091_v3 = vsub.f32 %v27108_v58, %v24031_v25  ;;  %v8282_v11 = vmul.f32 1.442695, %v8084_v52  ;;  %v8284_v52 = vmul.f32 1.442695, %v8085_v53 }
 0x714   : > { %v20261_v1 = vpop.eup %20260 }
 0x715   : > { %v8520_v26 = vpop.xlane.xlu1 %8519  ;;  %v8949_v44 = vmul.f32 %v20261_v1, %v24064_v12  ;;  %v8296_v8 = vmul.f32 1.442695, %v8091_v3 }
 0x716   : > { %20268 = vrcp.f32 %v8520_v26 }
 0x717   : > { %v24471_v42 = vpop.xlane.xlu0 %8537 }
 0x718   : > { %v20263_v31 = vpop.eup %20262 }
 0x719   : > { %v8526_v5 = vpop.xlane.xlu1 %8525  ;;  %v8948_v55 = vmul.f32 %v20263_v31, %v24084_v50 }
 0x71a   : > { %20270 = vrcp.f32 %v8526_v5  ;;  %v20265_v50 = vpop.eup %20264 }
 0x71b   : > { %v24478_v41 = vpop.xlane.xlu0 %8546  ;;  %17822 = vmatprep.mubr.msk.f32.mxu1 %vm2189_vm0, %v8948_v55  ;;  %20272 = vpow2.f32 %v8282_v11  ;;  %v8954_v1 = vmul.f32 %v20265_v50, %v24091_v32 }
 0x71c   : > { %17823 = vmatmul.mubr.msk.f32.vlgmr.msra.gmra.mrb[110].mxu1 %vm2189_vm0, %v8949_v44  ;;  %20274 = vpow2.f32 %v8294_v60  ;;  %v20267_v5 = vpop.eup %20266 }
 0x71d   : > { %v24483_v25 = vpop.f32.mrb[86].mxu0  ;;  %v24485_v58 = vpop.xlane.xlu1 %8000  ;;  %20276 = vpow2.f32 %v8296_v8  ;;  %v8951_v60 = vmul.f32 %v20267_v5, %v24099_v6 }
 0x71e   : > { %27110 = vst [vmem:[#allocation139_spill] sm:$0xff] %v24483_v25  ;;  %27111 = vst [vmem:[#allocation138_spill] sm:$0xff] %v24485_v58  ;;  %v24487_v26 = vpop.f32.mrb[87].mxu0  ;;  %20278 = vpow2.f32 %v8284_v52 }
 0x71f   : > { %27112 = vst [vmem:[#allocation49_spill] sm:$0xff] %v24487_v26  ;;  %v8544_v10 = vpop.xlane.xlu0 %8543 }
 0x720   : > { %v20269_v39 = vpop.eup %20268  ;;  %20280 = vrcp.f32 %v8544_v10 }
 0x721   : > { %v24489_v12 = vpop.f32.mrb[88].mxu0  ;;  %v24491_v55 = vpop.xlane.xlu1 %7997  ;;  %v8950_v3 = vmul.f32 %v20269_v39, %v24115_v46 }
 0x722   : > { %27113 = vst [vmem:[#allocation50_spill] sm:$0xff] %v24489_v12  ;;  %27114 = vst [vmem:[#allocation101_spill] sm:$0xff] %v24491_v55  ;;  %v24494_v11 = vpop.f32.mrb[89].mxu0 }
 0x723   : > { %27115 = vst [vmem:[#allocation91_spill] sm:$0xff] %v24494_v11  ;;  %v24496_v29 = vpop.xlane.xlu0 %8552  ;;  %17829 = vmatprep.mubr.msk.f32.mxu0 %vm2189_vm0, %v8950_v3 }
 0x724   : > { %v20271_v31 = vpop.eup %20270  ;;  %17830 = vmatmul.mubr.msk.f32.vlgmr.msra.gmra.mrb[104].mxu0 %vm2189_vm0, %v8951_v60 }
 0x725   : > { %v24502_v19 = vpop.f32.mrb[90].mxu0  ;;  %18760 = vmatpush3.bf16.msra.mxu0 %v18757_v13  ;;  %v8535_v53 = vpop.xlane.xlu1 %8534  ;;  %17843 = vmatprep.mubr.msk.f32.mxu0 %vm2189_vm0, %v8954_v1  ;;  %v8952_v46 = vmul.f32 %v20271_v31, %v24131_v43 }
 0x726   : > { %27116 = vst [vmem:[#allocation54_spill] sm:$0xff] %v24502_v19  ;;  %v24506_v44 = vpop.eup %20272  ;;  %v24508_v8 = vpop.f32.mrb[91].mxu0  ;;  %20282 = vrcp.f32 %v8535_v53 }
 0x727   : > { %27117 = vst [vmem:[#allocation117_spill] sm:$0xff] %v24508_v8  ;;  %v24510_v6 = vpop.xlane.xlu0 %8558  ;;  %17836 = vmatprep.mubr.msk.f32.mxu1 %vm2189_vm0, %v8952_v46  ;;  %v24513_v32 = vpop.eup %20274  ;;  %v8608_v13 = vsel %vm2189_vm0, %v24506_v44, 0.0  ;;  %20284 = vrcp.f32 %v24454_v16 }
 0x728   : > { %v24519_v52 = vpop.eup %20276  ;;  %v8626_v10 = vsel %vm2189_vm0, %v24513_v32, 0.0  ;;  %20286 = vrcp.f32 %v24478_v41 }
 0x729   : > { %v24515_v50 = vpop.xlane.xlu1 %8549  ;;  %27118 = vst [vmem:[#allocation66_spill] sm:$0xff] %v24519_v52  ;;  %v24525_v5 = vpop.eup %20278  ;;  %v8629_v60 = vsel %vm2189_vm0, %v24519_v52, 0.0 }
 0x72a   : > { %8609 = vadd.xlane.f32.xlu1 %v8608_v13  ;;  %27119 = vst [vmem:[#allocation31_spill] sm:$0xff] %v24525_v5  ;;  %v8611_v53 = vsel %vm2189_vm0, %v24525_v5, 0.0  ;;  %v20281_v46 = vpop.eup %20280  ;;  %v27128_v5 = vld [vmem:[#allocation99_spill] sm:$0xff] }
 0x72b   : > { %v24521_v43 = vpop.xlane.xlu0 %8564  ;;  %v8958_v11 = vmul.f32 %v20281_v46, %v24154_v30  ;;  %v27124_v30 = vld [vmem:[#allocation24_spill] sm:$0xff]  ;;  %v8088_v52 = vsub.f32 %v27128_v5, %v24161_v37  ;;  %v27135_v5 = vld [vmem:[#allocation143_spill] sm:$0xff] }
 0x72c   : > { %v27130_v37 = vld [vmem:[#allocation96_spill] sm:$0xff] }
 0x72d   : > { %8627 = vadd.xlane.f32.xlu0 %v8626_v10  ;;  %v24527_v39 = vpop.f32.mrb[94].mxu1  ;;  %v8556_v3 = vpop.xlane.xlu1 %8555 }
 0x72e   : > { %27120 = vst [vmem:[#allocation100_spill] sm:$0xff] %v24527_v39  ;;  %v24531_v1 = vpop.f32.mrb[95].mxu1  ;;  %8630 = vadd.xlane.f32.xlu1 %v8629_v60  ;;  %20288 = vrcp.f32 %v8556_v3 }
 0x72f   : > { %27121 = vst [vmem:[#allocation36_spill] sm:$0xff] %v24531_v1  ;;  %v24533_v31 = vpop.xlane.xlu0 %8567  ;;  %20290 = vrcp.f32 %v24471_v42 }
 0x730   : > { %v20283_v13 = vpop.eup %20282 }
 0x731   : > { %8612 = vadd.xlane.f32.xlu0 %v8611_v53  ;;  %v24537_v8 = vpop.xlane.xlu1 %8561  ;;  %v8955_v19 = vmul.f32 %v20283_v13, %v24181_v24  ;;  %v27125_v13 = vld [vmem:[#allocation28_spill] sm:$0xff]  ;;  %v20285_v47 = vpop.eup %20284 }
 0x732   : > { %v20287_v21 = vpop.eup %20286 }
 0x733   : > { %v24539_v10 = vpop.xlane.xlu0 %8576  ;;  %17844 = vmatmul.mubr.msk.f32.vlgmr.msra.gmra.mrb[106].mxu0 %vm2189_vm0, %v8955_v19 }
 0x734   : > { %17857 = vmatprep.mubr.msk.f32.mxu0 %vm2189_vm0, %v8958_v11 }
 0x735   : > { %v24545_v12 = vpop.xlane.xlu1 %8570 }
 0x737   : > { %v24547_v60 = vpop.xlane.xlu0 %8573 }
 0x738   : > { %v20289_v42 = vpop.eup %20288 }
 0x739   : > { %v24549_v1 = vpop.xlane.xlu1 %8582  ;;  %v20291_v20 = vpop.eup %20290 }
 0x73b   : > { %v24551_v53 = vpop.xlane.xlu0 %8579 }
 0x73d   : > { %v24553_v39 = vpop.f32.mrb[96].mxu1  ;;  %v24555_v26 = vpop.xlane.xlu1 %8585 }
 0x73e   : > { %27122 = vst [vmem:[#allocation111_spill] sm:$0xff] %v24553_v39  ;;  %v24557_v25 = vpop.f32.mrb[97].mxu1 }
 0x73f   : > { %27123 = vst [vmem:[#allocation114_spill] sm:$0xff] %v24557_v25  ;;  %v24559_v24 = vpop.xlane.xlu0 %8588  ;;  %19544 = vrot.lane.b32.xlu1 %v27124_v30, %s20988_s27 }
 0x741   : > { %v24563_v11 = vpop.xlane.xlu1 %8594 }
 0x743   : > { %v24566_v19 = vpop.xlane.xlu0 %8591 }
 0x745   : > { %v24570_v46 = vpop.xlane.xlu1 %8606 }
 0x747   : > { %19539 = vrot.lane.b32.xlu0 %v27125_v13, %s20988_s27  ;;  %v24574_v25 = vpop.xlane.xlu0 %8603 }
 0x749   : > { %v19525_v39 = vpop.permute.xlu1 %19524 }
 0x74a   : > { %v19527_v58 = vunpack.i.h.bf16 %v19525_v39  ;;  %v19526_v55 = vunpack.i.l.bf16 %v19525_v39  ;;  %v8959_v39 = vmul.f32 %v20287_v21, %v24137_v61  ;;  %v27131_v61 = vld [vmem:[#allocation46_spill] sm:$0xff] }
 0x74b   : > { %v19520_v45 = vpop.permute.xlu0 %19519 }
 0x74c   : > { %v19522_v36 = vunpack.i.h.bf16 %v19520_v45  ;;  %v19521_v16 = vunpack.i.l.bf16 %v19520_v45  ;;  %v18765_v7 = vpack.c.bf16 %v19527_v58, %v19526_v55  ;;  %v8953_v45 = vmul.f32 %v20285_v47, %v24071_v9  ;;  %v27129_v55 = vld [vmem:[#allocation83_spill] sm:$0xff] }
 0x74d   : > { %v24576_v41 = vpop.f32.mrb[98].mxu1  ;;  %v8962_v58 = vmul.f32 %v20289_v42, %v24211_v48  ;;  %v27132_v48 = vld [vmem:[#allocation45_spill] sm:$0xff] }
 0x74e   : > { %27126 = vst [vmem:[#allocation60_spill] sm:$0xff] %v24576_v41  ;;  %v18753_v3 = vpack.c.bf16 %v19522_v36, %v19521_v16  ;;  %v24578_v0 = vpop.f32.mrb[99].mxu1  ;;  %18766 = vmatprep.subr.bf16.mxu0 %v18765_v7  ;;  %v8956_v36 = vmul.f32 %v20291_v20, %v24121_v59  ;;  %v8094_v16 = vsub.f32 %v27129_v55, %v24087_v27  ;;  %v27133_v27 = vld [vmem:[#allocation144_spill] sm:$0xff] }
 0x74f   : > { %27127 = vst [vmem:[#allocation72_spill] sm:$0xff] %v24578_v0  ;;  %18768 = vmatpush3.bf16.msra.mxu0 %v18765_v7  ;;  %v8290_v0 = vmul.f32 1.442695, %v8088_v52  ;;  %v8095_v7 = vsub.f32 %v27131_v61, %v27130_v37  ;;  %v8089_v21 = vsub.f32 %v27132_v48, %v24144_v18  ;;  %v24597_v20 = vmul.f32 0.25, %v27133_v27 }
 0x750   : > { %18754 = vmatprep.subr.bf16.mxu1 %v18753_v3  ;;  %v8302_v9 = vmul.f32 1.442695, %v8094_v16 }
 0x751   : > { %18756 = vmatpush3.bf16.msra.mxu1 %v18753_v3  ;;  %20292 = vpow2.f32 %v8290_v0  ;;  %v8304_v47 = vmul.f32 1.442695, %v8095_v7  ;;  %v8292_v59 = vmul.f32 1.442695, %v8089_v21  ;;  %27134 = vst [vmem:[#allocation24_spill] sm:$0xff] %v24597_v20  ;;  %v24602_v3 = vmul.f32 0.25, %v27135_v5 }
 0x752   : > { %17858 = vmatmul.mubr.msk.f32.vlgmr.msra.gmra.mrb[108].mxu0 %vm2189_vm0, %v8959_v39  ;;  %20294 = vpow2.f32 %v8302_v9  ;;  %v8008_v42 = vsel %vm2189_vm0, %v24597_v20, -inf  ;;  %v27140_v7 = vld [vmem:[#allocation32_spill] sm:$0xff]  ;;  %v27144_v5 = vld [vmem:[#allocation35_spill] sm:$0xff]  ;;  %v27147_v20 = vld [vmem:[#allocation62_spill] sm:$0xff] }
 0x753   : > { %17871 = vmatprep.mubr.msk.f32.mxu0 %vm2189_vm0, %v8962_v58  ;;  %20296 = vpow2.f32 %v8304_v47  ;;  %27136 = vst [vmem:[#allocation28_spill] sm:$0xff] %v24602_v3  ;;  %v8011_v39 = vsel %vm2189_vm0, %v24602_v3, -inf  ;;  %v27146_v3 = vld [vmem:[#allocation80_spill] sm:$0xff] }
 0x754   : > { %17837 = vmatmul.mubr.msk.f32.vlgmr.msra.gmra.mrb[112].mxu1 %vm2189_vm0, %v8953_v45  ;;  %20298 = vpow2.f32 %v8292_v59 }
 0x755   : > { %17850 = vmatprep.mubr.msk.f32.mxu1 %vm2189_vm0, %v8956_v36  ;;  %20300 = vrcp.f32 %v24510_v6 }
 0x756   : > { %20302 = vrcp.f32 %v24533_v31  ;;  %v27145_v31 = vld [vmem:[#allocation64_spill] sm:$0xff] }
 0x757   : > { %20304 = vrcp.f32 %v24465_v33  ;;  %v8092_v33 = vsub.f32 %v27145_v31, %v24191_v54 }
 0x758   : > { %20306 = vrcp.f32 %v24515_v50 }
 0x75b   : > { %v24599_v52 = vpop.eup %20292 }
 0x75c   : > { %v8620_v18 = vsel %vm2189_vm0, %v24599_v52, 0.0  ;;  %v24608_v0 = vpop.eup %20294 }
 0x75d   : > { %v24612_v45 = vpop.eup %20296  ;;  %v8638_v58 = vsel %vm2189_vm0, %v24608_v0, 0.0 }
 0x75e   : > { %27137 = vst [vmem:[#allocation99_spill] sm:$0xff] %v24612_v45  ;;  %v24616_v36 = vpop.eup %20298  ;;  %v8641_v55 = vsel %vm2189_vm0, %v24612_v45, 0.0  ;;  %v27149_v45 = vld [vmem:[#allocation116_spill] sm:$0xff] }
 0x75f   : > { %27138 = vst [vmem:[#allocation83_spill] sm:$0xff] %v24616_v36  ;;  %v8623_v16 = vsel %vm2189_vm0, %v24616_v36, 0.0  ;;  %v20301_v41 = vpop.eup %20300  ;;  %v27148_v36 = vld [vmem:[#allocation51_spill] sm:$0xff] }
 0x763   : > { %8009 = vmax.xlane.f32.xlu1 %v8008_v42 }
 0x766   : > { %8621 = vadd.xlane.f32.xlu0 %v8620_v18 }
 0x767   : > { %8012 = vmax.xlane.f32.xlu1 %v8011_v39 }
 0x76a   : > { %8639 = vadd.xlane.f32.xlu0 %v8638_v58 }
 0x76b   : > { %8642 = vadd.xlane.f32.xlu1 %v8641_v55 }
 0x76e   : > { %8624 = vadd.xlane.f32.xlu0 %v8623_v16 }
 0x77a   : > { %v24622_v37 = vpop.xlane.xlu1 %8003 }
 0x77b   : > { %27139 = vst [vmem:[#allocation96_spill] sm:$0xff] %v24622_v37 }
 0x77c   : > { %19554 = vrot.lane.b32.xlu1 %v27140_v7, %s20988_s27 }
 0x77d   : > { %v24624_v61 = vpop.xlane.xlu0 %8597 }
 0x77e   : > { %v24628_v9 = vpop.xlane.xlu1 %8006 }
 0x77f   : > { %27141 = vst [vmem:[#allocation46_spill] sm:$0xff] %v24628_v9  ;;  %v24630_v48 = vpop.f32.mrb[92].mxu0  ;;  %v8098_v9 = vsub.f32 %v27147_v20, %v27146_v3 }
 0x780   : > { %27142 = vst [vmem:[#allocation45_spill] sm:$0xff] %v24630_v48  ;;  %v24632_v21 = vpop.f32.mrb[93].mxu0 }
 0x781   : > { %27143 = vst [vmem:[#allocation144_spill] sm:$0xff] %v24632_v21  ;;  %v24635_v47 = vpop.xlane.xlu0 %8615  ;;  %v20303_v21 = vpop.eup %20302  ;;  %v8310_v3 = vmul.f32 1.442695, %v8098_v9 }
 0x782   : > { %v24641_v27 = vpop.xlane.xlu1 %8618  ;;  %v20305_v50 = vpop.eup %20304  ;;  %v8966_v54 = vmul.f32 %v20303_v21, %v24215_v4 }
 0x783   : > { %v20307_v37 = vpop.eup %20306 }
 0x784   : > { %19549 = vrot.lane.b32.xlu0 %v27144_v5, %s20988_s27 }
 0x785   : > { %v24646_v42 = vpop.xlane.xlu0 %8600 }
 0x786   : > { %v19535_v18 = vpop.permute.xlu1 %19534 }
 0x787   : > { %v19537_v6 = vunpack.i.h.bf16 %v19535_v18  ;;  %v19536_v39 = vunpack.i.l.bf16 %v19535_v18  ;;  %v8963_v18 = vmul.f32 %v20301_v41, %v24187_v63  ;;  %v8960_v41 = vmul.f32 %v20307_v37, %v24197_v62 }
 0x789   : > { %v19530_v58 = vpop.permute.xlu0 %19529  ;;  %v18773_v59 = vpack.c.bf16 %v19537_v6, %v19536_v39  ;;  %v8298_v6 = vmul.f32 1.442695, %v8092_v33 }
 0x78a   : > { %v19532_v55 = vunpack.i.h.bf16 %v19530_v58  ;;  %v19531_v16 = vunpack.i.l.bf16 %v19530_v58  ;;  %v8099_v58 = vsub.f32 %v27149_v45, %v27148_v36 }
 0x78b   : > { %18774 = vmatprep.subr.bf16.mxu0 %v18773_v59  ;;  %20308 = vpow2.f32 %v8298_v6 }
 0x78c   : > { %v18761_v48 = vpack.c.bf16 %v19532_v55, %v19531_v16  ;;  %18776 = vmatpush3.bf16.msra.mxu0 %v18773_v59  ;;  %v27152_v16 = vld [vmem:[#allocation76_spill] sm:$0xff]  ;;  %v27153_v59 = vld [vmem:[#allocation65_spill] sm:$0xff]  ;;  %v8312_v4 = vmul.f32 1.442695, %v8099_v58  ;;  %20310 = vpow2.f32 %v8310_v3 }
 0x78d   : > { %v8957_v20 = vmul.f32 %v20305_v50, %v27152_v16  ;;  %v8093_v31 = vsub.f32 %v27153_v59, %v24175_v35 }
 0x78e   : > { %18762 = vmatprep.subr.bf16.mxu1 %v18761_v48  ;;  %20312 = vpow2.f32 %v8312_v4 }
 0x78f   : > { %18764 = vmatpush3.bf16.msra.mxu1 %v18761_v48  ;;  %v24655_v39 = vpop.f32.mrb[94].mxu0  ;;  %17872 = vmatmul.mubr.msk.f32.vlgmr.msra.gmra.mrb[110].mxu0 %vm2189_vm0, %v8963_v18  ;;  %v8300_v45 = vmul.f32 1.442695, %v8093_v31 }
 0x790   : > { %27150 = vst [vmem:[#allocation143_spill] sm:$0xff] %v24655_v39  ;;  %v24659_v55 = vpop.f32.mrb[95].mxu0  ;;  %17885 = vmatprep.mubr.msk.f32.mxu0 %vm2189_vm0, %v8966_v54 }
 0x791   : > { %27151 = vst [vmem:[#allocation32_spill] sm:$0xff] %v24659_v55  ;;  %20314 = vpow2.f32 %v8300_v45 }
 0x792   : > { %17851 = vmatmul.mubr.msk.f32.vlgmr.msra.gmra.mrb[114].mxu1 %vm2189_vm0, %v8957_v20  ;;  %20316 = vrcp.f32 %v24545_v12 }
 0x793   : > { %17864 = vmatprep.mubr.msk.f32.mxu1 %vm2189_vm0, %v8960_v41  ;;  %20318 = vrcp.f32 %v24551_v53 }
 0x794   : > { %20320 = vrcp.f32 %v24496_v29 }
 0x795   : > { %v24670_v36 = vpop.eup %20308  ;;  %20322 = vrcp.f32 %v24537_v8 }
 0x796   : > { %v24672_v35 = vpop.eup %20310  ;;  %v8632_v9 = vsel %vm2189_vm0, %v24670_v36, 0.0 }
 0x797   : > { %v8650_v21 = vsel %vm2189_vm0, %v24672_v35, 0.0 }
 0x798   : > { %v24676_v48 = vpop.eup %20312 }
 0x799   : > { %v8653_v58 = vsel %vm2189_vm0, %v24676_v48, 0.0 }
 0x79b   : > { %v24684_v33 = vpop.eup %20314 }
 0x79c   : > { %27156 = vst [vmem:[#allocation80_spill] sm:$0xff] %v24684_v33  ;;  %v8635_v16 = vsel %vm2189_vm0, %v24684_v33, 0.0 }
 0x7a0   : > { %8633 = vadd.xlane.f32.xlu1 %v8632_v9  ;;  %v27163_v9 = vld [vmem:[#allocation108_spill] sm:$0xff] }
 0x7a1   : > { %v24678_v62 = vpop.f32.mrb[100].mxu1 }
 0x7a2   : > { %27154 = vst [vmem:[#allocation35_spill] sm:$0xff] %v24678_v62  ;;  %v24680_v37 = vpop.f32.mrb[101].mxu1 }
 0x7a3   : > { %27155 = vst [vmem:[#allocation64_spill] sm:$0xff] %v24680_v37  ;;  %8651 = vadd.xlane.f32.xlu0 %v8650_v21 }
 0x7a4   : > { %v24688_v18 = vpop.f32.mrb[96].mxu0  ;;  %8654 = vadd.xlane.f32.xlu1 %v8653_v58 }
 0x7a5   : > { %27157 = vst [vmem:[#allocation62_spill] sm:$0xff] %v24688_v18  ;;  %v24692_v6 = vpop.f32.mrb[97].mxu0 }
 0x7a6   : > { %27158 = vst [vmem:[#allocation51_spill] sm:$0xff] %v24692_v6  ;;  %v20317_v6 = vpop.eup %20316 }
 0x7a7   : > { %8636 = vadd.xlane.f32.xlu0 %v8635_v16 }
 0x7ac   : > { %v24698_v20 = vpop.f32.mrb[102].mxu1 }
 0x7ad   : > { %27159 = vst [vmem:[#allocation116_spill] sm:$0xff] %v24698_v20  ;;  %v24700_v3 = vpop.f32.mrb[103].mxu1  ;;  %v27166_v20 = vld [vmem:[#allocation89_spill] sm:$0xff] }
 0x7ae   : > { %27160 = vst [vmem:[#allocation76_spill] sm:$0xff] %v24700_v3  ;;  %v27165_v3 = vld [vmem:[#allocation106_spill] sm:$0xff] }
 0x7af   : > { %v8102_v55 = vsub.f32 %v27166_v20, %v27165_v3  ;;  %v27172_v3 = vld [vmem:[#allocation38_spill] sm:$0xff] }
 0x7b5   : > { %19564 = vrot.lane.b32.xlu1 %v27065_v22, %s20989_s3 }
 0x7b7   : > { %v24706_v31 = vpop.xlane.xlu1 %8609 }
 0x7b8   : > { %v24708_v41 = vpop.f32.mrb[104].mxu1 }
 0x7b9   : > { %27161 = vst [vmem:[#allocation65_spill] sm:$0xff] %v24708_v41  ;;  %v24711_v4 = vpop.f32.mrb[105].mxu1  ;;  %v20319_v41 = vpop.eup %20318 }
 0x7ba   : > { %27162 = vst [vmem:[#allocation149_spill] sm:$0xff] %v24711_v4  ;;  %v24713_v45 = vpop.xlane.xlu0 %8627  ;;  %v27164_v4 = vld [vmem:[#allocation63_spill] sm:$0xff]  ;;  %v20321_v8 = vpop.eup %20320 }
 0x7bb   : > { %v24719_v21 = vpop.xlane.xlu1 %8630  ;;  %v8096_v29 = vsub.f32 %v27164_v4, %v27163_v9  ;;  %v20323_v39 = vpop.eup %20322  ;;  %v27173_v9 = vld [vmem:[#allocation61_spill] sm:$0xff] }
 0x7bd   : > { %19559 = vrot.lane.b32.xlu0 %v27067_v49, %s20988_s27 }
 0x7be   : > { %v24724_v58 = vpop.xlane.xlu0 %8612 }
 0x7bf   : > { %v19545_v12 = vpop.permute.xlu1 %19544 }
 0x7c0   : > { %v19547_v16 = vunpack.i.h.bf16 %v19545_v12  ;;  %v19546_v54 = vunpack.i.l.bf16 %v19545_v12  ;;  %v8967_v12 = vmul.f32 %v20317_v6, %v24241_v14  ;;  %v8318_v14 = vmul.f32 1.442695, %v8102_v55  ;;  %v27174_v6 = vld [vmem:[#allocation125_spill] sm:$0xff] }
 0x7c2   : > { %v19540_v59 = vpop.permute.xlu0 %19539  ;;  %v18781_v50 = vpack.c.bf16 %v19547_v16, %v19546_v54  ;;  %v27168_v54 = vld [vmem:[#allocation53_spill] sm:$0xff]  ;;  %v27169_v16 = vld [vmem:[#allocation118_spill] sm:$0xff] }
 0x7c3   : > { %v19542_v63 = vunpack.i.h.bf16 %v19540_v59  ;;  %v19541_v53 = vunpack.i.l.bf16 %v19540_v59  ;;  %v8306_v59 = vmul.f32 1.442695, %v8096_v29  ;;  %v8103_v62 = vsub.f32 %v27169_v16, %v27168_v54 }
 0x7c4   : > { %18782 = vmatprep.subr.bf16.mxu0 %v18781_v50  ;;  %v8964_v29 = vmul.f32 %v20323_v39, %v27174_v6 }
 0x7c5   : > { %v18769_v18 = vpack.c.bf16 %v19542_v63, %v19541_v53  ;;  %18784 = vmatpush3.bf16.msra.mxu0 %v18781_v50  ;;  %v24730_v37 = vpop.f32.mrb[98].mxu0  ;;  %v8970_v63 = vmul.f32 %v20319_v41, %v24260_v40  ;;  %v27171_v50 = vld [vmem:[#allocation126_spill] sm:$0xff]  ;;  %v8097_v53 = vsub.f32 %v27173_v9, %v27172_v3  ;;  %20324 = vpow2.f32 %v8306_v59 }
 0x7c6   : > { %27167 = vst [vmem:[#allocation108_spill] sm:$0xff] %v24730_v37  ;;  %v24735_v33 = vpop.f32.mrb[99].mxu0  ;;  %v8961_v20 = vmul.f32 %v20321_v8, %v27171_v50  ;;  %20326 = vpow2.f32 %v8318_v14 }
 0x7c7   : > { %18770 = vmatprep.subr.bf16.mxu1 %v18769_v18  ;;  %27170 = vst [vmem:[#allocation63_spill] sm:$0xff] %v24735_v33  ;;  %v8308_v41 = vmul.f32 1.442695, %v8097_v53  ;;  %v27194_v33 = vld [vmem:[#allocation120_spill] sm:$0xff] }
 0x7c8   : > { %18772 = vmatpush3.bf16.msra.mxu1 %v18769_v18  ;;  %17886 = vmatmul.mubr.msk.f32.vlgmr.msra.gmra.mrb[112].mxu0 %vm2189_vm0, %v8967_v12  ;;  %v8320_v18 = vmul.f32 1.442695, %v8103_v62 }
 0x7c9   : > { %17899 = vmatprep.mubr.msk.f32.mxu0 %vm2189_vm0, %v8970_v63 }
 0x7ca   : > { %20328 = vpow2.f32 %v8320_v18 }
 0x7cb   : > { %17865 = vmatmul.mubr.msk.f32.vlgmr.msra.gmra.mrb[116].mxu1 %vm2189_vm0, %v8961_v20  ;;  %20330 = vpow2.f32 %v8308_v41 }
 0x7cc   : > { %17878 = vmatprep.mubr.msk.f32.mxu1 %vm2189_vm0, %v8964_v29  ;;  %20332 = vrcp.f32 %v24549_v1  ;;  %v27193_v1 = vld [vmem:[#allocation130_spill] sm:$0xff] }
 0x7cd   : > { %v24748_v40 = vpop.f32.mrb[106].mxu1  ;;  %20334 = vrcp.f32 %v24566_v19  ;;  %v8100_v37 = vsub.f32 %v27194_v33, %v27193_v1  ;;  %v27199_v33 = vld [vmem:[#allocation44_spill] sm:$0xff]  ;;  %v27200_v1 = vld [vmem:[#allocation85_spill] sm:$0xff] }
 0x7ce   : > { %27175 = vst [vmem:[#allocation106_spill] sm:$0xff] %v24748_v40  ;;  %v24750_v12 = vpop.f32.mrb[107].mxu1  ;;  %20336 = vrcp.f32 %v24521_v43 }
 0x7cf   : > { %27176 = vst [vmem:[#allocation89_spill] sm:$0xff] %v24750_v12  ;;  %v24758_v54 = vpop.eup %20324  ;;  %20338 = vrcp.f32 %v24547_v60  ;;  %v8314_v60 = vmul.f32 1.442695, %v8100_v37  ;;  %v27202_v37 = vld [vmem:[#allocation82_spill] sm:$0xff] }
 0x7d0   : > { %27179 = vst [vmem:[#allocation126_spill] sm:$0xff] %v24758_v54  ;;  %v24766_v63 = vpop.eup %20326  ;;  %v8644_v20 = vsel %vm2189_vm0, %v24758_v54, 0.0  ;;  %v8101_v54 = vsub.f32 %v27200_v1, %v27199_v33 }
 0x7d1   : > { %27182 = vst [vmem:[#allocation125_spill] sm:$0xff] %v24766_v63  ;;  %v8662_v9 = vsel %vm2189_vm0, %v24766_v63, 0.0  ;;  %20340 = vpow2.f32 %v8314_v60 }
 0x7d3   : > { %v24754_v55 = vpop.f32.mrb[108].mxu1 }
 0x7d4   : > { %27177 = vst [vmem:[#allocation53_spill] sm:$0xff] %v24754_v55  ;;  %v24756_v39 = vpop.f32.mrb[109].mxu1  ;;  %v24772_v3 = vpop.eup %20328 }
 0x7d5   : > { %27178 = vst [vmem:[#allocation118_spill] sm:$0xff] %v24756_v39  ;;  %v24760_v62 = vpop.f32.mrb[100].mxu0  ;;  %27183 = vst [vmem:[#allocation150_spill] sm:$0xff] %v24772_v3  ;;  %v24776_v53 = vpop.eup %20330  ;;  %v8665_v14 = vsel %vm2189_vm0, %v24772_v3, 0.0 }
 0x7d6   : > { %27180 = vst [vmem:[#allocation38_spill] sm:$0xff] %v24760_v62  ;;  %v24764_v16 = vpop.f32.mrb[101].mxu0  ;;  %27184 = vst [vmem:[#allocation151_spill] sm:$0xff] %v24776_v53  ;;  %v8647_v6 = vsel %vm2189_vm0, %v24776_v53, 0.0  ;;  %v27198_v53 = vld [vmem:[#allocation132_spill] sm:$0xff] }
 0x7d7   : > { %27181 = vst [vmem:[#allocation61_spill] sm:$0xff] %v24764_v16 }
 0x7d9   : > { %8645 = vadd.xlane.f32.xlu1 %v8644_v20 }
 0x7dc   : > { %8663 = vadd.xlane.f32.xlu0 %v8662_v9 }
 0x7dd   : > { %8666 = vadd.xlane.f32.xlu1 %v8665_v14 }
 0x7df   : > { %v24782_v29 = vpop.f32.mrb[102].mxu0 }
 0x7e0   : > { %8648 = vadd.xlane.f32.xlu0 %v8647_v6  ;;  %27185 = vst [vmem:[#allocation152_spill] sm:$0xff] %v24782_v29  ;;  %v24784_v18 = vpop.f32.mrb[103].mxu0  ;;  %v27196_v29 = vld [vmem:[#allocation113_spill] sm:$0xff] }
 0x7e1   : > { %27186 = vst [vmem:[#allocation153_spill] sm:$0xff] %v24784_v18  ;;  %v27195_v18 = vld [vmem:[#allocation78_spill] sm:$0xff] }
 0x7e2   : > { %v8106_v43 = vsub.f32 %v27196_v29, %v27195_v18  ;;  %v27201_v29 = vld [vmem:[#allocation70_spill] sm:$0xff] }
 0x7ee   : > { %19574 = vrot.lane.b32.xlu1 %v27101_v51, %s20989_s3 }
 0x7ef   : > { %v24790_v20 = vpop.f32.mrb[110].mxu1 }
 0x7f0   : > { %27187 = vst [vmem:[#allocation154_spill] sm:$0xff] %v24790_v20  ;;  %v24792_v9 = vpop.f32.mrb[111].mxu1  ;;  %v24794_v8 = vpop.xlane.xlu1 %8009 }
 0x7f1   : > { %27188 = vst [vmem:[#allocation155_spill] sm:$0xff] %v24792_v9  ;;  %27189 = vst [vmem:[#allocation156_spill] sm:$0xff] %v24794_v8  ;;  %v27197_v8 = vld [vmem:[#allocation77_spill] sm:$0xff] }
 0x7f2   : > { %v8107_v12 = vsub.f32 %v27198_v53, %v27197_v8  ;;  %v27203_v8 = vld [vmem:[#allocation128_spill] sm:$0xff] }
 0x7f3   : > { %v24798_v6 = vpop.xlane.xlu0 %8621 }
 0x7f4   : > { %v24800_v4 = vpop.xlane.xlu1 %8012 }
 0x7f5   : > { %27190 = vst [vmem:[#allocation157_spill] sm:$0xff] %v24800_v4  ;;  %v20333_v4 = vpop.eup %20332 }
 0x7f6   : > { %19569 = vrot.lane.b32.xlu0 %v27103_v57, %s20988_s27  ;;  %v8971_v18 = vmul.f32 %v20333_v4, %v27201_v29 }
 0x7f7   : > { %v24805_v41 = vpop.xlane.xlu0 %8639  ;;  %v24808_v59 = vpop.f32.mrb[104].mxu0 }
 0x7f8   : > { %27191 = vst [vmem:[#allocation158_spill] sm:$0xff] %v24808_v59  ;;  %v24811_v50 = vpop.f32.mrb[105].mxu0  ;;  %v24813_v14 = vpop.xlane.xlu1 %8642 }
 0x7f9   : > { %27192 = vst [vmem:[#allocation159_spill] sm:$0xff] %v24811_v50  ;;  %v20335_v50 = vpop.eup %20334 }
 0x7fa   : > { %v20337_v3 = vpop.eup %20336 }
 0x7fb   : > { %v24818_v40 = vpop.xlane.xlu0 %8624  ;;  %v20339_v63 = vpop.eup %20338  ;;  %v8965_v53 = vmul.f32 %v20337_v3, %v27203_v8 }
 0x7fc   : > { %v19555_v9 = vpop.permute.xlu1 %19554 }
 0x7fd   : > { %v19557_v19 = vunpack.i.h.bf16 %v19555_v9  ;;  %v19556_v20 = vunpack.i.l.bf16 %v19555_v9  ;;  %v8326_v9 = vmul.f32 1.442695, %v8106_v43 }
 0x7ff   : > { %v19550_v39 = vpop.permute.xlu0 %19549  ;;  %v18789_v62 = vpack.c.bf16 %v19557_v19, %v19556_v20  ;;  %v8974_v20 = vmul.f32 %v20335_v50, %v27202_v37  ;;  %20342 = vpow2.f32 %v8326_v9 }
 0x800   : > { %v19552_v55 = vunpack.i.h.bf16 %v19550_v39  ;;  %v19551_v16 = vunpack.i.l.bf16 %v19550_v39  ;;  %v8328_v39 = vmul.f32 1.442695, %v8107_v12  ;;  %v27217_v12 = vld [vmem:[#allocation121_spill] sm:$0xff] }
 0x801   : > { %18790 = vmatprep.subr.bf16.mxu0 %v18789_v62 }
 0x802   : > { %v18777_v59 = vpack.c.bf16 %v19552_v55, %v19551_v16  ;;  %18792 = vmatpush3.bf16.msra.mxu0 %v18789_v62  ;;  %v8316_v55 = vmul.f32 1.442695, %v8101_v54  ;;  %v27204_v16 = vld [vmem:[#allocation86_spill] sm:$0xff]  ;;  %20344 = vpow2.f32 %v8328_v39 }
 0x803   : > { %v8968_v19 = vmul.f32 %v20339_v63, %v27204_v16  ;;  %v27215_v16 = vld [vmem:[#allocation67_spill] sm:$0xff] }
 0x804   : > { %18778 = vmatprep.subr.bf16.mxu1 %v18777_v59  ;;  %20346 = vpow2.f32 %v8316_v55 }
 0x805   : > { %18780 = vmatpush3.bf16.msra.mxu1 %v18777_v59  ;;  %17900 = vmatmul.mubr.msk.f32.vlgmr.msra.gmra.mrb[114].mxu0 %vm2189_vm0, %v8971_v18  ;;  %v24842_v59 = vpop.eup %20340  ;;  %20348 = vrcp.f32 %v24563_v11  ;;  %v27218_v11 = vld [vmem:[#allocation29_spill] sm:$0xff] }
 0x806   : > { %17913 = vmatprep.mubr.msk.f32.mxu0 %vm2189_vm0, %v8974_v20  ;;  %v24834_v62 = vpop.f32.mrb[106].mxu0  ;;  %27207 = vst [vmem:[#allocation78_spill] sm:$0xff] %v24842_v59  ;;  %v8656_v63 = vsel %vm2189_vm0, %v24842_v59, 0.0  ;;  %20350 = vrcp.f32 %v24574_v25  ;;  %v8110_v37 = vsub.f32 %v27218_v11, %v27217_v12  ;;  %v27222_v59 = vld [vmem:[#allocation37_spill] sm:$0xff]  ;;  %v27223_v12 = vld [vmem:[#allocation110_spill] sm:$0xff] }
 0x807   : > { %27205 = vst [vmem:[#allocation130_spill] sm:$0xff] %v24834_v62  ;;  %v24837_v4 = vpop.f32.mrb[107].mxu0  ;;  %20352 = vrcp.f32 %v24539_v10 }
 0x808   : > { %17879 = vmatmul.mubr.msk.f32.vlgmr.msra.gmra.mrb[118].mxu1 %vm2189_vm0, %v8965_v53  ;;  %27206 = vst [vmem:[#allocation120_spill] sm:$0xff] %v24837_v4  ;;  %20354 = vrcp.f32 %v24555_v26 }
 0x809   : > { %17892 = vmatprep.mubr.msk.f32.mxu1 %vm2189_vm0, %v8968_v19  ;;  %v24844_v54 = vpop.eup %20342  ;;  %v27216_v19 = vld [vmem:[#allocation129_spill] sm:$0xff] }
 0x80a   : > { %27208 = vst [vmem:[#allocation113_spill] sm:$0xff] %v24844_v54  ;;  %v8674_v3 = vsel %vm2189_vm0, %v24844_v54, 0.0 }
 0x80c   : > { %v24848_v50 = vpop.eup %20344 }
 0x80d   : > { %27209 = vst [vmem:[#allocation77_spill] sm:$0xff] %v24848_v50  ;;  %v8677_v60 = vsel %vm2189_vm0, %v24848_v50, 0.0 }
 0x80e   : > { %v24852_v43 = vpop.eup %20346 }
 0x80f   : > { %27210 = vst [vmem:[#allocation132_spill] sm:$0xff] %v24852_v43  ;;  %v8659_v33 = vsel %vm2189_vm0, %v24852_v43, 0.0  ;;  %v20349_v10 = vpop.eup %20348 }
 0x810   : > { %v8975_v11 = vmul.f32 %v20349_v10, %v27223_v12 }
 0x812   : > { %8657 = vadd.xlane.f32.xlu1 %v8656_v63  ;;  %v8104_v63 = vsub.f32 %v27216_v19, %v27215_v16  ;;  %v8334_v16 = vmul.f32 1.442695, %v8110_v37  ;;  %v27221_v19 = vld [vmem:[#allocation58_spill] sm:$0xff]  ;;  %v27226_v37 = vld [vmem:[#allocation133_spill] sm:$0xff] }
 0x814   : > { %v8322_v26 = vmul.f32 1.442695, %v8104_v63 }
 0x815   : > { %8675 = vadd.xlane.f32.xlu0 %v8674_v3 }
 0x816   : > { %8678 = vadd.xlane.f32.xlu1 %v8677_v60  ;;  %20356 = vpow2.f32 %v8322_v26 }
 0x817   : > { %20358 = vpow2.f32 %v8334_v16 }
 0x819   : > { %8660 = vadd.xlane.f32.xlu0 %v8659_v33 }
 0x825   : > { %v24858_v1 = vpop.f32.mrb[108].mxu0 }
 0x826   : > { %27211 = vst [vmem:[#allocation44_spill] sm:$0xff] %v24858_v1  ;;  %v24862_v29 = vpop.f32.mrb[109].mxu0  ;;  %v20351_v1 = vpop.eup %20350 }
 0x827   : > { %v24860_v9 = vpop.f32.mrb[112].mxu1  ;;  %27213 = vst [vmem:[#allocation70_spill] sm:$0xff] %v24862_v29  ;;  %19584 = vrot.lane.b32.xlu1 %v27124_v30, %s20989_s3  ;;  %v20353_v50 = vpop.eup %20352 }
 0x828   : > { %27212 = vst [vmem:[#allocation85_spill] sm:$0xff] %v24860_v9  ;;  %v24866_v39 = vpop.f32.mrb[113].mxu1  ;;  %v27220_v9 = vld [vmem:[#allocation33_spill] sm:$0xff]  ;;  %v20355_v54 = vpop.eup %20354 }
 0x829   : > { %27214 = vst [vmem:[#allocation82_spill] sm:$0xff] %v24866_v39  ;;  %v27219_v39 = vld [vmem:[#allocation41_spill] sm:$0xff] }
 0x82a   : > { %v8111_v29 = vsub.f32 %v27220_v9, %v27219_v39  ;;  %v27225_v9 = vld [vmem:[#allocation68_spill] sm:$0xff] }
 0x82b   : > { %v8969_v39 = vmul.f32 %v20353_v50, %v27225_v9  ;;  %v27235_v9 = vld [vmem:[#allocation109_spill] sm:$0xff] }
 0x82d   : > { %v24872_v20 = vpop.xlane.xlu1 %8633 }
 0x82f   : > { %19579 = vrot.lane.b32.xlu0 %v27125_v13, %s20989_s3 }
 0x830   : > { %v24877_v8 = vpop.xlane.xlu0 %8651 }
 0x831   : > { %v24881_v53 = vpop.xlane.xlu1 %8654 }
 0x834   : > { %v24884_v55 = vpop.xlane.xlu0 %8636 }
 0x835   : > { %v19565_v3 = vpop.permute.xlu1 %19564 }
 0x836   : > { %v19567_v60 = vunpack.i.h.bf16 %v19565_v3  ;;  %v19566_v33 = vunpack.i.l.bf16 %v19565_v3  ;;  %v8105_v3 = vsub.f32 %v27222_v59, %v27221_v19  ;;  %v8972_v59 = vmul.f32 %v20355_v54, %v27226_v37 }
 0x838   : > { %v19560_v18 = vpop.permute.xlu0 %19559  ;;  %v18797_v62 = vpack.c.bf16 %v19567_v60, %v19566_v33  ;;  %v27224_v60 = vld [vmem:[#allocation105_spill] sm:$0xff] }
 0x839   : > { %v19562_v4 = vunpack.i.h.bf16 %v19560_v18  ;;  %v19561_v25 = vunpack.i.l.bf16 %v19560_v18  ;;  %v8336_v18 = vmul.f32 1.442695, %v8111_v29  ;;  %v8978_v33 = vmul.f32 %v20351_v1, %v27224_v60 }
 0x83a   : > { %18798 = vmatprep.subr.bf16.mxu0 %v18797_v62 }
 0x83b   : > { %v18785_v43 = vpack.c.bf16 %v19562_v4, %v19561_v25  ;;  %18800 = vmatpush3.bf16.msra.mxu0 %v18797_v62  ;;  %v8324_v4 = vmul.f32 1.442695, %v8105_v3  ;;  %20360 = vpow2.f32 %v8336_v18  ;;  %v24902_v62 = vpop.eup %20356 }
 0x83c   : > { %27227 = vst [vmem:[#allocation128_spill] sm:$0xff] %v24902_v62  ;;  %v8668_v1 = vsel %vm2189_vm0, %v24902_v62, 0.0 }
 0x83d   : > { %18786 = vmatprep.subr.bf16.mxu1 %v18785_v43  ;;  %20362 = vpow2.f32 %v8324_v4 }
 0x83e   : > { %18788 = vmatpush3.bf16.msra.mxu1 %v18785_v43  ;;  %17914 = vmatmul.mubr.msk.f32.vlgmr.msra.gmra.mrb[116].mxu0 %vm2189_vm0, %v8975_v11  ;;  %v24904_v43 = vpop.eup %20358  ;;  %20364 = vrcp.f32 %v24570_v46  ;;  %v27238_v46 = vld [vmem:[#allocation136_spill] sm:$0xff] }
 0x83f   : > { %17927 = vmatprep.mubr.msk.f32.mxu0 %vm2189_vm0, %v8978_v33  ;;  %27228 = vst [vmem:[#allocation86_spill] sm:$0xff] %v24904_v43  ;;  %v8686_v29 = vsel %vm2189_vm0, %v24904_v43, 0.0  ;;  %20366 = vrcp.f32 %v24635_v47 }
 0x840   : > { %20368 = vrcp.f32 %v24559_v24 }
 0x841   : > { %17893 = vmatmul.mubr.msk.f32.vlgmr.msra.gmra.mrb[120].mxu1 %vm2189_vm0, %v8969_v39  ;;  %20370 = vrcp.f32 %v24624_v61  ;;  %v27236_v39 = vld [vmem:[#allocation137_spill] sm:$0xff] }
 0x842   : > { %17906 = vmatprep.mubr.msk.f32.mxu1 %vm2189_vm0, %v8972_v59  ;;  %v8108_v4 = vsub.f32 %v27236_v39, %v27235_v9  ;;  %v27241_v9 = vld [vmem:[#allocation55_spill] sm:$0xff] }
 0x843   : > { %v27242_v39 = vld [vmem:[#allocation135_spill] sm:$0xff] }
 0x844   : > { %v8330_v61 = vmul.f32 1.442695, %v8108_v4  ;;  %v8109_v62 = vsub.f32 %v27242_v39, %v27241_v9 }
 0x845   : > { %v24908_v50 = vpop.eup %20360 }
 0x846   : > { %27229 = vst [vmem:[#allocation67_spill] sm:$0xff] %v24908_v50  ;;  %v8689_v63 = vsel %vm2189_vm0, %v24908_v50, 0.0  ;;  %20372 = vpow2.f32 %v8330_v61  ;;  %v27256_v61 = vld [vmem:[#allocation26_spill] sm:$0xff] }
 0x847   : > { %v24912_v54 = vpop.eup %20362 }
 0x848   : > { %27230 = vst [vmem:[#allocation129_spill] sm:$0xff] %v24912_v54  ;;  %v8671_v25 = vsel %vm2189_vm0, %v24912_v54, 0.0  ;;  %v20365_v24 = vpop.eup %20364 }
 0x84b   : > { %8669 = vadd.xlane.f32.xlu1 %v8668_v1 }
 0x84e   : > { %8687 = vadd.xlane.f32.xlu0 %v8686_v29  ;;  %v27237_v29 = vld [vmem:[#allocation81_spill] sm:$0xff] }
 0x84f   : > { %8690 = vadd.xlane.f32.xlu1 %v8689_v63  ;;  %v8114_v63 = vsub.f32 %v27238_v46, %v27237_v29  ;;  %v27243_v29 = vld [vmem:[#allocation112_spill] sm:$0xff] }
 0x850   : > { %v8979_v46 = vmul.f32 %v20365_v24, %v27243_v29 }
 0x852   : > { %8672 = vadd.xlane.f32.xlu0 %v8671_v25 }
 0x860   : > { %19594 = vrot.lane.b32.xlu1 %v27140_v7, %s20989_s3 }
 0x862   : > { %v24920_v10 = vpop.f32.mrb[110].mxu0 }
 0x863   : > { %27231 = vst [vmem:[#allocation121_spill] sm:$0xff] %v24920_v10  ;;  %v24922_v26 = vpop.f32.mrb[111].mxu0  ;;  %v20367_v10 = vpop.eup %20366 }
 0x864   : > { %27232 = vst [vmem:[#allocation29_spill] sm:$0xff] %v24922_v26  ;;  %v20369_v50 = vpop.eup %20368 }
 0x865   : > { %v24924_v16 = vpop.f32.mrb[114].mxu1  ;;  %v20371_v43 = vpop.eup %20370 }
 0x866   : > { %27233 = vst [vmem:[#allocation41_spill] sm:$0xff] %v24924_v16  ;;  %v24928_v3 = vpop.f32.mrb[115].mxu1  ;;  %v24932_v11 = vpop.xlane.xlu1 %8645  ;;  %v27240_v16 = vld [vmem:[#allocation134_spill] sm:$0xff]  ;;  %v8976_v4 = vmul.f32 %v20371_v43, %v24381_v17 }
 0x867   : > { %27234 = vst [vmem:[#allocation33_spill] sm:$0xff] %v24928_v3  ;;  %v27239_v3 = vld [vmem:[#allocation79_spill] sm:$0xff] }
 0x868   : > { %19589 = vrot.lane.b32.xlu0 %v27144_v5, %s20989_s3  ;;  %v8115_v26 = vsub.f32 %v27240_v16, %v27239_v3  ;;  %v27244_v16 = vld [vmem:[#allocation52_spill] sm:$0xff] }
 0x869   : > { %v24937_v18 = vpop.xlane.xlu0 %8663  ;;  %v8973_v3 = vmul.f32 %v20369_v50, %v27244_v16 }
 0x86a   : > { %v24941_v60 = vpop.xlane.xlu1 %8666 }
 0x86d   : > { %v24944_v33 = vpop.xlane.xlu0 %8648 }
 0x86e   : > { %v19575_v37 = vpop.permute.xlu1 %19574 }
 0x86f   : > { %v19577_v59 = vunpack.i.h.bf16 %v19575_v37  ;;  %v19576_v1 = vunpack.i.l.bf16 %v19575_v37  ;;  %v8342_v37 = vmul.f32 1.442695, %v8114_v63 }
 0x871   : > { %v19570_v25 = vpop.permute.xlu0 %19569  ;;  %v18805_v19 = vpack.c.bf16 %v19577_v59, %v19576_v1  ;;  %v8982_v59 = vmul.f32 %v20367_v10, %v24388_v34  ;;  %20374 = vpow2.f32 %v8342_v37 }
 0x872   : > { %v19572_v12 = vunpack.i.h.bf16 %v19570_v25  ;;  %v19571_v47 = vunpack.i.l.bf16 %v19570_v25  ;;  %v8344_v25 = vmul.f32 1.442695, %v8115_v26  ;;  %v24962_v26 = vpop.eup %20372 }
 0x873   : > { %18806 = vmatprep.subr.bf16.mxu0 %v18805_v19  ;;  %v8680_v34 = vsel %vm2189_vm0, %v24962_v26, 0.0 }
 0x874   : > { %v18793_v54 = vpack.c.bf16 %v19572_v12, %v19571_v47  ;;  %18808 = vmatpush3.bf16.msra.mxu0 %v18805_v19  ;;  %v8332_v12 = vmul.f32 1.442695, %v8109_v62  ;;  %20376 = vpow2.f32 %v8344_v25  ;;  %v27252_v25 = vld [vmem:[#allocation141_spill] sm:$0xff]  ;;  %v27255_v47 = vld [vmem:[#allocation84_spill] sm:$0xff] }
 0x876   : > { %18794 = vmatprep.subr.bf16.mxu1 %v18793_v54  ;;  %20378 = vpow2.f32 %v8332_v12 }
 0x877   : > { %18796 = vmatpush3.bf16.msra.mxu1 %v18793_v54  ;;  %17928 = vmatmul.mubr.msk.f32.vlgmr.msra.gmra.mrb[118].mxu0 %vm2189_vm0, %v8979_v46  ;;  %20380 = vrcp.f32 %v24641_v27  ;;  %v27251_v46 = vld [vmem:[#allocation95_spill] sm:$0xff]  ;;  %v27254_v27 = vld [vmem:[#allocation142_spill] sm:$0xff] }
 0x878   : > { %17941 = vmatprep.mubr.msk.f32.mxu0 %vm2189_vm0, %v8982_v59  ;;  %20382 = vrcp.f32 %v24713_v45  ;;  %v8112_v59 = vsub.f32 %v27252_v25, %v27251_v46  ;;  %v27257_v46 = vld [vmem:[#allocation94_spill] sm:$0xff]  ;;  %v27258_v25 = vld [vmem:[#allocation140_spill] sm:$0xff] }
 0x879   : > { %20384 = vrcp.f32 %v24646_v42 }
 0x87a   : > { %17907 = vmatmul.mubr.msk.f32.vlgmr.msra.gmra.mrb[122].mxu1 %vm2189_vm0, %v8973_v3  ;;  %20386 = vrcp.f32 %v24706_v31  ;;  %v8338_v31 = vmul.f32 1.442695, %v8112_v59 }
 0x87b   : > { %17920 = vmatprep.mubr.msk.f32.mxu1 %vm2189_vm0, %v8976_v4  ;;  %v24964_v54 = vpop.eup %20374  ;;  %v27253_v4 = vld [vmem:[#allocation59_spill] sm:$0xff] }
 0x87c   : > { %v8698_v62 = vsel %vm2189_vm0, %v24964_v54, 0.0  ;;  %20388 = vpow2.f32 %v8338_v31  ;;  %v27263_v31 = vld [vmem:[#allocation146_spill] sm:$0xff] }
 0x87e   : > { %v24968_v50 = vpop.eup %20376 }
 0x87f   : > { %27245 = vst [vmem:[#allocation58_spill] sm:$0xff] %v24968_v50  ;;  %v8701_v43 = vsel %vm2189_vm0, %v24968_v50, 0.0 }
 0x880   : > { %v24972_v17 = vpop.eup %20378 }
 0x881   : > { %27246 = vst [vmem:[#allocation37_spill] sm:$0xff] %v24972_v17  ;;  %v8683_v10 = vsel %vm2189_vm0, %v24972_v17, 0.0  ;;  %v20381_v42 = vpop.eup %20380  ;;  %v8113_v17 = vsub.f32 %v27258_v25, %v27257_v46  ;;  %v8116_v46 = vsub.f32 %v27263_v31, %v24344_v2  ;;  %v27266_v2 = vld [vmem:[#allocation145_spill] sm:$0xff] }
 0x882   : > { %v8117_v31 = vsub.f32 %v27266_v2, %v24333_v28 }
 0x884   : > { %8681 = vadd.xlane.f32.xlu1 %v8680_v34  ;;  %v8118_v34 = vsub.f32 %v27254_v27, %v27253_v4  ;;  %v8983_v4 = vmul.f32 %v20381_v42, %v24399_v38 }
 0x887   : > { %8699 = vadd.xlane.f32.xlu0 %v8698_v62 }
 0x888   : > { %8702 = vadd.xlane.f32.xlu1 %v8701_v43 }
 0x88b   : > { %8684 = vadd.xlane.f32.xlu0 %v8683_v10 }
 0x899   : > { %19604 = vrot.lane.b32.xlu1 %v27065_v22, %s20990_s12 }
 0x89b   : > { %v24980_v19 = vpop.f32.mrb[112].mxu0 }
 0x89c   : > { %27247 = vst [vmem:[#allocation110_spill] sm:$0xff] %v24980_v19  ;;  %v24982_v1 = vpop.f32.mrb[113].mxu0  ;;  %v20383_v19 = vpop.eup %20382 }
 0x89d   : > { %27248 = vst [vmem:[#allocation105_spill] sm:$0xff] %v24982_v1  ;;  %v8119_v1 = vsub.f32 %v27256_v61, %v27255_v47  ;;  %v8340_v61 = vmul.f32 1.442695, %v8113_v17 }
 0x89e   : > { %v24984_v63 = vpop.f32.mrb[116].mxu1 }
 0x89f   : > { %27249 = vst [vmem:[#allocation68_spill] sm:$0xff] %v24984_v63  ;;  %v24988_v24 = vpop.f32.mrb[117].mxu1  ;;  %v24992_v9 = vpop.xlane.xlu1 %8657  ;;  %v8352_v27 = vmul.f32 1.442695, %v8119_v1 }
 0x8a0   : > { %27250 = vst [vmem:[#allocation133_spill] sm:$0xff] %v24988_v24  ;;  %v20385_v63 = vpop.eup %20384 }
 0x8a1   : > { %19599 = vrot.lane.b32.xlu0 %v27067_v49, %s20989_s3  ;;  %v20387_v50 = vpop.eup %20386  ;;  %v8977_v47 = vmul.f32 %v20385_v63, %v24405_v56 }
 0x8a2   : > { %v24997_v39 = vpop.xlane.xlu0 %8675  ;;  %v8980_v59 = vmul.f32 %v20387_v50, %v24506_v44  ;;  %v25022_v38 = vpop.eup %20388 }
 0x8a3   : > { %v25001_v37 = vpop.xlane.xlu1 %8678 }
 0x8a6   : > { %v25004_v29 = vpop.xlane.xlu0 %8660 }
 0x8a7   : > { %v19585_v16 = vpop.permute.xlu1 %19584 }
 0x8a8   : > { %v19587_v3 = vunpack.i.h.bf16 %v19585_v16  ;;  %v19586_v12 = vunpack.i.l.bf16 %v19585_v16  ;;  %v8350_v16 = vmul.f32 1.442695, %v8118_v34 }
 0x8aa   : > { %v19580_v62 = vpop.permute.xlu0 %19579  ;;  %v18813_v10 = vpack.c.bf16 %v19587_v3, %v19586_v12  ;;  %v8986_v3 = vmul.f32 %v20383_v19, %v24513_v32  ;;  %20390 = vpow2.f32 %v8350_v16  ;;  %v8692_v32 = vsel %vm2189_vm0, %v25022_v38, 0.0 }
 0x8ab   : > { %v19582_v43 = vunpack.i.h.bf16 %v19580_v62  ;;  %v19581_v45 = vunpack.i.l.bf16 %v19580_v62  ;;  %20392 = vpow2.f32 %v8352_v27 }
 0x8ac   : > { %18814 = vmatprep.subr.bf16.mxu0 %v18813_v10  ;;  %20394 = vpow2.f32 %v8340_v61 }
 0x8ad   : > { %v18801_v24 = vpack.c.bf16 %v19582_v43, %v19581_v45  ;;  %18816 = vmatpush3.bf16.msra.mxu0 %v18813_v10  ;;  %20396 = vrcp.f32 %v24719_v21 }
 0x8ae   : > { %20398 = vrcp.f32 %v24805_v41  ;;  %v27264_v41 = vld [vmem:[#allocation147_spill] sm:$0xff] }
 0x8af   : > { %18802 = vmatprep.subr.bf16.mxu1 %v18801_v24  ;;  %20400 = vrcp.f32 %v24724_v58  ;;  %v8122_v27 = vsub.f32 %v27264_v41, %v24354_v15  ;;  %v27267_v15 = vld [vmem:[#allocation66_spill] sm:$0xff] }
 0x8b0   : > { %18804 = vmatpush3.bf16.msra.mxu1 %v18801_v24  ;;  %17942 = vmatmul.mubr.msk.f32.vlgmr.msra.gmra.mrb[120].mxu0 %vm2189_vm0, %v8983_v4  ;;  %20402 = vrcp.f32 %v24798_v6 }
 0x8b1   : > { %17955 = vmatprep.mubr.msk.f32.mxu0 %vm2189_vm0, %v8986_v3 }
 0x8b3   : > { %17921 = vmatmul.mubr.msk.f32.vlgmr.msra.gmra.mrb[124].mxu1 %vm2189_vm0, %v8977_v47 }
 0x8b4   : > { %17934 = vmatprep.mubr.msk.f32.mxu1 %vm2189_vm0, %v8980_v59  ;;  %v25024_v1 = vpop.eup %20390 }
 0x8b5   : > { %v25028_v56 = vpop.eup %20392  ;;  %v8710_v17 = vsel %vm2189_vm0, %v25024_v1, 0.0 }
 0x8b6   : > { %v25032_v44 = vpop.eup %20394  ;;  %v8713_v50 = vsel %vm2189_vm0, %v25028_v56, 0.0 }
 0x8b7   : > { %v8695_v19 = vsel %vm2189_vm0, %v25032_v44, 0.0  ;;  %v20397_v59 = vpop.eup %20396 }
 0x8b8   : > { %v8987_v41 = vmul.f32 %v20397_v59, %v27267_v15  ;;  %v27271_v15 = vld [vmem:[#allocation107_spill] sm:$0xff] }
 0x8bd   : > { %8693 = vadd.xlane.f32.xlu1 %v8692_v32  ;;  %v8346_v32 = vmul.f32 1.442695, %v8116_v46 }
 0x8bf   : > { %20404 = vpow2.f32 %v8346_v32 }
 0x8c0   : > { %8711 = vadd.xlane.f32.xlu0 %v8710_v17  ;;  %v27265_v17 = vld [vmem:[#allocation30_spill] sm:$0xff] }
 0x8c1   : > { %8714 = vadd.xlane.f32.xlu1 %v8713_v50  ;;  %v8123_v6 = vsub.f32 %v27265_v17, %v24346_v23  ;;  %v20399_v50 = vpop.eup %20398  ;;  %v27268_v23 = vld [vmem:[#allocation31_spill] sm:$0xff] }
 0x8c2   : > { %v20401_v43 = vpop.eup %20400  ;;  %v8990_v46 = vmul.f32 %v20399_v50, %v24608_v0 }
 0x8c3   : > { %v20403_v10 = vpop.eup %20402 }
 0x8c4   : > { %8696 = vadd.xlane.f32.xlu0 %v8695_v19  ;;  %v8984_v28 = vmul.f32 %v20403_v10, %v24599_v52 }
 0x8d2   : > { %19614 = vrot.lane.b32.xlu1 %v27101_v51, %s20990_s12 }
 0x8d8   : > { %v25040_v63 = vpop.xlane.xlu1 %8669  ;;  %v25042_v24 = vpop.f32.mrb[114].mxu0 }
 0x8d9   : > { %27259 = vst [vmem:[#allocation109_spill] sm:$0xff] %v25042_v24  ;;  %v25046_v12 = vpop.f32.mrb[115].mxu0 }
 0x8da   : > { %19609 = vrot.lane.b32.xlu0 %v27103_v57, %s20989_s3  ;;  %27260 = vst [vmem:[#allocation137_spill] sm:$0xff] %v25046_v12  ;;  %v27276_v12 = vld [vmem:[#allocation34_spill] sm:$0xff] }
 0x8db   : > { %v25049_v34 = vpop.xlane.xlu0 %8687  ;;  %v25051_v62 = vpop.f32.mrb[118].mxu1 }
 0x8dc   : > { %27261 = vst [vmem:[#allocation81_spill] sm:$0xff] %v25051_v62  ;;  %v25056_v45 = vpop.f32.mrb[119].mxu1  ;;  %v25061_v42 = vpop.xlane.xlu1 %8690 }
 0x8dd   : > { %27262 = vst [vmem:[#allocation136_spill] sm:$0xff] %v25056_v45 }
 0x8df   : > { %v25064_v21 = vpop.xlane.xlu0 %8672 }
 0x8e0   : > { %v19595_v25 = vpop.permute.xlu1 %19594 }
 0x8e1   : > { %v19597_v16 = vunpack.i.h.bf16 %v19595_v25  ;;  %v19596_v4 = vunpack.i.l.bf16 %v19595_v25  ;;  %v8358_v25 = vmul.f32 1.442695, %v8122_v27  ;;  %v25082_v27 = vpop.eup %20404 }
 0x8e2   : > { %v8704_v0 = vsel %vm2189_vm0, %v25082_v27, 0.0 }
 0x8e3   : > { %v19590_v3 = vpop.permute.xlu0 %19589  ;;  %v18821_v61 = vpack.c.bf16 %v19597_v16, %v19596_v4  ;;  %v8360_v16 = vmul.f32 1.442695, %v8123_v6  ;;  %v8981_v4 = vmul.f32 %v20401_v43, %v27268_v23  ;;  %20406 = vpow2.f32 %v8358_v25 }
 0x8e4   : > { %v19592_v58 = vunpack.i.h.bf16 %v19590_v3  ;;  %v19591_v47 = vunpack.i.l.bf16 %v19590_v3  ;;  %v8348_v3 = vmul.f32 1.442695, %v8117_v31 }
 0x8e5   : > { %18822 = vmatprep.subr.bf16.mxu0 %v18821_v61  ;;  %20408 = vpow2.f32 %v8360_v16 }
 0x8e6   : > { %v18809_v19 = vpack.c.bf16 %v19592_v58, %v19591_v47  ;;  %18824 = vmatpush3.bf16.msra.mxu0 %v18821_v61  ;;  %20410 = vpow2.f32 %v8348_v3  ;;  %v27274_v3 = vld [vmem:[#allocation42_spill] sm:$0xff] }
 0x8e7   : > { %20412 = vrcp.f32 %v24813_v14 }
 0x8e8   : > { %18810 = vmatprep.subr.bf16.mxu1 %v18809_v19  ;;  %20414 = vrcp.f32 %v24877_v8  ;;  %v27273_v8 = vld [vmem:[#allocation90_spill] sm:$0xff] }
 0x8e9   : > { %18812 = vmatpush3.bf16.msra.mxu1 %v18809_v19  ;;  %17956 = vmatmul.mubr.msk.f32.vlgmr.msra.gmra.mrb[122].mxu0 %vm2189_vm0, %v8987_v41  ;;  %20416 = vrcp.f32 %v24818_v40  ;;  %v27272_v41 = vld [vmem:[#allocation75_spill] sm:$0xff] }
 0x8ea   : > { %17969 = vmatprep.mubr.msk.f32.mxu0 %vm2189_vm0, %v8990_v46  ;;  %20418 = vrcp.f32 %v24872_v20  ;;  %v8120_v16 = vsub.f32 %v27272_v41, %v27271_v15  ;;  %v27275_v19 = vld [vmem:[#allocation43_spill] sm:$0xff]  ;;  %v27277_v15 = vld [vmem:[#allocation122_spill] sm:$0xff]  ;;  %v27278_v41 = vld [vmem:[#allocation148_spill] sm:$0xff] }
 0x8eb   : > { %v8127_v20 = vsub.f32 %v27276_v12, %v27275_v19  ;;  %v8121_v45 = vsub.f32 %v27278_v41, %v27277_v15  ;;  %v27280_v12 = vld [vmem:[#allocation83_spill] sm:$0xff] }
 0x8ec   : > { %17935 = vmatmul.mubr.msk.f32.vlgmr.msra.gmra.mrb[126].mxu1 %vm2189_vm0, %v8981_v4  ;;  %v8354_v31 = vmul.f32 1.442695, %v8120_v16 }
 0x8ed   : > { %17948 = vmatprep.mubr.msk.f32.mxu1 %vm2189_vm0, %v8984_v28  ;;  %v25084_v58 = vpop.eup %20406  ;;  %v8126_v28 = vsub.f32 %v27274_v3, %v27273_v8  ;;  %v27279_v8 = vld [vmem:[#allocation99_spill] sm:$0xff] }
 0x8ee   : > { %v8722_v47 = vsel %vm2189_vm0, %v25084_v58, 0.0  ;;  %20420 = vpow2.f32 %v8354_v31 }
 0x8ef   : > { %v25088_v43 = vpop.eup %20408 }
 0x8f0   : > { %v25092_v52 = vpop.eup %20410  ;;  %v8725_v10 = vsel %vm2189_vm0, %v25088_v43, 0.0 }
 0x8f1   : > { %v8707_v61 = vsel %vm2189_vm0, %v25092_v52, 0.0 }
 0x8f6   : > { %8705 = vadd.xlane.f32.xlu1 %v8704_v0 }
 0x8f9   : > { %8723 = vadd.xlane.f32.xlu0 %v8722_v47 }
 0x8fa   : > { %8726 = vadd.xlane.f32.xlu1 %v8725_v10 }
 0x8fd   : > { %8708 = vadd.xlane.f32.xlu0 %v8707_v61  ;;  %v20413_v61 = vpop.eup %20412 }
 0x8fe   : > { %v20415_v24 = vpop.eup %20414  ;;  %v8991_v3 = vmul.f32 %v20413_v61, %v27279_v8  ;;  %v27285_v8 = vld [vmem:[#allocation119_spill] sm:$0xff] }
 0x8ff   : > { %v8994_v16 = vmul.f32 %v20415_v24, %v24672_v35 }
 0x90b   : > { %19624 = vrot.lane.b32.xlu1 %v27124_v30, %s20990_s12 }
 0x911   : > { %v25100_v59 = vpop.xlane.xlu1 %8681  ;;  %v25102_v32 = vpop.f32.mrb[116].mxu0 }
 0x912   : > { %v25106_v17 = vpop.f32.mrb[117].mxu0 }
 0x913   : > { %19619 = vrot.lane.b32.xlu0 %v27125_v13, %s20990_s12 }
 0x914   : > { %v25109_v6 = vpop.xlane.xlu0 %8699  ;;  %v25111_v50 = vpop.f32.mrb[120].mxu1 }
 0x915   : > { %27269 = vst [vmem:[#allocation79_spill] sm:$0xff] %v25111_v50  ;;  %v25116_v2 = vpop.f32.mrb[121].mxu1  ;;  %v25121_v25 = vpop.xlane.xlu1 %8702 }
 0x916   : > { %27270 = vst [vmem:[#allocation134_spill] sm:$0xff] %v25116_v2  ;;  %v20417_v50 = vpop.eup %20416 }
 0x917   : > { %v20419_v62 = vpop.eup %20418  ;;  %v8985_v19 = vmul.f32 %v20417_v50, %v27280_v12 }
 0x918   : > { %v25124_v14 = vpop.xlane.xlu0 %8684  ;;  %v25142_v31 = vpop.eup %20420 }
 0x919   : > { %v19605_v46 = vpop.permute.xlu1 %19604  ;;  %v8716_v35 = vsel %vm2189_vm0, %v25142_v31, 0.0 }
 0x91a   : > { %v19607_v23 = vunpack.i.h.bf16 %v19605_v46  ;;  %v19606_v4 = vunpack.i.l.bf16 %v19605_v46  ;;  %v8366_v46 = vmul.f32 1.442695, %v8126_v28  ;;  %v8988_v28 = vmul.f32 %v20419_v62, %v24670_v36 }
 0x91c   : > { %v19600_v0 = vpop.permute.xlu0 %19599  ;;  %v18829_v10 = vpack.c.bf16 %v19607_v23, %v19606_v4  ;;  %v8368_v23 = vmul.f32 1.442695, %v8127_v20  ;;  %v8356_v4 = vmul.f32 1.442695, %v8121_v45  ;;  %20422 = vpow2.f32 %v8366_v46 }
 0x91d   : > { %v19602_v40 = vunpack.i.h.bf16 %v19600_v0  ;;  %v19601_v47 = vunpack.i.l.bf16 %v19600_v0 }
 0x91e   : > { %18830 = vmatprep.subr.bf16.mxu0 %v18829_v10  ;;  %20424 = vpow2.f32 %v8368_v23 }
 0x91f   : > { %v18817_v2 = vpack.c.bf16 %v19602_v40, %v19601_v47  ;;  %18832 = vmatpush3.bf16.msra.mxu0 %v18829_v10  ;;  %20426 = vpow2.f32 %v8356_v4  ;;  %v27288_v4 = vld [vmem:[#allocation48_spill] sm:$0xff] }
 0x920   : > { %20428 = vrcp.f32 %v24881_v53 }
 0x921   : > { %18818 = vmatprep.subr.bf16.mxu1 %v18817_v2  ;;  %20430 = vrcp.f32 %v24937_v18  ;;  %v27287_v18 = vld [vmem:[#allocation71_spill] sm:$0xff] }
 0x922   : > { %18820 = vmatpush3.bf16.msra.mxu1 %v18817_v2  ;;  %17970 = vmatmul.mubr.msk.f32.vlgmr.msra.gmra.mrb[124].mxu0 %vm2189_vm0, %v8991_v3  ;;  %20432 = vrcp.f32 %v24884_v55  ;;  %v27286_v3 = vld [vmem:[#allocation73_spill] sm:$0xff] }
 0x923   : > { %17983 = vmatprep.mubr.msk.f32.mxu0 %vm2189_vm0, %v8994_v16  ;;  %20434 = vrcp.f32 %v24932_v11  ;;  %v8124_v23 = vsub.f32 %v27286_v3, %v27285_v8  ;;  %v27289_v3 = vld [vmem:[#allocation125_spill] sm:$0xff] }
 0x925   : > { %17949 = vmatmul.mubr.msk.f32.vlgmr.msra.gmra.mrb[128].mxu1 %vm2189_vm0, %v8985_v19  ;;  %v8362_v41 = vmul.f32 1.442695, %v8124_v23  ;;  %v27291_v23 = vld [vmem:[#allocation126_spill] sm:$0xff] }
 0x926   : > { %17962 = vmatprep.mubr.msk.f32.mxu1 %vm2189_vm0, %v8988_v28  ;;  %v25144_v2 = vpop.eup %20422  ;;  %v8125_v28 = vsub.f32 %v27288_v4, %v27287_v18  ;;  %v27290_v18 = vld [vmem:[#allocation80_spill] sm:$0xff] }
 0x927   : > { %v8734_v45 = vsel %vm2189_vm0, %v25144_v2, 0.0  ;;  %20436 = vpow2.f32 %v8362_v41 }
 0x928   : > { %v25148_v24 = vpop.eup %20424 }
 0x929   : > { %v25152_v36 = vpop.eup %20426  ;;  %v8737_v62 = vsel %vm2189_vm0, %v25148_v24, 0.0 }
 0x92a   : > { %v8719_v50 = vsel %vm2189_vm0, %v25152_v36, 0.0 }
 0x92f   : > { %8717 = vadd.xlane.f32.xlu1 %v8716_v35 }
 0x932   : > { %8735 = vadd.xlane.f32.xlu0 %v8734_v45 }
 0x933   : > { %8738 = vadd.xlane.f32.xlu1 %v8737_v62 }
 0x936   : > { %8720 = vadd.xlane.f32.xlu0 %v8719_v50  ;;  %v20429_v50 = vpop.eup %20428 }
 0x937   : > { %v20431_v20 = vpop.eup %20430  ;;  %v8995_v8 = vmul.f32 %v20429_v50, %v24676_v48  ;;  %v27297_v50 = vld [vmem:[#allocation103_spill] sm:$0xff] }
 0x944   : > { %19634 = vrot.lane.b32.xlu1 %v27140_v7, %s20990_s12 }
 0x94a   : > { %v25160_v0 = vpop.xlane.xlu1 %8693  ;;  %v25162_v40 = vpop.f32.mrb[118].mxu0 }
 0x94b   : > { %27281 = vst [vmem:[#allocation55_spill] sm:$0xff] %v25162_v40  ;;  %v25166_v47 = vpop.f32.mrb[119].mxu0  ;;  %v27301_v40 = vld [vmem:[#allocation113_spill] sm:$0xff] }
 0x94c   : > { %19629 = vrot.lane.b32.xlu0 %v27144_v5, %s20990_s12  ;;  %27282 = vst [vmem:[#allocation135_spill] sm:$0xff] %v25166_v47 }
 0x94d   : > { %v25169_v10 = vpop.xlane.xlu0 %8711  ;;  %v25171_v61 = vpop.f32.mrb[122].mxu1 }
 0x94e   : > { %27283 = vst [vmem:[#allocation112_spill] sm:$0xff] %v25171_v61  ;;  %v25176_v15 = vpop.f32.mrb[123].mxu1  ;;  %v25181_v46 = vpop.xlane.xlu1 %8714  ;;  %v8364_v61 = vmul.f32 1.442695, %v8125_v28 }
 0x94f   : > { %27284 = vst [vmem:[#allocation52_spill] sm:$0xff] %v25176_v15  ;;  %v20433_v15 = vpop.eup %20432 }
 0x950   : > { %v20435_v47 = vpop.eup %20434  ;;  %20438 = vpow2.f32 %v8364_v61 }
 0x951   : > { %v25184_v53 = vpop.xlane.xlu0 %8696  ;;  %v25198_v4 = vpop.eup %20436  ;;  %20440 = vrcp.f32 %v24941_v60 }
 0x952   : > { %v19615_v16 = vpop.permute.xlu1 %19614  ;;  %20442 = vrcp.f32 %v24997_v39 }
 0x953   : > { %v19617_v12 = vunpack.i.h.bf16 %v19615_v16  ;;  %v19616_v19 = vunpack.i.l.bf16 %v19615_v16  ;;  %v8998_v16 = vmul.f32 %v20431_v20, %v27289_v3  ;;  %v8728_v20 = vsel %vm2189_vm0, %v25198_v4, 0.0  ;;  %v27298_v3 = vld [vmem:[#allocation131_spill] sm:$0xff] }
 0x954   : > { %20444 = vrcp.f32 %v24944_v33 }
 0x955   : > { %v19610_v35 = vpop.permute.xlu0 %19609  ;;  %v18837_v62 = vpack.c.bf16 %v19617_v12, %v19616_v19  ;;  %v8989_v12 = vmul.f32 %v20433_v15, %v27290_v18  ;;  %v8992_v19 = vmul.f32 %v20435_v47, %v27291_v23  ;;  %20446 = vrcp.f32 %v24992_v9 }
 0x956   : > { %v19612_v55 = vunpack.i.h.bf16 %v19610_v35  ;;  %v19611_v45 = vunpack.i.l.bf16 %v19610_v35 }
 0x957   : > { %18838 = vmatprep.subr.bf16.mxu0 %v18837_v62 }
 0x958   : > { %v18825_v11 = vpack.c.bf16 %v19612_v55, %v19611_v45  ;;  %18840 = vmatpush3.bf16.msra.mxu0 %v18837_v62  ;;  %v27296_v62 = vld [vmem:[#allocation127_spill] sm:$0xff] }
 0x95a   : > { %18826 = vmatprep.subr.bf16.mxu1 %v18825_v11  ;;  %v25200_v48 = vpop.eup %20438 }
 0x95b   : > { %18828 = vmatpush3.bf16.msra.mxu1 %v18825_v11  ;;  %17984 = vmatmul.mubr.msk.f32.vlgmr.msra.gmra.mrb[126].mxu0 %vm2189_vm0, %v8995_v8  ;;  %v8731_v15 = vsel %vm2189_vm0, %v25200_v48, 0.0  ;;  %v8128_v11 = vsub.f32 %v27297_v50, %v27296_v62 }
 0x95c   : > { %17997 = vmatprep.mubr.msk.f32.mxu0 %vm2189_vm0, %v8998_v16  ;;  %v27299_v16 = vld [vmem:[#allocation39_spill] sm:$0xff] }
 0x95d   : > { %v8129_v18 = vsub.f32 %v27299_v16, %v27298_v3  ;;  %v8370_v39 = vmul.f32 1.442695, %v8128_v11  ;;  %v27300_v16 = vld [vmem:[#allocation150_spill] sm:$0xff] }
 0x95e   : > { %17963 = vmatmul.mubr.msk.f32.vlgmr.msra.gmra.mrb[130].mxu1 %vm2189_vm0, %v8989_v12 }
 0x95f   : > { %17976 = vmatprep.mubr.msk.f32.mxu1 %vm2189_vm0, %v8992_v19  ;;  %20448 = vpow2.f32 %v8370_v39  ;;  %v27303_v39 = vld [vmem:[#allocation78_spill] sm:$0xff] }
 0x968   : > { %8729 = vadd.xlane.f32.xlu1 %v8728_v20 }
 0x96b   : > { %8732 = vadd.xlane.f32.xlu0 %v8731_v15  ;;  %v8372_v15 = vmul.f32 1.442695, %v8129_v18  ;;  %v27302_v18 = vld [vmem:[#allocation151_spill] sm:$0xff] }
 0x96d   : > { %20450 = vpow2.f32 %v8372_v15 }
 0x96e   : > { %20452 = vrcp.f32 %v25001_v37 }
 0x96f   : > { %20454 = vrcp.f32 %v25049_v34 }
 0x970   : > { %20456 = vrcp.f32 %v25004_v29 }
 0x971   : > { %20458 = vrcp.f32 %v25040_v63 }
 0x979   : > { %19644 = vrot.lane.b32.xlu1 %v27065_v22, %s20991_s22 }
 0x981   : > { %19639 = vrot.lane.b32.xlu0 %v27067_v49, %s20990_s12 }
 0x983   : > { %v25210_v47 = vpop.xlane.xlu1 %8705  ;;  %v25212_v61 = vpop.f32.mrb[120].mxu0 }
 0x984   : > { %27292 = vst [vmem:[#allocation95_spill] sm:$0xff] %v25212_v61  ;;  %v25214_v41 = vpop.f32.mrb[121].mxu0 }
 0x985   : > { %27293 = vst [vmem:[#allocation141_spill] sm:$0xff] %v25214_v41  ;;  %v20441_v41 = vpop.eup %20440 }
 0x986   : > { %v25217_v28 = vpop.xlane.xlu0 %8723  ;;  %v25219_v35 = vpop.f32.mrb[124].mxu1  ;;  %v8999_v11 = vmul.f32 %v20441_v41, %v27300_v16 }
 0x987   : > { %27294 = vst [vmem:[#allocation59_spill] sm:$0xff] %v25219_v35  ;;  %v25224_v45 = vpop.f32.mrb[125].mxu1  ;;  %v25231_v60 = vpop.xlane.xlu1 %8726  ;;  %v27314_v35 = vld [vmem:[#allocation77_spill] sm:$0xff] }
 0x988   : > { %27295 = vst [vmem:[#allocation142_spill] sm:$0xff] %v25224_v45  ;;  %v20443_v8 = vpop.eup %20442 }
 0x989   : > { %v20445_v9 = vpop.eup %20444 }
 0x98a   : > { %v25236_v12 = vpop.xlane.xlu0 %8708  ;;  %v20447_v3 = vpop.eup %20446 }
 0x98b   : > { %v19625_v23 = vpop.permute.xlu1 %19624 }
 0x98c   : > { %v19627_v19 = vunpack.i.h.bf16 %v19625_v23  ;;  %v19626_v20 = vunpack.i.l.bf16 %v19625_v23  ;;  %v9002_v23 = vmul.f32 %v20443_v8, %v27301_v40 }
 0x98e   : > { %v19620_v62 = vpop.permute.xlu0 %19619  ;;  %v18845_v55 = vpack.c.bf16 %v19627_v19, %v19626_v20  ;;  %v8996_v19 = vmul.f32 %v20447_v3, %v27303_v39 }
 0x98f   : > { %v19622_v50 = vunpack.i.h.bf16 %v19620_v62  ;;  %v19621_v33 = vunpack.i.l.bf16 %v19620_v62  ;;  %v8993_v62 = vmul.f32 %v20445_v9, %v27302_v18 }
 0x990   : > { %18846 = vmatprep.subr.bf16.mxu0 %v18845_v55 }
 0x991   : > { %v18833_v61 = vpack.c.bf16 %v19622_v50, %v19621_v33  ;;  %18848 = vmatpush3.bf16.msra.mxu0 %v18845_v55  ;;  %v25246_v55 = vpop.eup %20448  ;;  %v27308_v50 = vld [vmem:[#allocation69_spill] sm:$0xff] }
 0x992   : > { %27304 = vst [vmem:[#allocation84_spill] sm:$0xff] %v25246_v55  ;;  %v25248_v20 = vpop.eup %20450  ;;  %v27309_v33 = vld [vmem:[#allocation97_spill] sm:$0xff] }
 0x993   : > { %18834 = vmatprep.subr.bf16.mxu1 %v18833_v61  ;;  %27305 = vst [vmem:[#allocation26_spill] sm:$0xff] %v25248_v20  ;;  %v8743_v40 = vsel %vm2189_vm0, %v25248_v20, 0.0  ;;  %v8130_v9 = vsub.f32 %v27309_v33, %v27308_v50  ;;  %v20453_v45 = vpop.eup %20452 }
 0x994   : > { %18836 = vmatpush3.bf16.msra.mxu1 %v18833_v61  ;;  %17998 = vmatmul.mubr.msk.f32.vlgmr.msra.gmra.mrb[128].mxu0 %vm2189_vm0, %v8999_v11  ;;  %v8740_v61 = vsel %vm2189_vm0, %v25246_v55, 0.0  ;;  %v9003_v20 = vmul.f32 %v20453_v45, %v27314_v35 }
 0x995   : > { %18011 = vmatprep.mubr.msk.f32.mxu0 %vm2189_vm0, %v9002_v23  ;;  %v8374_v37 = vmul.f32 1.442695, %v8130_v9 }
 0x997   : > { %17977 = vmatmul.mubr.msk.f32.vlgmr.msra.gmra.mrb[132].mxu1 %vm2189_vm0, %v8993_v62  ;;  %20460 = vpow2.f32 %v8374_v37  ;;  %v27316_v37 = vld [vmem:[#allocation132_spill] sm:$0xff] }
 0x998   : > { %17990 = vmatprep.mubr.msk.f32.mxu1 %vm2189_vm0, %v8996_v19  ;;  %v27312_v19 = vld [vmem:[#allocation27_spill] sm:$0xff] }
 0x99d   : > { %8741 = vadd.xlane.f32.xlu1 %v8740_v61  ;;  %v27313_v61 = vld [vmem:[#allocation115_spill] sm:$0xff] }
 0x9a0   : > { %8744 = vadd.xlane.f32.xlu0 %v8743_v40  ;;  %v8131_v40 = vsub.f32 %v27313_v61, %v27312_v19  ;;  %v27315_v19 = vld [vmem:[#allocation86_spill] sm:$0xff] }
 0x9a2   : > { %v8376_v18 = vmul.f32 1.442695, %v8131_v40  ;;  %v27317_v40 = vld [vmem:[#allocation128_spill] sm:$0xff] }
 0x9a4   : > { %20462 = vpow2.f32 %v8376_v18  ;;  %v27319_v18 = vld [vmem:[#allocation23_spill] sm:$0xff] }
 0x9a5   : > { %20464 = vrcp.f32 %v25061_v42 }
 0x9a6   : > { %20466 = vrcp.f32 %v25109_v6 }
 0x9a7   : > { %20468 = vrcp.f32 %v25064_v21  ;;  %v27324_v21 = vld [vmem:[#allocation67_spill] sm:$0xff] }
 0x9a8   : > { %20470 = vrcp.f32 %v25100_v59 }
 0x9ae   : > { %19654 = vrot.lane.b32.xlu1 %v27101_v51, %s20991_s22 }
 0x9b2   : > { %19659 = vrot.lane.b32.xlu1 %v27125_v13, %s20991_s22 }
 0x9b6   : > { %19649 = vrot.lane.b32.xlu0 %v27103_v57, %s20990_s12  ;;  %19664 = vrot.lane.b32.xlu1 %v27124_v30, %s20991_s22 }
 0x9bc   : > { %v25262_v41 = vpop.xlane.xlu1 %8717  ;;  %v25264_v8 = vpop.f32.mrb[122].mxu0 }
 0x9bd   : > { %27306 = vst [vmem:[#allocation94_spill] sm:$0xff] %v25264_v8  ;;  %v25266_v15 = vpop.f32.mrb[123].mxu0 }
 0x9be   : > { %27307 = vst [vmem:[#allocation140_spill] sm:$0xff] %v25266_v15 }
 0x9bf   : > { %v25271_v3 = vpop.xlane.xlu0 %8735  ;;  %v25273_v16 = vpop.f32.mrb[126].mxu1 }
 0x9c0   : > { %27310 = vst [vmem:[#allocation146_spill] sm:$0xff] %v25273_v16  ;;  %v25278_v23 = vpop.f32.mrb[127].mxu1  ;;  %v25283_v62 = vpop.xlane.xlu1 %8738 }
 0x9c1   : > { %27311 = vst [vmem:[#allocation147_spill] sm:$0xff] %v25278_v23  ;;  %v20455_v23 = vpop.eup %20454 }
 0x9c2   : > { %v20457_v63 = vpop.eup %20456  ;;  %v9006_v61 = vmul.f32 %v20455_v23, %v27315_v19 }
 0x9c3   : > { %v25286_v39 = vpop.xlane.xlu0 %8720  ;;  %v20459_v9 = vpop.eup %20458 }
 0x9c4   : > { %v19635_v50 = vpop.permute.xlu1 %19634 }
 0x9c5   : > { %v19637_v33 = vunpack.i.h.bf16 %v19635_v50  ;;  %v19636_v34 = vunpack.i.l.bf16 %v19635_v50  ;;  %v9000_v50 = vmul.f32 %v20459_v9, %v27317_v40 }
 0x9c7   : > { %v19630_v11 = vpop.permute.xlu0 %19629  ;;  %v18853_v8 = vpack.c.bf16 %v19637_v33, %v19636_v34  ;;  %v27320_v33 = vld [vmem:[#allocation74_spill] sm:$0xff] }
 0x9c8   : > { %v19632_v15 = vunpack.i.h.bf16 %v19630_v11  ;;  %v19631_v29 = vunpack.i.l.bf16 %v19630_v11  ;;  %v8997_v11 = vmul.f32 %v20457_v63, %v27316_v37  ;;  %v8132_v34 = vsub.f32 %v27320_v33, %v27319_v18 }
 0x9c9   : > { %18854 = vmatprep.subr.bf16.mxu0 %v18853_v8 }
 0x9ca   : > { %v18841_v16 = vpack.c.bf16 %v19632_v15, %v19631_v29  ;;  %18856 = vmatpush3.bf16.msra.mxu0 %v18853_v8  ;;  %v25297_v15 = vpop.eup %20460  ;;  %v8378_v19 = vmul.f32 1.442695, %v8132_v34 }
 0x9cb   : > { %v8746_v35 = vsel %vm2189_vm0, %v25297_v15, 0.0  ;;  %v25302_v45 = vpop.eup %20462 }
 0x9cc   : > { %18842 = vmatprep.subr.bf16.mxu1 %v18841_v16  ;;  %27318 = vst [vmem:[#allocation30_spill] sm:$0xff] %v25302_v45  ;;  %20472 = vpow2.f32 %v8378_v19 }
 0x9cd   : > { %18844 = vmatpush3.bf16.msra.mxu1 %v18841_v16  ;;  %18012 = vmatmul.mubr.msk.f32.vlgmr.msra.gmra.mrb[130].mxu0 %vm2189_vm0, %v9003_v20  ;;  %v8749_v20 = vsel %vm2189_vm0, %v25302_v45, 0.0 }
 0x9ce   : > { %18025 = vmatprep.mubr.msk.f32.mxu0 %vm2189_vm0, %v9006_v61 }
 0x9d0   : > { %17991 = vmatmul.mubr.msk.f32.vlgmr.msra.gmra.mrb[134].mxu1 %vm2189_vm0, %v8997_v11 }
 0x9d1   : > { %18004 = vmatprep.mubr.msk.f32.mxu1 %vm2189_vm0, %v9000_v50  ;;  %v20465_v50 = vpop.eup %20464 }
 0x9d2   : > { %v20467_v33 = vpop.eup %20466 }
 0x9d3   : > { %v20469_v45 = vpop.eup %20468  ;;  %v9010_v34 = vmul.f32 %v20467_v33, %v24964_v54 }
 0x9d4   : > { %v20471_v55 = vpop.eup %20470 }
 0x9d5   : > { %8747 = vadd.xlane.f32.xlu0 %v8746_v35  ;;  %v27322_v35 = vld [vmem:[#allocation102_spill] sm:$0xff] }
 0x9d6   : > { %v25346_v19 = vpop.eup %20472 }
 0x9da   : > { %8750 = vadd.xlane.f32.xlu1 %v8749_v20  ;;  %v27323_v20 = vld [vmem:[#allocation25_spill] sm:$0xff] }
 0x9db   : > { %v8133_v18 = vsub.f32 %v27323_v20, %v27322_v35 }
 0x9eb   : > { %19669 = vrot.lane.b32.xlu0 %v27144_v5, %s20991_s22  ;;  %19674 = vrot.lane.b32.xlu1 %v27140_v7, %s20991_s22 }
 0x9ef   : > { %19679 = vrot.lane.b32.xlu0 %v27067_v49, %s20991_s22  ;;  %19684 = vrot.lane.b32.xlu1 %v27065_v22, %s20992_s25 }
 0x9f5   : > { %v25317_v8 = vpop.xlane.xlu1 %8729  ;;  %v25319_v16 = vpop.f32.mrb[124].mxu0 }
 0x9f6   : > { %v25322_v23 = vpop.f32.mrb[125].mxu0 }
 0x9f8   : > { %v25326_v29 = vpop.xlane.xlu0 %8732  ;;  %v25328_v22 = vpop.f32.mrb[128].mxu1 }
 0x9f9   : > { %v25332_v6 = vpop.f32.mrb[129].mxu1  ;;  %v19645_v63 = vpop.permute.xlu1 %19644 }
 0x9fa   : > { %27321 = vst [vmem:[#allocation145_spill] sm:$0xff] %v25332_v6  ;;  %v19647_v9 = vunpack.i.h.bf16 %v19645_v63  ;;  %v19646_v59 = vunpack.i.l.bf16 %v19645_v63  ;;  %v9007_v6 = vmul.f32 %v20465_v50, %v27324_v21  ;;  %v8380_v63 = vmul.f32 1.442695, %v8133_v18 }
 0x9fc   : > { %v19640_v61 = vpop.permute.xlu0 %19639  ;;  %v18861_v40 = vpack.c.bf16 %v19647_v9, %v19646_v59  ;;  %v27325_v9 = vld [vmem:[#allocation129_spill] sm:$0xff]  ;;  %20474 = vpow2.f32 %v8380_v63  ;;  %v27329_v63 = vld [vmem:[#allocation124_spill] sm:$0xff] }
 0x9fd   : > { %v19642_v37 = vunpack.i.h.bf16 %v19640_v61  ;;  %v19641_v11 = vunpack.i.l.bf16 %v19640_v61  ;;  %v9001_v59 = vmul.f32 %v20469_v45, %v27325_v9  ;;  %v9004_v61 = vmul.f32 %v20471_v55, %v24962_v26  ;;  %v27326_v55 = vld [vmem:[#allocation98_spill] sm:$0xff] }
 0x9fe   : > { %18862 = vmatprep.subr.bf16.mxu0 %v18861_v40  ;;  %20476 = vrcp.f32 %v25121_v25 }
 0x9ff   : > { %v18849_v42 = vpack.c.bf16 %v19642_v37, %v19641_v11  ;;  %18864 = vmatpush3.bf16.msra.mxu0 %v18861_v40  ;;  %20478 = vrcp.f32 %v25169_v10 }
 0xa00   : > { %20480 = vrcp.f32 %v25124_v14 }
 0xa01   : > { %18850 = vmatprep.subr.bf16.mxu1 %v18849_v42  ;;  %20482 = vrcp.f32 %v25160_v0 }
 0xa02   : > { %18852 = vmatpush3.bf16.msra.mxu1 %v18849_v42  ;;  %18026 = vmatmul.mubr.msk.f32.vlgmr.msra.gmra.mrb[132].mxu0 %vm2189_vm0, %v9007_v6  ;;  %v8752_v42 = vsel %vm2189_vm0, %v25346_v19, 0.0  ;;  %v27327_v6 = vld [vmem:[#allocation87_spill] sm:$0xff]  ;;  %20484 = vrcp.f32 %v25184_v53 }
 0xa03   : > { %18039 = vmatprep.mubr.msk.f32.mxu0 %vm2189_vm0, %v9010_v34  ;;  %v8134_v21 = vsub.f32 %v27327_v6, %v27326_v55  ;;  %20486 = vrcp.f32 %v25210_v47  ;;  %v27330_v34 = vld [vmem:[#allocation56_spill] sm:$0xff] }
 0xa04   : > { %20488 = vrcp.f32 %v25181_v46  ;;  %v8135_v9 = vsub.f32 %v27330_v34, %v27329_v63  ;;  %v27333_v63 = vld [vmem:[#allocation93_spill] sm:$0xff] }
 0xa05   : > { %18005 = vmatmul.mubr.msk.f32.vlgmr.msra.gmra.mrb[136].mxu1 %vm2189_vm0, %v9001_v59  ;;  %v8382_v14 = vmul.f32 1.442695, %v8134_v21  ;;  %20490 = vrcp.f32 %v25217_v28 }
 0xa06   : > { %18018 = vmatprep.mubr.msk.f32.mxu1 %vm2189_vm0, %v9004_v61  ;;  %v25350_v54 = vpop.eup %20474 }
 0xa07   : > { %v8755_v45 = vsel %vm2189_vm0, %v25350_v54, 0.0  ;;  %20492 = vpow2.f32 %v8382_v14  ;;  %v27334_v14 = vld [vmem:[#allocation37_spill] sm:$0xff] }
 0xa08   : > { %v20477_v33 = vpop.eup %20476 }
 0xa09   : > { %v20479_v61 = vpop.eup %20478 }
 0xa0a   : > { %v20481_v6 = vpop.eup %20480  ;;  %v9014_v35 = vmul.f32 %v20479_v61, %v25024_v1  ;;  %v27336_v1 = vld [vmem:[#allocation57_spill] sm:$0xff] }
 0xa0b   : > { %v20483_v28 = vpop.eup %20482 }
 0xa0e   : > { %8753 = vadd.xlane.f32.xlu0 %v8752_v42 }
 0xa13   : > { %8756 = vadd.xlane.f32.xlu1 %v8755_v45 }
 0xa24   : > { %19689 = vrot.lane.b32.xlu0 %v27103_v57, %s20991_s22  ;;  %19694 = vrot.lane.b32.xlu1 %v27125_v13, %s20992_s25 }
 0xa2a   : > { %v25361_v26 = vpop.xlane.xlu1 %8741 }
 0xa2d   : > { %v25366_v37 = vpop.xlane.xlu0 %8744 }
 0xa2e   : > { %v19655_v11 = vpop.permute.xlu1 %19654  ;;  %v25369_v40 = vpop.f32.mrb[126].mxu0 }
 0xa2f   : > { %v19657_v13 = vunpack.i.h.bf16 %v19655_v11  ;;  %v19656_v25 = vunpack.i.l.bf16 %v19655_v11  ;;  %v25372_v10 = vpop.f32.mrb[127].mxu0  ;;  %v27331_v11 = vld [vmem:[#allocation58_spill] sm:$0xff] }
 0xa31   : > { %v19650_v0 = vpop.permute.xlu0 %19649  ;;  %v25375_v50 = vpop.f32.mrb[130].mxu1  ;;  %v18869_v47 = vpack.c.bf16 %v19657_v13, %v19656_v25  ;;  %v9011_v13 = vmul.f32 %v20477_v33, %v27331_v11  ;;  %v8384_v25 = vmul.f32 1.442695, %v8135_v9 }
 0xa32   : > { %v19652_v53 = vunpack.i.h.bf16 %v19650_v0  ;;  %v19651_v20 = vunpack.i.l.bf16 %v19650_v0  ;;  %v25380_v18 = vpop.f32.mrb[131].mxu1  ;;  %v19660_v59 = vpop.permute.xlu1 %19659  ;;  %v27332_v0 = vld [vmem:[#allocation101_spill] sm:$0xff] }
 0xa33   : > { %27328 = vst [vmem:[#allocation66_spill] sm:$0xff] %v25380_v18  ;;  %v19662_v42 = vunpack.i.h.bf16 %v19660_v59  ;;  %v19661_v45 = vunpack.i.l.bf16 %v19660_v59  ;;  %18870 = vmatprep.subr.bf16.mxu0 %v18869_v47  ;;  %v8136_v34 = vsub.f32 %v27333_v63, %v27332_v0  ;;  %20494 = vpow2.f32 %v8384_v25  ;;  %v27337_v0 = vld [vmem:[#allocation96_spill] sm:$0xff]  ;;  %v27338_v63 = vld [vmem:[#allocation123_spill] sm:$0xff] }
 0xa34   : > { %v18857_v55 = vpack.c.bf16 %v19652_v53, %v19651_v20  ;;  %18872 = vmatpush3.bf16.msra.mxu0 %v18869_v47  ;;  %v9005_v53 = vmul.f32 %v20481_v6, %v27334_v14  ;;  %v20485_v20 = vpop.eup %20484  ;;  %v9008_v47 = vmul.f32 %v20483_v28, %v25022_v38 }
 0xa35   : > { %v18865_v21 = vpack.c.bf16 %v19662_v42, %v19661_v45  ;;  %v20487_v33 = vpop.eup %20486  ;;  %v27335_v45 = vld [vmem:[#allocation138_spill] sm:$0xff]  ;;  %v9009_v6 = vmul.f32 %v20485_v20, %v25032_v44 }
 0xa36   : > { %18858 = vmatprep.subr.bf16.mxu1 %v18857_v55  ;;  %v19665_v46 = vpop.permute.xlu1 %19664  ;;  %v20489_v42 = vpop.eup %20488  ;;  %v8137_v61 = vsub.f32 %v27336_v1, %v27335_v45  ;;  %v9012_v38 = vmul.f32 %v20487_v33, %v25082_v27 }
 0xa37   : > { %18860 = vmatpush3.bf16.msra.mxu1 %v18857_v55  ;;  %v19667_v18 = vunpack.i.h.bf16 %v19665_v46  ;;  %v19666_v59 = vunpack.i.l.bf16 %v19665_v46  ;;  %18040 = vmatmul.mubr.msk.f32.vlgmr.msra.gmra.mrb[134].mxu0 %vm2189_vm0, %v9011_v13  ;;  %v8386_v46 = vmul.f32 1.442695, %v8136_v34  ;;  %v20491_v55 = vpop.eup %20490  ;;  %v8138_v34 = vsub.f32 %v27338_v63, %v27337_v0 }
 0xa38   : > { %18866 = vmatprep.subr.bf16.mxu1 %v18865_v21  ;;  %18053 = vmatprep.mubr.msk.f32.mxu0 %vm2189_vm0, %v9014_v35  ;;  %v9015_v35 = vmul.f32 %v20489_v42, %v25028_v56  ;;  %v8388_v28 = vmul.f32 1.442695, %v8137_v61 }
 0xa39   : > { %v18877_v9 = vpack.c.bf16 %v19667_v18, %v19666_v59  ;;  %v25402_v18 = vpop.eup %20492  ;;  %20496 = vpow2.f32 %v8386_v46  ;;  %v8390_v14 = vmul.f32 1.442695, %v8138_v34 }
 0xa3a   : > { %18019 = vmatmul.mubr.msk.f32.vlgmr.msra.gmra.mrb[138].mxu1 %vm2189_vm0, %v9005_v53  ;;  %v8758_v44 = vsel %vm2189_vm0, %v25402_v18, 0.0  ;;  %20498 = vpow2.f32 %v8388_v28 }
 0xa3b   : > { %18868 = vmatpush3.bf16.msra.mxu1 %v18865_v21  ;;  %18032 = vmatprep.mubr.msk.f32.mxu1 %vm2189_vm0, %v9008_v47  ;;  %v9018_v21 = vmul.f32 %v20491_v55, %v25084_v58  ;;  %20500 = vrcp.f32 %v25236_v12 }
 0xa3c   : > { %18878 = vmatprep.subr.bf16.mxu0 %v18877_v9  ;;  %20502 = vrcp.f32 %v25262_v41 }
 0xa3d   : > { %18880 = vmatpush3.bf16.msra.mxu0 %v18877_v9  ;;  %v25410_v27 = vpop.eup %20494  ;;  %20504 = vrcp.f32 %v25286_v39 }
 0xa3e   : > { %18033 = vmatmul.mubr.msk.f32.vlgmr.msra.gmra.mrb[140].mxu1 %vm2189_vm0, %v9009_v6  ;;  %v8761_v56 = vsel %vm2189_vm0, %v25410_v27, 0.0  ;;  %20506 = vrcp.f32 %v25317_v8 }
 0xa3f   : > { %18046 = vmatprep.mubr.msk.f32.mxu1 %vm2189_vm0, %v9012_v38  ;;  %20508 = vrcp.f32 %v25231_v60 }
 0xa40   : > { %18054 = vmatmul.mubr.msk.f32.vlgmr.msra.gmra.mrb[136].mxu0 %vm2189_vm0, %v9015_v35  ;;  %20510 = vrcp.f32 %v25271_v3 }
 0xa41   : > { %18067 = vmatprep.mubr.msk.f32.mxu0 %vm2189_vm0, %v9018_v21  ;;  %20512 = vpow2.f32 %v8390_v14 }
 0xa42   : > { %20514 = vrcp.f32 %v25283_v62 }
 0xa43   : > { %8759 = vadd.xlane.f32.xlu0 %v8758_v44  ;;  %v25414_v11 = vpop.eup %20496 }
 0xa44   : > { %v8764_v58 = vsel %vm2189_vm0, %v25414_v11, 0.0  ;;  %v25418_v13 = vpop.eup %20498 }
 0xa45   : > { %v8767_v25 = vsel %vm2189_vm0, %v25418_v13, 0.0  ;;  %v20501_v33 = vpop.eup %20500 }
 0xa46   : > { %v20503_v3 = vpop.eup %20502  ;;  %v9013_v55 = vmul.f32 %v20501_v33, %v25092_v52  ;;  %v27341_v33 = vld [vmem:[#allocation156_spill] sm:$0xff] }
 0xa47   : > { %v20505_v38 = vpop.eup %20504  ;;  %v9016_v35 = vmul.f32 %v20503_v3, %v25142_v31 }
 0xa48   : > { %8762 = vadd.xlane.f32.xlu1 %v8761_v56  ;;  %v20507_v28 = vpop.eup %20506  ;;  %v27339_v56 = vld [vmem:[#allocation46_spill] sm:$0xff] }
 0xa49   : > { %v20509_v44 = vpop.eup %20508  ;;  %v9020_v31 = vmul.f32 %v20507_v28, %v25198_v4 }
 0xa4a   : > { %v20511_v63 = vpop.eup %20510 }
 0xa4b   : > { %v25457_v14 = vpop.eup %20512 }
 0xa4c   : > { %8765 = vadd.xlane.f32.xlu1 %v8764_v58  ;;  %v27340_v58 = vld [vmem:[#allocation92_spill] sm:$0xff] }
 0xa50   : > { %8768 = vadd.xlane.f32.xlu1 %v8767_v25  ;;  %v8139_v25 = vsub.f32 %v27340_v58, %v27339_v56 }
 0xa59   : > { %19699 = vrot.lane.b32.xlu0 %v27101_v51, %s20992_s25 }
 0xa61   : > { %19704 = vrot.lane.b32.xlu1 %v27144_v5, %s20992_s25 }
 0xa62   : > { %v8748_v59 = vpop.xlane.xlu0 %8747 }
 0xa63   : > { %20516 = vrcp.f32 %v8748_v59  ;;  %v9017_v59 = vmul.f32 %v20505_v38, %v25152_v36 }
 0xa66   : > { %v19670_v53 = vpop.permute.xlu0 %19669 }
 0xa67   : > { %v19672_v51 = vunpack.i.h.bf16 %v19670_v53  ;;  %v19671_v12 = vunpack.i.l.bf16 %v19670_v53  ;;  %v25434_v20 = vpop.xlane.xlu1 %8750  ;;  %v25436_v47 = vpop.f32.mrb[128].mxu0  ;;  %v9019_v53 = vmul.f32 %v20509_v44, %v25088_v43  ;;  %v8770_v43 = vsel %vm2189_vm0, %v25457_v14, 0.0  ;;  %v27346_v44 = vld [vmem:[#allocation144_spill] sm:$0xff] }
 0xa68   : > { %v25438_v41 = vpop.f32.mrb[129].mxu0 }
 0xa69   : > { %v18873_v5 = vpack.c.bf16 %v19672_v51, %v19671_v12  ;;  %v19888_v60 = vpack.i.bf16 %v25436_v47, %v25438_v41  ;;  %v20515_v12 = vpop.eup %20514 }
 0xa6a   : > { %v19680_v39 = vpop.permute.xlu0 %19679  ;;  %v25441_v8 = vpop.f32.mrb[132].mxu1  ;;  %v9023_v4 = vmul.f32 %v20515_v12, %v25148_v24  ;;  %v27354_v12 = vpack.i.bf16 %v25102_v32, %v25106_v17  ;;  %v27356_v32 = vld [vmem:[#allocation84_spill] sm:$0xff] }
 0xa6b   : > { %v19682_v9 = vunpack.i.h.bf16 %v19680_v39  ;;  %v19681_v42 = vunpack.i.l.bf16 %v19680_v39  ;;  %v25445_v45 = vpop.f32.mrb[133].mxu1  ;;  %18874 = vmatprep.subr.bf16.mxu1 %v18873_v5  ;;  %v19675_v61 = vpop.permute.xlu1 %19674  ;;  %v27342_v39 = vld [vmem:[#allocation24_spill] sm:$0xff] }
 0xa6c   : > { %v19783_v1 = vpack.i.bf16 %v25441_v8, %v25445_v45  ;;  %18876 = vmatpush3.bf16.msra.mxu1 %v18873_v5  ;;  %v19677_v46 = vunpack.i.h.bf16 %v19675_v61  ;;  %v19676_v62 = vunpack.i.l.bf16 %v19675_v61  ;;  %v8392_v5 = vmul.f32 1.442695, %v8139_v25  ;;  %v27343_v61 = vld [vmem:[#allocation157_spill] sm:$0xff]  ;;  %v27348_v25 = vld [vmem:[#allocation38_spill] sm:$0xff] }
 0xa6d   : > { %v18881_v6 = vpack.c.bf16 %v19682_v9, %v19681_v42  ;;  %v8140_v3 = vsub.f32 %v27342_v39, %v27341_v33  ;;  %v9022_v9 = vmul.f32 %v20511_v63, %v25144_v2  ;;  %v20517_v36 = vpop.eup %20516 }
 0xa6e   : > { %v18885_v21 = vpack.c.bf16 %v19677_v46, %v19676_v62  ;;  %20518 = vpow2.f32 %v8392_v5  ;;  %v27344_v46 = vld [vmem:[#allocation28_spill] sm:$0xff]  ;;  %v9026_v2 = vmul.f32 %v20517_v36, %v25297_v15 }
 0xa6f   : > { %18047 = vmatmul.mubr.msk.f32.vlgmr.msra.gmra.mrb[142].mxu1 %vm2189_vm0, %v9013_v55  ;;  %18882 = vmatprep.subr.bf16.mxu1 %v18881_v6  ;;  %v19685_v0 = vpop.permute.xlu1 %19684  ;;  %v8394_v42 = vmul.f32 1.442695, %v8140_v3  ;;  %v8141_v62 = vsub.f32 %v27344_v46, %v27343_v61 }
 0xa70   : > { %18884 = vmatpush3.bf16.msra.mxu1 %v18881_v6  ;;  %18060 = vmatprep.mubr.msk.f32.mxu1 %vm2189_vm0, %v9016_v35  ;;  %v19687_v34 = vunpack.i.h.bf16 %v19685_v0  ;;  %v19686_v52 = vunpack.i.l.bf16 %v19685_v0 }
 0xa71   : > { %18886 = vmatprep.subr.bf16.mxu0 %v18885_v21  ;;  %20520 = vpow2.f32 %v8394_v42  ;;  %v8396_v55 = vmul.f32 1.442695, %v8141_v62  ;;  %v27357_v62 = vld [vmem:[#allocation26_spill] sm:$0xff] }
 0xa72   : > { %18888 = vmatpush3.bf16.msra.mxu0 %v18885_v21  ;;  %v18893_v51 = vpack.c.bf16 %v19687_v34, %v19686_v52  ;;  %v27345_v21 = vld [vmem:[#allocation45_spill] sm:$0xff]  ;;  %v27351_v34 = vld [vmem:[#allocation44_spill] sm:$0xff]  ;;  %v27352_v52 = vld [vmem:[#allocation70_spill] sm:$0xff] }
 0xa73   : > { %18061 = vmatmul.mubr.msk.f32.vlgmr.msra.gmra.mrb[144].mxu1 %vm2189_vm0, %v9017_v59  ;;  %20522 = vpow2.f32 %v8396_v55  ;;  %v27347_v56 = vpack.i.bf16 %v27345_v21, %v27346_v44  ;;  %v27353_v59 = vpack.i.bf16 %v27351_v34, %v27352_v52  ;;  %v27359_v52 = vld [vmem:[#allocation35_spill] sm:$0xff] }
 0xa74   : > { %18074 = vmatprep.mubr.msk.f32.mxu1 %vm2189_vm0, %v9020_v31  ;;  %18894 = vmatprep.subr.bf16.mxu0 %v18893_v51  ;;  %20524 = vrcp.f32 %v25326_v29 }
 0xa75   : > { %18068 = vmatmul.mubr.msk.f32.vlgmr.msra.gmra.mrb[138].mxu0 %vm2189_vm0, %v9019_v53  ;;  %20526 = vrcp.f32 %v25361_v26 }
 0xa76   : > { %18896 = vmatpush3.bf16.msra.mxu0 %v18893_v51  ;;  %18081 = vmatprep.mubr.msk.f32.mxu0 %vm2189_vm0, %v9022_v9  ;;  %20528 = vrcp.f32 %v25366_v37 }
 0xa78   : > { %8771 = vadd.xlane.f32.xlu0 %v8770_v43  ;;  %v25475_v6 = vpop.eup %20518  ;;  %v27355_v43 = vpack.i.bf16 %v25319_v16, %v25322_v23 }
 0xa79   : > { %18082 = vmatmul.mubr.msk.f32.vlgmr.msra.gmra.mrb[140].mxu0 %vm2189_vm0, %v9023_v4  ;;  %v8773_v24 = vsel %vm2189_vm0, %v25475_v6, 0.0 }
 0xa7a   : > { %18095 = vmatprep.mubr.msk.f32.mxu0 %vm2189_vm0, %v9026_v2 }
 0xa7b   : > { %v25479_v38 = vpop.eup %20520 }
 0xa7c   : > { %v8776_v35 = vsel %vm2189_vm0, %v25479_v38, 0.0 }
 0xa7d   : > { %v25483_v28 = vpop.eup %20522 }
 0xa7e   : > { %v8779_v15 = vsel %vm2189_vm0, %v25483_v28, 0.0  ;;  %v20525_v51 = vpop.eup %20524 }
 0xa7f   : > { %v20527_v5 = vpop.eup %20526  ;;  %v9021_v4 = vmul.f32 %v20525_v51, %v25200_v48 }
 0xa80   : > { %v9024_v17 = vmul.f32 %v20527_v5, %v27356_v32  ;;  %v20529_v61 = vpop.eup %20528  ;;  %v27363_v5 = vld [vmem:[#allocation133_spill] sm:$0xff] }
 0xa81   : > { %v9025_v2 = vmul.f32 %v20529_v61, %v27357_v62 }
 0xa85   : > { %8774 = vadd.xlane.f32.xlu1 %v8773_v24 }
 0xa89   : > { %8777 = vadd.xlane.f32.xlu1 %v8776_v35 }
 0xa8d   : > { %8780 = vadd.xlane.f32.xlu1 %v8779_v15 }
 0xa8e   : > { %19709 = vrot.lane.b32.xlu0 %v27124_v30, %s20992_s25  ;;  %v27349_v30 = vld [vmem:[#allocation61_spill] sm:$0xff] }
 0xa8f   : > { %v27350_v0 = vpack.i.bf16 %v27348_v25, %v27349_v30 }
 0xa92   : > { %19714 = vrot.lane.b32.xlu0 %v27067_v49, %s20992_s25 }
 0xa96   : > { %19724 = vrot.lane.b32.xlu0 %v27103_v57, %s20992_s25 }
 0xa9a   : > { %19729 = vrot.lane.b32.xlu0 %v27347_v56, %s20992_s25 }
 0xa9b   : > { %v8754_v58 = vpop.xlane.xlu0 %8753 }
 0xa9c   : > { %20530 = vrcp.f32 %v8754_v58 }
 0xa9d   : > { %20532 = vrcp.f32 %v25434_v20 }
 0xa9e   : > { %19734 = vrot.lane.b32.xlu0 %v27350_v0, %s20991_s22  ;;  %19719 = vrot.lane.b32.xlu1 %v27140_v7, %s20992_s25 }
 0xa9f   : > { %v19690_v49 = vpop.permute.xlu0 %19689 }
 0xaa0   : > { %v19692_v57 = vunpack.i.h.bf16 %v19690_v49  ;;  %v19691_v29 = vunpack.i.l.bf16 %v19690_v49  ;;  %v8757_v26 = vpop.xlane.xlu1 %8756  ;;  %v25506_v63 = vpop.f32.mrb[130].mxu0  ;;  %v27358_v49 = vld [vmem:[#allocation30_spill] sm:$0xff] }
 0xaa1   : > { %v25512_v31 = vpop.f32.mrb[131].mxu0 }
 0xaa2   : > { %19739 = vrot.lane.b32.xlu0 %v27353_v59, %s20990_s12  ;;  %v18889_v53 = vpack.c.bf16 %v19692_v57, %v19691_v29  ;;  %v19958_v7 = vpack.i.bf16 %v25506_v63, %v25512_v31  ;;  %19744 = vrot.lane.b32.xlu1 %v27354_v12, %s20989_s3  ;;  %v27360_v59 = vld [vmem:[#allocation64_spill] sm:$0xff] }
 0xaa3   : > { %v25514_v37 = vpop.f32.mrb[134].mxu1  ;;  %v27362_v12 = vld [vmem:[#allocation68_spill] sm:$0xff] }
 0xaa4   : > { %v25522_v33 = vpop.f32.mrb[135].mxu1  ;;  %18890 = vmatprep.subr.bf16.mxu1 %v18889_v53  ;;  %v19695_v3 = vpop.permute.xlu1 %19694 }
 0xaa5   : > { %v19853_v39 = vpack.i.bf16 %v25514_v37, %v25522_v33  ;;  %18892 = vmatpush3.bf16.msra.mxu1 %v18889_v53  ;;  %v19697_v9 = vunpack.i.h.bf16 %v19695_v3  ;;  %v19696_v36 = vunpack.i.l.bf16 %v19695_v3  ;;  %v27361_v53 = vpack.i.bf16 %v27359_v52, %v27360_v59 }
 0xaa6   : > { %19749 = vrot.lane.b32.xlu0 %v27355_v43, %s20988_s27  ;;  %v20531_v46 = vpop.eup %20530  ;;  %v27364_v3 = vpack.i.bf16 %v27362_v12, %v27363_v5  ;;  %v14788_v5 = vld [vmem:[#allocation11] sm:$0xff] }
 0xaa7   : > { %v18897_v42 = vpack.c.bf16 %v19697_v9, %v19696_v36  ;;  %v9028_v55 = vmul.f32 %v20531_v46, %v25346_v19  ;;  %v20533_v56 = vpop.eup %20532 }
 0xaa8   : > { %18075 = vmatmul.mubr.msk.f32.vlgmr.msra.gmra.mrb[146].mxu1 %vm2189_vm0, %v9021_v4  ;;  %v9027_v57 = vmul.f32 %v20533_v56, %v27358_v49 }
 0xaa9   : > { %18088 = vmatprep.mubr.msk.f32.mxu1 %vm2189_vm0, %v9024_v17  ;;  %18898 = vmatprep.subr.bf16.mxu1 %v18897_v42 }
 0xaaa   : > { %18900 = vmatpush3.bf16.msra.mxu1 %v18897_v42 }
 0xaad   : > { %18089 = vmatmul.mubr.msk.f32.vlgmr.msra.gmra.mrb[148].mxu1 %vm2189_vm0, %v9025_v2 }
 0xaae   : > { %18102 = vmatprep.mubr.msk.f32.mxu1 %vm2189_vm0, %v9028_v55 }
 0xad0   : > { %v8760_v48 = vpop.xlane.xlu0 %8759 }
 0xad1   : > { %20534 = vrcp.f32 %v8760_v48 }
 0xad2   : > { %20536 = vrcp.f32 %v8757_v26 }
 0xad4   : > { %v19700_v16 = vpop.permute.xlu0 %19699 }
 0xad5   : > { %v19702_v23 = vunpack.i.h.bf16 %v19700_v16  ;;  %v19701_v24 = vunpack.i.l.bf16 %v19700_v16  ;;  %v8763_v35 = vpop.xlane.xlu1 %8762  ;;  %v18027_v15 = vpop.f32.mrb[132].mxu0 }
 0xad6   : > { %v12998_v21 = vpop.f32.mrb[133].mxu0 }
 0xad7   : > { %v18901_v44 = vpack.c.bf16 %v19702_v23, %v19701_v24  ;;  %v19753_v25 = vpack.i.bf16 %v18027_v15, %v12998_v21 }
 0xad8   : > { %v25539_v58 = vpop.f32.mrb[136].mxu1 }
 0xad9   : > { %v25541_v19 = vpop.f32.mrb[137].mxu1  ;;  %18902 = vmatprep.subr.bf16.mxu0 %v18901_v44  ;;  %v8766_v20 = vpop.xlane.xlu1 %8765  ;;  %19754 = vrot.lane.b32.xlu1 %v19753_v25, %s20987_s14 }
 0xada   : > { %v19923_v30 = vpack.i.bf16 %v25539_v58, %v25541_v19  ;;  %18904 = vmatpush3.bf16.msra.mxu0 %v18901_v44  ;;  %20538 = vrcp.f32 %v8766_v20  ;;  %v27416_v58 = vld [vmem:[#allocation85_spill] sm:$0xff]  ;;  %v27417_v19 = vld [vmem:[#allocation82_spill] sm:$0xff] }
 0xadb   : > { %v20535_v0 = vpop.eup %20534  ;;  %20540 = vrcp.f32 %v8763_v35 }
 0xadc   : > { %v9030_v29 = vmul.f32 %v20535_v0, %v25402_v18  ;;  %v20537_v36 = vpop.eup %20536 }
 0xadd   : > { %18096 = vmatmul.mubr.msk.f32.vlgmr.msra.gmra.mrb[142].mxu0 %vm2189_vm0, %v9027_v57  ;;  %v8769_v34 = vpop.xlane.xlu1 %8768  ;;  %19764 = vrot.lane.b32.xlu1 %v27361_v53, %s20992_s25  ;;  %v9029_v4 = vmul.f32 %v20537_v36, %v25350_v54 }
 0xade   : > { %18109 = vmatprep.mubr.msk.f32.mxu0 %vm2189_vm0, %v9030_v29 }
 0xae1   : > { %v19705_v51 = vpop.permute.xlu1 %19704  ;;  %19774 = vrot.lane.b32.xlu1 %v27364_v3, %s20990_s12  ;;  %v14789_v3 = vld [vmem:[#allocation11 + $0x8] sm:$0xff] }
 0xae2   : > { %v19707_v26 = vunpack.i.h.bf16 %v19705_v51  ;;  %v19706_v9 = vunpack.i.l.bf16 %v19705_v51  ;;  %v18925_v36 = vpack.c.bf16 %v14789_v3, %v14788_v5 }
 0xae4   : > { %v18905_v18 = vpack.c.bf16 %v19707_v26, %v19706_v9  ;;  %v20539_v43 = vpop.eup %20538 }
 0xae5   : > { %19784 = vrot.lane.b32.xlu1 %v19783_v1, %s20988_s27  ;;  %v9032_v32 = vmul.f32 %v20539_v43, %v25414_v11  ;;  %v20541_v62 = vpop.eup %20540 }
 0xae6   : > { %18906 = vmatprep.subr.bf16.mxu1 %v18905_v18  ;;  %v9031_v15 = vmul.f32 %v20541_v62, %v25410_v27  ;;  %v14793_v62 = vld [vmem:[#allocation11 + $0x28] sm:$0xff] }
 0xae7   : > { %18908 = vmatpush3.bf16.msra.mxu1 %v18905_v18 }
 0xaea   : > { %18103 = vmatmul.mubr.msk.f32.vlgmr.msra.gmra.mrb[150].mxu1 %vm2189_vm0, %v9029_v4 }
 0xaeb   : > { %18116 = vmatprep.mubr.msk.f32.mxu1 %vm2189_vm0, %v9032_v32  ;;  %v14790_v32 = vld [vmem:[#allocation11 + $0x10] sm:$0xff] }
 0xb05   : > { %v8772_v17 = vpop.xlane.xlu0 %8771 }
 0xb06   : > { %20542 = vrcp.f32 %v8772_v17  ;;  %v14791_v17 = vld [vmem:[#allocation11 + $0x18] sm:$0xff] }
 0xb07   : > { %20544 = vrcp.f32 %v8769_v34 }
 0xb09   : > { %v19710_v42 = vpop.permute.xlu0 %19709 }
 0xb0a   : > { %v19712_v61 = vunpack.i.h.bf16 %v19710_v42  ;;  %v19711_v46 = vunpack.i.l.bf16 %v19710_v42  ;;  %v25566_v8 = vpop.f32.mrb[134].mxu0 }
 0xb0b   : > { %v25568_v1 = vpop.f32.mrb[135].mxu0 }
 0xb0c   : > { %v18909_v45 = vpack.c.bf16 %v19712_v61, %v19711_v46  ;;  %v19823_v11 = vpack.i.bf16 %v25566_v8, %v25568_v1  ;;  %v18929_v46 = vpack.c.bf16 %v14791_v17, %v14790_v32  ;;  %v27365_v32 = vld [vmem:[#allocation53_spill] sm:$0xff]  ;;  %v27366_v17 = vld [vmem:[#allocation118_spill] sm:$0xff] }
 0xb0d   : > { %v19715_v54 = vpop.permute.xlu0 %19714  ;;  %v25570_v2 = vpop.f32.mrb[138].mxu1 }
 0xb0e   : > { %v19717_v55 = vunpack.i.h.bf16 %v19715_v54  ;;  %v19716_v48 = vunpack.i.l.bf16 %v19715_v54  ;;  %v25574_v16 = vpop.f32.mrb[139].mxu1  ;;  %18910 = vmatprep.subr.bf16.mxu0 %v18909_v45 }
 0xb0f   : > { %v19993_v23 = vpack.i.bf16 %v25570_v2, %v25574_v16  ;;  %18912 = vmatpush3.bf16.msra.mxu0 %v18909_v45 }
 0xb10   : > { %v20543_v24 = vpop.eup %20542  ;;  %v18913_v35 = vpack.c.bf16 %v19717_v55, %v19716_v48  ;;  %v14794_v55 = vld [vmem:[#allocation11 + $0x30] sm:$0xff]  ;;  %v14795_v48 = vld [vmem:[#allocation11 + $0x38] sm:$0xff] }
 0xb11   : > { %v20545_v21 = vpop.eup %20544  ;;  %v19725_v44 = vpop.permute.xlu0 %19724  ;;  %v9034_v25 = vmul.f32 %v20543_v24, %v25457_v14  ;;  %v18937_v24 = vpack.c.bf16 %v14795_v48, %v14794_v55  ;;  %v27374_v55 = vld [vmem:[#allocation121_spill] sm:$0xff] }
 0xb12   : > { %v25579_v56 = vpop.f32.mrb[140].mxu1  ;;  %v19727_v20 = vunpack.i.h.bf16 %v19725_v44  ;;  %v19726_v0 = vunpack.i.l.bf16 %v19725_v44  ;;  %18110 = vmatmul.mubr.msk.f32.vlgmr.msra.gmra.mrb[144].mxu0 %vm2189_vm0, %v9031_v15  ;;  %18914 = vmatprep.subr.bf16.mxu1 %v18913_v35  ;;  %v8775_v27 = vpop.xlane.xlu1 %8774  ;;  %v9033_v34 = vmul.f32 %v20545_v21, %v25418_v13  ;;  %v14799_v21 = vld [vmem:[#allocation11 + $0x58] sm:$0xff]  ;;  %v27375_v48 = vld [vmem:[#allocation29_spill] sm:$0xff] }
 0xb13   : > { %v25582_v49 = vpop.f32.mrb[141].mxu1  ;;  %18916 = vmatpush3.bf16.msra.mxu1 %v18913_v35  ;;  %18123 = vmatprep.mubr.msk.f32.mxu0 %vm2189_vm0, %v9034_v25  ;;  %v25588_v29 = vpop.f32.mrb[136].mxu0  ;;  %v14797_v35 = vld [vmem:[#allocation11 + $0x48] sm:$0xff]  ;;  %v14800_v25 = vld [vmem:[#allocation11 + $0x60] sm:$0xff] }
 0xb14   : > { %v19788_v57 = vpack.i.bf16 %v25579_v56, %v25582_v49  ;;  %v18921_v52 = vpack.c.bf16 %v19727_v20, %v19726_v0  ;;  %v25591_v14 = vpop.f32.mrb[137].mxu0  ;;  %v14801_v20 = vld [vmem:[#allocation11 + $0x68] sm:$0xff] }
 0xb15   : > { %v19893_v59 = vpack.i.bf16 %v25588_v29, %v25591_v14  ;;  %v18949_v0 = vpack.c.bf16 %v14801_v20, %v14800_v25 }
 0xb16   : > { %18117 = vmatmul.mubr.msk.f32.vlgmr.msra.gmra.mrb[152].mxu1 %vm2189_vm0, %v9033_v34  ;;  %18922 = vmatprep.subr.bf16.mxu1 %v18921_v52  ;;  %v8778_v53 = vpop.xlane.xlu1 %8777 }
 0xb17   : > { %18924 = vmatpush3.bf16.msra.mxu1 %v18921_v52  ;;  %20546 = vrcp.f32 %v8778_v53  ;;  %v14802_v52 = vld [vmem:[#allocation11 + $0x70] sm:$0xff]  ;;  %v14803_v53 = vld [vmem:[#allocation11 + $0x78] sm:$0xff] }
 0xb18   : > { %20548 = vrcp.f32 %v8775_v27 }
 0xb1a   : > { %v8781_v51 = vpop.xlane.xlu1 %8780 }
 0xb1b   : > { %20550 = vrcp.f32 %v8781_v51 }
 0xb1e   : > { %v19720_v12 = vpop.permute.xlu1 %19719 }
 0xb1f   : > { %v19722_v26 = vunpack.i.h.bf16 %v19720_v12  ;;  %v19721_v13 = vunpack.i.l.bf16 %v19720_v12  ;;  %v18953_v12 = vpack.c.bf16 %v14803_v53, %v14802_v52  ;;  %v27385_v52 = vld [vmem:[#allocation76_spill] sm:$0xff] }
 0xb21   : > { %v20547_v9 = vpop.eup %20546  ;;  %v18917_v18 = vpack.c.bf16 %v19722_v26, %v19721_v13 }
 0xb22   : > { %v20549_v43 = vpop.eup %20548  ;;  %v9036_v4 = vmul.f32 %v20547_v9, %v25479_v38  ;;  %v14792_v38 = vld [vmem:[#allocation11 + $0x20] sm:$0xff] }
 0xb23   : > { %18918 = vmatprep.subr.bf16.mxu0 %v18917_v18  ;;  %v9035_v61 = vmul.f32 %v20549_v43, %v25475_v6  ;;  %v18933_v54 = vpack.c.bf16 %v14793_v62, %v14792_v38  ;;  %v14796_v6 = vld [vmem:[#allocation11 + $0x40] sm:$0xff]  ;;  %v27372_v62 = vld [vmem:[#allocation32_spill] sm:$0xff] }
 0xb24   : > { %18920 = vmatpush3.bf16.msra.mxu0 %v18917_v18  ;;  %18130 = vmatprep.mubr.msk.f32.mxu1 %vm2189_vm0, %v9036_v4  ;;  %v18941_v15 = vpack.c.bf16 %v14797_v35, %v14796_v6  ;;  %v27371_v38 = vld [vmem:[#allocation143_spill] sm:$0xff]  ;;  %v27377_v6 = vpack.i.bf16 %v25369_v40, %v25372_v10 }
 0xb25   : > { %v20551_v42 = vpop.eup %20550  ;;  %18926 = vmatprep.subr.bf16.mxu0 %v18925_v36  ;;  %v27381_v40 = vld [vmem:[#allocation55_spill] sm:$0xff] }
 0xb26   : > { %v9037_v45 = vmul.f32 %v20551_v42, %v25483_v28  ;;  %v14798_v28 = vld [vmem:[#allocation11 + $0x50] sm:$0xff]  ;;  %v27367_v42 = vpack.i.bf16 %v27365_v32, %v27366_v17  ;;  %v27382_v10 = vld [vmem:[#allocation135_spill] sm:$0xff] }
 0xb27   : > { %18124 = vmatmul.mubr.msk.f32.vlgmr.msra.gmra.mrb[146].mxu0 %vm2189_vm0, %v9035_v61  ;;  %v18945_v44 = vpack.c.bf16 %v14799_v21, %v14798_v28  ;;  %v27368_v61 = vld [vmem:[#allocation59_spill] sm:$0xff]  ;;  %v27378_v21 = vld [vmem:[#allocation152_spill] sm:$0xff]  ;;  %v27383_v20 = vpack.i.bf16 %v27381_v40, %v27382_v10 }
 0xb28   : > { %18131 = vmatmul.mubr.msk.f32.vlgmr.msra.gmra.mrb[154].mxu1 %vm2189_vm0, %v9037_v45  ;;  %18928 = vmatpush3.bf16.msra.mxu0 %v18925_v36 }
 0xb29   : > { %18930 = vmatprep.subr.bf16.mxu0 %v18929_v46 }
 0xb2c   : > { %18932 = vmatpush3.bf16.msra.mxu0 %v18929_v46  ;;  %v27369_v46 = vld [vmem:[#allocation142_spill] sm:$0xff] }
 0xb2d   : > { %18934 = vmatprep.subr.bf16.mxu0 %v18933_v54  ;;  %v27370_v45 = vpack.i.bf16 %v27368_v61, %v27369_v46  ;;  %v19745_v61 = vpop.permute.xlu1 %19744  ;;  %v27390_v46 = vld [vmem:[#allocation154_spill] sm:$0xff] }
 0xb30   : > { %18936 = vmatpush3.bf16.msra.mxu0 %v18933_v54  ;;  %v27373_v54 = vpack.i.bf16 %v27371_v38, %v27372_v62 }
 0xb31   : > { %18938 = vmatprep.subr.bf16.mxu0 %v18937_v24 }
 0xb34   : > { %18940 = vmatpush3.bf16.msra.mxu0 %v18937_v24  ;;  %v27376_v24 = vpack.i.bf16 %v27374_v55, %v27375_v48  ;;  %v19747_v55 = vunpack.i.h.bf16 %v19745_v61  ;;  %v27393_v48 = vld [vmem:[#allocation47_spill] sm:$0xff] }
 0xb35   : > { %18942 = vmatprep.subr.bf16.mxu0 %v18941_v15 }
 0xb38   : > { %18944 = vmatpush3.bf16.msra.mxu0 %v18941_v15 }
 0xb39   : > { %18946 = vmatprep.subr.bf16.mxu0 %v18945_v44 }
 0xb3c   : > { %18948 = vmatpush3.bf16.msra.mxu0 %v18945_v44  ;;  %v27379_v44 = vld [vmem:[#allocation153_spill] sm:$0xff] }
 0xb3d   : > { %18950 = vmatprep.subr.bf16.mxu0 %v18949_v0  ;;  %v27380_v25 = vpack.i.bf16 %v27378_v21, %v27379_v44  ;;  %v27397_v21 = vld [vmem:[#allocation104_spill] sm:$0xff] }
 0xb40   : > { %18952 = vmatpush3.bf16.msra.mxu0 %v18949_v0  ;;  %v27384_v0 = vld [vmem:[#allocation116_spill] sm:$0xff] }
 0xb41   : > { %18954 = vmatprep.subr.bf16.mxu0 %v18953_v12  ;;  %v27386_v53 = vpack.i.bf16 %v27384_v0, %v27385_v52 }
 0xb42   : > { %v25602_v27 = vpop.f32.mrb[142].mxu1 }
 0xb43   : > { %v25604_v34 = vpop.f32.mrb[143].mxu1 }
 0xb44   : > { %v19858_v51 = vpack.i.bf16 %v25602_v27, %v25604_v34  ;;  %18956 = vmatpush3.bf16.msra.mxu0 %v18953_v12  ;;  %v27387_v12 = vld [vmem:[#allocation81_spill] sm:$0xff] }
 0xb46   : > { %v25608_v5 = vpop.f32.mrb[144].mxu1 }
 0xb47   : > { %v25610_v3 = vpop.f32.mrb[145].mxu1 }
 0xb48   : > { %v19928_v26 = vpack.i.bf16 %v25608_v5, %v25610_v3  ;;  %v25614_v13 = vpop.f32.mrb[138].mxu0 }
 0xb49   : > { %v25616_v9 = vpop.f32.mrb[139].mxu0 }
 0xb4a   : > { %v19963_v18 = vpack.i.bf16 %v25614_v13, %v25616_v9  ;;  %v27432_v13 = vld [vmem:[#allocation106_spill] sm:$0xff]  ;;  %v27433_v9 = vld [vmem:[#allocation89_spill] sm:$0xff] }
 0xb4b   : > { %v19755_v40 = vpop.permute.xlu1 %19754 }
 0xb4c   : > { %v18083_v36 = vpop.f32.mrb[140].mxu0 }
 0xb4d   : > { %v13646_v43 = vpop.f32.mrb[141].mxu0 }
 0xb4e   : > { %v19758_v4 = vpack.i.bf16 %v18083_v36, %v13646_v43  ;;  %v27388_v36 = vld [vmem:[#allocation136_spill] sm:$0xff] }
 0xb4f   : > { %v27389_v43 = vpack.i.bf16 %v27387_v12, %v27388_v36  ;;  %v19765_v29 = vpop.permute.xlu1 %19764 }
 0xb50   : > { %19759 = vrot.lane.b32.xlu0 %v19758_v4, %s20986_s1  ;;  %v19730_v4 = vpop.permute.xlu0 %19729 }
 0xb51   : > { %v19731_v62 = vunpack.i.l.bf16 %v19730_v4 }
 0xb53   : > { %v14670_v44 = vsel %vm2189_vm0, %v27397_v21, %v19731_v62  ;;  %v27399_v62 = vld [vmem:[#allocation51_spill] sm:$0xff]  ;;  %v27410_v21 = vld [vmem:[#allocation65_spill] sm:$0xff] }
 0xb54   : > { %19769 = vrot.lane.b32.xlu0 %v27367_v42, %s20991_s22  ;;  %v19735_v17 = vpop.permute.xlu0 %19734  ;;  %v19732_v42 = vunpack.i.h.bf16 %v19730_v4  ;;  %v19757_v4 = vunpack.i.h.bf16 %v19755_v40 }
 0xb55   : > { %v19736_v37 = vunpack.i.l.bf16 %v19735_v17 }
 0xb57   : > { %v14687_v10 = vsel %vm14686_vm2, %v14670_v44, %v19736_v37  ;;  %v27411_v44 = vld [vmem:[#allocation149_spill] sm:$0xff] }
 0xb58   : > { %19779 = vrot.lane.b32.xlu0 %v27370_v45, %s20989_s3  ;;  %v27391_v45 = vld [vmem:[#allocation155_spill] sm:$0xff] }
 0xb59   : > { %v27392_v38 = vpack.i.bf16 %v27390_v46, %v27391_v45 }
 0xb5c   : > { %19789 = vrot.lane.b32.xlu0 %v19788_v57, %s20987_s14 }
 0xb60   : > { %19799 = vrot.lane.b32.xlu0 %v27373_v54, %s20992_s25  ;;  %v19737_v54 = vunpack.i.h.bf16 %v19735_v17 }
 0xb64   : > { %19809 = vrot.lane.b32.xlu0 %v27376_v24, %s20990_s12  ;;  %v14671_v24 = vsel %vm2189_vm0, %v27393_v48, %v19732_v42  ;;  %v27404_v48 = vld [vmem:[#allocation110_spill] sm:$0xff] }
 0xb68   : > { %19819 = vrot.lane.b32.xlu0 %v27377_v6, %s20988_s27  ;;  %v19746_v6 = vunpack.i.l.bf16 %v19745_v61 }
 0xb7b   : > { %v25645_v35 = vpop.f32.mrb[146].mxu1 }
 0xb7c   : > { %v25647_v15 = vpop.f32.mrb[147].mxu1 }
 0xb7d   : > { %v19998_v56 = vpack.i.bf16 %v25645_v35, %v25647_v15 }
 0xb80   : > { %v18090_v49 = vpop.f32.mrb[148].mxu1 }
 0xb81   : > { %v13727_v57 = vpop.f32.mrb[149].mxu1 }
 0xb82   : > { %v19793_v28 = vpack.i.bf16 %v18090_v49, %v13727_v57  ;;  %v27394_v49 = vld [vmem:[#allocation146_spill] sm:$0xff]  ;;  %v27395_v57 = vld [vmem:[#allocation147_spill] sm:$0xff] }
 0xb84   : > { %19794 = vrot.lane.b32.xlu1 %v19793_v28, %s20986_s1  ;;  %v27396_v28 = vpack.i.bf16 %v27394_v49, %v27395_v57  ;;  %v27407_v49 = vld [vmem:[#allocation95_spill] sm:$0xff]  ;;  %v27408_v57 = vld [vmem:[#allocation141_spill] sm:$0xff] }
 0xb88   : > { %19804 = vrot.lane.b32.xlu1 %v27380_v25, %s20991_s22  ;;  %v14688_v25 = vsel %vm14686_vm2, %v14671_v24, %v19737_v54  ;;  %v27405_v24 = vld [vmem:[#allocation105_spill] sm:$0xff] }
 0xb8c   : > { %19814 = vrot.lane.b32.xlu1 %v27383_v20, %s20989_s3 }
 0xb90   : > { %19824 = vrot.lane.b32.xlu1 %v19823_v11, %s20987_s14  ;;  %v19740_v11 = vpop.permute.xlu0 %19739 }
 0xb91   : > { %v19742_v33 = vunpack.i.h.bf16 %v19740_v11 }
 0xb93   : > { %v14705_v20 = vsel %vm14703_vm3, %v14688_v25, %v19742_v33  ;;  %v27401_v33 = vld [vmem:[#allocation158_spill] sm:$0xff]  ;;  %v27412_v25 = vpack.i.bf16 %v27410_v21, %v27411_v44  ;;  %v27427_v21 = vld [vmem:[#allocation140_spill] sm:$0xff] }
 0xb94   : > { %19834 = vrot.lane.b32.xlu1 %v27386_v53, %s20992_s25  ;;  %v19750_v0 = vpop.permute.xlu0 %19749  ;;  %v14722_v12 = vsel %vm14720_vm4, %v14705_v20, %v19747_v55 }
 0xb98   : > { %19844 = vrot.lane.b32.xlu1 %v27389_v43, %s20990_s12 }
 0xb9c   : > { %19854 = vrot.lane.b32.xlu1 %v19853_v39, %s20988_s27  ;;  %v19741_v39 = vunpack.i.l.bf16 %v19740_v11 }
 0xb9e   : > { %v14704_v53 = vsel %vm14703_vm3, %v14687_v10, %v19741_v39  ;;  %v27402_v39 = vld [vmem:[#allocation159_spill] sm:$0xff]  ;;  %v27414_v10 = vld [vmem:[#allocation134_spill] sm:$0xff] }
 0xb9f   : > { %v14721_v43 = vsel %vm14720_vm4, %v14704_v53, %v19746_v6  ;;  %v27403_v55 = vpack.i.bf16 %v27401_v33, %v27402_v39  ;;  %v27406_v6 = vpack.i.bf16 %v27404_v48, %v27405_v24  ;;  %v19767_v53 = vunpack.i.h.bf16 %v19765_v29 }
 0xbb0   : > { %v18097_v32 = vpop.f32.mrb[142].mxu0 }
 0xbb1   : > { %v13808_v8 = vpop.f32.mrb[143].mxu0 }
 0xbb2   : > { %v19828_v1 = vpack.i.bf16 %v18097_v32, %v13808_v8  ;;  %v19756_v32 = vunpack.i.l.bf16 %v19755_v40  ;;  %v19752_v8 = vunpack.i.h.bf16 %v19750_v0  ;;  %v27413_v40 = vld [vmem:[#allocation79_spill] sm:$0xff] }
 0xbb3   : > { %v27415_v20 = vpack.i.bf16 %v27413_v40, %v27414_v10 }
 0xbb4   : > { %19829 = vrot.lane.b32.xlu0 %v19828_v1, %s20986_s1  ;;  %v19751_v1 = vunpack.i.l.bf16 %v19750_v0  ;;  %v14739_v45 = vsel %vm14737_vm5, %v14722_v12, %v19752_v8  ;;  %v19766_v12 = vunpack.i.l.bf16 %v19765_v29  ;;  %v27430_v29 = vld [vmem:[#allocation63_spill] sm:$0xff] }
 0xbb5   : > { %v14756_v34 = vsel %vm14754_vm6, %v14739_v45, %v19757_v4 }
 0xbb6   : > { %v14738_v46 = vsel %vm14737_vm5, %v14721_v43, %v19751_v1  ;;  %v19775_v43 = vpop.permute.xlu1 %19774  ;;  %v27420_v1 = vld [vmem:[#allocation88_spill] sm:$0xff] }
 0xbb7   : > { %v14755_v27 = vsel %vm14754_vm6, %v14738_v46, %v19756_v32 }
 0xbb8   : > { %19839 = vrot.lane.b32.xlu0 %v27392_v38, %s20991_s22  ;;  %v27398_v38 = vld [vmem:[#allocation62_spill] sm:$0xff] }
 0xbb9   : > { %v27400_v54 = vpack.i.bf16 %v27398_v38, %v27399_v62  ;;  %v27421_v38 = vld [vmem:[#allocation130_spill] sm:$0xff]  ;;  %v27422_v62 = vld [vmem:[#allocation120_spill] sm:$0xff] }
 0xbba   : > { %v19785_v39 = vpop.permute.xlu1 %19784 }
 0xbbc   : > { %19849 = vrot.lane.b32.xlu0 %v27396_v28, %s20989_s3  ;;  %v27409_v28 = vpack.i.bf16 %v27407_v49, %v27408_v57 }
 0xbbd   : > { %v18104_v52 = vpop.f32.mrb[150].mxu1 }
 0xbbe   : > { %v13889_v36 = vpop.f32.mrb[151].mxu1 }
 0xbbf   : > { %v19863_v17 = vpack.i.bf16 %v18104_v52, %v13889_v36 }
 0xbc0   : > { %19859 = vrot.lane.b32.xlu0 %v19858_v51, %s20987_s14 }
 0xbc1   : > { %19864 = vrot.lane.b32.xlu1 %v19863_v17, %s20986_s1  ;;  %v27419_v17 = vld [vmem:[#allocation40_spill] sm:$0xff] }
 0xbc2   : > { %v19760_v11 = vpop.permute.xlu0 %19759  ;;  %v14673_v8 = vsel %vm2189_vm0, %v27419_v17, %v19767_v53 }
 0xbc3   : > { %v19762_v42 = vunpack.i.h.bf16 %v19760_v11  ;;  %v19761_v61 = vunpack.i.l.bf16 %v19760_v11  ;;  %v14672_v11 = vsel %vm2189_vm0, %v27420_v1, %v19766_v12  ;;  %v27435_v12 = vld [vmem:[#allocation109_spill] sm:$0xff] }
 0xbc4   : > { %19869 = vrot.lane.b32.xlu0 %v27400_v54, %s20992_s25  ;;  %v27423_v54 = vpack.i.bf16 %v27421_v38, %v27422_v62  ;;  %v27442_v1 = vld [vmem:[#allocation33_spill] sm:$0xff]  ;;  %v27446_v62 = vld [vmem:[#allocation139_spill] sm:$0xff] }
 0xbc5   : > { %v14772_v51 = vsel %vm14771_vm7, %v14755_v27, %v19761_v61  ;;  %v14773_v37 = vsel %vm14771_vm7, %v14756_v34, %v19762_v42  ;;  %19874 = vrot.lane.b32.xlu1 %v27403_v55, %s20991_s22  ;;  %v27424_v27 = vld [vmem:[#allocation145_spill] sm:$0xff] }
 0xbc6   : > { %18165 = vmatprep.mubr.f32.mxu0 %v14772_v51  ;;  %v19770_v41 = vpop.permute.xlu0 %19769  ;;  %v27425_v34 = vpack.i.bf16 %v25328_v22, %v27424_v27  ;;  %v19777_v51 = vunpack.i.h.bf16 %v19775_v43  ;;  %v19787_v22 = vunpack.i.h.bf16 %v19785_v39  ;;  %v27447_v27 = vld [vmem:[#allocation49_spill] sm:$0xff] }
 0xbc7   : > { %18166 = vmatmul.mubr.f32.vlgmr.msra.gmra.mrb[148].mxu0 %v14773_v37  ;;  %v19772_v4 = vunpack.i.h.bf16 %v19770_v41  ;;  %v19771_v32 = vunpack.i.l.bf16 %v19770_v41  ;;  %v19776_v37 = vunpack.i.l.bf16 %v19775_v43 }
 0xbc8   : > { %19879 = vrot.lane.b32.xlu0 %v27406_v6, %s20990_s12 }
 0xbc9   : > { %19884 = vrot.lane.b32.xlu1 %v27409_v28, %s20989_s3  ;;  %v14690_v42 = vsel %vm14686_vm2, %v14673_v8, %v19772_v4  ;;  %v14689_v61 = vsel %vm14686_vm2, %v14672_v11, %v19771_v32  ;;  %v27426_v28 = vld [vmem:[#allocation94_spill] sm:$0xff]  ;;  %v27441_v8 = vld [vmem:[#allocation41_spill] sm:$0xff] }
 0xbca   : > { %v19780_v36 = vpop.permute.xlu0 %19779  ;;  %v14706_v55 = vsel %vm14703_vm3, %v14689_v61, %v19776_v37  ;;  %v14707_v48 = vsel %vm14703_vm3, %v14690_v42, %v19777_v51  ;;  %v27428_v44 = vpack.i.bf16 %v27426_v28, %v27427_v21  ;;  %v27443_v11 = vpack.i.bf16 %v27441_v8, %v27442_v1  ;;  %v27444_v42 = vld [vmem:[#allocation66_spill] sm:$0xff] }
 0xbcb   : > { %v19782_v46 = vunpack.i.h.bf16 %v19780_v36  ;;  %v19781_v45 = vunpack.i.l.bf16 %v19780_v36  ;;  %v27436_v36 = vld [vmem:[#allocation137_spill] sm:$0xff]  ;;  %v27445_v61 = vpack.i.bf16 %v25375_v50, %v27444_v42 }
 0xbcc   : > { %19889 = vrot.lane.b32.xlu0 %v19888_v60, %s20988_s27  ;;  %v27437_v43 = vpack.i.bf16 %v27435_v12, %v27436_v36 }
 0xbcd   : > { %19894 = vrot.lane.b32.xlu1 %v19893_v59, %s20987_s14  ;;  %v14723_v24 = vsel %vm14720_vm4, %v14706_v55, %v19781_v45  ;;  %v14724_v6 = vsel %vm14720_vm4, %v14707_v48, %v19782_v46 }
 0xbce   : > { %v19790_v33 = vpop.permute.xlu0 %19789  ;;  %v14741_v41 = vsel %vm14737_vm5, %v14724_v6, %v19787_v22 }
 0xbcf   : > { %v19792_v49 = vunpack.i.h.bf16 %v19790_v33  ;;  %v19791_v57 = vunpack.i.l.bf16 %v19790_v33 }
 0xbd1   : > { %19904 = vrot.lane.b32.xlu1 %v27412_v25, %s20992_s25  ;;  %v19786_v25 = vunpack.i.l.bf16 %v19785_v39  ;;  %v14758_v3 = vsel %vm14754_vm6, %v14741_v41, %v19792_v49 }
 0xbd2   : > { %v19800_v31 = vpop.permute.xlu0 %19799 }
 0xbd3   : > { %v19802_v2 = vunpack.i.h.bf16 %v19800_v31  ;;  %v19801_v16 = vunpack.i.l.bf16 %v19800_v31 }
 0xbd5   : > { %19914 = vrot.lane.b32.xlu1 %v27415_v20, %s20990_s12  ;;  %v14674_v50 = vsel %vm2189_vm0, %v27447_v27, %v19801_v16 }
 0xbd9   : > { %19924 = vrot.lane.b32.xlu1 %v19923_v30, %s20988_s27  ;;  %v27418_v30 = vpack.i.bf16 %v27416_v58, %v27417_v19  ;;  %v27438_v19 = vld [vmem:[#allocation112_spill] sm:$0xff] }
 0xbe5   : > { %v18111_v47 = vpop.f32.mrb[144].mxu0 }
 0xbe6   : > { %v13970_v60 = vpop.f32.mrb[145].mxu0 }
 0xbe7   : > { %v19898_v14 = vpack.i.bf16 %v18111_v47, %v13970_v60  ;;  %v14740_v47 = vsel %vm14737_vm5, %v14723_v24, %v19786_v25  ;;  %v27429_v60 = vld [vmem:[#allocation108_spill] sm:$0xff] }
 0xbe8   : > { %v14757_v5 = vsel %vm14754_vm6, %v14740_v47, %v19791_v57 }
 0xbe9   : > { %v18118_v59 = vpop.f32.mrb[152].mxu1  ;;  %19899 = vrot.lane.b32.xlu0 %v19898_v14, %s20986_s1  ;;  %v27431_v14 = vpack.i.bf16 %v27429_v60, %v27430_v29 }
 0xbea   : > { %v14051_v0 = vpop.f32.mrb[153].mxu1 }
 0xbeb   : > { %v19933_v52 = vpack.i.bf16 %v18118_v59, %v14051_v0 }
 0xbed   : > { %19934 = vrot.lane.b32.xlu1 %v19933_v52, %s20986_s1  ;;  %19909 = vrot.lane.b32.xlu0 %v27418_v30, %s20991_s22  ;;  %v27439_v30 = vld [vmem:[#allocation52_spill] sm:$0xff] }
 0xbee   : > { %v27440_v17 = vpack.i.bf16 %v27438_v19, %v27439_v30 }
 0xbf1   : > { %19944 = vrot.lane.b32.xlu1 %v27423_v54, %s20991_s22  ;;  %19919 = vrot.lane.b32.xlu0 %v27425_v34, %s20989_s3  ;;  %v14675_v54 = vsel %vm2189_vm0, %v27446_v62, %v19802_v2 }
 0xbf5   : > { %19954 = vrot.lane.b32.xlu1 %v27428_v44, %s20989_s3  ;;  %19929 = vrot.lane.b32.xlu0 %v19928_v26, %s20987_s14 }
 0xbf6   : > { %v19795_v40 = vpop.permute.xlu1 %19794 }
 0xbf7   : > { %v19797_v10 = vunpack.i.h.bf16 %v19795_v40  ;;  %v19796_v20 = vunpack.i.l.bf16 %v19795_v40 }
 0xbf9   : > { %19964 = vrot.lane.b32.xlu1 %v19963_v18, %s20987_s14  ;;  %19939 = vrot.lane.b32.xlu0 %v27431_v14, %s20992_s25  ;;  %v14774_v26 = vsel %vm14771_vm7, %v14757_v5, %v19796_v20  ;;  %v14775_v59 = vsel %vm14771_vm7, %v14758_v3, %v19797_v10  ;;  %v27434_v18 = vpack.i.bf16 %v27432_v13, %v27433_v9 }
 0xbfa   : > { %v18125_v0 = vpop.f32.mrb[146].mxu0  ;;  %18168 = vmatprep.mubr.f32.mxu0 %v14774_v26  ;;  %v19805_v63 = vpop.permute.xlu1 %19804 }
 0xbfb   : > { %v18132_v52 = vpop.f32.mrb[154].mxu1  ;;  %18169 = vmatmul.mubr.f32.gmra.mrb[150].mxu0 %v14775_v59  ;;  %v14132_v53 = vpop.f32.mrb[147].mxu0  ;;  %v19807_v46 = vunpack.i.h.bf16 %v19805_v63  ;;  %v19806_v45 = vunpack.i.l.bf16 %v19805_v63 }
 0xbfc   : > { %v19968_v4 = vpack.i.bf16 %v18125_v0, %v14132_v53  ;;  %v14213_v32 = vpop.f32.mrb[155].mxu1  ;;  %v27448_v0 = vld [vmem:[#allocation100_spill] sm:$0xff] }
 0xbfd   : > { %19974 = vrot.lane.b32.xlu1 %v27434_v18, %s20992_s25  ;;  %19949 = vrot.lane.b32.xlu0 %v27437_v43, %s20990_s12  ;;  %v20003_v58 = vpack.i.bf16 %v18132_v52, %v14213_v32  ;;  %v14691_v34 = vsel %vm14686_vm2, %v14674_v50, %v19806_v45  ;;  %v14692_v35 = vsel %vm14686_vm2, %v14675_v54, %v19807_v46  ;;  %v27449_v53 = vld [vmem:[#allocation36_spill] sm:$0xff]  ;;  %s27461_s25 = sld [smem:[#allocation165_spill]] }
 0xc01   : > { %19984 = vrot.lane.b32.xlu1 %v27440_v17, %s20990_s12  ;;  %19959 = vrot.lane.b32.xlu0 %v19958_v7, %s20988_s27  ;;  %v19815_v7 = vpop.permute.xlu1 %19814  ;;  %s15776_s12 = scalar_lea.sflag [#allocation4], %s21365_s16 }
 0xc02   : > { %v19817_v15 = vunpack.i.h.bf16 %v19815_v7 }
 0xc05   : > { %19994 = vrot.lane.b32.xlu1 %v19993_v23, %s20988_s27  ;;  %19969 = vrot.lane.b32.xlu0 %v19968_v4, %s20986_s1  ;;  %v19810_v23 = vpop.permute.xlu0 %19809  ;;  %v19825_v38 = vpop.permute.xlu1 %19824  ;;  %s27463_s27 = sld [smem:[#allocation167_spill]] }
 0xc06   : > { %v19812_v51 = vunpack.i.h.bf16 %v19810_v23  ;;  %v19811_v37 = vunpack.i.l.bf16 %v19810_v23  ;;  %v19827_v6 = vunpack.i.h.bf16 %v19825_v38  ;;  %v19826_v49 = vunpack.i.l.bf16 %v19825_v38 }
 0xc08   : > { %v14708_v39 = vsel %vm14703_vm3, %v14691_v34, %v19811_v37  ;;  %v14709_v55 = vsel %vm14703_vm3, %v14692_v35, %v19812_v51 }
 0xc09   : > { %20004 = vrot.lane.b32.xlu1 %v20003_v58, %s20986_s1  ;;  %19979 = vrot.lane.b32.xlu0 %v27443_v11, %s20991_s22  ;;  %v19820_v33 = vpop.permute.xlu0 %19819  ;;  %v14726_v24 = vsel %vm14720_vm4, %v14709_v55, %v19817_v15  ;;  %v19835_v57 = vpop.permute.xlu1 %19834  ;;  %s27459_s1 = sld [smem:[#allocation163_spill]] }
 0xc0a   : > { %v19822_v28 = vunpack.i.h.bf16 %v19820_v33  ;;  %v19821_v21 = vunpack.i.l.bf16 %v19820_v33  ;;  %v19837_v41 = vunpack.i.h.bf16 %v19835_v57  ;;  %v19836_v60 = vunpack.i.l.bf16 %v19835_v57 }
 0xc0c   : > { %v14743_v10 = vsel %vm14737_vm5, %v14726_v24, %v19822_v28  ;;  %v14677_v52 = vsel %vm2189_vm0, %v27448_v0, %v19837_v41  ;;  %v14676_v13 = vsel %vm2189_vm0, %v27449_v53, %v19836_v60 }
 0xc0d   : > { %19989 = vrot.lane.b32.xlu0 %v27445_v61, %s20989_s3  ;;  %v14760_v47 = vsel %vm14754_vm6, %v14743_v10, %v19827_v6  ;;  %v19845_v5 = vpop.permute.xlu1 %19844  ;;  %s27460_s3 = sld [smem:[#allocation164_spill]] }
 0xc0e   : > { %v19847_v36 = vunpack.i.h.bf16 %v19845_v5  ;;  %v19846_v43 = vunpack.i.l.bf16 %v19845_v5 }
 0xc11   : > { %19999 = vrot.lane.b32.xlu0 %v19998_v56, %s20987_s14  ;;  %v19816_v56 = vunpack.i.l.bf16 %v19815_v7  ;;  %v19855_v58 = vpop.permute.xlu1 %19854 }
 0xc12   : > { %v19857_v11 = vunpack.i.h.bf16 %v19855_v58  ;;  %v19856_v42 = vunpack.i.l.bf16 %v19855_v58 }
 0xc13   : > { %v14725_v48 = vsel %vm14720_vm4, %v14708_v39, %v19816_v56  ;;  %v27450_v39 = vld [vmem:[#allocation50_spill] sm:$0xff] }
 0xc14   : > { %v14742_v40 = vsel %vm14737_vm5, %v14725_v48, %v19821_v21  ;;  %v27451_v48 = vld [vmem:[#allocation91_spill] sm:$0xff] }
 0xc15   : > { %v14759_v20 = vsel %vm14754_vm6, %v14742_v40, %v19826_v49 }
 0xc26   : > { %v19830_v44 = vpop.permute.xlu0 %19829 }
 0xc27   : > { %v19832_v22 = vunpack.i.h.bf16 %v19830_v44  ;;  %v19831_v25 = vunpack.i.l.bf16 %v19830_v44 }
 0xc29   : > { %v14776_v29 = vsel %vm14771_vm7, %v14759_v20, %v19831_v25  ;;  %v14777_v14 = vsel %vm14771_vm7, %v14760_v47, %v19832_v22 }
 0xc2a   : > { %v19840_v3 = vpop.permute.xlu0 %19839  ;;  %18171 = vmatprep.mubr.f32.mxu0 %v14776_v29 }
 0xc2b   : > { %v19842_v26 = vunpack.i.h.bf16 %v19840_v3  ;;  %v19841_v59 = vunpack.i.l.bf16 %v19840_v3  ;;  %18172 = vmatmul.mubr.f32.gmra.mrb[152].mxu0 %v14777_v14 }
 0xc2d   : > { %v14694_v9 = vsel %vm14686_vm2, %v14677_v52, %v19842_v26  ;;  %v14693_v18 = vsel %vm14686_vm2, %v14676_v13, %v19841_v59 }
 0xc2e   : > { %v19850_v12 = vpop.permute.xlu0 %19849  ;;  %v14710_v19 = vsel %vm14703_vm3, %v14693_v18, %v19846_v43  ;;  %v14711_v30 = vsel %vm14703_vm3, %v14694_v9, %v19847_v36 }
 0xc2f   : > { %v19852_v4 = vunpack.i.h.bf16 %v19850_v12  ;;  %v19851_v32 = vunpack.i.l.bf16 %v19850_v12 }
 0xc31   : > { %v14727_v17 = vsel %vm14720_vm4, %v14710_v19, %v19851_v32  ;;  %v14728_v8 = vsel %vm14720_vm4, %v14711_v30, %v19852_v4  ;;  %v27452_v19 = vld [vmem:[#allocation111_spill] sm:$0xff] }
 0xc32   : > { %v19860_v1 = vpop.permute.xlu0 %19859  ;;  %v14744_v16 = vsel %vm14737_vm5, %v14727_v17, %v19856_v42  ;;  %v14745_v23 = vsel %vm14737_vm5, %v14728_v8, %v19857_v11  ;;  %v27453_v17 = vld [vmem:[#allocation114_spill] sm:$0xff] }
 0xc33   : > { %v19862_v61 = vunpack.i.h.bf16 %v19860_v1  ;;  %v19861_v63 = vunpack.i.l.bf16 %v19860_v1  ;;  %v19865_v31 = vpop.permute.xlu1 %19864 }
 0xc34   : > { %v19867_v7 = vunpack.i.h.bf16 %v19865_v31  ;;  %v19866_v2 = vunpack.i.l.bf16 %v19865_v31 }
 0xc35   : > { %v14761_v46 = vsel %vm14754_vm6, %v14744_v16, %v19861_v63  ;;  %v14762_v45 = vsel %vm14754_vm6, %v14745_v23, %v19862_v61 }
 0xc36   : > { %v14778_v38 = vsel %vm14771_vm7, %v14761_v46, %v19866_v2  ;;  %v14779_v62 = vsel %vm14771_vm7, %v14762_v45, %v19867_v7  ;;  %v19870_v50 = vpop.permute.xlu0 %19869 }
 0xc37   : > { %18174 = vmatprep.mubr.f32.mxu0 %v14778_v38  ;;  %v19875_v54 = vpop.permute.xlu1 %19874  ;;  %v19872_v56 = vunpack.i.h.bf16 %v19870_v50  ;;  %v19871_v51 = vunpack.i.l.bf16 %v19870_v50 }
 0xc38   : > { %18175 = vmatmul.mubr.f32.gmra.mrb[154].mxu0 %v14779_v62  ;;  %v19877_v37 = vunpack.i.h.bf16 %v19875_v54  ;;  %v19876_v33 = vunpack.i.l.bf16 %v19875_v54 }
 0xc39   : > { %v14679_v55 = vsel %vm2189_vm0, %v27450_v39, %v19872_v56  ;;  %v14678_v24 = vsel %vm2189_vm0, %v27451_v48, %v19871_v51 }
 0xc3a   : > { %v19880_v35 = vpop.permute.xlu0 %19879  ;;  %v14695_v57 = vsel %vm14686_vm2, %v14678_v24, %v19876_v33  ;;  %v14696_v28 = vsel %vm14686_vm2, %v14679_v55, %v19877_v37 }
 0xc3b   : > { %v19885_v27 = vpop.permute.xlu1 %19884  ;;  %v19882_v6 = vunpack.i.h.bf16 %v19880_v35  ;;  %v19881_v49 = vunpack.i.l.bf16 %v19880_v35 }
 0xc3c   : > { %v19887_v21 = vunpack.i.h.bf16 %v19885_v27  ;;  %v19886_v44 = vunpack.i.l.bf16 %v19885_v27 }
 0xc3d   : > { %v14712_v40 = vsel %vm14703_vm3, %v14695_v57, %v19881_v49  ;;  %v14713_v10 = vsel %vm14703_vm3, %v14696_v28, %v19882_v6  ;;  %v27454_v57 = vld [vmem:[#allocation54_spill] sm:$0xff] }
 0xc3e   : > { %v19890_v22 = vpop.permute.xlu0 %19889  ;;  %v14729_v41 = vsel %vm14720_vm4, %v14712_v40, %v19886_v44  ;;  %v14730_v60 = vsel %vm14720_vm4, %v14713_v10, %v19887_v21  ;;  %v27455_v21 = vld [vmem:[#allocation117_spill] sm:$0xff] }
 0xc3f   : > { %v19895_v34 = vpop.permute.xlu1 %19894  ;;  %v19892_v20 = vunpack.i.h.bf16 %v19890_v22  ;;  %v19891_v47 = vunpack.i.l.bf16 %v19890_v22 }
 0xc40   : > { %v19897_v29 = vunpack.i.h.bf16 %v19895_v34  ;;  %v19896_v14 = vunpack.i.l.bf16 %v19895_v34 }
 0xc41   : > { %v14746_v0 = vsel %vm14737_vm5, %v14729_v41, %v19891_v47  ;;  %v14747_v52 = vsel %vm14737_vm5, %v14730_v60, %v19892_v20 }
 0xc42   : > { %v14763_v9 = vsel %vm14754_vm6, %v14746_v0, %v19896_v14  ;;  %v14764_v18 = vsel %vm14754_vm6, %v14747_v52, %v19897_v29 }
 0xc43   : > { %v19905_v15 = vpop.permute.xlu1 %19904 }
 0xc44   : > { %v19907_v53 = vunpack.i.h.bf16 %v19905_v15  ;;  %v19906_v13 = vunpack.i.l.bf16 %v19905_v15 }
 0xc46   : > { %v14681_v30 = vsel %vm2189_vm0, %v27452_v19, %v19907_v53  ;;  %v14680_v8 = vsel %vm2189_vm0, %v27453_v17, %v19906_v13 }
 0xc47   : > { %v19915_v25 = vpop.permute.xlu1 %19914 }
 0xc48   : > { %v19917_v42 = vunpack.i.h.bf16 %v19915_v25  ;;  %v19916_v61 = vunpack.i.l.bf16 %v19915_v25 }
 0xc4b   : > { %v19925_v5 = vpop.permute.xlu1 %19924 }
 0xc4c   : > { %v19927_v38 = vunpack.i.h.bf16 %v19925_v5  ;;  %v19926_v62 = vunpack.i.l.bf16 %v19925_v5 }
 0xc5b   : > { %v19900_v3 = vpop.permute.xlu0 %19899 }
 0xc5c   : > { %v19902_v26 = vunpack.i.h.bf16 %v19900_v3  ;;  %v19901_v59 = vunpack.i.l.bf16 %v19900_v3 }
 0xc5e   : > { %v14780_v12 = vsel %vm14771_vm7, %v14763_v9, %v19901_v59  ;;  %v14781_v36 = vsel %vm14771_vm7, %v14764_v18, %v19902_v26 }
 0xc5f   : > { %v19935_v43 = vpop.permute.xlu1 %19934  ;;  %v19910_v4 = vpop.permute.xlu0 %19909  ;;  %18177 = vmatprep.mubr.f32.mxu0 %v14780_v12 }
 0xc60   : > { %v19912_v32 = vunpack.i.h.bf16 %v19910_v4  ;;  %v19911_v58 = vunpack.i.l.bf16 %v19910_v4  ;;  %18178 = vmatmul.mubr.f32.gmra.mrb[156].mxu0 %v14781_v36  ;;  %v19937_v35 = vunpack.i.h.bf16 %v19935_v43  ;;  %v19936_v15 = vunpack.i.l.bf16 %v19935_v43 }
 0xc62   : > { %v14698_v1 = vsel %vm14686_vm2, %v14681_v30, %v19912_v32  ;;  %v14697_v11 = vsel %vm14686_vm2, %v14680_v8, %v19911_v58 }
 0xc63   : > { %v19945_v63 = vpop.permute.xlu1 %19944  ;;  %v19920_v31 = vpop.permute.xlu0 %19919  ;;  %v14714_v16 = vsel %vm14703_vm3, %v14697_v11, %v19916_v61  ;;  %v14715_v23 = vsel %vm14703_vm3, %v14698_v1, %v19917_v42 }
 0xc64   : > { %v19922_v7 = vunpack.i.h.bf16 %v19920_v31  ;;  %v19921_v2 = vunpack.i.l.bf16 %v19920_v31  ;;  %v19947_v22 = vunpack.i.h.bf16 %v19945_v63  ;;  %v19946_v25 = vunpack.i.l.bf16 %v19945_v63  ;;  %v27456_v31 = vld [vmem:[#allocation60_spill] sm:$0xff] }
 0xc66   : > { %v14731_v46 = vsel %vm14720_vm4, %v14714_v16, %v19921_v2  ;;  %v14732_v45 = vsel %vm14720_vm4, %v14715_v23, %v19922_v7  ;;  %v27457_v2 = vld [vmem:[#allocation72_spill] sm:$0xff] }
 0xc67   : > { %v19955_v54 = vpop.permute.xlu1 %19954  ;;  %v19930_v27 = vpop.permute.xlu0 %19929  ;;  %v14748_v56 = vsel %vm14737_vm5, %v14731_v46, %v19926_v62  ;;  %v14749_v51 = vsel %vm14737_vm5, %v14732_v45, %v19927_v38 }
 0xc68   : > { %v19932_v50 = vunpack.i.h.bf16 %v19930_v27  ;;  %v19931_v34 = vunpack.i.l.bf16 %v19930_v27  ;;  %v19957_v5 = vunpack.i.h.bf16 %v19955_v54  ;;  %v19956_v3 = vunpack.i.l.bf16 %v19955_v54 }
 0xc6a   : > { %v14765_v37 = vsel %vm14754_vm6, %v14748_v56, %v19931_v34  ;;  %v14766_v33 = vsel %vm14754_vm6, %v14749_v51, %v19932_v50 }
 0xc6b   : > { %v19965_v39 = vpop.permute.xlu1 %19964  ;;  %v19940_v55 = vpop.permute.xlu0 %19939  ;;  %v14782_v48 = vsel %vm14771_vm7, %v14765_v37, %v19936_v15  ;;  %v14783_v24 = vsel %vm14771_vm7, %v14766_v33, %v19937_v35 }
 0xc6c   : > { %v19942_v6 = vunpack.i.h.bf16 %v19940_v55  ;;  %v19941_v49 = vunpack.i.l.bf16 %v19940_v55  ;;  %18180 = vmatprep.mubr.f32.mxu0 %v14782_v48  ;;  %v19967_v12 = vunpack.i.h.bf16 %v19965_v39  ;;  %v19966_v36 = vunpack.i.l.bf16 %v19965_v39 }
 0xc6d   : > { %18181 = vmatmul.mubr.f32.gmra.mrb[158].mxu0 %v14783_v24 }
 0xc6e   : > { %v14683_v28 = vsel %vm2189_vm0, %v27454_v57, %v19942_v6  ;;  %v14682_v44 = vsel %vm2189_vm0, %v27455_v21, %v19941_v49 }
 0xc6f   : > { %v19950_v40 = vpop.permute.xlu0 %19949  ;;  %v19975_v10 = vpop.permute.xlu1 %19974  ;;  %v14699_v41 = vsel %vm14686_vm2, %v14682_v44, %v19946_v25  ;;  %v14700_v60 = vsel %vm14686_vm2, %v14683_v28, %v19947_v22  ;;  %v25921_v22 = vld [vmem:[%s27458_s15] ss:$0 sm:$0xff]  ;;  %s27462_s15 = sld [smem:[#allocation166_spill]] }
 0xc70   : > { %v19952_v20 = vunpack.i.h.bf16 %v19950_v40  ;;  %v19951_v47 = vunpack.i.l.bf16 %v19950_v40  ;;  %v19977_v58 = vunpack.i.h.bf16 %v19975_v10  ;;  %v19976_v19 = vunpack.i.l.bf16 %v19975_v10 }
 0xc72   : > { %v14716_v29 = vsel %vm14703_vm3, %v14699_v41, %v19951_v47  ;;  %v14717_v14 = vsel %vm14703_vm3, %v14700_v60, %v19952_v20  ;;  %v14685_v7 = vsel %vm2189_vm0, %v27456_v31, %v19977_v58  ;;  %v14684_v16 = vsel %vm2189_vm0, %v27457_v2, %v19976_v19  ;;  %v20648_v47 = vld [vmem:[%s21371_s28 + $0x8] sm:$0xff]  ;;  %v20649_v60 = vld [vmem:[%s21371_s28] sm:$0xff] }
 0xc73   : > { %v19960_v26 = vpop.permute.xlu0 %19959  ;;  %v14733_v52 = vsel %vm14720_vm4, %v14716_v29, %v19956_v3  ;;  %v14734_v53 = vsel %vm14720_vm4, %v14717_v14, %v19957_v5  ;;  %v19985_v13 = vpop.permute.xlu1 %19984  ;;  %v20656_v2 = vld [vmem:[%s21371_s28 + $0x48] sm:$0xff] }
 0xc74   : > { %v19962_v59 = vunpack.i.h.bf16 %v19960_v26  ;;  %v19961_v0 = vunpack.i.l.bf16 %v19960_v26  ;;  %v19987_v45 = vunpack.i.h.bf16 %v19985_v13  ;;  %v19986_v38 = vunpack.i.l.bf16 %v19985_v13 }
 0xc76   : > { %v14750_v9 = vsel %vm14737_vm5, %v14733_v52, %v19961_v0  ;;  %v14751_v18 = vsel %vm14737_vm5, %v14734_v53, %v19962_v59  ;;  %v20650_v59 = vld [vmem:[%s21371_s28 + $0x10] sm:$0xff]  ;;  %v20651_v52 = vld [vmem:[%s21371_s28 + $0x18] sm:$0xff] }
 0xc77   : > { %v19970_v43 = vpop.permute.xlu0 %19969  ;;  %v14767_v30 = vsel %vm14754_vm6, %v14750_v9, %v19966_v36  ;;  %v14768_v17 = vsel %vm14754_vm6, %v14751_v18, %v19967_v12  ;;  %v19995_v42 = vpop.permute.xlu1 %19994  ;;  %v20652_v36 = vld [vmem:[%s21371_s28 + $0x28] sm:$0xff] }
 0xc78   : > { %v19972_v4 = vunpack.i.h.bf16 %v19970_v43  ;;  %v19971_v32 = vunpack.i.l.bf16 %v19970_v43  ;;  %v19997_v51 = vunpack.i.h.bf16 %v19995_v42  ;;  %v19996_v37 = vunpack.i.l.bf16 %v19995_v42 }
 0xc7a   : > { %v14784_v8 = vsel %vm14771_vm7, %v14767_v30, %v19971_v32  ;;  %v14785_v1 = vsel %vm14771_vm7, %v14768_v17, %v19972_v4  ;;  %v20653_v4 = vld [vmem:[%s21371_s28 + $0x20] sm:$0xff] }
 0xc7b   : > { %v19980_v11 = vpop.permute.xlu0 %19979  ;;  %18183 = vmatprep.mubr.f32.mxu0 %v14784_v8  ;;  %v20005_v35 = vpop.permute.xlu1 %20004  ;;  %v20654_v8 = vld [vmem:[%s21371_s28 + $0x38] sm:$0xff] }
 0xc7c   : > { %v19982_v61 = vunpack.i.h.bf16 %v19980_v11  ;;  %v19981_v63 = vunpack.i.l.bf16 %v19980_v11  ;;  %18184 = vmatmul.mubr.f32.gmra.mrb[160].mxu0 %v14785_v1  ;;  %v20007_v48 = vunpack.i.h.bf16 %v20005_v35  ;;  %v20006_v24 = vunpack.i.l.bf16 %v20005_v35  ;;  %v20655_v11 = vld [vmem:[%s21371_s28 + $0x30] sm:$0xff] }
 0xc7e   : > { %v14702_v23 = vsel %vm14686_vm2, %v14685_v7, %v19982_v61  ;;  %v14701_v46 = vsel %vm14686_vm2, %v14684_v16, %v19981_v63 }
 0xc7f   : > { %v19990_v62 = vpop.permute.xlu0 %19989  ;;  %v14718_v50 = vsel %vm14703_vm3, %v14701_v46, %v19986_v38  ;;  %v14719_v34 = vsel %vm14703_vm3, %v14702_v23, %v19987_v45  ;;  %v20657_v23 = vld [vmem:[%s21371_s28 + $0x40] sm:$0xff] }
 0xc80   : > { %v19992_v54 = vunpack.i.h.bf16 %v19990_v62  ;;  %v19991_v27 = vunpack.i.l.bf16 %v19990_v62 }
 0xc82   : > { %v14735_v15 = vsel %vm14720_vm4, %v14718_v50, %v19991_v27  ;;  %v14736_v56 = vsel %vm14720_vm4, %v14719_v34, %v19992_v54  ;;  %v20658_v27 = vld [vmem:[%s21371_s28 + $0x58] sm:$0xff]  ;;  %v20659_v34 = vld [vmem:[%s21371_s28 + $0x50] sm:$0xff] }
 0xc83   : > { %v20000_v33 = vpop.permute.xlu0 %19999  ;;  %v14752_v6 = vsel %vm14737_vm5, %v14735_v15, %v19996_v37  ;;  %v14753_v49 = vsel %vm14737_vm5, %v14736_v56, %v19997_v51 }
 0xc84   : > { %v20002_v39 = vunpack.i.h.bf16 %v20000_v33  ;;  %v20001_v55 = vunpack.i.l.bf16 %v20000_v33  ;;  %v20660_v33 = vld [vmem:[%s21371_s28 + $0x68] sm:$0xff] }
 0xc86   : > { %v14769_v57 = vsel %vm14754_vm6, %v14752_v6, %v20001_v55  ;;  %v14770_v28 = vsel %vm14754_vm6, %v14753_v49, %v20002_v39  ;;  %v20661_v55 = vld [vmem:[%s21371_s28 + $0x60] sm:$0xff] }
 0xc87   : > { %v14786_v21 = vsel %vm14771_vm7, %v14769_v57, %v20006_v24  ;;  %v14787_v44 = vsel %vm14771_vm7, %v14770_v28, %v20007_v48 }
 0xc88   : > { %18186 = vmatprep.mubr.f32.mxu0 %v14786_v21 }
 0xc89   : > { %18187 = vmatmul.mubr.f32.gmra.mrb[162].mxu0 %v14787_v44 }
 0xc9a   : > { %v18167_v25 = vpop.f32.mrb[148].mxu0 }
 0xc9b   : > { %v14883_v40 = vadd.f32 %v18167_v25, %v25921_v22  ;;  %v14877_v10 = vpop.f32.mrb[149].mxu0 }
 0xc9c   : > { %v14878_v20 = vadd.f32 %v25921_v22, %v14877_v10  ;;  %v20662_v10 = vld [vmem:[%s21371_s28 + $0x78] sm:$0xff] }
 0xc9d   : > { %v25926_v41 = vadd.f32 %v20648_v47, %v14883_v40 }
 0xc9e   : > { %v25929_v29 = vadd.f32 %v20649_v60, %v14878_v20  ;;  %v20663_v60 = vld [vmem:[%s21371_s28 + $0x70] sm:$0xff]  ;;  %s26205_s28 = scalar_lea.vmem [#allocation16], %s15943_s9  ;;  %s16348_s9 = sshll.u32 %s21098_s24, 11 }
 0xc9f   : > { %14976 = vadd.xlane.f32.xlu1 %v25926_v41  ;;  %s15789_s30 = sshll.u32 %s26205_s28, 4  ;;  %s20994_s24 = smov [#allocation16]   ;;  %s26258_s30 = int_to_ptr.vmem [resolvable:$true] %s15789_s30 }
 0xca0   : > { %14974 = vadd.xlane.f32.xlu0 %v25929_v29  ;;  %s20890_s22 = scalar_lea.vmem %s26258_s30, 2048 }
 0xca1   : > { %p20891_p12 = scmp.ne.s32.totalorder %s26258_s30, %s20890_s22 }
 0xca3   : > { %p20892_p13 = pnand %p20891_p12, %p27464_p1 }
 0xca5   : > { %p20893_p0 = pneg %p20892_p13 }
 0xcce   : > { %v18170_v14 = vpop.f32.mrb[150].mxu0 }
 0xccf   : > { %v14887_v5 = vpop.f32.mrb[151].mxu0  ;;  %v14893_v26 = vadd.f32 %v18170_v14, %v25921_v22 }
 0xcd0   : > { %v14888_v3 = vadd.f32 %v25921_v22, %v14887_v5 }
 0xcd1   : > { %v25940_v53 = vadd.f32 %v20651_v52, %v14893_v26 }
 0xcd2   : > { %v25936_v0 = vadd.f32 %v20650_v59, %v14888_v3 }
 0xcd4   : > { %14978 = vadd.xlane.f32.xlu0 %v25936_v0 }
 0xcd8   : > { %14980 = vadd.xlane.f32.xlu0 %v25940_v53 }
 0xcfe   : > { %v18173_v13 = vpop.f32.mrb[152].mxu0 }
 0xcff   : > { %v14903_v9 = vadd.f32 %v18173_v13, %v25921_v22  ;;  %v14897_v18 = vpop.f32.mrb[153].mxu0 }
 0xd00   : > { %v14898_v12 = vadd.f32 %v25921_v22, %v14897_v18  ;;  %v15195_v18 = vld [vmem:[#allocation13 + $0x8] sm:$0xff] }
 0xd01   : > { %v25946_v43 = vadd.f32 %v20652_v36, %v14903_v9 }
 0xd02   : > { %v25949_v32 = vadd.f32 %v20653_v4, %v14898_v12  ;;  %v15197_v12 = vld [vmem:[#allocation13 + $0x18] sm:$0xff] }
 0xd03   : > { %14984 = vadd.xlane.f32.xlu1 %v25946_v43  ;;  %v18957_v4 = vpack.c.bf16 %v15197_v12, %v15195_v18  ;;  %v15225_v18 = vld [vmem:[#allocation13 + $0xf8] sm:$0xff] }
 0xd04   : > { %14982 = vadd.xlane.f32.xlu0 %v25949_v32 }
 0xd05   : > { %18958 = vmatprep.subr.bf16.mxu1 %v18957_v4 }
 0xd0b   : > { %v18176_v58 = vpop.f32.mrb[154].mxu0 }
 0xd0c   : > { %v14913_v19 = vadd.f32 %v18176_v58, %v25921_v22  ;;  %v14907_v30 = vpop.f32.mrb[155].mxu0  ;;  %v15194_v58 = vld [vmem:[#allocation13] sm:$0xff] }
 0xd0d   : > { %v14908_v17 = vadd.f32 %v25921_v22, %v14907_v30  ;;  %v15199_v30 = vld [vmem:[#allocation13 + $0x28] sm:$0xff] }
 0xd0e   : > { %v25956_v1 = vadd.f32 %v20654_v8, %v14913_v19  ;;  %v15196_v19 = vld [vmem:[#allocation13 + $0x10] sm:$0xff]  ;;  %v15201_v8 = vld [vmem:[#allocation13 + $0x38] sm:$0xff] }
 0xd0f   : > { %v25959_v42 = vadd.f32 %v20655_v11, %v14908_v17  ;;  %v18959_v17 = vpack.c.bf16 %v15196_v19, %v15194_v58  ;;  %v15198_v11 = vld [vmem:[#allocation13 + $0x20] sm:$0xff]  ;;  %v15224_v19 = vld [vmem:[#allocation13 + $0xf0] sm:$0xff] }
 0xd10   : > { %14988 = vadd.xlane.f32.xlu1 %v25956_v1  ;;  %v15222_v58 = vld [vmem:[#allocation13 + $0xe0] sm:$0xff] }
 0xd11   : > { %14986 = vadd.xlane.f32.xlu0 %v25959_v42  ;;  %18960 = vmatpush1.bf16.msra.mxu1 %v18959_v17 }
 0xd2c   : > { %v14977_v24 = vpop.xlane.xlu1 %14976 }
 0xd2d   : > { %v14975_v6 = vpop.xlane.xlu0 %14974  ;;  %v15007_v49 = vmul.f32 0.0078125, %v14977_v24  ;;  %v15210_v24 = vld [vmem:[#allocation13 + $0x80] sm:$0xff] }
 0xd2e   : > { %v15006_v57 = vmul.f32 0.0078125, %v14975_v6 }
 0xd2f   : > { %v25996_v40 = vsub.f32 %v25926_v41, %v15007_v49  ;;  %v15212_v49 = vld [vmem:[#allocation13 + $0x90] sm:$0xff] }
 0xd30   : > { %v26002_v47 = vsub.f32 %v25929_v29, %v15006_v57  ;;  %v18975_v57 = vpack.c.bf16 %v15212_v49, %v15210_v24 }
 0xd32   : > { %v15038_v26 = vmul.f32 %v26002_v47, %v26002_v47 }
 0xd33   : > { %v18179_v61 = vpop.f32.mrb[156].mxu0 }
 0xd34   : > { %v14923_v63 = vadd.f32 %v18179_v61, %v25921_v22  ;;  %v14917_v31 = vpop.f32.mrb[157].mxu0  ;;  %v15200_v61 = vld [vmem:[#allocation13 + $0x30] sm:$0xff] }
 0xd35   : > { %v14918_v7 = vadd.f32 %v25921_v22, %v14917_v31  ;;  %v18961_v31 = vpack.c.bf16 %v15201_v8, %v15199_v30  ;;  %v18987_v30 = vpack.c.bf16 %v15224_v19, %v15222_v58 }
 0xd36   : > { %v25966_v16 = vadd.f32 %v20656_v2, %v14923_v63  ;;  %v15203_v2 = vld [vmem:[#allocation13 + $0x48] sm:$0xff] }
 0xd37   : > { %v25969_v46 = vadd.f32 %v20657_v23, %v14918_v7  ;;  %v18963_v7 = vpack.c.bf16 %v15200_v61, %v15198_v11  ;;  %18962 = vmatprep.subr.bf16.mxu1 %v18961_v31  ;;  %v15205_v23 = vld [vmem:[#allocation13 + $0x58] sm:$0xff] }
 0xd38   : > { %14992 = vadd.xlane.f32.xlu1 %v25966_v16 }
 0xd39   : > { %14990 = vadd.xlane.f32.xlu0 %v25969_v46  ;;  %18964 = vmatpush1.bf16.msra.mxu1 %v18963_v7 }
 0xd40   : > { %v18182_v45 = vpop.f32.mrb[158].mxu0 }
 0xd41   : > { %v14933_v38 = vadd.f32 %v18182_v45, %v25921_v22  ;;  %v14927_v62 = vpop.f32.mrb[159].mxu0  ;;  %v15202_v45 = vld [vmem:[#allocation13 + $0x40] sm:$0xff] }
 0xd42   : > { %v14928_v54 = vadd.f32 %v25921_v22, %v14927_v62  ;;  %v15204_v62 = vld [vmem:[#allocation13 + $0x50] sm:$0xff] }
 0xd43   : > { %v25976_v50 = vadd.f32 %v20658_v27, %v14933_v38  ;;  %v18965_v38 = vpack.c.bf16 %v15205_v23, %v15203_v2  ;;  %v15207_v27 = vld [vmem:[#allocation13 + $0x68] sm:$0xff] }
 0xd44   : > { %v25979_v35 = vadd.f32 %v20659_v34, %v14928_v54  ;;  %v18967_v54 = vpack.c.bf16 %v15204_v62, %v15202_v45  ;;  %v15209_v34 = vld [vmem:[#allocation13 + $0x78] sm:$0xff] }
 0xd45   : > { %14996 = vadd.xlane.f32.xlu1 %v25976_v50  ;;  %18966 = vmatprep.subr.bf16.mxu1 %v18965_v38 }
 0xd46   : > { %14994 = vadd.xlane.f32.xlu0 %v25979_v35  ;;  %18968 = vmatpush1.bf16.msra.mxu1 %v18967_v54 }
 0xd4f   : > { %v18185_v15 = vpop.f32.mrb[160].mxu0 }
 0xd50   : > { %v14943_v56 = vadd.f32 %v18185_v15, %v25921_v22  ;;  %v14937_v51 = vpop.f32.mrb[161].mxu0  ;;  %v15206_v15 = vld [vmem:[#allocation13 + $0x60] sm:$0xff] }
 0xd51   : > { %v14938_v37 = vadd.f32 %v25921_v22, %v14937_v51  ;;  %v15208_v51 = vld [vmem:[#allocation13 + $0x70] sm:$0xff] }
 0xd52   : > { %v25986_v39 = vadd.f32 %v20660_v33, %v14943_v56  ;;  %v18969_v56 = vpack.c.bf16 %v15209_v34, %v15207_v27  ;;  %v15211_v33 = vld [vmem:[#allocation13 + $0x88] sm:$0xff] }
 0xd53   : > { %v25989_v48 = vadd.f32 %v20661_v55, %v14938_v37  ;;  %v18971_v37 = vpack.c.bf16 %v15208_v51, %v15206_v15  ;;  %v15213_v55 = vld [vmem:[#allocation13 + $0x98] sm:$0xff] }
 0xd54   : > { %15000 = vadd.xlane.f32.xlu1 %v25986_v39  ;;  %18970 = vmatprep.subr.bf16.mxu1 %v18969_v56  ;;  %v18973_v6 = vpack.c.bf16 %v15213_v55, %v15211_v33 }
 0xd55   : > { %14998 = vadd.xlane.f32.xlu0 %v25989_v48  ;;  %18972 = vmatpush1.bf16.msra.mxu1 %v18971_v37 }
 0xd56   : > { %18974 = vmatprep.subr.bf16.mxu1 %v18973_v6 }
 0xd59   : > { %18976 = vmatpush1.bf16.msra.mxu1 %v18975_v57 }
 0xd5c   : > { %v18188_v28 = vpop.f32.mrb[162].mxu0 }
 0xd5d   : > { %v14953_v21 = vadd.f32 %v18188_v28, %v25921_v22  ;;  %v14947_v44 = vpop.f32.mrb[163].mxu0  ;;  %v15215_v28 = vld [vmem:[#allocation13 + $0xa8] sm:$0xff] }
 0xd5e   : > { %v14948_v25 = vadd.f32 %v25921_v22, %v14947_v44  ;;  %v15039_v22 = vmul.f32 %v25996_v40, %v25996_v40  ;;  %v15214_v44 = vld [vmem:[#allocation13 + $0xa0] sm:$0xff] }
 0xd5f   : > { %v25999_v20 = vadd.f32 %v20662_v10, %v14953_v21  ;;  %v15217_v21 = vld [vmem:[#allocation13 + $0xb8] sm:$0xff]  ;;  %v15216_v10 = vld [vmem:[#allocation13 + $0xb0] sm:$0xff] }
 0xd60   : > { %v26005_v14 = vadd.f32 %v20663_v60, %v14948_v25  ;;  %v18977_v25 = vpack.c.bf16 %v15217_v21, %v15215_v28  ;;  %v15219_v60 = vld [vmem:[#allocation13 + $0xc8] sm:$0xff] }
 0xd61   : > { %15004 = vadd.xlane.f32.xlu1 %v25999_v20  ;;  %v14979_v5 = vpop.xlane.xlu0 %14978 }
 0xd62   : > { %15002 = vadd.xlane.f32.xlu0 %v26005_v14  ;;  %v15008_v3 = vmul.f32 0.0078125, %v14979_v5  ;;  %v15221_v5 = vld [vmem:[#allocation13 + $0xd8] sm:$0xff]  ;;  %18978 = vmatprep.subr.bf16.mxu1 %v18977_v25 }
 0xd64   : > { %v26014_v59 = vsub.f32 %v25936_v0, %v15008_v3  ;;  %v20993_v3 = vmov 0.0  }
 0xd65   : > { %15056 = vadd.xlane.f32.xlu1 %v15039_v22  ;;  %v14981_v52 = vpop.xlane.xlu0 %14980  ;;  %15302 = vmatprep.mubr.f32.mxu1 %v20993_v3  ;;  %v18979_v22 = vpack.c.bf16 %v15216_v10, %v15214_v44 }
 0xd66   : > { %15054 = vadd.xlane.f32.xlu0 %v15038_v26  ;;  %v15009_v13 = vmul.f32 0.0078125, %v14981_v52  ;;  %v15040_v9 = vmul.f32 %v26014_v59, %v26014_v59  ;;  %v18981_v26 = vpack.c.bf16 %v15221_v5, %v15219_v60  ;;  %v15218_v52 = vld [vmem:[#allocation13 + $0xc0] sm:$0xff] }
 0xd67   : > { %18980 = vmatpush1.bf16.msra.mxu1 %v18979_v22 }
 0xd68   : > { %v26019_v36 = vsub.f32 %v25940_v53, %v15009_v13  ;;  %v15220_v13 = vld [vmem:[#allocation13 + $0xd0] sm:$0xff]  ;;  %18982 = vmatprep.subr.bf16.mxu1 %v18981_v26 }
 0xd69   : > { %v18983_v12 = vpack.c.bf16 %v15220_v13, %v15218_v52 }
 0xd6a   : > { %15058 = vadd.xlane.f32.xlu0 %v15040_v9  ;;  %v15041_v63 = vmul.f32 %v26019_v36, %v26019_v36  ;;  %v15223_v9 = vld [vmem:[#allocation13 + $0xe8] sm:$0xff] }
 0xd6b   : > { %v18985_v4 = vpack.c.bf16 %v15225_v18, %v15223_v9  ;;  %18984 = vmatpush1.bf16.msra.mxu1 %v18983_v12 }
 0xd6c   : > { %15060 = vadd.xlane.f32.xlu1 %v15041_v63 }
 0xd6d   : > { %18986 = vmatprep.subr.bf16.mxu1 %v18985_v4 }
 0xd6f   : > { %18988 = vmatpush1.bf16.msra.mxu1 %v18987_v30 }
 0xd90   : > { %v14985_v17 = vpop.xlane.xlu1 %14984 }
 0xd91   : > { %v15011_v8 = vmul.f32 0.0078125, %v14985_v17  ;;  %v14983_v11 = vpop.xlane.xlu0 %14982 }
 0xd92   : > { %v15010_v61 = vmul.f32 0.0078125, %v14983_v11 }
 0xd93   : > { %v26025_v63 = vsub.f32 %v25946_v43, %v15011_v8 }
 0xd94   : > { %v26028_v31 = vsub.f32 %v25949_v32, %v15010_v61 }
 0xd95   : > { %v15043_v7 = vmul.f32 %v26025_v63, %v26025_v63 }
 0xd96   : > { %v15042_v2 = vmul.f32 %v26028_v31, %v26028_v31 }
 0xd97   : > { %15064 = vadd.xlane.f32.xlu1 %v15043_v7 }
 0xd98   : > { %15062 = vadd.xlane.f32.xlu0 %v15042_v2 }
 0xd9d   : > { %v14989_v23 = vpop.xlane.xlu1 %14988 }
 0xd9e   : > { %v15013_v45 = vmul.f32 0.0078125, %v14989_v23  ;;  %v14987_v38 = vpop.xlane.xlu0 %14986 }
 0xd9f   : > { %v15012_v62 = vmul.f32 0.0078125, %v14987_v38 }
 0xda0   : > { %v26035_v54 = vsub.f32 %v25956_v1, %v15013_v45 }
 0xda1   : > { %v26038_v27 = vsub.f32 %v25959_v42, %v15012_v62 }
 0xda2   : > { %v15045_v34 = vmul.f32 %v26035_v54, %v26035_v54 }
 0xda3   : > { %v15044_v15 = vmul.f32 %v26038_v27, %v26038_v27 }
 0xda4   : > { %15068 = vadd.xlane.f32.xlu1 %v15045_v34 }
 0xda5   : > { %15066 = vadd.xlane.f32.xlu0 %v15044_v15 }
 0xdc5   : > { %v14993_v56 = vpop.xlane.xlu1 %14992 }
 0xdc6   : > { %v15015_v51 = vmul.f32 0.0078125, %v14993_v56  ;;  %v14991_v37 = vpop.xlane.xlu0 %14990 }
 0xdc7   : > { %v15014_v33 = vmul.f32 0.0078125, %v14991_v37 }
 0xdc8   : > { %v26045_v55 = vsub.f32 %v25966_v16, %v15015_v51 }
 0xdc9   : > { %v26048_v24 = vsub.f32 %v25969_v46, %v15014_v33 }
 0xdca   : > { %v15047_v6 = vmul.f32 %v26045_v55, %v26045_v55 }
 0xdcb   : > { %v15046_v49 = vmul.f32 %v26048_v24, %v26048_v24 }
 0xdcc   : > { %15072 = vadd.xlane.f32.xlu1 %v15047_v6 }
 0xdcd   : > { %15070 = vadd.xlane.f32.xlu0 %v15046_v49 }
 0xdd2   : > { %v14997_v57 = vpop.xlane.xlu1 %14996 }
 0xdd3   : > { %v15017_v28 = vmul.f32 0.0078125, %v14997_v57  ;;  %v14995_v21 = vpop.xlane.xlu0 %14994 }
 0xdd4   : > { %v15016_v44 = vmul.f32 0.0078125, %v14995_v21 }
 0xdd5   : > { %v26055_v25 = vsub.f32 %v25976_v50, %v15017_v28  ;;  %v26087_v28 = vld [vmem:[%s27459_s1] ss:$0 sm:$0xff] }
 0xdd6   : > { %v26058_v10 = vsub.f32 %v25979_v35, %v15016_v44 }
 0xdd7   : > { %v15049_v60 = vmul.f32 %v26055_v25, %v26055_v25 }
 0xdd8   : > { %v15048_v5 = vmul.f32 %v26058_v10, %v26058_v10 }
 0xdd9   : > { %15076 = vadd.xlane.f32.xlu1 %v15049_v60  ;;  %v26094_v60 = vld [vmem:[%s27460_s3] ss:$0 sm:$0xff]  ;;  %s26256_s3 = scalar_lea.hbm %s27463_s27, %s16348_s9 }
 0xdda   : > { %15074 = vadd.xlane.f32.xlu0 %v15048_v5 }
 0xde1   : > { %v15001_v22 = vpop.xlane.xlu1 %15000 }
 0xde2   : > { %v15019_v26 = vmul.f32 0.0078125, %v15001_v22  ;;  %v14999_v52 = vpop.xlane.xlu0 %14998 }
 0xde3   : > { %v15018_v13 = vmul.f32 0.0078125, %v14999_v52 }
 0xde4   : > { %v26065_v9 = vsub.f32 %v25986_v39, %v15019_v26 }
 0xde5   : > { %v26068_v18 = vsub.f32 %v25989_v48, %v15018_v13 }
 0xde6   : > { %v15051_v12 = vmul.f32 %v26065_v9, %v26065_v9 }
 0xde7   : > { %v15050_v4 = vmul.f32 %v26068_v18, %v26068_v18 }
 0xde8   : > { %15080 = vadd.xlane.f32.xlu1 %v15051_v12 }
 0xde9   : > { %15078 = vadd.xlane.f32.xlu0 %v15050_v4 }
 0xdee   : > { %v15005_v58 = vpop.xlane.xlu1 %15004 }
 0xdef   : > { %v15021_v19 = vmul.f32 0.0078125, %v15005_v58  ;;  %v15003_v30 = vpop.xlane.xlu0 %15002 }
 0xdf0   : > { %v15020_v17 = vmul.f32 0.0078125, %v15003_v30  ;;  %v15575_v30 = vld [vmem:[#allocation14 + $0x80] sm:$0xff] }
 0xdf1   : > { %v26075_v8 = vsub.f32 %v25999_v20, %v15021_v19 }
 0xdf2   : > { %v26078_v11 = vsub.f32 %v26005_v14, %v15020_v17  ;;  %v15057_v61 = vpop.xlane.xlu1 %15056  ;;  %v15576_v17 = vld [vmem:[#allocation14 + $0x88] sm:$0xff] }
 0xdf3   : > { %v15087_v7 = vmul.f32 0.0078125, %v15057_v61  ;;  %v15055_v2 = vpop.xlane.xlu0 %15054  ;;  %v15053_v23 = vmul.f32 %v26075_v8, %v26075_v8  ;;  %v15559_v61 = vld [vmem:[#allocation14] sm:$0xff] }
 0xdf4   : > { %v15086_v45 = vmul.f32 0.0078125, %v15055_v2  ;;  %v15052_v38 = vmul.f32 %v26078_v11, %v26078_v11  ;;  %v15577_v2 = vld [vmem:[#allocation14 + $0x90] sm:$0xff] }
 0xdf5   : > { %v15103_v62 = vadd.f32 1e-05, %v15087_v7  ;;  %15084 = vadd.xlane.f32.xlu1 %v15053_v23  ;;  %v18989_v7 = vpack.c.bf16 %v15576_v17, %v15575_v30  ;;  %v15578_v23 = vld [vmem:[#allocation14 + $0x98] sm:$0xff] }
 0xdf6   : > { %v15102_v34 = vadd.f32 1e-05, %v15086_v45  ;;  %15082 = vadd.xlane.f32.xlu0 %v15052_v38  ;;  %v18993_v38 = vpack.c.bf16 %v15578_v23, %v15577_v2 }
 0xdf7   : > { %20552 = vrsqrt.f32 %v15103_v62  ;;  %v15059_v15 = vpop.xlane.xlu0 %15058  ;;  %v15561_v62 = vld [vmem:[#allocation14 + $0x10] sm:$0xff]  ;;  %18990 = vmatprep.subr.bf16.mxu0 %v18989_v7 }
 0xdf8   : > { %20554 = vrsqrt.f32 %v15102_v34  ;;  %v15088_v56 = vmul.f32 0.0078125, %v15059_v15  ;;  %v15562_v34 = vld [vmem:[#allocation14 + $0x18] sm:$0xff]  ;;  %v15579_v15 = vld [vmem:[#allocation14 + $0xa0] sm:$0xff] }
 0xdf9   : > { %v15061_v37 = vpop.xlane.xlu1 %15060 }
 0xdfa   : > { %v15104_v51 = vadd.f32 1e-05, %v15088_v56  ;;  %v15089_v33 = vmul.f32 0.0078125, %v15061_v37  ;;  %v15580_v56 = vld [vmem:[#allocation14 + $0xa8] sm:$0xff] }
 0xdfb   : > { %v18997_v37 = vpack.c.bf16 %v15580_v56, %v15579_v15 }
 0xdfc   : > { %20556 = vrsqrt.f32 %v15104_v51  ;;  %v15105_v6 = vadd.f32 1e-05, %v15089_v33  ;;  %v18995_v51 = vpack.c.bf16 %v15562_v34, %v15561_v62  ;;  %v15563_v33 = vld [vmem:[#allocation14 + $0x20] sm:$0xff] }
 0xdfe   : > { %20558 = vrsqrt.f32 %v15105_v6  ;;  %v15564_v6 = vld [vmem:[#allocation14 + $0x28] sm:$0xff] }
 0xe01   : > { %v20553_v49 = vpop.eup %20552 }
 0xe02   : > { %v20555_v57 = vpop.eup %20554  ;;  %v15135_v44 = vmul.f32 %v20553_v49, %v25996_v40 }
 0xe03   : > { %v15134_v21 = vmul.f32 %v20555_v57, %v26002_v47 }
 0xe04   : > { %v15157_v52 = vmul.f32 %v26087_v28, %v15135_v44  ;;  %v18999_v44 = vpack.c.bf16 %v15564_v6, %v15563_v33 }
 0xe05   : > { %v15156_v5 = vmul.f32 %v26087_v28, %v15134_v21 }
 0xe06   : > { %v20557_v22 = vpop.eup %20556  ;;  %v15179_v40 = vadd.f32 %v26094_v60, %v15157_v52 }
 0xe07   : > { %v15178_v26 = vadd.f32 %v26094_v60, %v15156_v5  ;;  %v15136_v13 = vmul.f32 %v20557_v22, %v26014_v59 }
 0xe08   : > { %v20559_v12 = vpop.eup %20558 }
 0xe09   : > { %15303 = vmatmul.mubr.f32.vlgmr.msra.gmra.mrb[156].mxu1 %v15178_v26  ;;  %v15158_v47 = vmul.f32 %v26087_v28, %v15136_v13  ;;  %v15137_v4 = vmul.f32 %v20559_v12, %v26019_v36  ;;  %v15560_v36 = vld [vmem:[#allocation14 + $0x8] sm:$0xff] }
 0xe0a   : > { %15308 = vmatprep.mubr.f32.mxu1 %v20993_v3  ;;  %v18991_v45 = vpack.c.bf16 %v15560_v36, %v15559_v61 }
 0xe0b   : > { %v15180_v58 = vadd.f32 %v26094_v60, %v15158_v47  ;;  %v15159_v19 = vmul.f32 %v26087_v28, %v15137_v4 }
 0xe0c   : > { %18992 = vmatpush3.bf16.msra.mxu0 %v18991_v45 }
 0xe0d   : > { %15309 = vmatmul.mubr.f32.gmra.mrb[158].mxu1 %v15179_v40  ;;  %v15181_v59 = vadd.f32 %v26094_v60, %v15159_v19  ;;  %18994 = vmatprep.subr.bf16.mxu0 %v18993_v38 }
 0xe0e   : > { %15314 = vmatprep.mubr.f32.mxu1 %v20993_v3 }
 0xe10   : > { %18996 = vmatpush3.bf16.msra.mxu0 %v18995_v51 }
 0xe11   : > { %15315 = vmatmul.mubr.f32.gmra.mrb[160].mxu1 %v15180_v58  ;;  %18998 = vmatprep.subr.bf16.mxu0 %v18997_v37 }
 0xe12   : > { %15320 = vmatprep.mubr.f32.mxu1 %v20993_v3 }
 0xe14   : > { %19000 = vmatpush3.bf16.msra.mxu0 %v18999_v44 }
 0xe15   : > { %15321 = vmatmul.mubr.f32.gmra.mrb[162].mxu1 %v15181_v59 }
 0xe16   : > { %15326 = vmatprep.mubr.f32.mxu1 %v20993_v3 }
 0xe24   : > { %v15065_v49 = vpop.xlane.xlu1 %15064 }
 0xe25   : > { %v15091_v57 = vmul.f32 0.0078125, %v15065_v49  ;;  %v15063_v21 = vpop.xlane.xlu0 %15062 }
 0xe26   : > { %v15090_v5 = vmul.f32 0.0078125, %v15063_v21 }
 0xe27   : > { %v15107_v22 = vadd.f32 1e-05, %v15091_v57 }
 0xe28   : > { %v15106_v26 = vadd.f32 1e-05, %v15090_v5 }
 0xe29   : > { %20560 = vrsqrt.f32 %v15107_v22 }
 0xe2a   : > { %20562 = vrsqrt.f32 %v15106_v26 }
 0xe31   : > { %v15069_v52 = vpop.xlane.xlu1 %15068 }
 0xe32   : > { %v15093_v12 = vmul.f32 0.0078125, %v15069_v52  ;;  %v15067_v40 = vpop.xlane.xlu0 %15066 }
 0xe33   : > { %v20561_v13 = vpop.eup %20560  ;;  %v15092_v4 = vmul.f32 0.0078125, %v15067_v40 }
 0xe34   : > { %v20563_v47 = vpop.eup %20562  ;;  %v15109_v58 = vadd.f32 1e-05, %v15093_v12  ;;  %v15139_v59 = vmul.f32 %v20561_v13, %v26025_v63  ;;  %v15581_v13 = vld [vmem:[#allocation14 + $0xb0] sm:$0xff]  ;;  %v15582_v12 = vld [vmem:[#allocation14 + $0xb8] sm:$0xff] }
 0xe35   : > { %v15138_v19 = vmul.f32 %v20563_v47, %v26028_v31  ;;  %v15108_v30 = vadd.f32 1e-05, %v15092_v4  ;;  %v19001_v40 = vpack.c.bf16 %v15582_v12, %v15581_v13  ;;  %v15565_v47 = vld [vmem:[#allocation14 + $0x30] sm:$0xff]  ;;  %v15566_v4 = vld [vmem:[#allocation14 + $0x38] sm:$0xff] }
 0xe36   : > { %20564 = vrsqrt.f32 %v15109_v58  ;;  %v15161_v7 = vmul.f32 %v26087_v28, %v15139_v59  ;;  %v15589_v13 = vld [vmem:[#allocation14 + $0xf0] sm:$0xff]  ;;  %v15590_v12 = vld [vmem:[#allocation14 + $0xf8] sm:$0xff] }
 0xe37   : > { %v15160_v17 = vmul.f32 %v26087_v28, %v15138_v19  ;;  %20566 = vrsqrt.f32 %v15108_v30  ;;  %v19003_v19 = vpack.c.bf16 %v15566_v4, %v15565_v47  ;;  %19002 = vmatprep.subr.bf16.mxu0 %v19001_v40  ;;  %v15573_v40 = vld [vmem:[#allocation14 + $0x70] sm:$0xff]  ;;  %v19017_v47 = vpack.c.bf16 %v15590_v12, %v15589_v13  ;;  %v15574_v4 = vld [vmem:[#allocation14 + $0x78] sm:$0xff] }
 0xe38   : > { %v15183_v36 = vadd.f32 %v26094_v60, %v15161_v7  ;;  %v15568_v7 = vld [vmem:[#allocation14 + $0x48] sm:$0xff] }
 0xe39   : > { %v15182_v61 = vadd.f32 %v26094_v60, %v15160_v17  ;;  %19004 = vmatpush3.bf16.msra.mxu0 %v19003_v19  ;;  %v15583_v17 = vld [vmem:[#allocation14 + $0xc0] sm:$0xff] }
 0xe3b   : > { %15327 = vmatmul.mubr.f32.gmra.mrb[164].mxu1 %v15182_v61 }
 0xe3c   : > { %15332 = vmatprep.mubr.f32.mxu1 %v20993_v3 }
 0xe3f   : > { %15333 = vmatmul.mubr.f32.gmra.mrb[166].mxu1 %v15183_v36 }
 0xe40   : > { %15338 = vmatprep.mubr.f32.mxu1 %v20993_v3  ;;  %v20565_v31 = vpop.eup %20564 }
 0xe41   : > { %v20567_v2 = vpop.eup %20566  ;;  %v15141_v23 = vmul.f32 %v20565_v31, %v26035_v54 }
 0xe42   : > { %v15140_v63 = vmul.f32 %v20567_v2, %v26038_v27  ;;  %v15585_v2 = vld [vmem:[#allocation14 + $0xd0] sm:$0xff] }
 0xe43   : > { %v15163_v62 = vmul.f32 %v26087_v28, %v15141_v23 }
 0xe44   : > { %v15162_v45 = vmul.f32 %v26087_v28, %v15140_v63  ;;  %v15586_v63 = vld [vmem:[#allocation14 + $0xd8] sm:$0xff] }
 0xe45   : > { %v15185_v34 = vadd.f32 %v26094_v60, %v15163_v62  ;;  %v19009_v23 = vpack.c.bf16 %v15586_v63, %v15585_v2 }
 0xe46   : > { %v15184_v38 = vadd.f32 %v26094_v60, %v15162_v45  ;;  %v15569_v45 = vld [vmem:[#allocation14 + $0x50] sm:$0xff] }
 0xe48   : > { %15339 = vmatmul.mubr.f32.gmra.mrb[168].mxu1 %v15184_v38  ;;  %v15570_v38 = vld [vmem:[#allocation14 + $0x58] sm:$0xff] }
 0xe49   : > { %15344 = vmatprep.mubr.f32.mxu1 %v20993_v3  ;;  %v19011_v62 = vpack.c.bf16 %v15570_v38, %v15569_v45 }
 0xe4c   : > { %15345 = vmatmul.mubr.f32.gmra.mrb[170].mxu1 %v15185_v34 }
 0xe4d   : > { %15350 = vmatprep.mubr.f32.mxu1 %v20993_v3 }
 0xe59   : > { %v15073_v15 = vpop.xlane.xlu1 %15072 }
 0xe5a   : > { %v15095_v56 = vmul.f32 0.0078125, %v15073_v15  ;;  %v15071_v51 = vpop.xlane.xlu0 %15070 }
 0xe5b   : > { %v15094_v27 = vmul.f32 0.0078125, %v15071_v51 }
 0xe5c   : > { %v15111_v37 = vadd.f32 1e-05, %v15095_v56 }
 0xe5d   : > { %v15110_v54 = vadd.f32 1e-05, %v15094_v27 }
 0xe5e   : > { %20568 = vrsqrt.f32 %v15111_v37  ;;  %v15587_v37 = vld [vmem:[#allocation14 + $0xe0] sm:$0xff] }
 0xe5f   : > { %20570 = vrsqrt.f32 %v15110_v54  ;;  %v15588_v54 = vld [vmem:[#allocation14 + $0xe8] sm:$0xff] }
 0xe66   : > { %v15077_v33 = vpop.xlane.xlu1 %15076 }
 0xe67   : > { %v15097_v6 = vmul.f32 0.0078125, %v15077_v33  ;;  %v15075_v49 = vpop.xlane.xlu0 %15074 }
 0xe68   : > { %v20569_v57 = vpop.eup %20568  ;;  %v15096_v21 = vmul.f32 0.0078125, %v15075_v49 }
 0xe69   : > { %v20571_v44 = vpop.eup %20570  ;;  %v15113_v5 = vadd.f32 1e-05, %v15097_v6  ;;  %v15143_v52 = vmul.f32 %v20569_v57, %v26045_v55  ;;  %v15567_v55 = vld [vmem:[#allocation14 + $0x40] sm:$0xff]  ;;  %v19013_v57 = vpack.c.bf16 %v15588_v54, %v15587_v37  ;;  %v15228_v37 = vlaneseq }
 0xe6a   : > { %v15112_v22 = vadd.f32 1e-05, %v15096_v21  ;;  %v15142_v26 = vmul.f32 %v20571_v44, %v26048_v24  ;;  %v15584_v24 = vld [vmem:[#allocation14 + $0xc8] sm:$0xff]  ;;  %v19007_v36 = vpack.c.bf16 %v15568_v7, %v15567_v55  ;;  %v15571_v21 = vld [vmem:[#allocation14 + $0x60] sm:$0xff] }
 0xe6b   : > { %20572 = vrsqrt.f32 %v15113_v5  ;;  %v15165_v30 = vmul.f32 %v26087_v28, %v15143_v52  ;;  %v19005_v61 = vpack.c.bf16 %v15584_v24, %v15583_v17  ;;  %v15572_v44 = vld [vmem:[#allocation14 + $0x68] sm:$0xff]  ;;  %v15229_v54 = vshrl.u32 %v15228_v37, 7 }
 0xe6c   : > { %20574 = vrsqrt.f32 %v15112_v22  ;;  %v15164_v58 = vmul.f32 %v26087_v28, %v15142_v26  ;;  %v19015_v22 = vpack.c.bf16 %v15572_v44, %v15571_v21 }
 0xe6d   : > { %19006 = vmatprep.subr.bf16.mxu0 %v19005_v61  ;;  %v15187_v31 = vadd.f32 %v26094_v60, %v15165_v30 }
 0xe6e   : > { %v15186_v59 = vadd.f32 %v26094_v60, %v15164_v58  ;;  %19008 = vmatpush3.bf16.msra.mxu0 %v19007_v36  ;;  %v19019_v58 = vpack.c.bf16 %v15574_v4, %v15573_v40 }
 0xe6f   : > { %19010 = vmatprep.subr.bf16.mxu0 %v19009_v23 }
 0xe70   : > { %15351 = vmatmul.mubr.f32.gmra.mrb[172].mxu1 %v15186_v59 }
 0xe71   : > { %15356 = vmatprep.mubr.f32.mxu1 %v20993_v3 }
 0xe72   : > { %19012 = vmatpush3.bf16.msra.mxu0 %v19011_v62 }
 0xe73   : > { %19014 = vmatprep.subr.bf16.mxu0 %v19013_v57 }
 0xe74   : > { %15357 = vmatmul.mubr.f32.gmra.mrb[174].mxu1 %v15187_v31 }
 0xe75   : > { %v20573_v34 = vpop.eup %20572  ;;  %v15081_v15 = vpop.xlane.xlu1 %15080  ;;  %15362 = vmatprep.mubr.f32.mxu1 %v20993_v3 }
 0xe76   : > { %v20575_v56 = vpop.eup %20574  ;;  %v15099_v51 = vmul.f32 0.0078125, %v15081_v15  ;;  %v15079_v27 = vpop.xlane.xlu0 %15078  ;;  %v15145_v49 = vmul.f32 %v20573_v34, %v26055_v25  ;;  %19016 = vmatpush3.bf16.msra.mxu0 %v19015_v22 }
 0xe77   : > { %v15098_v33 = vmul.f32 0.0078125, %v15079_v27  ;;  %v15144_v6 = vmul.f32 %v20575_v56, %v26058_v10  ;;  %19018 = vmatprep.subr.bf16.mxu0 %v19017_v47 }
 0xe78   : > { %v15115_v5 = vadd.f32 1e-05, %v15099_v51  ;;  %v15167_v25 = vmul.f32 %v26087_v28, %v15145_v49 }
 0xe79   : > { %v15114_v26 = vadd.f32 1e-05, %v15098_v33  ;;  %v15166_v52 = vmul.f32 %v26087_v28, %v15144_v6  ;;  %v15230_v33 = vsub.s32 0, %v15229_v54 }
 0xe7a   : > { %20576 = vrsqrt.f32 %v15115_v5  ;;  %19020 = vmatpush3.bf16.msra.mxu0 %v19019_v58  ;;  %v15189_v19 = vadd.f32 %v26094_v60, %v15167_v25 }
 0xe7b   : > { %20578 = vrsqrt.f32 %v15114_v26  ;;  %v15188_v10 = vadd.f32 %v26094_v60, %v15166_v52 }
 0xe7d   : > { %15363 = vmatmul.mubr.f32.gmra.mrb[176].mxu1 %v15188_v10 }
 0xe7e   : > { %15368 = vmatprep.mubr.f32.mxu1 %v20993_v3 }
 0xe81   : > { %15369 = vmatmul.mubr.f32.gmra.mrb[178].mxu1 %v15189_v19 }
 0xe82   : > { %v15085_v59 = vpop.xlane.xlu1 %15084  ;;  %15374 = vmatprep.mubr.f32.mxu1 %v20993_v3 }
 0xe83   : > { %v15101_v30 = vmul.f32 0.0078125, %v15085_v59  ;;  %v15083_v17 = vpop.xlane.xlu0 %15082 }
 0xe84   : > { %v20577_v24 = vpop.eup %20576  ;;  %v15100_v61 = vmul.f32 0.0078125, %v15083_v17 }
 0xe85   : > { %v20579_v55 = vpop.eup %20578  ;;  %v15117_v7 = vadd.f32 1e-05, %v15101_v30  ;;  %v15147_v2 = vmul.f32 %v20577_v24, %v26065_v9 }
 0xe86   : > { %v15116_v36 = vadd.f32 1e-05, %v15100_v61  ;;  %v15146_v31 = vmul.f32 %v20579_v55, %v26068_v18 }
 0xe87   : > { %20580 = vrsqrt.f32 %v15117_v7  ;;  %v15169_v45 = vmul.f32 %v26087_v28, %v15147_v2 }
 0xe88   : > { %20582 = vrsqrt.f32 %v15116_v36  ;;  %v15168_v63 = vmul.f32 %v26087_v28, %v15146_v31 }
 0xe89   : > { %v15191_v38 = vadd.f32 %v26094_v60, %v15169_v45 }
 0xe8a   : > { %v15190_v23 = vadd.f32 %v26094_v60, %v15168_v63 }
 0xe8c   : > { %15375 = vmatmul.mubr.f32.gmra.mrb[180].mxu1 %v15190_v23 }
 0xe8d   : > { %15380 = vmatprep.mubr.f32.mxu1 %v20993_v3 }
 0xe90   : > { %15381 = vmatmul.mubr.f32.gmra.mrb[182].mxu1 %v15191_v38 }
 0xe91   : > { %v20581_v62 = vpop.eup %20580  ;;  %15386 = vmatprep.mubr.f32.mxu1 %v20993_v3 }
 0xe92   : > { %v20583_v18 = vpop.eup %20582  ;;  %v15149_v34 = vmul.f32 %v20581_v62, %v26075_v8  ;;  %v15234_v8 = vsub.s32 1, %v15229_v54 }
 0xe93   : > { %v15148_v9 = vmul.f32 %v20583_v18, %v26078_v11  ;;  %v15226_v11 = vld [vmem:[%s27461_s25] sm:$0x3]  ;;  %s20894_s25 = sshll.u32 %s20994_s24, 4  ;;  %s20895_s25 = int_to_ptr.vmem [resolvable:$false] %s20894_s25 }
 0xe94   : > { %v15171_v51 = vmul.f32 %v26087_v28, %v15149_v34  ;;  %v26160_v6 = vrot.slane %v15226_v11, %v15230_v33  ;;  %v26162_v49 = vrot.slane %v15226_v11, %v15234_v8  ;;  %s20896_s23 = scalar_lea.vmem %s20895_s25, 4096  ;;  %p20897_p2 = scmp.lt.s32.totalorder %s26258_s30, %s20895_s25 }
 0xe95   : > { %v15170_v15 = vmul.f32 %v26087_v28, %v15148_v9  ;;  %p20898_p8 = scmp.lt.s32.totalorder %s20896_s23, %s20890_s22 }
 0xe96   : > { %v15193_v27 = vadd.f32 %v26094_v60, %v15171_v51 }
 0xe97   : > { %v15192_v56 = vadd.f32 %v26094_v60, %v15170_v15  ;;  %p20899_p6 = por %p20898_p8, %p20897_p2 }
 0xe99   : > { %15387 = vmatmul.mubr.f32.gmra.mrb[184].mxu1 %v15192_v56  ;;  %p20900_p10 = pnand %p20899_p6, %p20893_p0 }
 0xe9a   : > { %15392 = vmatprep.mubr.f32.mxu1 %v20993_v3 }
 0xe9d   : > { %15393 = vmatmul.mubr.f32.gmra.mrb[186].mxu1 %v15193_v27 }
 0xedc   : > { %v15304_v57 = vpop.f32.mrb[156].mxu1 }
 0xedd   : > { %v15305_v28 = vadd.f32 %v15304_v57, %v26160_v6  ;;  %v15306_v21 = vpop.f32.mrb[157].mxu1 }
 0xede   : > { %v15307_v3 = vadd.f32 %v15306_v21, %v26162_v49 }
 0xedf   : > { %v15431_v60 = vmul.f32 0.70710677, %v15305_v28  ;;  %v15399_v63 = vmul.f32 0.5, %v15305_v28 }
 0xee0   : > { %v15432_v44 = vmul.f32 0.70710677, %v15307_v3  ;;  %v15310_v5 = vpop.f32.mrb[158].mxu1  ;;  %v15400_v31 = vmul.f32 0.5, %v15307_v3 }
 0xee1   : > { %20584 = verf.f32 %v15431_v60  ;;  %v15311_v22 = vadd.f32 %v15310_v5, %v26160_v6  ;;  %v15312_v26 = vpop.f32.mrb[159].mxu1 }
 0xee2   : > { %20586 = verf.f32 %v15432_v44  ;;  %v15313_v52 = vadd.f32 %v15312_v26, %v26162_v49 }
 0xee3   : > { %v15433_v13 = vmul.f32 0.70710677, %v15311_v22  ;;  %v15401_v15 = vmul.f32 0.5, %v15311_v22 }
 0xee4   : > { %v15434_v12 = vmul.f32 0.70710677, %v15313_v52  ;;  %v15316_v40 = vpop.f32.mrb[160].mxu1  ;;  %v15402_v9 = vmul.f32 0.5, %v15313_v52 }
 0xee5   : > { %20588 = verf.f32 %v15433_v13  ;;  %v15317_v47 = vadd.f32 %v15316_v40, %v26160_v6  ;;  %v15318_v4 = vpop.f32.mrb[161].mxu1 }
 0xee6   : > { %20590 = verf.f32 %v15434_v12  ;;  %v15319_v10 = vadd.f32 %v15318_v4, %v26162_v49 }
 0xee7   : > { %v15435_v25 = vmul.f32 0.70710677, %v15317_v47  ;;  %v15403_v8 = vmul.f32 0.5, %v15317_v47 }
 0xee8   : > { %v15436_v58 = vmul.f32 0.70710677, %v15319_v10  ;;  %v15322_v19 = vpop.f32.mrb[162].mxu1  ;;  %v15404_v33 = vmul.f32 0.5, %v15319_v10 }
 0xee9   : > { %20592 = verf.f32 %v15435_v25  ;;  %v15323_v59 = vadd.f32 %v15322_v19, %v26160_v6  ;;  %v15324_v30 = vpop.f32.mrb[163].mxu1 }
 0xeea   : > { %20594 = verf.f32 %v15436_v58  ;;  %v15325_v17 = vadd.f32 %v15324_v30, %v26162_v49 }
 0xeeb   : > { %v20585_v24 = vpop.eup %20584  ;;  %v15437_v61 = vmul.f32 0.70710677, %v15323_v59  ;;  %v15405_v22 = vmul.f32 0.5, %v15323_v59 }
 0xeec   : > { %v20587_v55 = vpop.eup %20586  ;;  %v15495_v7 = vadd.f32 1.0, %v20585_v24  ;;  %v15438_v36 = vmul.f32 0.70710677, %v15325_v17  ;;  %v15406_v44 = vmul.f32 0.5, %v15325_v17 }
 0xeed   : > { %v15496_v2 = vadd.f32 1.0, %v20587_v55  ;;  %20596 = verf.f32 %v15437_v61 }
 0xeee   : > { %20598 = verf.f32 %v15438_v36  ;;  %v15527_v62 = vmul.f32 %v15495_v7, %v15399_v63 }
 0xeef   : > { %v20589_v23 = vpop.eup %20588  ;;  %v15528_v45 = vmul.f32 %v15496_v2, %v15400_v31 }
 0xef0   : > { %v20591_v38 = vpop.eup %20590  ;;  %v15497_v18 = vadd.f32 1.0, %v20589_v23 }
 0xef1   : > { %v15498_v34 = vadd.f32 1.0, %v20591_v38  ;;  %15662 = vmatprep.mubr.f32.mxu0 %v15528_v45 }
 0xef2   : > { %15663 = vmatmul.mubr.f32.vlgmr.msra.gmra.mrb[164].mxu0 %v15527_v62  ;;  %v15529_v54 = vmul.f32 %v15497_v18, %v15401_v15 }
 0xef3   : > { %v20593_v56 = vpop.eup %20592  ;;  %v15530_v51 = vmul.f32 %v15498_v34, %v15402_v9 }
 0xef4   : > { %v20595_v27 = vpop.eup %20594  ;;  %v15499_v37 = vadd.f32 1.0, %v20593_v56 }
 0xef5   : > { %v15500_v11 = vadd.f32 1.0, %v20595_v27  ;;  %15667 = vmatprep.mubr.f32.mxu0 %v15530_v51 }
 0xef6   : > { %15668 = vmatmul.mubr.f32.gmra.mrb[166].mxu0 %v15529_v54  ;;  %v15531_v60 = vmul.f32 %v15499_v37, %v15403_v8 }
 0xef7   : > { %v20597_v57 = vpop.eup %20596  ;;  %v15532_v28 = vmul.f32 %v15500_v11, %v15404_v33 }
 0xef8   : > { %v20599_v21 = vpop.eup %20598  ;;  %v15501_v3 = vadd.f32 1.0, %v20597_v57 }
 0xef9   : > { %v15502_v5 = vadd.f32 1.0, %v20599_v21  ;;  %15672 = vmatprep.mubr.f32.mxu0 %v15532_v28 }
 0xefa   : > { %15673 = vmatmul.mubr.f32.gmra.mrb[168].mxu0 %v15531_v60  ;;  %v15533_v52 = vmul.f32 %v15501_v3, %v15405_v22 }
 0xefb   : > { %v15534_v26 = vmul.f32 %v15502_v5, %v15406_v44 }
 0xefd   : > { %15677 = vmatprep.mubr.f32.mxu0 %v15534_v26 }
 0xefe   : > { %15678 = vmatmul.mubr.f32.gmra.mrb[170].mxu0 %v15533_v52 }
 0xf0e   : > { %v15328_v13 = vpop.f32.mrb[164].mxu1 }
 0xf0f   : > { %v15329_v12 = vadd.f32 %v15328_v13, %v26160_v6  ;;  %v15330_v40 = vpop.f32.mrb[165].mxu1 }
 0xf10   : > { %v15331_v47 = vadd.f32 %v15330_v40, %v26162_v49 }
 0xf11   : > { %v15439_v4 = vmul.f32 0.70710677, %v15329_v12  ;;  %v15407_v38 = vmul.f32 0.5, %v15329_v12 }
 0xf12   : > { %v15440_v10 = vmul.f32 0.70710677, %v15331_v47  ;;  %v15334_v25 = vpop.f32.mrb[166].mxu1  ;;  %v15408_v63 = vmul.f32 0.5, %v15331_v47 }
 0xf13   : > { %20600 = verf.f32 %v15439_v4  ;;  %v15335_v58 = vadd.f32 %v15334_v25, %v26160_v6  ;;  %v15336_v19 = vpop.f32.mrb[167].mxu1 }
 0xf14   : > { %20602 = verf.f32 %v15440_v10  ;;  %v15337_v59 = vadd.f32 %v15336_v19, %v26162_v49 }
 0xf15   : > { %v15441_v30 = vmul.f32 0.70710677, %v15335_v58  ;;  %v15409_v57 = vmul.f32 0.5, %v15335_v58 }
 0xf16   : > { %v15442_v17 = vmul.f32 0.70710677, %v15337_v59  ;;  %v15410_v33 = vmul.f32 0.5, %v15337_v59 }
 0xf17   : > { %20604 = verf.f32 %v15441_v30 }
 0xf18   : > { %20606 = verf.f32 %v15442_v17 }
 0xf1b   : > { %v15340_v24 = vpop.f32.mrb[168].mxu1 }
 0xf1c   : > { %v15341_v55 = vadd.f32 %v15340_v24, %v26160_v6  ;;  %v15342_v7 = vpop.f32.mrb[169].mxu1 }
 0xf1d   : > { %v20601_v61 = vpop.eup %20600  ;;  %v15343_v2 = vadd.f32 %v15342_v7, %v26162_v49 }
 0xf1e   : > { %v20603_v36 = vpop.eup %20602  ;;  %v15503_v31 = vadd.f32 1.0, %v20601_v61  ;;  %v15443_v45 = vmul.f32 0.70710677, %v15341_v55  ;;  %v15411_v52 = vmul.f32 0.5, %v15341_v55 }
 0xf1f   : > { %v15504_v23 = vadd.f32 1.0, %v20603_v36  ;;  %v15444_v62 = vmul.f32 0.70710677, %v15343_v2  ;;  %v15346_v18 = vpop.f32.mrb[170].mxu1  ;;  %v15412_v22 = vmul.f32 0.5, %v15343_v2 }
 0xf20   : > { %20608 = verf.f32 %v15443_v45  ;;  %v15347_v34 = vadd.f32 %v15346_v18, %v26160_v6  ;;  %v15348_v15 = vpop.f32.mrb[171].mxu1  ;;  %v15535_v54 = vmul.f32 %v15503_v31, %v15407_v38 }
 0xf21   : > { %v20605_v9 = vpop.eup %20604  ;;  %v15536_v56 = vmul.f32 %v15504_v23, %v15408_v63  ;;  %20610 = verf.f32 %v15444_v62  ;;  %v15349_v37 = vadd.f32 %v15348_v15, %v26162_v49 }
 0xf22   : > { %v20607_v51 = vpop.eup %20606  ;;  %v15505_v27 = vadd.f32 1.0, %v20605_v9  ;;  %v15445_v8 = vmul.f32 0.70710677, %v15347_v34  ;;  %v15413_v58 = vmul.f32 0.5, %v15347_v34 }
 0xf23   : > { %v15506_v11 = vadd.f32 1.0, %v20607_v51  ;;  %15682 = vmatprep.mubr.f32.mxu0 %v15536_v56  ;;  %v15446_v28 = vmul.f32 0.70710677, %v15349_v37  ;;  %v15414_v10 = vmul.f32 0.5, %v15349_v37 }
 0xf24   : > { %15683 = vmatmul.mubr.f32.gmra.mrb[172].mxu0 %v15535_v54  ;;  %20612 = verf.f32 %v15445_v8  ;;  %v15537_v3 = vmul.f32 %v15505_v27, %v15409_v57 }
 0xf25   : > { %v15538_v21 = vmul.f32 %v15506_v11, %v15410_v33  ;;  %20614 = verf.f32 %v15446_v28 }
 0xf27   : > { %15687 = vmatprep.mubr.f32.mxu0 %v15538_v21 }
 0xf28   : > { %15688 = vmatmul.mubr.f32.gmra.mrb[174].mxu0 %v15537_v3 }
 0xf2a   : > { %v20609_v60 = vpop.eup %20608 }
 0xf2b   : > { %v20611_v44 = vpop.eup %20610  ;;  %v15507_v5 = vadd.f32 1.0, %v20609_v60 }
 0xf2c   : > { %v15508_v26 = vadd.f32 1.0, %v20611_v44 }
 0xf2d   : > { %v15539_v4 = vmul.f32 %v15507_v5, %v15411_v52 }
 0xf2e   : > { %v20613_v13 = vpop.eup %20612  ;;  %v15540_v12 = vmul.f32 %v15508_v26, %v15412_v22 }
 0xf2f   : > { %v20615_v40 = vpop.eup %20614  ;;  %v15509_v47 = vadd.f32 1.0, %v20613_v13 }
 0xf30   : > { %v15510_v25 = vadd.f32 1.0, %v20615_v40  ;;  %15692 = vmatprep.mubr.f32.mxu0 %v15540_v12 }
 0xf31   : > { %15693 = vmatmul.mubr.f32.gmra.mrb[176].mxu0 %v15539_v4  ;;  %v15541_v59 = vmul.f32 %v15509_v47, %v15413_v58 }
 0xf32   : > { %v15542_v19 = vmul.f32 %v15510_v25, %v15414_v10 }
 0xf34   : > { %15697 = vmatprep.mubr.f32.mxu0 %v15542_v19 }
 0xf35   : > { %15698 = vmatmul.mubr.f32.gmra.mrb[178].mxu0 %v15541_v59 }
 0xf43   : > { %v15352_v30 = vpop.f32.mrb[172].mxu1 }
 0xf44   : > { %v15353_v17 = vadd.f32 %v15352_v30, %v26160_v6  ;;  %v15354_v24 = vpop.f32.mrb[173].mxu1 }
 0xf45   : > { %v15355_v61 = vadd.f32 %v15354_v24, %v26162_v49 }
 0xf46   : > { %v15447_v55 = vmul.f32 0.70710677, %v15353_v17  ;;  %v15415_v11 = vmul.f32 0.5, %v15353_v17 }
 0xf47   : > { %v15448_v7 = vmul.f32 0.70710677, %v15355_v61  ;;  %v15358_v36 = vpop.f32.mrb[174].mxu1  ;;  %v15416_v27 = vmul.f32 0.5, %v15355_v61 }
 0xf48   : > { %20616 = verf.f32 %v15447_v55  ;;  %v15359_v31 = vadd.f32 %v15358_v36, %v26160_v6  ;;  %v15360_v2 = vpop.f32.mrb[175].mxu1 }
 0xf49   : > { %20618 = verf.f32 %v15448_v7  ;;  %v15361_v63 = vadd.f32 %v15360_v2, %v26162_v49 }
 0xf4a   : > { %v15449_v23 = vmul.f32 0.70710677, %v15359_v31  ;;  %v15417_v12 = vmul.f32 0.5, %v15359_v31 }
 0xf4b   : > { %v15450_v45 = vmul.f32 0.70710677, %v15361_v63  ;;  %v15418_v26 = vmul.f32 0.5, %v15361_v63 }
 0xf4c   : > { %20620 = verf.f32 %v15449_v23 }
 0xf4d   : > { %20622 = verf.f32 %v15450_v45 }
 0xf50   : > { %v15364_v38 = vpop.f32.mrb[176].mxu1 }
 0xf51   : > { %v15365_v62 = vadd.f32 %v15364_v38, %v26160_v6  ;;  %v15366_v18 = vpop.f32.mrb[177].mxu1 }
 0xf52   : > { %v20617_v9 = vpop.eup %20616  ;;  %v15367_v34 = vadd.f32 %v15366_v18, %v26162_v49 }
 0xf53   : > { %v20619_v15 = vpop.eup %20618  ;;  %v15511_v56 = vadd.f32 1.0, %v20617_v9  ;;  %v15451_v51 = vmul.f32 0.70710677, %v15365_v62  ;;  %v15419_v61 = vmul.f32 0.5, %v15365_v62 }
 0xf54   : > { %v15512_v37 = vadd.f32 1.0, %v20619_v15  ;;  %v15452_v54 = vmul.f32 0.70710677, %v15367_v34  ;;  %v15370_v33 = vpop.f32.mrb[178].mxu1  ;;  %v15420_v30 = vmul.f32 0.5, %v15367_v34 }
 0xf55   : > { %20624 = verf.f32 %v15451_v51  ;;  %v15371_v8 = vadd.f32 %v15370_v33, %v26160_v6  ;;  %v15372_v57 = vpop.f32.mrb[179].mxu1  ;;  %v15543_v22 = vmul.f32 %v15511_v56, %v15415_v11 }
 0xf56   : > { %v20621_v28 = vpop.eup %20620  ;;  %20626 = verf.f32 %v15452_v54  ;;  %v15373_v21 = vadd.f32 %v15372_v57, %v26162_v49  ;;  %v15544_v3 = vmul.f32 %v15512_v37, %v15416_v27 }
 0xf57   : > { %v20623_v60 = vpop.eup %20622  ;;  %v15513_v44 = vadd.f32 1.0, %v20621_v28  ;;  %v15453_v5 = vmul.f32 0.70710677, %v15371_v8  ;;  %v15421_v56 = vmul.f32 0.5, %v15371_v8 }
 0xf58   : > { %v15514_v52 = vadd.f32 1.0, %v20623_v60  ;;  %v15454_v13 = vmul.f32 0.70710677, %v15373_v21  ;;  %15702 = vmatprep.mubr.f32.mxu0 %v15544_v3  ;;  %v15422_v9 = vmul.f32 0.5, %v15373_v21 }
 0xf59   : > { %20628 = verf.f32 %v15453_v5  ;;  %15703 = vmatmul.mubr.f32.gmra.mrb[180].mxu0 %v15543_v22  ;;  %v15545_v47 = vmul.f32 %v15513_v44, %v15417_v12 }
 0xf5a   : > { %20630 = verf.f32 %v15454_v13  ;;  %v15546_v40 = vmul.f32 %v15514_v52, %v15418_v26 }
 0xf5c   : > { %15707 = vmatprep.mubr.f32.mxu0 %v15546_v40 }
 0xf5d   : > { %15708 = vmatmul.mubr.f32.gmra.mrb[182].mxu0 %v15545_v47 }
 0xf5f   : > { %v20625_v4 = vpop.eup %20624  ;;  %v15376_v10 = vpop.f32.mrb[180].mxu1 }
 0xf60   : > { %v20627_v25 = vpop.eup %20626  ;;  %v15515_v58 = vadd.f32 1.0, %v20625_v4  ;;  %v15377_v19 = vadd.f32 %v15376_v10, %v26160_v6  ;;  %v15378_v59 = vpop.f32.mrb[181].mxu1 }
 0xf61   : > { %v15516_v17 = vadd.f32 1.0, %v20627_v25  ;;  %v15379_v24 = vadd.f32 %v15378_v59, %v26162_v49 }
 0xf62   : > { %v15455_v55 = vmul.f32 0.70710677, %v15377_v19  ;;  %v15547_v18 = vmul.f32 %v15515_v58, %v15419_v61  ;;  %v15423_v26 = vmul.f32 0.5, %v15377_v19 }
 0xf63   : > { %v20629_v7 = vpop.eup %20628  ;;  %v15456_v36 = vmul.f32 0.70710677, %v15379_v24  ;;  %v15382_v31 = vpop.f32.mrb[182].mxu1  ;;  %v15548_v2 = vmul.f32 %v15516_v17, %v15420_v30  ;;  %v15424_v8 = vmul.f32 0.5, %v15379_v24 }
 0xf64   : > { %v20631_v63 = vpop.eup %20630  ;;  %v15517_v23 = vadd.f32 1.0, %v20629_v7  ;;  %20632 = verf.f32 %v15455_v55  ;;  %v15383_v45 = vadd.f32 %v15382_v31, %v26160_v6  ;;  %v15384_v38 = vpop.f32.mrb[183].mxu1 }
 0xf65   : > { %v15518_v15 = vadd.f32 1.0, %v20631_v63  ;;  %20634 = verf.f32 %v15456_v36  ;;  %v15385_v34 = vadd.f32 %v15384_v38, %v26162_v49  ;;  %15712 = vmatprep.mubr.f32.mxu0 %v15548_v2 }
 0xf66   : > { %v15457_v62 = vmul.f32 0.70710677, %v15383_v45  ;;  %15713 = vmatmul.mubr.f32.gmra.mrb[184].mxu0 %v15547_v18  ;;  %v15549_v37 = vmul.f32 %v15517_v23, %v15421_v56  ;;  %v15425_v24 = vmul.f32 0.5, %v15383_v45 }
 0xf67   : > { %v15458_v51 = vmul.f32 0.70710677, %v15385_v34  ;;  %v15550_v27 = vmul.f32 %v15518_v15, %v15422_v9  ;;  %v15426_v59 = vmul.f32 0.5, %v15385_v34 }
 0xf68   : > { %20636 = verf.f32 %v15457_v62 }
 0xf69   : > { %20638 = verf.f32 %v15458_v51  ;;  %15717 = vmatprep.mubr.f32.mxu0 %v15550_v27  ;;  %v26199_v51 = vld [vmem:[%s27462_s15] ss:$0 sm:$0xff] }
 0xf6a   : > { %15718 = vmatmul.mubr.f32.gmra.mrb[186].mxu0 %v15549_v37 }
 0xf6c   : > { %v15388_v54 = vpop.f32.mrb[184].mxu1 }
 0xf6d   : > { %v15389_v33 = vadd.f32 %v15388_v54, %v26160_v6  ;;  %v15390_v11 = vpop.f32.mrb[185].mxu1 }
 0xf6e   : > { %v20633_v57 = vpop.eup %20632  ;;  %v15391_v28 = vadd.f32 %v15390_v11, %v26162_v49 }
 0xf6f   : > { %v20635_v21 = vpop.eup %20634  ;;  %v15519_v3 = vadd.f32 1.0, %v20633_v57  ;;  %v15459_v60 = vmul.f32 0.70710677, %v15389_v33  ;;  %v15427_v31 = vmul.f32 0.5, %v15389_v33 }
 0xf70   : > { %v15520_v44 = vadd.f32 1.0, %v20635_v21  ;;  %v15460_v5 = vmul.f32 0.70710677, %v15391_v28  ;;  %v15394_v22 = vpop.f32.mrb[186].mxu1  ;;  %v15428_v7 = vmul.f32 0.5, %v15391_v28 }
 0xf71   : > { %20640 = verf.f32 %v15459_v60  ;;  %v15395_v52 = vadd.f32 %v15394_v22, %v26160_v6  ;;  %v15396_v13 = vpop.f32.mrb[187].mxu1  ;;  %v15551_v58 = vmul.f32 %v15519_v3, %v15423_v26 }
 0xf72   : > { %v20637_v12 = vpop.eup %20636  ;;  %20642 = verf.f32 %v15460_v5  ;;  %v15397_v40 = vadd.f32 %v15396_v13, %v26162_v49  ;;  %v15552_v47 = vmul.f32 %v15520_v44, %v15424_v8 }
 0xf73   : > { %v20639_v4 = vpop.eup %20638  ;;  %v15521_v10 = vadd.f32 1.0, %v20637_v12  ;;  %v15461_v25 = vmul.f32 0.70710677, %v15395_v52  ;;  %v15429_v15 = vmul.f32 0.5, %v15395_v52 }
 0xf74   : > { %v15522_v30 = vadd.f32 1.0, %v20639_v4  ;;  %v15462_v17 = vmul.f32 0.70710677, %v15397_v40  ;;  %15722 = vmatprep.mubr.f32.mxu0 %v15552_v47  ;;  %v15430_v9 = vmul.f32 0.5, %v15397_v40 }
 0xf75   : > { %20644 = verf.f32 %v15461_v25  ;;  %15723 = vmatmul.mubr.f32.gmra.mrb[188].mxu0 %v15551_v58  ;;  %v15553_v6 = vmul.f32 %v15521_v10, %v15425_v24 }
 0xf76   : > { %20646 = verf.f32 %v15462_v17  ;;  %v15554_v19 = vmul.f32 %v15522_v30, %v15426_v59 }
 0xf78   : > { %15727 = vmatprep.mubr.f32.mxu0 %v15554_v19 }
 0xf79   : > { %15728 = vmatmul.mubr.f32.gmra.mrb[190].mxu0 %v15553_v6 }
 0xf7b   : > { %v20641_v61 = vpop.eup %20640 }
 0xf7c   : > { %v20643_v55 = vpop.eup %20642  ;;  %v15523_v49 = vadd.f32 1.0, %v20641_v61 }
 0xf7d   : > { %v15524_v36 = vadd.f32 1.0, %v20643_v55 }
 0xf7e   : > { %v15555_v18 = vmul.f32 %v15523_v49, %v15427_v31 }
 0xf7f   : > { %v20645_v2 = vpop.eup %20644  ;;  %v15556_v63 = vmul.f32 %v15524_v36, %v15428_v7 }
 0xf80   : > { %v20647_v23 = vpop.eup %20646  ;;  %v15525_v38 = vadd.f32 1.0, %v20645_v2 }
 0xf81   : > { %v15526_v45 = vadd.f32 1.0, %v20647_v23  ;;  %15732 = vmatprep.mubr.f32.mxu0 %v15556_v63 }
 0xf82   : > { %15733 = vmatmul.mubr.f32.gmra.mrb[192].mxu0 %v15555_v18  ;;  %v15557_v56 = vmul.f32 %v15525_v38, %v15429_v15 }
 0xf83   : > { %v15558_v34 = vmul.f32 %v15526_v45, %v15430_v9 }
 0xf85   : > { %15737 = vmatprep.mubr.f32.mxu0 %v15558_v34 }
 0xf86   : > { %15738 = vmatmul.mubr.f32.gmra.mrb[194].mxu0 %v15557_v56 }
 0xfc5   : > { %v17021_v62 = vpop.f32.mrb[164].mxu0 }
 0xfc6   : > { %v17022_v27 = vpop.f32.mrb[165].mxu0 }
 0xfc7   : > { %v17023_v37 = vadd.f32 %v17022_v27, %v17021_v62 }
 0xfc9   : > { %v15665_v54 = vadd.f32 %v17023_v37, %v26199_v51  ;;  %v17024_v33 = vpop.f32.mrb[166].mxu0 }
 0xfca   : > { %v17025_v11 = vpop.f32.mrb[167].mxu0 }
 0xfcb   : > { %v15743_v57 = vadd.f32 %v15665_v54, %v25929_v29  ;;  %v17026_v28 = vadd.f32 %v17025_v11, %v17024_v33 }
 0xfcd   : > { %15759 = vst [vmem:[%s26205_s28] sm:$0xff] %v15743_v57  ;;  %v15670_v21 = vadd.f32 %v17026_v28, %v26199_v51  ;;  %v17027_v3 = vpop.f32.mrb[168].mxu0 }
 0xfce   : > { %v17028_v60 = vpop.f32.mrb[169].mxu0 }
 0xfcf   : > { %v15744_v8 = vadd.f32 %v15670_v21, %v25926_v41  ;;  %v17029_v44 = vadd.f32 %v17028_v60, %v17027_v3 }
 0xfd1   : > { %15760 = vst [vmem:[%s26205_s28 + $0x8] sm:$0xff] %v15744_v8  ;;  %v15675_v5 = vadd.f32 %v17029_v44, %v26199_v51  ;;  %v17030_v29 = vpop.f32.mrb[170].mxu0 }
 0xfd2   : > { %v17031_v22 = vpop.f32.mrb[171].mxu0 }
 0xfd3   : > { %v15745_v26 = vadd.f32 %v15675_v5, %v25936_v0  ;;  %v17032_v52 = vadd.f32 %v17031_v22, %v17030_v29 }
 0xfd5   : > { %15761 = vst [vmem:[%s26205_s28 + $0x10] sm:$0xff] %v15745_v26  ;;  %v15680_v13 = vadd.f32 %v17032_v52, %v26199_v51 }
 0xfd7   : > { %v15746_v12 = vadd.f32 %v15680_v13, %v25940_v53 }
 0xfd9   : > { %15762 = vst [vmem:[%s26205_s28 + $0x18] sm:$0xff] %v15746_v12 }
 0xff7   : > { %v17033_v40 = vpop.f32.mrb[172].mxu0 }
 0xff8   : > { %v17034_v47 = vpop.f32.mrb[173].mxu0 }
 0xff9   : > { %v17035_v41 = vadd.f32 %v17034_v47, %v17033_v40 }
 0xffb   : > { %v15685_v4 = vadd.f32 %v17035_v41, %v26199_v51  ;;  %v17036_v10 = vpop.f32.mrb[174].mxu0 }
 0xffc   : > { %v17037_v25 = vpop.f32.mrb[175].mxu0 }
 0xffd   : > { %v15747_v58 = vadd.f32 %v15685_v4, %v25949_v32  ;;  %v17038_v59 = vadd.f32 %v17037_v25, %v17036_v10 }
 0xfff   : > { %15763 = vst [vmem:[%s26205_s28 + $0x20] sm:$0xff] %v15747_v58  ;;  %v15690_v0 = vadd.f32 %v17038_v59, %v26199_v51 }
0x1001   : > { %v15748_v30 = vadd.f32 %v15690_v0, %v25946_v43 }
0x1003   : > { %15764 = vst [vmem:[%s26205_s28 + $0x28] sm:$0xff] %v15748_v30 }
0x1004   : > { %v17039_v53 = vpop.f32.mrb[176].mxu0 }
0x1005   : > { %v17040_v17 = vpop.f32.mrb[177].mxu0 }
0x1006   : > { %v17041_v24 = vadd.f32 %v17040_v17, %v17039_v53 }
0x1008   : > { %v15695_v19 = vadd.f32 %v17041_v24, %v26199_v51  ;;  %v17042_v6 = vpop.f32.mrb[178].mxu0 }
0x1009   : > { %v17043_v61 = vpop.f32.mrb[179].mxu0 }
0x100a   : > { %v15749_v55 = vadd.f32 %v15695_v19, %v25959_v42  ;;  %v17044_v49 = vadd.f32 %v17043_v61, %v17042_v6 }
0x100c   : > { %15765 = vst [vmem:[%s26205_s28 + $0x30] sm:$0xff] %v15749_v55  ;;  %v15700_v32 = vadd.f32 %v17044_v49, %v26199_v51 }
0x100e   : > { %v15750_v7 = vadd.f32 %v15700_v32, %v25956_v1 }
0x1010   : > { %15766 = vst [vmem:[%s26205_s28 + $0x38] sm:$0xff] %v15750_v7 }
0x102c   : > { %v17045_v43 = vpop.f32.mrb[180].mxu0 }
0x102d   : > { %v17046_v36 = vpop.f32.mrb[181].mxu0 }
0x102e   : > { %v17047_v31 = vadd.f32 %v17046_v36, %v17045_v43 }
0x1030   : > { %v15705_v2 = vadd.f32 %v17047_v31, %v26199_v51  ;;  %v17048_v63 = vpop.f32.mrb[182].mxu0 }
0x1031   : > { %v17049_v23 = vpop.f32.mrb[183].mxu0 }
0x1032   : > { %v15751_v38 = vadd.f32 %v15705_v2, %v25969_v46  ;;  %v17050_v18 = vadd.f32 %v17049_v23, %v17048_v63 }
0x1034   : > { %15767 = vst [vmem:[%s26205_s28 + $0x40] sm:$0xff] %v15751_v38  ;;  %v15710_v42 = vadd.f32 %v17050_v18, %v26199_v51 }
0x1036   : > { %v15752_v9 = vadd.f32 %v15710_v42, %v25966_v16 }
0x1038   : > { %15768 = vst [vmem:[%s26205_s28 + $0x48] sm:$0xff] %v15752_v9 }
0x1039   : > { %v17051_v1 = vpop.f32.mrb[184].mxu0 }
0x103a   : > { %v17052_v45 = vpop.f32.mrb[185].mxu0 }
0x103b   : > { %v17053_v15 = vadd.f32 %v17052_v45, %v17051_v1 }
0x103d   : > { %v15715_v34 = vadd.f32 %v17053_v15, %v26199_v51  ;;  %v17054_v56 = vpop.f32.mrb[186].mxu0 }
0x103e   : > { %v17055_v62 = vpop.f32.mrb[187].mxu0 }
0x103f   : > { %v15753_v27 = vadd.f32 %v15715_v34, %v25979_v35  ;;  %v17056_v37 = vadd.f32 %v17055_v62, %v17054_v56 }
0x1041   : > { %15769 = vst [vmem:[%s26205_s28 + $0x50] sm:$0xff] %v15753_v27  ;;  %v15720_v46 = vadd.f32 %v17056_v37, %v26199_v51 }
0x1043   : > { %v15754_v54 = vadd.f32 %v15720_v46, %v25976_v50 }
0x1045   : > { %15770 = vst [vmem:[%s26205_s28 + $0x58] sm:$0xff] %v15754_v54 }
0x1048   : > { %v17057_v16 = vpop.f32.mrb[188].mxu0 }
0x1049   : > { %v17058_v33 = vpop.f32.mrb[189].mxu0 }
0x104a   : > { %v17059_v11 = vadd.f32 %v17058_v33, %v17057_v16 }
0x104c   : > { %v15725_v57 = vadd.f32 %v17059_v11, %v26199_v51  ;;  %v17060_v28 = vpop.f32.mrb[190].mxu0 }
0x104d   : > { %v17061_v21 = vpop.f32.mrb[191].mxu0 }
0x104e   : > { %v15755_v3 = vadd.f32 %v15725_v57, %v25989_v48  ;;  %v17062_v35 = vadd.f32 %v17061_v21, %v17060_v28 }
0x1050   : > { %15771 = vst [vmem:[%s26205_s28 + $0x60] sm:$0xff] %v15755_v3  ;;  %v15730_v60 = vadd.f32 %v17062_v35, %v26199_v51 }
0x1052   : > { %v15756_v8 = vadd.f32 %v15730_v60, %v25986_v39 }
0x1054   : > { %15772 = vst [vmem:[%s26205_s28 + $0x68] sm:$0xff] %v15756_v8 }
0x1055   : > { %v17063_v50 = vpop.f32.mrb[192].mxu0 }
0x1056   : > { %v17064_v44 = vpop.f32.mrb[193].mxu0 }
0x1057   : > { %v17065_v5 = vadd.f32 %v17064_v44, %v17063_v50 }
0x1059   : > { %v15735_v29 = vadd.f32 %v17065_v5, %v26199_v51  ;;  %v17066_v22 = vpop.f32.mrb[194].mxu0 }
0x105a   : > { %v17067_v26 = vpop.f32.mrb[195].mxu0 }
0x105b   : > { %v15757_v48 = vadd.f32 %v15735_v29, %v26005_v14  ;;  %v17068_v52 = vadd.f32 %v17067_v26, %v17066_v22 }
0x105d   : > { %15773 = vst [vmem:[%s26205_s28 + $0x70] sm:$0xff] %v15757_v48  ;;  %v15740_v13 = vadd.f32 %v17068_v52, %v26199_v51 }
0x105f   : > { %v15758_v39 = vadd.f32 %v15740_v13, %v25999_v20 }
0x1061   : > { %15774 = vst [vmem:[%s26205_s28 + $0x78] sm:$0xff] %v15758_v39 }
0x1062   : > { %20903 = shalt.err (!%p20900_p10)
}
0x1063   : > { %s20904_s17 = scalar_lea.hbm %s26256_s3, 2048  ;;  %s20908_s9 = scalar_lea.hbm %s27463_s27, 4096 }
0x1064   : > { %p20905_p11 = scmp.ne.s32.totalorder %s26256_s3, %s20904_s17  ;;  %p20909_p9 = scmp.lt.u32.totalorder %s26256_s3, %s27463_s27 }
0x1065   : > { %p20910_p7 = scmp.lt.u32.totalorder %s20908_s9, %s20904_s17  ;;  %p20912_p12 = scmp.lt.u32.totalorder %s20904_s17, %s26256_s3 }
0x1066   : > { %p20906_p3 = pnand %p20905_p11, %p27464_p1 }
0x1067   : > { %p20911_p4 = por %p20910_p7, %p20909_p9 }
0x1068   : > { %p20907_p5 = pneg %p20906_p3 }
0x1069   : > { %p20913_p13 = por %p20912_p12, %p20911_p4 }
0x106b   : > { %p20914_p0 = pnand %p20913_p13, %p20907_p5 }
0x106d   : > { %20917 = shalt.err (!%p20914_p0)
}
0x106e   : > { %s20995_s22 = smov 128   ;;  %s20996_s24 = smov 8  }
0x106f   : > { %19067 = dma.vmem_to_hbm [thread:$0]  (%p27464_p1), %s26258_s30, 2048, %s26256_s3, %s15776_s12, %s20995_s22, %s20995_s22, %s20996_s24  }
0x1070 PF: > { %s15804_s25 = sand.u32 1, %s20960_s18   ;;  %p27465_p2 = scmp.ne.s32.totalorder %s26615_s29, 0 }
0x1071   : > { %p27466_p8 = scmp.ge.s32.totalorder %s20972_s21, 2  ;;  %s15805_s23 = scalar_lea.sflag [#allocation4], %s15804_s25 }
0x1073   : > { %p19096_p6 = pnand %p27466_p8, %p27465_p2 }
0x1075   : > { %20955 = dma.done.wait (!%p19096_p6), %s15805_s23, 2048  }
0x1076   : > { %20957 = vsyncadd (!%p19096_p6), %s15805_s23, 4294965248  ;;  %p32_p10 = scmp.ge.s32.totalorder %s21289_s26, 4   ;;  %s27467_s18 = smov %s20964_s19 }
0x1077   : > { %s27468_s19 = smov %s20968_s20  ;;  %s27469_s20 = smov %s21301_s8 }
0x1078   : > { %s27470_s21 = smov %s21289_s26  ;;  %34 = sbr.rel (!%p32_p10) target bundleno = 18 (0x12), region = 153 }
0x107f   :  { %15810 = vsyncpa [#allocation3], 1 }
0x1080   :  { %15812 = vsyncpa [#allocation3 + $0x1], 1 }
0x1081   :  { %15813 = vsyncpa [#allocation6], 1 }
0x1082   :  { %15814 = vsyncpa [#allocation9], 1 }
0x1083   :  { %15815 = vsyncpa [#allocation12], 1 }
0x1084   :  { %15816 = vsyncpa [#allocation15], 1 }
0x1085   :  { %15817 = vsyncpa [#allocation4], 1 }
0x1086   :  { %15819 = vsyncpa [#allocation4 + $0x1], 1 }

</bundles_post_ra>
